<compile_context>
chip_gen: v6e
topology: v6e:2x2x1
jax: 0.10.0
libtpu: 0.0.40
codegen_flags: <defaults>
</compile_context>

<pallas_src>
import functools
import math

import jax
import jax.numpy as jnp
from jax.experimental import pallas as pl
from jax.experimental.pallas import tpu as pltpu


def _round_up(x, m):
    return ((x + m - 1) // m) * m


def _carry(c):
    return _round_up(c, 128)


# 32 MiB scoped-VMEM guardrail (worst per-call working set here is ~2.5 MiB).
_COMPILER_PARAMS = pltpu.CompilerParams(vmem_limit_bytes=32 * 1024 * 1024)

_LAYER_CFG = (('layer1', 64, 1), ('layer2', 128, 2), ('layer3', 256, 2))


# ----------------------------------------------------------------------------
# Kernel A: y = [relu](x @ w + b), one whole-problem VMEM block (no grid).
# ----------------------------------------------------------------------------
@functools.lru_cache(maxsize=None)
def _mm_kernel(relu):
    def kernel(x_ref, w_ref, b_ref, o_ref):
        y = jnp.dot(x_ref[...], w_ref[...], preferred_element_type=jnp.float32)
        y = y + b_ref[...]
        if relu:
            y = jnp.maximum(y, 0.0)
        o_ref[...] = y.astype(o_ref.dtype)

    return kernel


def mm(x, cp, relu=True):
    """(M,K) bf16 @ (K,N) bf16 + f32 bias -> (M,N) bf16, single VMEM block."""
    m, k = x.shape
    kw, n = cp['w'].shape
    assert kw == k, (kw, k)
    return pl.pallas_call(
        _mm_kernel(relu),
        out_shape=jax.ShapeDtypeStruct((m, n), jnp.bfloat16),
        compiler_params=_COMPILER_PARAMS,
    )(x, cp['w'], cp['b'])


# ----------------------------------------------------------------------------
# Kernel B: fused bottleneck tail (one pallas_call per bottleneck block):
#     u = relu(zcol @ w2 + b2)              3x3 conv (im2col input) + bn + relu
#     y = relu(u @ w3 + b3 + residual)      1x1 conv + bn + skip + relu
#     z = relu(y @ w1n + b1n)   [optional]  NEXT block's 1x1 conv + bn + relu
# ----------------------------------------------------------------------------
@functools.lru_cache(maxsize=None)
def _chain_kernel(has_next):
    def kernel(x_ref, w2_ref, b2_ref, w3_ref, b3_ref, r_ref, *rest):
        u = jnp.dot(x_ref[...], w2_ref[...], preferred_element_type=jnp.float32)
        u = jnp.maximum(u + b2_ref[...], 0.0).astype(jnp.bfloat16)
        y = jnp.dot(u, w3_ref[...], preferred_element_type=jnp.float32)
        y = y + b3_ref[...] + r_ref[...].astype(jnp.float32)
        y = jnp.maximum(y, 0.0).astype(jnp.bfloat16)
        if has_next:
            w1n_ref, b1n_ref, y_ref, z_ref = rest
            y_ref[...] = y
            z = jnp.dot(y, w1n_ref[...], preferred_element_type=jnp.float32)
            z = jnp.maximum(z + b1n_ref[...], 0.0)
            z_ref[...] = z.astype(jnp.bfloat16)
        else:
            (y_ref,) = rest
            y_ref[...] = y

    return kernel


def bottleneck_tail(zcol, cp2, cp3, res, cp1_next=None):
    m = zcol.shape[0]
    co = cp3['w'].shape[1]
    assert zcol.shape[1] == cp2['w'].shape[0], (zcol.shape, cp2['w'].shape)
    assert res.shape == (m, co), (res.shape, (m, co))
    args = [zcol, cp2['w'], cp2['b'], cp3['w'], cp3['b'], res]
    if cp1_next is None:
        y = pl.pallas_call(
            _chain_kernel(False),
            out_shape=jax.ShapeDtypeStruct((m, co), jnp.bfloat16),
            compiler_params=_COMPILER_PARAMS,
        )(*args)
        return y, None
    assert cp1_next['w'].shape[0] == co
    nn = cp1_next['w'].shape[1]
    y, z = pl.pallas_call(
        _chain_kernel(True),
        out_shape=(jax.ShapeDtypeStruct((m, co), jnp.bfloat16),
                   jax.ShapeDtypeStruct((m, nn), jnp.bfloat16)),
        compiler_params=_COMPILER_PARAMS,
    )(*(args + [cp1_next['w'], cp1_next['b']]))
    return y, z


# ----------------------------------------------------------------------------
# XLA glue: zero-pad + tap extraction (im2col) and max-pool, all on tiny,
# lane-dense bf16 tensors.
# ----------------------------------------------------------------------------
def _extract_patches(x, kh, kw, stride, padding):
    n, h, w, _ = x.shape
    xp = jnp.pad(x, ((0, 0), (padding, padding), (padding, padding), (0, 0)))
    ho = (h + 2 * padding - kh) // stride + 1
    wo = (w + 2 * padding - kw) // stride + 1
    taps = []
    for i in range(kh):
        for j in range(kw):
            taps.append(xp[:, i:i + stride * (ho - 1) + 1:stride,
                            j:j + stride * (wo - 1) + 1:stride, :])
    return jnp.concatenate(taps, axis=-1), ho, wo


def maxpool_3x3_s2_p1(x):
    return jax.lax.reduce_window(
        x, jnp.asarray(-jnp.inf, x.dtype), jax.lax.max,
        window_dimensions=(1, 3, 3, 1),
        window_strides=(1, 2, 2, 1),
        padding=((0, 0), (1, 1), (1, 1), (0, 0)))


# ----------------------------------------------------------------------------
# Backbone forward
# ----------------------------------------------------------------------------
def backbone_forward(x_nchw, params):
    x = jnp.transpose(x_nchw, (0, 2, 3, 1)).astype(jnp.bfloat16)  # NHWC bf16
    n = x.shape[0]

    # conv1 (7x7 s2 p3) + bn1 + relu; output carried zero-padded to 128 ch.
    patches, ho, wo = _extract_patches(x, 7, 7, 2, 3)
    k = patches.shape[-1]
    kp = params['conv1']['w'].shape[0]
    xm = jnp.pad(patches.reshape(n * ho * wo, k), ((0, 0), (0, kp - k)))
    a = mm(xm, params['conv1'], relu=True).reshape(n, ho, wo, -1)
    a = maxpool_3x3_s2_p1(a)

    # Flatten the 13 bottlenecks into one sequence so each block's c3 can be
    # fused with the FOLLOWING block's c1 (also across layer boundaries).
    blocks = []
    for name, _, stride in _LAYER_CFG:
        nblk = len(params[name])
        for b, bp in enumerate(params[name]):
            blocks.append((name, b == nblk - 1, stride if b == 0 else 1, bp))

    feats = {}
    y_sp = a            # NHWC bf16 input to the current block
    z_flat = None       # current block's c1 output (already computed by fusion)
    for i, (name, is_last, stride, bp) in enumerate(blocks):
        nb, h, w, c = y_sp.shape
        x_flat = y_sp.reshape(nb * h * w, c)

        if z_flat is None:                       # only the very first block
            z_flat = mm(x_flat, bp['c1'], relu=True)

        if bp['ds'] is not None:                 # projection shortcut
            xs = y_sp[:, ::stride, ::stride, :] if stride > 1 else y_sp
            res = mm(xs.reshape(-1, c), bp['ds'], relu=False)
        else:                                    # identity shortcut
            res = x_flat

        # 3x3 conv of the bottleneck: im2col in XLA, matmul fused in kernel B.
        z_sp = z_flat.reshape(nb, h, w, -1)
        zcol, ho, wo = _extract_patches(z_sp, 3, 3, stride, 1)
        zcol = zcol.reshape(nb * ho * wo, -1)

        cp1_next = blocks[i + 1][3]['c1'] if i + 1 < len(blocks) else None
        y_flat, z_flat = bottleneck_tail(zcol, bp['c2'], bp['c3'], res, cp1_next)
        y_sp = y_flat.reshape(nb, ho, wo, -1)

        if is_last:
            feats[name] = y_sp

    res3 = jnp.transpose(feats['layer2'], (0, 3, 1, 2)).astype(jnp.float32)
    res4 = jnp.transpose(feats['layer3'], (0, 3, 1, 2)).astype(jnp.float32)
    return res3, res4


# ----------------------------------------------------------------------------
# Deterministic parameter init (matches the module's __init__ shapes & init).
# BatchNorm is inference-mode with fresh running stats (mean 0, var 1).
# ----------------------------------------------------------------------------
def init_params(key):
    keys = iter(jax.random.split(key, 64))

    def conv_w(cout, cin, kh, kw):
        nfan = kh * kw * cout
        return (math.sqrt(2.0 / nfan) *
                jax.random.normal(next(keys), (cout, cin, kh, kw), jnp.float32))

    def bn(c):
        gamma = jnp.ones((c,), jnp.float32)
        beta = jnp.zeros((c,), jnp.float32)
        mean = jnp.zeros((c,), jnp.float32)
        var = jnp.ones((c,), jnp.float32)
        scale = gamma / jnp.sqrt(var + 1e-5)
        bias = beta - mean * scale
        return scale, bias

    params = {'conv1_w': conv_w(64, 3, 7, 7), 'bn1': bn(64)}
    inplanes = 64

    def make_layer(planes, blocks, stride):
        nonlocal inplanes
        out = []
        for i in range(blocks):
            s_ = stride if i == 0 else 1
            bp = {'w1': conv_w(planes, inplanes, 1, 1),
                  'w2': conv_w(planes, planes, 3, 3),
                  'w3': conv_w(planes * 4, planes, 1, 1)}
            bp['bn1_s'], bp['bn1_b'] = bn(planes)
            bp['bn2_s'], bp['bn2_b'] = bn(planes)
            bp['bn3_s'], bp['bn3_b'] = bn(planes * 4)
            if i == 0 and (s_ != 1 or inplanes != planes * 4):
                bp['dw'] = conv_w(planes * 4, inplanes, 1, 1)
                bp['dbn_s'], bp['dbn_b'] = bn(planes * 4)
            else:
                bp['dw'] = bp['dbn_s'] = bp['dbn_b'] = None
            out.append(bp)
            inplanes = planes * 4
        return out

    params['layer1'] = make_layer(64, 3, 1)
    params['layer2'] = make_layer(128, 4, 2)
    params['layer3'] = make_layer(256, 6, 2)
    return params


# One-time weight prep: transpose to (kh,kw,Cin,Cout), fold BN scale, zero-pad
# input/output channels to the carried widths, flatten to (K, Cout_carry),
# pad K to a multiple of 128, cast bf16.  Bias stays f32.
def _prep_conv(w, bn_scale, bn_bias, cin_carry=None, cout_carry=None):
    cout, cin, kh, kw = w.shape
    cin_carry = cin if cin_carry is None else cin_carry
    cout_carry = cout if cout_carry is None else cout_carry
    wm = jnp.transpose(w, (2, 3, 1, 0)) * bn_scale[None, None, None, :]
    wm = jnp.pad(wm, ((0, 0), (0, 0),
                      (0, cin_carry - cin), (0, cout_carry - cout)))
    k = kh * kw * cin_carry
    wm = wm.reshape(k, cout_carry)
    wm = jnp.pad(wm, ((0, _round_up(k, 128) - k), (0, 0))).astype(jnp.bfloat16)
    bm = jnp.pad(bn_bias, (0, cout_carry - cout)).reshape(1, cout_carry)
    return {'w': wm, 'b': bm.astype(jnp.float32)}


def prepare_params(raw):
    prepped = {'conv1': _prep_conv(raw['conv1_w'], *raw['bn1'],
                                   cin_carry=3, cout_carry=_carry(64))}
    inplanes = 64
    for name, planes, _ in _LAYER_CFG:
        blocks = []
        for bp in raw[name]:
            pc, ci, co = _carry(planes), _carry(inplanes), _carry(planes * 4)
            blocks.append({
                'c1': _prep_conv(bp['w1'], bp['bn1_s'], bp['bn1_b'],
                                 cin_carry=ci, cout_carry=pc),
                'c2': _prep_conv(bp['w2'], bp['bn2_s'], bp['bn2_b'],
                                 cin_carry=pc, cout_carry=pc),
                'c3': _prep_conv(bp['w3'], bp['bn3_s'], bp['bn3_b'],
                                 cin_carry=pc, cout_carry=co),
                'ds': (_prep_conv(bp['dw'], bp['dbn_s'], bp['dbn_b'],
                                  cin_carry=ci, cout_carry=co)
                       if bp['dw'] is not None else None),
            })
            inplanes = planes * 4
        prepped[name] = blocks
    return prepped


if __name__ == "__main__":
    key = jax.random.PRNGKey(0)
    pkey, xkey = jax.random.split(key)
    raw_params = init_params(pkey)
    params = jax.block_until_ready(prepare_params(raw_params))
    x = jax.random.normal(xkey, (2, 3, 32, 32), jnp.float32)  # NCHW like torch

    fwd = jax.jit(backbone_forward)
    res3, res4 = fwd(x, params)
    jax.block_until_ready((res3, res4))

    assert res3.shape == (2, 512, 4, 4), res3.shape
    assert res4.shape == (2, 1024, 2, 2), res4.shape
    assert bool(jnp.all(jnp.isfinite(res3))) and bool(jnp.all(jnp.isfinite(res4)))
    print("KERNEL_OK")
</pallas_src>

<mosaic_0001>
module attributes {stable_mosaic.version = 11 : i64} {
  func.func @kernel(%arg0: memref<512x256xbf16, #tpu.memory_space<vmem>>, %arg1: memref<256x128xbf16, #tpu.memory_space<vmem>>, %arg2: memref<1x128xf32, #tpu.memory_space<vmem>>, %arg3: memref<512x128xbf16, #tpu.memory_space<vmem>>) attributes {dimension_semantics = [], scalar_prefetch = 0 : i64, scratch_operands = 0 : i64, tpu.core_type = #tpu.core_type<tc>} {
    %c0 = arith.constant 0 : index
    %c0_0 = arith.constant 0 : index
    %0 = vector.load %arg0[%c0, %c0_0] : memref<512x256xbf16, #tpu.memory_space<vmem>>, vector<512x256xbf16>
    %c0_1 = arith.constant 0 : index
    %c0_2 = arith.constant 0 : index
    %1 = vector.load %arg1[%c0_1, %c0_2] : memref<256x128xbf16, #tpu.memory_space<vmem>>, vector<256x128xbf16>
    %cst = arith.constant dense<0.000000e+00> : vector<512x128xf32>
    %2 = tpu.matmul %0, %1, %cst {dimension_numbers = #tpu.dot_dimension_numbers<[1], [0], [0], [1], [0, 0, 1, 1], [], []>} : vector<512x256xbf16>, vector<256x128xbf16>, vector<512x128xf32> -> vector<512x128xf32>
    %c0_3 = arith.constant 0 : index
    %c0_4 = arith.constant 0 : index
    %3 = vector.load %arg2[%c0_3, %c0_4] : memref<1x128xf32, #tpu.memory_space<vmem>>, vector<1x128xf32>
    %4 = vector.broadcast %3 : vector<1x128xf32> to vector<512x128xf32>
    %5 = arith.addf %2, %4 : vector<512x128xf32>
    %cst_5 = arith.constant 0.000000e+00 : f32
    %6 = vector.broadcast %cst_5 : f32 to vector<512x128xf32>
    %7 = arith.maximumf %5, %6 : vector<512x128xf32>
    %8 = arith.truncf %7 : vector<512x128xf32> to vector<512x128xbf16>
    %c0_6 = arith.constant 0 : index
    %c0_7 = arith.constant 0 : index
    %9 = vector.load %arg3[%c0_6, %c0_7] : memref<512x128xbf16, #tpu.memory_space<vmem>>, vector<512x128xbf16>
    tpu.vector_store %arg3[%c0_6, %c0_7], %8 {strides = array<i32>} : memref<512x128xbf16, #tpu.memory_space<vmem>>, vector<512x128xbf16>,
    return
  }
}

module attributes {stable_mosaic.version = 11 : i64} {
  func.func @kernel(%arg0: memref<128x128xbf16, #tpu.memory_space<vmem>>, %arg1: memref<128x128xbf16, #tpu.memory_space<vmem>>, %arg2: memref<1x128xf32, #tpu.memory_space<vmem>>, %arg3: memref<128x128xbf16, #tpu.memory_space<vmem>>) attributes {dimension_semantics = [], scalar_prefetch = 0 : i64, scratch_operands = 0 : i64, tpu.core_type = #tpu.core_type<tc>} {
    %c0 = arith.constant 0 : index
    %c0_0 = arith.constant 0 : index
    %0 = vector.load %arg0[%c0, %c0_0] : memref<128x128xbf16, #tpu.memory_space<vmem>>, vector<128x128xbf16>
    %c0_1 = arith.constant 0 : index
    %c0_2 = arith.constant 0 : index
    %1 = vector.load %arg1[%c0_1, %c0_2] : memref<128x128xbf16, #tpu.memory_space<vmem>>, vector<128x128xbf16>
    %cst = arith.constant dense<0.000000e+00> : vector<128x128xf32>
    %2 = tpu.matmul %0, %1, %cst {dimension_numbers = #tpu.dot_dimension_numbers<[1], [0], [0], [1], [0, 0, 1, 1], [], []>} : vector<128x128xbf16>, vector<128x128xbf16>, vector<128x128xf32> -> vector<128x128xf32>
    %c0_3 = arith.constant 0 : index
    %c0_4 = arith.constant 0 : index
    %3 = vector.load %arg2[%c0_3, %c0_4] : memref<1x128xf32, #tpu.memory_space<vmem>>, vector<1x128xf32>
    %4 = vector.broadcast %3 : vector<1x128xf32> to vector<128x128xf32>
    %5 = arith.addf %2, %4 : vector<128x128xf32>
    %cst_5 = arith.constant 0.000000e+00 : f32
    %6 = vector.broadcast %cst_5 : f32 to vector<128x128xf32>
    %7 = arith.maximumf %5, %6 : vector<128x128xf32>
    %8 = arith.truncf %7 : vector<128x128xf32> to vector<128x128xbf16>
    %c0_6 = arith.constant 0 : index
    %c0_7 = arith.constant 0 : index
    %9 = vector.load %arg3[%c0_6, %c0_7] : memref<128x128xbf16, #tpu.memory_space<vmem>>, vector<128x128xbf16>
    tpu.vector_store %arg3[%c0_6, %c0_7], %8 {strides = array<i32>} : memref<128x128xbf16, #tpu.memory_space<vmem>>, vector<128x128xbf16>,
    return
  }
}

module attributes {stable_mosaic.version = 11 : i64} {
  func.func @kernel(%arg0: memref<128x128xbf16, #tpu.memory_space<vmem>>, %arg1: memref<128x256xbf16, #tpu.memory_space<vmem>>, %arg2: memref<1x256xf32, #tpu.memory_space<vmem>>, %arg3: memref<128x256xbf16, #tpu.memory_space<vmem>>) attributes {dimension_semantics = [], scalar_prefetch = 0 : i64, scratch_operands = 0 : i64, tpu.core_type = #tpu.core_type<tc>} {
    %c0 = arith.constant 0 : index
    %c0_0 = arith.constant 0 : index
    %0 = vector.load %arg0[%c0, %c0_0] : memref<128x128xbf16, #tpu.memory_space<vmem>>, vector<128x128xbf16>
    %c0_1 = arith.constant 0 : index
    %c0_2 = arith.constant 0 : index
    %1 = vector.load %arg1[%c0_1, %c0_2] : memref<128x256xbf16, #tpu.memory_space<vmem>>, vector<128x256xbf16>
    %cst = arith.constant dense<0.000000e+00> : vector<128x256xf32>
    %2 = tpu.matmul %0, %1, %cst {dimension_numbers = #tpu.dot_dimension_numbers<[1], [0], [0], [1], [0, 0, 1, 1], [], []>} : vector<128x128xbf16>, vector<128x256xbf16>, vector<128x256xf32> -> vector<128x256xf32>
    %c0_3 = arith.constant 0 : index
    %c0_4 = arith.constant 0 : index
    %3 = vector.load %arg2[%c0_3, %c0_4] : memref<1x256xf32, #tpu.memory_space<vmem>>, vector<1x256xf32>
    %4 = vector.broadcast %3 : vector<1x256xf32> to vector<128x256xf32>
    %5 = arith.addf %2, %4 : vector<128x256xf32>
    %6 = arith.truncf %5 : vector<128x256xf32> to vector<128x256xbf16>
    %c0_5 = arith.constant 0 : index
    %c0_6 = arith.constant 0 : index
    %7 = vector.load %arg3[%c0_5, %c0_6] : memref<128x256xbf16, #tpu.memory_space<vmem>>, vector<128x256xbf16>
    tpu.vector_store %arg3[%c0_5, %c0_6], %6 {strides = array<i32>} : memref<128x256xbf16, #tpu.memory_space<vmem>>, vector<128x256xbf16>,
    return
  }
}

module attributes {stable_mosaic.version = 11 : i64} {
  func.func @kernel(%arg0: memref<128x1152xbf16, #tpu.memory_space<vmem>>, %arg1: memref<1152x128xbf16, #tpu.memory_space<vmem>>, %arg2: memref<1x128xf32, #tpu.memory_space<vmem>>, %arg3: memref<128x256xbf16, #tpu.memory_space<vmem>>, %arg4: memref<1x256xf32, #tpu.memory_space<vmem>>, %arg5: memref<128x256xbf16, #tpu.memory_space<vmem>>, %arg6: memref<256x128xbf16, #tpu.memory_space<vmem>>, %arg7: memref<1x128xf32, #tpu.memory_space<vmem>>, %arg8: memref<128x256xbf16, #tpu.memory_space<vmem>>, %arg9: memref<128x128xbf16, #tpu.memory_space<vmem>>) attributes {dimension_semantics = [], scalar_prefetch = 0 : i64, scratch_operands = 0 : i64, tpu.core_type = #tpu.core_type<tc>} {
    %c0 = arith.constant 0 : index
    %c0_0 = arith.constant 0 : index
    %0 = vector.load %arg0[%c0, %c0_0] : memref<128x1152xbf16, #tpu.memory_space<vmem>>, vector<128x1152xbf16>
    %c0_1 = arith.constant 0 : index
    %c0_2 = arith.constant 0 : index
    %1 = vector.load %arg1[%c0_1, %c0_2] : memref<1152x128xbf16, #tpu.memory_space<vmem>>, vector<1152x128xbf16>
    %cst = arith.constant dense<0.000000e+00> : vector<128x128xf32>
    %2 = tpu.matmul %0, %1, %cst {dimension_numbers = #tpu.dot_dimension_numbers<[1], [0], [0], [1], [0, 0, 1, 1], [], []>} : vector<128x1152xbf16>, vector<1152x128xbf16>, vector<128x128xf32> -> vector<128x128xf32>
    %c0_3 = arith.constant 0 : index
    %c0_4 = arith.constant 0 : index
    %3 = vector.load %arg2[%c0_3, %c0_4] : memref<1x128xf32, #tpu.memory_space<vmem>>, vector<1x128xf32>
    %4 = vector.broadcast %3 : vector<1x128xf32> to vector<128x128xf32>
    %5 = arith.addf %2, %4 : vector<128x128xf32>
    %cst_5 = arith.constant 0.000000e+00 : f32
    %6 = vector.broadcast %cst_5 : f32 to vector<128x128xf32>
    %7 = arith.maximumf %5, %6 : vector<128x128xf32>
    %8 = arith.truncf %7 : vector<128x128xf32> to vector<128x128xbf16>
    %c0_6 = arith.constant 0 : index
    %c0_7 = arith.constant 0 : index
    %9 = vector.load %arg3[%c0_6, %c0_7] : memref<128x256xbf16, #tpu.memory_space<vmem>>, vector<128x256xbf16>
    %cst_8 = arith.constant dense<0.000000e+00> : vector<128x256xf32>
    %10 = tpu.matmul %8, %9, %cst_8 {dimension_numbers = #tpu.dot_dimension_numbers<[1], [0], [0], [1], [0, 0, 1, 1], [], []>} : vector<128x128xbf16>, vector<128x256xbf16>, vector<128x256xf32> -> vector<128x256xf32>
    %c0_9 = arith.constant 0 : index
    %c0_10 = arith.constant 0 : index
    %11 = vector.load %arg4[%c0_9, %c0_10] : memref<1x256xf32, #tpu.memory_space<vmem>>, vector<1x256xf32>
    %12 = vector.broadcast %11 : vector<1x256xf32> to vector<128x256xf32>
    %13 = arith.addf %10, %12 : vector<128x256xf32>
    %c0_11 = arith.constant 0 : index
    %c0_12 = arith.constant 0 : index
    %14 = vector.load %arg5[%c0_11, %c0_12] : memref<128x256xbf16, #tpu.memory_space<vmem>>, vector<128x256xbf16>
    %15 = arith.extf %14 : vector<128x256xbf16> to vector<128x256xf32>
    %16 = arith.addf %13, %15 : vector<128x256xf32>
    %cst_13 = arith.constant 0.000000e+00 : f32
    %17 = vector.broadcast %cst_13 : f32 to vector<128x256xf32>
    %18 = arith.maximumf %16, %17 : vector<128x256xf32>
    %19 = arith.truncf %18 : vector<128x256xf32> to vector<128x256xbf16>
    %c0_14 = arith.constant 0 : index
    %c0_15 = arith.constant 0 : index
    %20 = vector.load %arg8[%c0_14, %c0_15] : memref<128x256xbf16, #tpu.memory_space<vmem>>, vector<128x256xbf16>
    tpu.vector_store %arg8[%c0_14, %c0_15], %19 {strides = array<i32>} : memref<128x256xbf16, #tpu.memory_space<vmem>>, vector<128x256xbf16>,
    %c0_16 = arith.constant 0 : index
    %c0_17 = arith.constant 0 : index
    %21 = vector.load %arg6[%c0_16, %c0_17] : memref<256x128xbf16, #tpu.memory_space<vmem>>, vector<256x128xbf16>
    %cst_18 = arith.constant dense<0.000000e+00> : vector<128x128xf32>
    %22 = tpu.matmul %19, %21, %cst_18 {dimension_numbers = #tpu.dot_dimension_numbers<[1], [0], [0], [1], [0, 0, 1, 1], [], []>} : vector<128x256xbf16>, vector<256x128xbf16>, vector<128x128xf32> -> vector<128x128xf32>
    %c0_19 = arith.constant 0 : index
    %c0_20 = arith.constant 0 : index
    %23 = vector.load %arg7[%c0_19, %c0_20] : memref<1x128xf32, #tpu.memory_space<vmem>>, vector<1x128xf32>
    %24 = vector.broadcast %23 : vector<1x128xf32> to vector<128x128xf32>
    %25 = arith.addf %22, %24 : vector<128x128xf32>
    %cst_21 = arith.constant 0.000000e+00 : f32
    %26 = vector.broadcast %cst_21 : f32 to vector<128x128xf32>
    %27 = arith.maximumf %25, %26 : vector<128x128xf32>
    %28 = arith.truncf %27 : vector<128x128xf32> to vector<128x128xbf16>
    %c0_22 = arith.constant 0 : index
    %c0_23 = arith.constant 0 : index
    %29 = vector.load %arg9[%c0_22, %c0_23] : memref<128x128xbf16, #tpu.memory_space<vmem>>, vector<128x128xbf16>
    tpu.vector_store %arg9[%c0_22, %c0_23], %28 {strides = array<i32>} : memref<128x128xbf16, #tpu.memory_space<vmem>>, vector<128x128xbf16>,
    return
  }
}

module attributes {stable_mosaic.version = 11 : i64} {
  func.func @kernel(%arg0: memref<32x256xbf16, #tpu.memory_space<vmem>>, %arg1: memref<256x512xbf16, #tpu.memory_space<vmem>>, %arg2: memref<1x512xf32, #tpu.memory_space<vmem>>, %arg3: memref<32x512xbf16, #tpu.memory_space<vmem>>) attributes {dimension_semantics = [], scalar_prefetch = 0 : i64, scratch_operands = 0 : i64, tpu.core_type = #tpu.core_type<tc>} {
    %c0 = arith.constant 0 : index
    %c0_0 = arith.constant 0 : index
    %0 = vector.load %arg0[%c0, %c0_0] : memref<32x256xbf16, #tpu.memory_space<vmem>>, vector<32x256xbf16>
    %c0_1 = arith.constant 0 : index
    %c0_2 = arith.constant 0 : index
    %1 = vector.load %arg1[%c0_1, %c0_2] : memref<256x512xbf16, #tpu.memory_space<vmem>>, vector<256x512xbf16>
    %cst = arith.constant dense<0.000000e+00> : vector<32x512xf32>
    %2 = tpu.matmul %0, %1, %cst {dimension_numbers = #tpu.dot_dimension_numbers<[1], [0], [0], [1], [0, 0, 1, 1], [], []>} : vector<32x256xbf16>, vector<256x512xbf16>, vector<32x512xf32> -> vector<32x512xf32>
    %c0_3 = arith.constant 0 : index
    %c0_4 = arith.constant 0 : index
    %3 = vector.load %arg2[%c0_3, %c0_4] : memref<1x512xf32, #tpu.memory_space<vmem>>, vector<1x512xf32>
    %4 = vector.broadcast %3 : vector<1x512xf32> to vector<32x512xf32>
    %5 = arith.addf %2, %4 : vector<32x512xf32>
    %6 = arith.truncf %5 : vector<32x512xf32> to vector<32x512xbf16>
    %c0_5 = arith.constant 0 : index
    %c0_6 = arith.constant 0 : index
    %7 = vector.load %arg3[%c0_5, %c0_6] : memref<32x512xbf16, #tpu.memory_space<vmem>>, vector<32x512xbf16>
    tpu.vector_store %arg3[%c0_5, %c0_6], %6 {strides = array<i32>} : memref<32x512xbf16, #tpu.memory_space<vmem>>, vector<32x512xbf16>,
    return
  }
}

module attributes {stable_mosaic.version = 11 : i64} {
  func.func @kernel(%arg0: memref<32x1152xbf16, #tpu.memory_space<vmem>>, %arg1: memref<1152x128xbf16, #tpu.memory_space<vmem>>, %arg2: memref<1x128xf32, #tpu.memory_space<vmem>>, %arg3: memref<128x512xbf16, #tpu.memory_space<vmem>>, %arg4: memref<1x512xf32, #tpu.memory_space<vmem>>, %arg5: memref<32x512xbf16, #tpu.memory_space<vmem>>, %arg6: memref<512x128xbf16, #tpu.memory_space<vmem>>, %arg7: memref<1x128xf32, #tpu.memory_space<vmem>>, %arg8: memref<32x512xbf16, #tpu.memory_space<vmem>>, %arg9: memref<32x128xbf16, #tpu.memory_space<vmem>>) attributes {dimension_semantics = [], scalar_prefetch = 0 : i64, scratch_operands = 0 : i64, tpu.core_type = #tpu.core_type<tc>} {
    %c0 = arith.constant 0 : index
    %c0_0 = arith.constant 0 : index
    %0 = vector.load %arg0[%c0, %c0_0] : memref<32x1152xbf16, #tpu.memory_space<vmem>>, vector<32x1152xbf16>
    %c0_1 = arith.constant 0 : index
    %c0_2 = arith.constant 0 : index
    %1 = vector.load %arg1[%c0_1, %c0_2] : memref<1152x128xbf16, #tpu.memory_space<vmem>>, vector<1152x128xbf16>
    %cst = arith.constant dense<0.000000e+00> : vector<32x128xf32>
    %2 = tpu.matmul %0, %1, %cst {dimension_numbers = #tpu.dot_dimension_numbers<[1], [0], [0], [1], [0, 0, 1, 1], [], []>} : vector<32x1152xbf16>, vector<1152x128xbf16>, vector<32x128xf32> -> vector<32x128xf32>
    %c0_3 = arith.constant 0 : index
    %c0_4 = arith.constant 0 : index
    %3 = vector.load %arg2[%c0_3, %c0_4] : memref<1x128xf32, #tpu.memory_space<vmem>>, vector<1x128xf32>
    %4 = vector.broadcast %3 : vector<1x128xf32> to vector<32x128xf32>
    %5 = arith.addf %2, %4 : vector<32x128xf32>
    %cst_5 = arith.constant 0.000000e+00 : f32
    %6 = vector.broadcast %cst_5 : f32 to vector<32x128xf32>
    %7 = arith.maximumf %5, %6 : vector<32x128xf32>
    %8 = arith.truncf %7 : vector<32x128xf32> to vector<32x128xbf16>
    %c0_6 = arith.constant 0 : index
    %c0_7 = arith.constant 0 : index
    %9 = vector.load %arg3[%c0_6, %c0_7] : memref<128x512xbf16, #tpu.memory_space<vmem>>, vector<128x512xbf16>
    %cst_8 = arith.constant dense<0.000000e+00> : vector<32x512xf32>
    %10 = tpu.matmul %8, %9, %cst_8 {dimension_numbers = #tpu.dot_dimension_numbers<[1], [0], [0], [1], [0, 0, 1, 1], [], []>} : vector<32x128xbf16>, vector<128x512xbf16>, vector<32x512xf32> -> vector<32x512xf32>
    %c0_9 = arith.constant 0 : index
    %c0_10 = arith.constant 0 : index
    %11 = vector.load %arg4[%c0_9, %c0_10] : memref<1x512xf32, #tpu.memory_space<vmem>>, vector<1x512xf32>
    %12 = vector.broadcast %11 : vector<1x512xf32> to vector<32x512xf32>
    %13 = arith.addf %10, %12 : vector<32x512xf32>
    %c0_11 = arith.constant 0 : index
    %c0_12 = arith.constant 0 : index
    %14 = vector.load %arg5[%c0_11, %c0_12] : memref<32x512xbf16, #tpu.memory_space<vmem>>, vector<32x512xbf16>
    %15 = arith.extf %14 : vector<32x512xbf16> to vector<32x512xf32>
    %16 = arith.addf %13, %15 : vector<32x512xf32>
    %cst_13 = arith.constant 0.000000e+00 : f32
    %17 = vector.broadcast %cst_13 : f32 to vector<32x512xf32>
    %18 = arith.maximumf %16, %17 : vector<32x512xf32>
    %19 = arith.truncf %18 : vector<32x512xf32> to vector<32x512xbf16>
    %c0_14 = arith.constant 0 : index
    %c0_15 = arith.constant 0 : index
    %20 = vector.load %arg8[%c0_14, %c0_15] : memref<32x512xbf16, #tpu.memory_space<vmem>>, vector<32x512xbf16>
    tpu.vector_store %arg8[%c0_14, %c0_15], %19 {strides = array<i32>} : memref<32x512xbf16, #tpu.memory_space<vmem>>, vector<32x512xbf16>,
    %c0_16 = arith.constant 0 : index
    %c0_17 = arith.constant 0 : index
    %21 = vector.load %arg6[%c0_16, %c0_17] : memref<512x128xbf16, #tpu.memory_space<vmem>>, vector<512x128xbf16>
    %cst_18 = arith.constant dense<0.000000e+00> : vector<32x128xf32>
    %22 = tpu.matmul %19, %21, %cst_18 {dimension_numbers = #tpu.dot_dimension_numbers<[1], [0], [0], [1], [0, 0, 1, 1], [], []>} : vector<32x512xbf16>, vector<512x128xbf16>, vector<32x128xf32> -> vector<32x128xf32>
    %c0_19 = arith.constant 0 : index
    %c0_20 = arith.constant 0 : index
    %23 = vector.load %arg7[%c0_19, %c0_20] : memref<1x128xf32, #tpu.memory_space<vmem>>, vector<1x128xf32>
    %24 = vector.broadcast %23 : vector<1x128xf32> to vector<32x128xf32>
    %25 = arith.addf %22, %24 : vector<32x128xf32>
    %cst_21 = arith.constant 0.000000e+00 : f32
    %26 = vector.broadcast %cst_21 : f32 to vector<32x128xf32>
    %27 = arith.maximumf %25, %26 : vector<32x128xf32>
    %28 = arith.truncf %27 : vector<32x128xf32> to vector<32x128xbf16>
    %c0_22 = arith.constant 0 : index
    %c0_23 = arith.constant 0 : index
    %29 = vector.load %arg9[%c0_22, %c0_23] : memref<32x128xbf16, #tpu.memory_space<vmem>>, vector<32x128xbf16>
    tpu.vector_store %arg9[%c0_22, %c0_23], %28 {strides = array<i32>} : memref<32x128xbf16, #tpu.memory_space<vmem>>, vector<32x128xbf16>,
    return
  }
}

module attributes {stable_mosaic.version = 11 : i64} {
  func.func @kernel(%arg0: memref<32x1152xbf16, #tpu.memory_space<vmem>>, %arg1: memref<1152x128xbf16, #tpu.memory_space<vmem>>, %arg2: memref<1x128xf32, #tpu.memory_space<vmem>>, %arg3: memref<128x512xbf16, #tpu.memory_space<vmem>>, %arg4: memref<1x512xf32, #tpu.memory_space<vmem>>, %arg5: memref<32x512xbf16, #tpu.memory_space<vmem>>, %arg6: memref<512x256xbf16, #tpu.memory_space<vmem>>, %arg7: memref<1x256xf32, #tpu.memory_space<vmem>>, %arg8: memref<32x512xbf16, #tpu.memory_space<vmem>>, %arg9: memref<32x256xbf16, #tpu.memory_space<vmem>>) attributes {dimension_semantics = [], scalar_prefetch = 0 : i64, scratch_operands = 0 : i64, tpu.core_type = #tpu.core_type<tc>} {
    %c0 = arith.constant 0 : index
    %c0_0 = arith.constant 0 : index
    %0 = vector.load %arg0[%c0, %c0_0] : memref<32x1152xbf16, #tpu.memory_space<vmem>>, vector<32x1152xbf16>
    %c0_1 = arith.constant 0 : index
    %c0_2 = arith.constant 0 : index
    %1 = vector.load %arg1[%c0_1, %c0_2] : memref<1152x128xbf16, #tpu.memory_space<vmem>>, vector<1152x128xbf16>
    %cst = arith.constant dense<0.000000e+00> : vector<32x128xf32>
    %2 = tpu.matmul %0, %1, %cst {dimension_numbers = #tpu.dot_dimension_numbers<[1], [0], [0], [1], [0, 0, 1, 1], [], []>} : vector<32x1152xbf16>, vector<1152x128xbf16>, vector<32x128xf32> -> vector<32x128xf32>
    %c0_3 = arith.constant 0 : index
    %c0_4 = arith.constant 0 : index
    %3 = vector.load %arg2[%c0_3, %c0_4] : memref<1x128xf32, #tpu.memory_space<vmem>>, vector<1x128xf32>
    %4 = vector.broadcast %3 : vector<1x128xf32> to vector<32x128xf32>
    %5 = arith.addf %2, %4 : vector<32x128xf32>
    %cst_5 = arith.constant 0.000000e+00 : f32
    %6 = vector.broadcast %cst_5 : f32 to vector<32x128xf32>
    %7 = arith.maximumf %5, %6 : vector<32x128xf32>
    %8 = arith.truncf %7 : vector<32x128xf32> to vector<32x128xbf16>
    %c0_6 = arith.constant 0 : index
    %c0_7 = arith.constant 0 : index
    %9 = vector.load %arg3[%c0_6, %c0_7] : memref<128x512xbf16, #tpu.memory_space<vmem>>, vector<128x512xbf16>
    %cst_8 = arith.constant dense<0.000000e+00> : vector<32x512xf32>
    %10 = tpu.matmul %8, %9, %cst_8 {dimension_numbers = #tpu.dot_dimension_numbers<[1], [0], [0], [1], [0, 0, 1, 1], [], []>} : vector<32x128xbf16>, vector<128x512xbf16>, vector<32x512xf32> -> vector<32x512xf32>
    %c0_9 = arith.constant 0 : index
    %c0_10 = arith.constant 0 : index
    %11 = vector.load %arg4[%c0_9, %c0_10] : memref<1x512xf32, #tpu.memory_space<vmem>>, vector<1x512xf32>
    %12 = vector.broadcast %11 : vector<1x512xf32> to vector<32x512xf32>
    %13 = arith.addf %10, %12 : vector<32x512xf32>
    %c0_11 = arith.constant 0 : index
    %c0_12 = arith.constant 0 : index
    %14 = vector.load %arg5[%c0_11, %c0_12] : memref<32x512xbf16, #tpu.memory_space<vmem>>, vector<32x512xbf16>
    %15 = arith.extf %14 : vector<32x512xbf16> to vector<32x512xf32>
    %16 = arith.addf %13, %15 : vector<32x512xf32>
    %cst_13 = arith.constant 0.000000e+00 : f32
    %17 = vector.broadcast %cst_13 : f32 to vector<32x512xf32>
    %18 = arith.maximumf %16, %17 : vector<32x512xf32>
    %19 = arith.truncf %18 : vector<32x512xf32> to vector<32x512xbf16>
    %c0_14 = arith.constant 0 : index
    %c0_15 = arith.constant 0 : index
    %20 = vector.load %arg8[%c0_14, %c0_15] : memref<32x512xbf16, #tpu.memory_space<vmem>>, vector<32x512xbf16>
    tpu.vector_store %arg8[%c0_14, %c0_15], %19 {strides = array<i32>} : memref<32x512xbf16, #tpu.memory_space<vmem>>, vector<32x512xbf16>,
    %c0_16 = arith.constant 0 : index
    %c0_17 = arith.constant 0 : index
    %21 = vector.load %arg6[%c0_16, %c0_17] : memref<512x256xbf16, #tpu.memory_space<vmem>>, vector<512x256xbf16>
    %cst_18 = arith.constant dense<0.000000e+00> : vector<32x256xf32>
    %22 = tpu.matmul %19, %21, %cst_18 {dimension_numbers = #tpu.dot_dimension_numbers<[1], [0], [0], [1], [0, 0, 1, 1], [], []>} : vector<32x512xbf16>, vector<512x256xbf16>, vector<32x256xf32> -> vector<32x256xf32>
    %c0_19 = arith.constant 0 : index
    %c0_20 = arith.constant 0 : index
    %23 = vector.load %arg7[%c0_19, %c0_20] : memref<1x256xf32, #tpu.memory_space<vmem>>, vector<1x256xf32>
    %24 = vector.broadcast %23 : vector<1x256xf32> to vector<32x256xf32>
    %25 = arith.addf %22, %24 : vector<32x256xf32>
    %cst_21 = arith.constant 0.000000e+00 : f32
    %26 = vector.broadcast %cst_21 : f32 to vector<32x256xf32>
    %27 = arith.maximumf %25, %26 : vector<32x256xf32>
    %28 = arith.truncf %27 : vector<32x256xf32> to vector<32x256xbf16>
    %c0_22 = arith.constant 0 : index
    %c0_23 = arith.constant 0 : index
    %29 = vector.load %arg9[%c0_22, %c0_23] : memref<32x256xbf16, #tpu.memory_space<vmem>>, vector<32x256xbf16>
    tpu.vector_store %arg9[%c0_22, %c0_23], %28 {strides = array<i32>} : memref<32x256xbf16, #tpu.memory_space<vmem>>, vector<32x256xbf16>,
    return
  }
}

module attributes {stable_mosaic.version = 11 : i64} {
  func.func @kernel(%arg0: memref<8x512xbf16, #tpu.memory_space<vmem>>, %arg1: memref<512x1024xbf16, #tpu.memory_space<vmem>>, %arg2: memref<1x1024xf32, #tpu.memory_space<vmem>>, %arg3: memref<8x1024xbf16, #tpu.memory_space<vmem>>) attributes {dimension_semantics = [], scalar_prefetch = 0 : i64, scratch_operands = 0 : i64, tpu.core_type = #tpu.core_type<tc>} {
    %c0 = arith.constant 0 : index
    %c0_0 = arith.constant 0 : index
    %0 = vector.load %arg0[%c0, %c0_0] : memref<8x512xbf16, #tpu.memory_space<vmem>>, vector<8x512xbf16>
    %c0_1 = arith.constant 0 : index
    %c0_2 = arith.constant 0 : index
    %1 = vector.load %arg1[%c0_1, %c0_2] : memref<512x1024xbf16, #tpu.memory_space<vmem>>, vector<512x1024xbf16>
    %cst = arith.constant dense<0.000000e+00> : vector<8x1024xf32>
    %2 = tpu.matmul %0, %1, %cst {dimension_numbers = #tpu.dot_dimension_numbers<[1], [0], [0], [1], [0, 0, 1, 1], [], []>} : vector<8x512xbf16>, vector<512x1024xbf16>, vector<8x1024xf32> -> vector<8x1024xf32>
    %c0_3 = arith.constant 0 : index
    %c0_4 = arith.constant 0 : index
    %3 = vector.load %arg2[%c0_3, %c0_4] : memref<1x1024xf32, #tpu.memory_space<vmem>>, vector<1x1024xf32>
    %4 = vector.broadcast %3 : vector<1x1024xf32> to vector<8x1024xf32>
    %5 = arith.addf %2, %4 : vector<8x1024xf32>
    %6 = arith.truncf %5 : vector<8x1024xf32> to vector<8x1024xbf16>
    %c0_5 = arith.constant 0 : index
    %c0_6 = arith.constant 0 : index
    %7 = vector.load %arg3[%c0_5, %c0_6] : memref<8x1024xbf16, #tpu.memory_space<vmem>>, vector<8x1024xbf16>
    tpu.vector_store %arg3[%c0_5, %c0_6], %6 {strides = array<i32>} : memref<8x1024xbf16, #tpu.memory_space<vmem>>, vector<8x1024xbf16>,
    return
  }
}

module attributes {stable_mosaic.version = 11 : i64} {
  func.func @kernel(%arg0: memref<8x2304xbf16, #tpu.memory_space<vmem>>, %arg1: memref<2304x256xbf16, #tpu.memory_space<vmem>>, %arg2: memref<1x256xf32, #tpu.memory_space<vmem>>, %arg3: memref<256x1024xbf16, #tpu.memory_space<vmem>>, %arg4: memref<1x1024xf32, #tpu.memory_space<vmem>>, %arg5: memref<8x1024xbf16, #tpu.memory_space<vmem>>, %arg6: memref<1024x256xbf16, #tpu.memory_space<vmem>>, %arg7: memref<1x256xf32, #tpu.memory_space<vmem>>, %arg8: memref<8x1024xbf16, #tpu.memory_space<vmem>>, %arg9: memref<8x256xbf16, #tpu.memory_space<vmem>>) attributes {dimension_semantics = [], scalar_prefetch = 0 : i64, scratch_operands = 0 : i64, tpu.core_type = #tpu.core_type<tc>} {
    %c0 = arith.constant 0 : index
    %c0_0 = arith.constant 0 : index
    %0 = vector.load %arg0[%c0, %c0_0] : memref<8x2304xbf16, #tpu.memory_space<vmem>>, vector<8x2304xbf16>
    %c0_1 = arith.constant 0 : index
    %c0_2 = arith.constant 0 : index
    %1 = vector.load %arg1[%c0_1, %c0_2] : memref<2304x256xbf16, #tpu.memory_space<vmem>>, vector<2304x256xbf16>
    %cst = arith.constant dense<0.000000e+00> : vector<8x256xf32>
    %2 = tpu.matmul %0, %1, %cst {dimension_numbers = #tpu.dot_dimension_numbers<[1], [0], [0], [1], [0, 0, 1, 1], [], []>} : vector<8x2304xbf16>, vector<2304x256xbf16>, vector<8x256xf32> -> vector<8x256xf32>
    %c0_3 = arith.constant 0 : index
    %c0_4 = arith.constant 0 : index
    %3 = vector.load %arg2[%c0_3, %c0_4] : memref<1x256xf32, #tpu.memory_space<vmem>>, vector<1x256xf32>
    %4 = vector.broadcast %3 : vector<1x256xf32> to vector<8x256xf32>
    %5 = arith.addf %2, %4 : vector<8x256xf32>
    %cst_5 = arith.constant 0.000000e+00 : f32
    %6 = vector.broadcast %cst_5 : f32 to vector<8x256xf32>
    %7 = arith.maximumf %5, %6 : vector<8x256xf32>
    %8 = arith.truncf %7 : vector<8x256xf32> to vector<8x256xbf16>
    %c0_6 = arith.constant 0 : index
    %c0_7 = arith.constant 0 : index
    %9 = vector.load %arg3[%c0_6, %c0_7] : memref<256x1024xbf16, #tpu.memory_space<vmem>>, vector<256x1024xbf16>
    %cst_8 = arith.constant dense<0.000000e+00> : vector<8x1024xf32>
    %10 = tpu.matmul %8, %9, %cst_8 {dimension_numbers = #tpu.dot_dimension_numbers<[1], [0], [0], [1], [0, 0, 1, 1], [], []>} : vector<8x256xbf16>, vector<256x1024xbf16>, vector<8x1024xf32> -> vector<8x1024xf32>
    %c0_9 = arith.constant 0 : index
    %c0_10 = arith.constant 0 : index
    %11 = vector.load %arg4[%c0_9, %c0_10] : memref<1x1024xf32, #tpu.memory_space<vmem>>, vector<1x1024xf32>
    %12 = vector.broadcast %11 : vector<1x1024xf32> to vector<8x1024xf32>
    %13 = arith.addf %10, %12 : vector<8x1024xf32>
    %c0_11 = arith.constant 0 : index
    %c0_12 = arith.constant 0 : index
    %14 = vector.load %arg5[%c0_11, %c0_12] : memref<8x1024xbf16, #tpu.memory_space<vmem>>, vector<8x1024xbf16>
    %15 = arith.extf %14 : vector<8x1024xbf16> to vector<8x1024xf32>
    %16 = arith.addf %13, %15 : vector<8x1024xf32>
    %cst_13 = arith.constant 0.000000e+00 : f32
    %17 = vector.broadcast %cst_13 : f32 to vector<8x1024xf32>
    %18 = arith.maximumf %16, %17 : vector<8x1024xf32>
    %19 = arith.truncf %18 : vector<8x1024xf32> to vector<8x1024xbf16>
    %c0_14 = arith.constant 0 : index
    %c0_15 = arith.constant 0 : index
    %20 = vector.load %arg8[%c0_14, %c0_15] : memref<8x1024xbf16, #tpu.memory_space<vmem>>, vector<8x1024xbf16>
    tpu.vector_store %arg8[%c0_14, %c0_15], %19 {strides = array<i32>} : memref<8x1024xbf16, #tpu.memory_space<vmem>>, vector<8x1024xbf16>,
    %c0_16 = arith.constant 0 : index
    %c0_17 = arith.constant 0 : index
    %21 = vector.load %arg6[%c0_16, %c0_17] : memref<1024x256xbf16, #tpu.memory_space<vmem>>, vector<1024x256xbf16>
    %cst_18 = arith.constant dense<0.000000e+00> : vector<8x256xf32>
    %22 = tpu.matmul %19, %21, %cst_18 {dimension_numbers = #tpu.dot_dimension_numbers<[1], [0], [0], [1], [0, 0, 1, 1], [], []>} : vector<8x1024xbf16>, vector<1024x256xbf16>, vector<8x256xf32> -> vector<8x256xf32>
    %c0_19 = arith.constant 0 : index
    %c0_20 = arith.constant 0 : index
    %23 = vector.load %arg7[%c0_19, %c0_20] : memref<1x256xf32, #tpu.memory_space<vmem>>, vector<1x256xf32>
    %24 = vector.broadcast %23 : vector<1x256xf32> to vector<8x256xf32>
    %25 = arith.addf %22, %24 : vector<8x256xf32>
    %cst_21 = arith.constant 0.000000e+00 : f32
    %26 = vector.broadcast %cst_21 : f32 to vector<8x256xf32>
    %27 = arith.maximumf %25, %26 : vector<8x256xf32>
    %28 = arith.truncf %27 : vector<8x256xf32> to vector<8x256xbf16>
    %c0_22 = arith.constant 0 : index
    %c0_23 = arith.constant 0 : index
    %29 = vector.load %arg9[%c0_22, %c0_23] : memref<8x256xbf16, #tpu.memory_space<vmem>>, vector<8x256xbf16>
    tpu.vector_store %arg9[%c0_22, %c0_23], %28 {strides = array<i32>} : memref<8x256xbf16, #tpu.memory_space<vmem>>, vector<8x256xbf16>,
    return
  }
}

module attributes {stable_mosaic.version = 11 : i64} {
  func.func @kernel(%arg0: memref<8x2304xbf16, #tpu.memory_space<vmem>>, %arg1: memref<2304x256xbf16, #tpu.memory_space<vmem>>, %arg2: memref<1x256xf32, #tpu.memory_space<vmem>>, %arg3: memref<256x1024xbf16, #tpu.memory_space<vmem>>, %arg4: memref<1x1024xf32, #tpu.memory_space<vmem>>, %arg5: memref<8x1024xbf16, #tpu.memory_space<vmem>>, %arg6: memref<8x1024xbf16, #tpu.memory_space<vmem>>) attributes {dimension_semantics = [], scalar_prefetch = 0 : i64, scratch_operands = 0 : i64, tpu.core_type = #tpu.core_type<tc>} {
    %c0 = arith.constant 0 : index
    %c0_0 = arith.constant 0 : index
    %0 = vector.load %arg0[%c0, %c0_0] : memref<8x2304xbf16, #tpu.memory_space<vmem>>, vector<8x2304xbf16>
    %c0_1 = arith.constant 0 : index
    %c0_2 = arith.constant 0 : index
    %1 = vector.load %arg1[%c0_1, %c0_2] : memref<2304x256xbf16, #tpu.memory_space<vmem>>, vector<2304x256xbf16>
    %cst = arith.constant dense<0.000000e+00> : vector<8x256xf32>
    %2 = tpu.matmul %0, %1, %cst {dimension_numbers = #tpu.dot_dimension_numbers<[1], [0], [0], [1], [0, 0, 1, 1], [], []>} : vector<8x2304xbf16>, vector<2304x256xbf16>, vector<8x256xf32> -> vector<8x256xf32>
    %c0_3 = arith.constant 0 : index
    %c0_4 = arith.constant 0 : index
    %3 = vector.load %arg2[%c0_3, %c0_4] : memref<1x256xf32, #tpu.memory_space<vmem>>, vector<1x256xf32>
    %4 = vector.broadcast %3 : vector<1x256xf32> to vector<8x256xf32>
    %5 = arith.addf %2, %4 : vector<8x256xf32>
    %cst_5 = arith.constant 0.000000e+00 : f32
    %6 = vector.broadcast %cst_5 : f32 to vector<8x256xf32>
    %7 = arith.maximumf %5, %6 : vector<8x256xf32>
    %8 = arith.truncf %7 : vector<8x256xf32> to vector<8x256xbf16>
    %c0_6 = arith.constant 0 : index
    %c0_7 = arith.constant 0 : index
    %9 = vector.load %arg3[%c0_6, %c0_7] : memref<256x1024xbf16, #tpu.memory_space<vmem>>, vector<256x1024xbf16>
    %cst_8 = arith.constant dense<0.000000e+00> : vector<8x1024xf32>
    %10 = tpu.matmul %8, %9, %cst_8 {dimension_numbers = #tpu.dot_dimension_numbers<[1], [0], [0], [1], [0, 0, 1, 1], [], []>} : vector<8x256xbf16>, vector<256x1024xbf16>, vector<8x1024xf32> -> vector<8x1024xf32>
    %c0_9 = arith.constant 0 : index
    %c0_10 = arith.constant 0 : index
    %11 = vector.load %arg4[%c0_9, %c0_10] : memref<1x1024xf32, #tpu.memory_space<vmem>>, vector<1x1024xf32>
    %12 = vector.broadcast %11 : vector<1x1024xf32> to vector<8x1024xf32>
    %13 = arith.addf %10, %12 : vector<8x1024xf32>
    %c0_11 = arith.constant 0 : index
    %c0_12 = arith.constant 0 : index
    %14 = vector.load %arg5[%c0_11, %c0_12] : memref<8x1024xbf16, #tpu.memory_space<vmem>>, vector<8x1024xbf16>
    %15 = arith.extf %14 : vector<8x1024xbf16> to vector<8x1024xf32>
    %16 = arith.addf %13, %15 : vector<8x1024xf32>
    %cst_13 = arith.constant 0.000000e+00 : f32
    %17 = vector.broadcast %cst_13 : f32 to vector<8x1024xf32>
    %18 = arith.maximumf %16, %17 : vector<8x1024xf32>
    %19 = arith.truncf %18 : vector<8x1024xf32> to vector<8x1024xbf16>
    %c0_14 = arith.constant 0 : index
    %c0_15 = arith.constant 0 : index
    %20 = vector.load %arg6[%c0_14, %c0_15] : memref<8x1024xbf16, #tpu.memory_space<vmem>>, vector<8x1024xbf16>
    tpu.vector_store %arg6[%c0_14, %c0_15], %19 {strides = array<i32>} : memref<8x1024xbf16, #tpu.memory_space<vmem>>, vector<8x1024xbf16>,
    return
  }
}

</mosaic_0001>

<bundles_post_ra>
// kernel: backbone_forward.19
= control target key start
LH: loop header
LB: loop body
LE: loop exit
PB: predicated region body
PF: predicated region fallthrough
CT: control target
= control target key end

     0   :  { %s618_s1 = inlined_call_operand.vmem [shape: bf16[128,128], index: 1, kind: input, shape index: {}]   ;;  %s619_s0 = inlined_call_operand.vmem [shape: bf16[128,128], index: 0, kind: input, shape index: {}]   ;;  %s620_s2 = inlined_call_operand.vmem [shape: f32[1,128], index: 2, kind: input, shape index: {}]   ;;  %s621_s3 = inlined_call_operand.vmem [shape: bf16[128,128], index: 3, kind: output, shape index: {}]  }
   0x1   :  { %v507_v0 = vld [vmem:[%s618_s1 + $0x38] sm:$0xff]   ;;  %v508_v1 = vld [vmem:[%s618_s1 + $0x30] sm:$0xff]   ;;  %v509_v2 = vld [vmem:[%s618_s1 + $0x28] sm:$0xff]  }
   0x2   :  { %459 = vmatprep.subr.bf16.mxu0 %v507_v0  ;;  %491 = vmatprep.subr.bf16.mxu1 %v507_v0  ;;  %v510_v3 = vld [vmem:[%s618_s1 + $0x20] sm:$0xff]   ;;  %v511_v6 = vld [vmem:[%s618_s1 + $0x18] sm:$0xff]   ;;  %v512_v7 = vld [vmem:[%s618_s1 + $0x10] sm:$0xff]  }
   0x3   :  { %460 = vmatpush3.bf16.msra.mxu0 %v507_v0  ;;  %499 = vmatpush3.bf16.msra.mxu1 %v507_v0  ;;  %v515_v4 = vld [vmem:[%s619_s0] sm:$0xff]   ;;  %v513_v8 = vld [vmem:[%s618_s1 + $0x8] sm:$0xff]   ;;  %v519_v12 = vld [vmem:[%s619_s0 + $0x10] sm:$0xff]  }
   0x4   :  { %461 = vmatprep.subr.bf16.mxu0 %v508_v1  ;;  %492 = vmatprep.subr.bf16.mxu1 %v508_v1  ;;  %v516_v5 = vld [vmem:[%s619_s0 + $0x20] sm:$0xff]   ;;  %v517_v10 = vld [vmem:[%s619_s0 + $0x8] sm:$0xff]   ;;  %v520_v13 = vld [vmem:[%s619_s0 + $0x30] sm:$0xff]  }
   0x5   :  { %475 = vmatprep.mubr.bf16.mxu0 %v515_v4  ;;  %483 = vmatprep.mubr.bf16.mxu1 %v516_v5  ;;  %v514_v9 = vld [vmem:[%s618_s1] sm:$0xff]   ;;  %v518_v11 = vld [vmem:[%s619_s0 + $0x28] sm:$0xff]   ;;  %v521_v14 = vld [vmem:[%s619_s0 + $0x18] sm:$0xff]  }
   0x6   :  { %v522_v15 = vld [vmem:[%s619_s0 + $0x38] sm:$0xff]   ;;  %v347_v16 = vld [vmem:[%s620_s2] ss:$0 sm:$0xff] }
   0x7   :  { %462 = vmatpush3.bf16.msra.mxu0 %v508_v1  ;;  %500 = vmatpush3.bf16.msra.mxu1 %v508_v1 }
   0x8   :  { %463 = vmatprep.subr.bf16.mxu0 %v509_v2  ;;  %493 = vmatprep.subr.bf16.mxu1 %v509_v2 }
   0xb   :  { %464 = vmatpush3.bf16.msra.mxu0 %v509_v2  ;;  %501 = vmatpush3.bf16.msra.mxu1 %v509_v2 }
   0xc   :  { %465 = vmatprep.subr.bf16.mxu0 %v510_v3  ;;  %494 = vmatprep.subr.bf16.mxu1 %v510_v3 }
   0xf   :  { %466 = vmatpush3.bf16.msra.mxu0 %v510_v3  ;;  %502 = vmatpush3.bf16.msra.mxu1 %v510_v3 }
  0x10   :  { %467 = vmatprep.subr.bf16.mxu0 %v511_v6  ;;  %495 = vmatprep.subr.bf16.mxu1 %v511_v6 }
  0x13   :  { %468 = vmatpush3.bf16.msra.mxu0 %v511_v6  ;;  %503 = vmatpush3.bf16.msra.mxu1 %v511_v6 }
  0x14   :  { %469 = vmatprep.subr.bf16.mxu0 %v512_v7  ;;  %496 = vmatprep.subr.bf16.mxu1 %v512_v7 }
  0x17   :  { %470 = vmatpush3.bf16.msra.mxu0 %v512_v7  ;;  %504 = vmatpush3.bf16.msra.mxu1 %v512_v7 }
  0x18   :  { %471 = vmatprep.subr.bf16.mxu0 %v513_v8  ;;  %497 = vmatprep.subr.bf16.mxu1 %v513_v8 }
  0x1b   :  { %472 = vmatpush3.bf16.msra.mxu0 %v513_v8  ;;  %505 = vmatpush3.bf16.msra.mxu1 %v513_v8 }
  0x1c   :  { %473 = vmatprep.subr.bf16.mxu0 %v514_v9  ;;  %498 = vmatprep.subr.bf16.mxu1 %v514_v9 }
  0x1f   :  { %474 = vmatpush3.bf16.msra.mxu0 %v514_v9  ;;  %506 = vmatpush3.bf16.msra.mxu1 %v514_v9 }
  0x22   :  { %476 = vmatmul.mubr.bf16.vlgmr.msra.gmra.mxu0 %v517_v10  ;;  %484 = vmatmul.mubr.bf16.vlgmr.msra.gmra.mxu1 %v518_v11 }
  0x23   :  { %479 = vmatprep.mubr.bf16.mxu0 %v519_v12  ;;  %487 = vmatprep.mubr.bf16.mxu1 %v520_v13 }
  0x2a   :  { %480 = vmatmul.mubr.bf16.gmra.mxu0 %v521_v14  ;;  %488 = vmatmul.mubr.bf16.gmra.mxu1 %v522_v15 }
  0xe2   :  { %v477_v17 = vpop.f32.mrf.mxu0  ;;  %v485_v18 = vpop.f32.mrf.mxu1 }
  0xe3   :  { %v193_v19 = vadd.f32 %v477_v17, %v347_v16  ;;  %v225_v20 = vadd.f32 %v485_v18, %v347_v16 }
  0xe4   :  { %v184_v21 = vpop.f32.mrf.mxu0  ;;  %v216_v22 = vpop.f32.mrf.mxu1 }
  0xe5   :  { %v185_v23 = vadd.f32 %v347_v16, %v184_v21  ;;  %v217_v24 = vadd.f32 %v347_v16, %v216_v22  ;;  %v249_v29 = vmax.f32 %v193_v19, 0.0  ;;  %v257_v30 = vmax.f32 %v225_v20, 0.0 }
  0xe6   :  { %v478_v25 = vpop.f32.mrf.mxu0  ;;  %v486_v26 = vpop.f32.mrf.mxu1 }
  0xe7   :  { %v196_v27 = vadd.f32 %v478_v25, %v347_v16  ;;  %v228_v28 = vadd.f32 %v486_v26, %v347_v16  ;;  %v247_v37 = vmax.f32 %v185_v23, 0.0  ;;  %v255_v38 = vmax.f32 %v217_v24, 0.0 }
  0xe8   :  { %v187_v31 = vpop.f32.mrf.mxu0  ;;  %v219_v32 = vpop.f32.mrf.mxu1 }
  0xe9   :  { %v250_v33 = vmax.f32 %v196_v27, 0.0  ;;  %v258_v34 = vmax.f32 %v228_v28, 0.0  ;;  %v188_v35 = vadd.f32 %v347_v16, %v187_v31  ;;  %v220_v36 = vadd.f32 %v347_v16, %v219_v32 }
  0xea   :  { %v481_v39 = vpop.f32.mrf.mxu0  ;;  %v489_v40 = vpop.f32.mrf.mxu1 }
  0xeb   :  { %v404_v41 = vpack.c.bf16 %v250_v33, %v249_v29  ;;  %v424_v42 = vpack.c.bf16 %v258_v34, %v257_v30  ;;  %v248_v43 = vmax.f32 %v188_v35, 0.0  ;;  %v256_v44 = vmax.f32 %v220_v36, 0.0 }
  0xec   :  { %v209_v45 = vadd.f32 %v481_v39, %v347_v16  ;;  %v241_v46 = vadd.f32 %v489_v40, %v347_v16  ;;  %v200_v47 = vpop.f32.mrf.mxu0  ;;  %v232_v48 = vpop.f32.mrf.mxu1 }
  0xed   :  { %436 = vst [vmem:[%s621_s3 + $0x8] sm:$0xff] %v404_v41   ;;  %440 = vst [vmem:[%s621_s3 + $0x28] sm:$0xff] %v424_v42   ;;  %v399_v49 = vpack.c.bf16 %v248_v43, %v247_v37  ;;  %v419_v50 = vpack.c.bf16 %v256_v44, %v255_v38  ;;  %v201_v51 = vadd.f32 %v347_v16, %v200_v47 }
  0xee   :  { %v233_v52 = vadd.f32 %v347_v16, %v232_v48  ;;  %v482_v53 = vpop.f32.mrf.mxu0  ;;  %v490_v54 = vpop.f32.mrf.mxu1  ;;  %v253_v57 = vmax.f32 %v209_v45, 0.0  ;;  %v261_v58 = vmax.f32 %v241_v46, 0.0 }
  0xef   :  { %400 = vst [vmem:[%s621_s3] sm:$0xff] %v399_v49   ;;  %439 = vst [vmem:[%s621_s3 + $0x20] sm:$0xff] %v419_v50   ;;  %v212_v55 = vadd.f32 %v482_v53, %v347_v16  ;;  %v244_v56 = vadd.f32 %v490_v54, %v347_v16  ;;  %v251_v1 = vmax.f32 %v201_v51, 0.0 }
  0xf0   :  { %v203_v59 = vpop.f32.mrf.mxu0  ;;  %v235_v60 = vpop.f32.mrf.mxu1  ;;  %v259_v2 = vmax.f32 %v233_v52, 0.0 }
  0xf1   :  { %v254_v61 = vmax.f32 %v212_v55, 0.0  ;;  %v262_v62 = vmax.f32 %v244_v56, 0.0  ;;  %v204_v63 = vadd.f32 %v347_v16, %v203_v59  ;;  %v236_v0 = vadd.f32 %v347_v16, %v235_v60 }
  0xf3   :  { %v414_v3 = vpack.c.bf16 %v254_v61, %v253_v57  ;;  %v434_v4 = vpack.c.bf16 %v262_v62, %v261_v58  ;;  %v252_v5 = vmax.f32 %v204_v63, 0.0  ;;  %v260_v6 = vmax.f32 %v236_v0, 0.0 }
  0xf5   :  { %438 = vst [vmem:[%s621_s3 + $0x18] sm:$0xff] %v414_v3   ;;  %442 = vst [vmem:[%s621_s3 + $0x38] sm:$0xff] %v434_v4   ;;  %v409_v7 = vpack.c.bf16 %v252_v5, %v251_v1  ;;  %v429_v8 = vpack.c.bf16 %v260_v6, %v259_v2 }
  0xf7   :  { %437 = vst [vmem:[%s621_s3 + $0x10] sm:$0xff] %v409_v7   ;;  %441 = vst [vmem:[%s621_s3 + $0x30] sm:$0xff] %v429_v8  }

// kernel: backbone_forward.18
= control target key start
LH: loop header
LB: loop body
LE: loop exit
PB: predicated region body
PF: predicated region fallthrough
CT: control target
= control target key end

     0   :  { %v1756_v0 = vmov 0   ;;  %s2214_s1 = inlined_call_operand.vmem [shape: bf16[256,128], index: 1, kind: input, shape index: {}]   ;;  %s2215_s0 = inlined_call_operand.vmem [shape: bf16[512,256], index: 0, kind: input, shape index: {}]   ;;  %s2216_s2 = inlined_call_operand.vmem [shape: f32[1,128], index: 2, kind: input, shape index: {}]   ;;  %s2217_s3 = inlined_call_operand.vmem [shape: bf16[512,128], index: 3, kind: output, shape index: {}]  }
   0x1   :  { %534 = vmatprep.subr.bf16.mxu0 %v1756_v0  ;;  %1611 = vmatprep.subr.bf16.mxu1 %v1756_v0  ;;  %v1644_v1 = vld [vmem:[%s2214_s1 + $0x38] sm:$0xff]   ;;  %v1645_v2 = vld [vmem:[%s2214_s1 + $0x30] sm:$0xff]   ;;  %v1646_v3 = vld [vmem:[%s2214_s1 + $0x28] sm:$0xff]  }
   0x2   :  { %535 = vmatpush1.bf16.msra.mxu0 %v1644_v1  ;;  %1627 = vmatpush1.bf16.msra.mxu1 %v1644_v1  ;;  %v1647_v4 = vld [vmem:[%s2214_s1 + $0x20] sm:$0xff]   ;;  %v1648_v5 = vld [vmem:[%s2214_s1 + $0x18] sm:$0xff]   ;;  %v1649_v7 = vld [vmem:[%s2214_s1 + $0x10] sm:$0xff]  }
   0x3   :  { %536 = vmatprep.subr.bf16.mxu0 %v1756_v0  ;;  %1612 = vmatprep.subr.bf16.mxu1 %v1756_v0  ;;  %v1662_v6 = vld [vmem:[%s2215_s0 + $0x4] ss:$8 sps:$4 sm:$0xff]   ;;  %v1652_v11 = vld [vmem:[%s2214_s1 + $0x78] sm:$0xff]   ;;  %v1653_v12 = vld [vmem:[%s2214_s1 + $0x70] sm:$0xff]  }
   0x4   :  { %v1665_v8 = vld [vmem:[%s2215_s0 + $0x104] ss:$8 sps:$4 sm:$0xff]   ;;  %566 = vmatprep.mubr.bf16.mxu0 %v1662_v6  ;;  %v1656_v15 = vld [vmem:[%s2214_s1 + $0x58] sm:$0xff]   ;;  %v1657_v16 = vld [vmem:[%s2214_s1 + $0x50] sm:$0xff]  }
   0x5   :  { %694 = vmatprep.mubr.bf16.mxu1 %v1665_v8  ;;  %v1650_v9 = vld [vmem:[%s2214_s1 + $0x8] sm:$0xff]   ;;  %v1651_v10 = vld [vmem:[%s2214_s1] sm:$0xff]   ;;  %v1666_v21 = vld [vmem:[%s2215_s0 + $0x14] ss:$8 sps:$4 sm:$0xff]  }
   0x6   :  { %537 = vmatpush1.bf16.msra.mxu0 %v1645_v2  ;;  %1628 = vmatpush1.bf16.msra.mxu1 %v1645_v2  ;;  %v1654_v13 = vld [vmem:[%s2214_s1 + $0x68] sm:$0xff]   ;;  %v1655_v14 = vld [vmem:[%s2214_s1 + $0x60] sm:$0xff]   ;;  %v1668_v22 = vld [vmem:[%s2215_s0 + $0x114] ss:$8 sps:$4 sm:$0xff]  }
   0x7   :  { %538 = vmatprep.subr.bf16.mxu0 %v1756_v0  ;;  %1613 = vmatprep.subr.bf16.mxu1 %v1756_v0  ;;  %v1658_v17 = vld [vmem:[%s2214_s1 + $0x48] sm:$0xff]   ;;  %v1659_v18 = vld [vmem:[%s2214_s1 + $0x40] sm:$0xff]   ;;  %v1670_v23 = vld [vmem:[%s2215_s0 + $0x10] ss:$8 sps:$4 sm:$0xff]  }
   0x8   :  { %v1660_v19 = vld [vmem:[%s2215_s0] ss:$8 sps:$4 sm:$0xff]   ;;  %v1671_v24 = vld [vmem:[%s2215_s0 + $0x110] ss:$8 sps:$4 sm:$0xff]   ;;  %v1672_v25 = vld [vmem:[%s2215_s0 + $0x24] ss:$8 sps:$4 sm:$0xff]  }
   0x9   :  { %v1663_v20 = vld [vmem:[%s2215_s0 + $0x100] ss:$8 sps:$4 sm:$0xff]   ;;  %v1674_v26 = vld [vmem:[%s2215_s0 + $0x124] ss:$8 sps:$4 sm:$0xff]   ;;  %v1678_v29 = vld [vmem:[%s2215_s0 + $0x34] ss:$8 sps:$4 sm:$0xff]  }
   0xa   :  { %539 = vmatpush1.bf16.msra.mxu0 %v1646_v3  ;;  %1629 = vmatpush1.bf16.msra.mxu1 %v1646_v3  ;;  %v1676_v27 = vld [vmem:[%s2215_s0 + $0x20] ss:$8 sps:$4 sm:$0xff]   ;;  %v1680_v30 = vld [vmem:[%s2215_s0 + $0x134] ss:$8 sps:$4 sm:$0xff]   ;;  %v1682_v31 = vld [vmem:[%s2215_s0 + $0x30] ss:$8 sps:$4 sm:$0xff]  }
   0xb   :  { %540 = vmatprep.subr.bf16.mxu0 %v1756_v0  ;;  %1614 = vmatprep.subr.bf16.mxu1 %v1756_v0  ;;  %v1677_v28 = vld [vmem:[%s2215_s0 + $0x120] ss:$8 sps:$4 sm:$0xff]   ;;  %v1683_v32 = vld [vmem:[%s2215_s0 + $0x130] ss:$8 sps:$4 sm:$0xff]   ;;  %v1684_v33 = vld [vmem:[%s2215_s0 + $0x44] ss:$8 sps:$4 sm:$0xff]  }
   0xc   :  { %v1686_v34 = vld [vmem:[%s2215_s0 + $0x144] ss:$8 sps:$4 sm:$0xff]   ;;  %v1688_v35 = vld [vmem:[%s2215_s0 + $0x40] ss:$8 sps:$4 sm:$0xff]   ;;  %v1690_v37 = vld [vmem:[%s2215_s0 + $0x54] ss:$8 sps:$4 sm:$0xff]  }
   0xd   :  { %v1689_v36 = vld [vmem:[%s2215_s0 + $0x140] ss:$8 sps:$4 sm:$0xff]   ;;  %v1692_v38 = vld [vmem:[%s2215_s0 + $0x154] ss:$8 sps:$4 sm:$0xff]   ;;  %v1694_v39 = vld [vmem:[%s2215_s0 + $0x50] ss:$8 sps:$4 sm:$0xff]  }
   0xe   :  { %541 = vmatpush1.bf16.msra.mxu0 %v1647_v4  ;;  %1630 = vmatpush1.bf16.msra.mxu1 %v1647_v4  ;;  %v1695_v40 = vld [vmem:[%s2215_s0 + $0x150] ss:$8 sps:$4 sm:$0xff]   ;;  %v1696_v41 = vld [vmem:[%s2215_s0 + $0x64] ss:$8 sps:$4 sm:$0xff]   ;;  %v1700_v43 = vld [vmem:[%s2215_s0 + $0x60] ss:$8 sps:$4 sm:$0xff]  }
   0xf   :  { %542 = vmatprep.subr.bf16.mxu0 %v1756_v0  ;;  %1615 = vmatprep.subr.bf16.mxu1 %v1756_v0  ;;  %v1698_v42 = vld [vmem:[%s2215_s0 + $0x164] ss:$8 sps:$4 sm:$0xff]   ;;  %v1701_v44 = vld [vmem:[%s2215_s0 + $0x160] ss:$8 sps:$4 sm:$0xff]   ;;  %v1702_v45 = vld [vmem:[%s2215_s0 + $0x74] ss:$8 sps:$4 sm:$0xff]  }
  0x10   :  { %v1704_v46 = vld [vmem:[%s2215_s0 + $0x174] ss:$8 sps:$4 sm:$0xff]   ;;  %v1706_v47 = vld [vmem:[%s2215_s0 + $0x70] ss:$8 sps:$4 sm:$0xff]   ;;  %v1708_v49 = vld [vmem:[%s2215_s0 + $0x84] ss:$8 sps:$4 sm:$0xff]  }
  0x11   :  { %v1707_v48 = vld [vmem:[%s2215_s0 + $0x170] ss:$8 sps:$4 sm:$0xff]   ;;  %v1710_v50 = vld [vmem:[%s2215_s0 + $0x184] ss:$8 sps:$4 sm:$0xff]   ;;  %v1712_v51 = vld [vmem:[%s2215_s0 + $0x80] ss:$8 sps:$4 sm:$0xff]  }
  0x12   :  { %543 = vmatpush1.bf16.msra.mxu0 %v1648_v5  ;;  %1631 = vmatpush1.bf16.msra.mxu1 %v1648_v5  ;;  %v1713_v52 = vld [vmem:[%s2215_s0 + $0x180] ss:$8 sps:$4 sm:$0xff]   ;;  %v1714_v53 = vld [vmem:[%s2215_s0 + $0x94] ss:$8 sps:$4 sm:$0xff]   ;;  %v1718_v55 = vld [vmem:[%s2215_s0 + $0x90] ss:$8 sps:$4 sm:$0xff]  }
  0x13   :  { %544 = vmatprep.subr.bf16.mxu0 %v1756_v0  ;;  %1616 = vmatprep.subr.bf16.mxu1 %v1756_v0  ;;  %v1716_v54 = vld [vmem:[%s2215_s0 + $0x194] ss:$8 sps:$4 sm:$0xff]   ;;  %v1719_v56 = vld [vmem:[%s2215_s0 + $0x190] ss:$8 sps:$4 sm:$0xff]   ;;  %v1720_v57 = vld [vmem:[%s2215_s0 + $0xa4] ss:$8 sps:$4 sm:$0xff]  }
  0x14   :  { %v1722_v58 = vld [vmem:[%s2215_s0 + $0x1a4] ss:$8 sps:$4 sm:$0xff]   ;;  %v1724_v59 = vld [vmem:[%s2215_s0 + $0xa0] ss:$8 sps:$4 sm:$0xff]   ;;  %v1726_v61 = vld [vmem:[%s2215_s0 + $0xb4] ss:$8 sps:$4 sm:$0xff]  }
  0x15   :  { %v1725_v60 = vld [vmem:[%s2215_s0 + $0x1a0] ss:$8 sps:$4 sm:$0xff]   ;;  %v1728_v62 = vld [vmem:[%s2215_s0 + $0x1b4] ss:$8 sps:$4 sm:$0xff]   ;;  %v1730_v63 = vld [vmem:[%s2215_s0 + $0xb0] ss:$8 sps:$4 sm:$0xff]  }
  0x16   :  { %545 = vmatpush1.bf16.msra.mxu0 %v1649_v7  ;;  %1632 = vmatpush1.bf16.msra.mxu1 %v1649_v7  ;;  %v1732_v1 = vld [vmem:[%s2215_s0 + $0xc4] ss:$8 sps:$4 sm:$0xff]   ;;  %v1736_v3 = vld [vmem:[%s2215_s0 + $0xc0] ss:$8 sps:$4 sm:$0xff]   ;;  %v1738_v5 = vld [vmem:[%s2215_s0 + $0xd4] ss:$8 sps:$4 sm:$0xff]  }
  0x17   :  { %546 = vmatprep.subr.bf16.mxu0 %v1756_v0  ;;  %1617 = vmatprep.subr.bf16.mxu1 %v1756_v0  ;;  %v1734_v2 = vld [vmem:[%s2215_s0 + $0x1c4] ss:$8 sps:$4 sm:$0xff]   ;;  %v1737_v4 = vld [vmem:[%s2215_s0 + $0x1c0] ss:$8 sps:$4 sm:$0xff]   ;;  %v1740_v6 = vld [vmem:[%s2215_s0 + $0x1d4] ss:$8 sps:$4 sm:$0xff]  }
  0x18   :  { %v1742_v7 = vld [vmem:[%s2215_s0 + $0xd0] ss:$8 sps:$4 sm:$0xff]  }
  0x19   :  { %v1743_v8 = vld [vmem:[%s2215_s0 + $0x1d0] ss:$8 sps:$4 sm:$0xff]  }
  0x1a   :  { %547 = vmatpush1.bf16.msra.mxu0 %v1650_v9  ;;  %1633 = vmatpush1.bf16.msra.mxu1 %v1650_v9  ;;  %v1744_v9 = vld [vmem:[%s2215_s0 + $0xe4] ss:$8 sps:$4 sm:$0xff]  }
  0x1b   :  { %548 = vmatprep.subr.bf16.mxu0 %v1756_v0  ;;  %1618 = vmatprep.subr.bf16.mxu1 %v1756_v0 }
  0x1e   :  { %549 = vmatpush1.bf16.msra.mxu0 %v1651_v10  ;;  %1634 = vmatpush1.bf16.msra.mxu1 %v1651_v10  ;;  %v1746_v10 = vld [vmem:[%s2215_s0 + $0x1e4] ss:$8 sps:$4 sm:$0xff]  }
  0x1f   :  { %550 = vmatprep.subr.bf16.mxu0 %v1756_v0  ;;  %1619 = vmatprep.subr.bf16.mxu1 %v1756_v0 }
  0x22   :  { %551 = vmatpush2.bf16.msra.mxu0 %v1652_v11  ;;  %1635 = vmatpush2.bf16.msra.mxu1 %v1652_v11  ;;  %v1748_v11 = vld [vmem:[%s2215_s0 + $0xe0] ss:$8 sps:$4 sm:$0xff]  }
  0x23   :  { %552 = vmatprep.subr.bf16.mxu0 %v1756_v0  ;;  %1620 = vmatprep.subr.bf16.mxu1 %v1756_v0 }
  0x26   :  { %553 = vmatpush2.bf16.msra.mxu0 %v1653_v12  ;;  %1636 = vmatpush2.bf16.msra.mxu1 %v1653_v12  ;;  %v1749_v12 = vld [vmem:[%s2215_s0 + $0x1e0] ss:$8 sps:$4 sm:$0xff]  }
  0x27   :  { %554 = vmatprep.subr.bf16.mxu0 %v1756_v0  ;;  %1621 = vmatprep.subr.bf16.mxu1 %v1756_v0 }
  0x2a   :  { %555 = vmatpush2.bf16.msra.mxu0 %v1654_v13  ;;  %1637 = vmatpush2.bf16.msra.mxu1 %v1654_v13  ;;  %v1750_v13 = vld [vmem:[%s2215_s0 + $0xf4] ss:$8 sps:$4 sm:$0xff]  }
  0x2b   :  { %556 = vmatprep.subr.bf16.mxu0 %v1756_v0  ;;  %1622 = vmatprep.subr.bf16.mxu1 %v1756_v0 }
  0x2e   :  { %557 = vmatpush2.bf16.msra.mxu0 %v1655_v14  ;;  %1638 = vmatpush2.bf16.msra.mxu1 %v1655_v14  ;;  %v1752_v14 = vld [vmem:[%s2215_s0 + $0x1f4] ss:$8 sps:$4 sm:$0xff]  }
  0x2f   :  { %558 = vmatprep.subr.bf16.mxu0 %v1756_v0  ;;  %1623 = vmatprep.subr.bf16.mxu1 %v1756_v0 }
  0x32   :  { %559 = vmatpush2.bf16.msra.mxu0 %v1656_v15  ;;  %1639 = vmatpush2.bf16.msra.mxu1 %v1656_v15  ;;  %v1754_v15 = vld [vmem:[%s2215_s0 + $0xf0] ss:$8 sps:$4 sm:$0xff]  }
  0x33   :  { %560 = vmatprep.subr.bf16.mxu0 %v1756_v0  ;;  %1624 = vmatprep.subr.bf16.mxu1 %v1756_v0 }
  0x36   :  { %561 = vmatpush2.bf16.msra.mxu0 %v1657_v16  ;;  %1640 = vmatpush2.bf16.msra.mxu1 %v1657_v16  ;;  %v1755_v16 = vld [vmem:[%s2215_s0 + $0x1f0] ss:$8 sps:$4 sm:$0xff]  }
  0x37   :  { %562 = vmatprep.subr.bf16.mxu0 %v1756_v0  ;;  %1625 = vmatprep.subr.bf16.mxu1 %v1756_v0 }
  0x3a   :  { %563 = vmatpush2.bf16.msra.mxu0 %v1658_v17  ;;  %1641 = vmatpush2.bf16.msra.mxu1 %v1658_v17  ;;  %v2052_v17 = vld [vmem:[%s2216_s2] ss:$0 sm:$0xff] }
  0x3b   :  { %564 = vmatprep.subr.bf16.mxu0 %v1756_v0  ;;  %1626 = vmatprep.subr.bf16.mxu1 %v1756_v0  ;;  %v1731_v0 = vld [vmem:[%s2215_s0 + $0x1b0] ss:$8 sps:$4 sm:$0xff]  }
  0x3e   :  { %565 = vmatpush2.bf16.msra.mxu0 %v1659_v18  ;;  %1642 = vmatpush2.bf16.msra.mxu1 %v1659_v18 }
  0x41   :  { %567 = vmatmul.mubr.bf16.vlgmr.msra.gmra.mxu0 %v1660_v19  ;;  %695 = vmatmul.mubr.bf16.vlgmr.msra.gmra.mxu1 %v1663_v20 }
  0x42   :  { %574 = vmatprep.mubr.bf16.mxu0 %v1666_v21  ;;  %702 = vmatprep.mubr.bf16.mxu1 %v1668_v22 }
  0x49   :  { %575 = vmatmul.mubr.bf16.gmra.mxu0 %v1670_v23  ;;  %703 = vmatmul.mubr.bf16.gmra.mxu1 %v1671_v24 }
  0x4a   :  { %582 = vmatprep.mubr.bf16.mxu0 %v1672_v25  ;;  %710 = vmatprep.mubr.bf16.mxu1 %v1674_v26 }
  0x51   :  { %583 = vmatmul.mubr.bf16.gmra.mxu0 %v1676_v27  ;;  %711 = vmatmul.mubr.bf16.gmra.mxu1 %v1677_v28 }
  0x52   :  { %590 = vmatprep.mubr.bf16.mxu0 %v1678_v29  ;;  %718 = vmatprep.mubr.bf16.mxu1 %v1680_v30 }
  0x59   :  { %591 = vmatmul.mubr.bf16.gmra.mxu0 %v1682_v31  ;;  %719 = vmatmul.mubr.bf16.gmra.mxu1 %v1683_v32 }
  0x5a   :  { %598 = vmatprep.mubr.bf16.mxu0 %v1684_v33  ;;  %726 = vmatprep.mubr.bf16.mxu1 %v1686_v34 }
  0x61   :  { %599 = vmatmul.mubr.bf16.gmra.mxu0 %v1688_v35  ;;  %727 = vmatmul.mubr.bf16.gmra.mxu1 %v1689_v36 }
  0x62   :  { %606 = vmatprep.mubr.bf16.mxu0 %v1690_v37  ;;  %734 = vmatprep.mubr.bf16.mxu1 %v1692_v38 }
  0x69   :  { %607 = vmatmul.mubr.bf16.gmra.mxu0 %v1694_v39  ;;  %735 = vmatmul.mubr.bf16.gmra.mxu1 %v1695_v40 }
  0x6a   :  { %614 = vmatprep.mubr.bf16.mxu0 %v1696_v41  ;;  %742 = vmatprep.mubr.bf16.mxu1 %v1698_v42 }
  0x71   :  { %615 = vmatmul.mubr.bf16.gmra.mxu0 %v1700_v43  ;;  %743 = vmatmul.mubr.bf16.gmra.mxu1 %v1701_v44 }
  0x72   :  { %622 = vmatprep.mubr.bf16.mxu0 %v1702_v45  ;;  %750 = vmatprep.mubr.bf16.mxu1 %v1704_v46 }
  0x79   :  { %623 = vmatmul.mubr.bf16.gmra.mxu0 %v1706_v47  ;;  %751 = vmatmul.mubr.bf16.gmra.mxu1 %v1707_v48 }
  0x7a   :  { %630 = vmatprep.mubr.bf16.mxu0 %v1708_v49  ;;  %758 = vmatprep.mubr.bf16.mxu1 %v1710_v50 }
  0x81   :  { %631 = vmatmul.mubr.bf16.gmra.mxu0 %v1712_v51  ;;  %759 = vmatmul.mubr.bf16.gmra.mxu1 %v1713_v52 }
  0x82   :  { %638 = vmatprep.mubr.bf16.mxu0 %v1714_v53  ;;  %766 = vmatprep.mubr.bf16.mxu1 %v1716_v54 }
  0x89   :  { %639 = vmatmul.mubr.bf16.gmra.mxu0 %v1718_v55  ;;  %767 = vmatmul.mubr.bf16.gmra.mxu1 %v1719_v56 }
  0x8a   :  { %646 = vmatprep.mubr.bf16.mxu0 %v1720_v57  ;;  %774 = vmatprep.mubr.bf16.mxu1 %v1722_v58 }
  0x91   :  { %647 = vmatmul.mubr.bf16.gmra.mxu0 %v1724_v59  ;;  %775 = vmatmul.mubr.bf16.gmra.mxu1 %v1725_v60 }
  0x92   :  { %654 = vmatprep.mubr.bf16.mxu0 %v1726_v61  ;;  %782 = vmatprep.mubr.bf16.mxu1 %v1728_v62 }
  0x99   :  { %655 = vmatmul.mubr.bf16.gmra.mxu0 %v1730_v63  ;;  %783 = vmatmul.mubr.bf16.gmra.mxu1 %v1731_v0 }
  0x9a   :  { %662 = vmatprep.mubr.bf16.mxu0 %v1732_v1  ;;  %790 = vmatprep.mubr.bf16.mxu1 %v1734_v2 }
  0xa1   :  { %663 = vmatmul.mubr.bf16.gmra.mxu0 %v1736_v3  ;;  %791 = vmatmul.mubr.bf16.gmra.mxu1 %v1737_v4 }
  0xa2   :  { %670 = vmatprep.mubr.bf16.mxu0 %v1738_v5  ;;  %798 = vmatprep.mubr.bf16.mxu1 %v1740_v6 }
  0xa9   :  { %671 = vmatmul.mubr.bf16.gmra.mxu0 %v1742_v7  ;;  %799 = vmatmul.mubr.bf16.gmra.mxu1 %v1743_v8 }
  0xaa   :  { %678 = vmatprep.mubr.bf16.mxu0 %v1744_v9  ;;  %806 = vmatprep.mubr.bf16.mxu1 %v1746_v10 }
  0xb1   :  { %679 = vmatmul.mubr.bf16.gmra.mxu0 %v1748_v11  ;;  %807 = vmatmul.mubr.bf16.gmra.mxu1 %v1749_v12 }
  0xb2   :  { %686 = vmatprep.mubr.bf16.mxu0 %v1750_v13  ;;  %814 = vmatprep.mubr.bf16.mxu1 %v1752_v14 }
  0xb9   :  { %687 = vmatmul.mubr.bf16.gmra.mxu0 %v1754_v15  ;;  %815 = vmatmul.mubr.bf16.gmra.mxu1 %v1755_v16 }
 0x101   :  { %v568_v18 = vpop.f32.mrf.mxu0  ;;  %v696_v19 = vpop.f32.mrf.mxu1 }
 0x102   :  { %v569_v22 = vadd.f32 %v2052_v17, %v568_v18  ;;  %v697_v23 = vadd.f32 %v2052_v17, %v696_v19 }
 0x103   :  { %v570_v20 = vpop.f32.mrf.mxu0  ;;  %v698_v21 = vpop.f32.mrf.mxu1 }
 0x104   :  { %v823_v30 = vmax.f32 %v569_v22, 0.0  ;;  %v855_v31 = vmax.f32 %v697_v23, 0.0 }
 0x105   :  { %v571_v24 = vpop.f32.mrf.mxu0  ;;  %v699_v25 = vpop.f32.mrf.mxu1 }
 0x106   :  { %v572_v26 = vadd.f32 %v2052_v17, %v571_v24  ;;  %v700_v27 = vadd.f32 %v2052_v17, %v699_v25 }
 0x107   :  { %v573_v28 = vpop.f32.mrf.mxu0  ;;  %v701_v29 = vpop.f32.mrf.mxu1 }
 0x108   :  { %v824_v32 = vmax.f32 %v572_v26, 0.0  ;;  %v856_v33 = vmax.f32 %v700_v27, 0.0 }
 0x109   :  { %v576_v34 = vpop.f32.mrf.mxu0  ;;  %v704_v35 = vpop.f32.mrf.mxu1 }
 0x10a   :  { %v1423_v36 = vpack.c.bf16 %v824_v32, %v823_v30  ;;  %v1503_v37 = vpack.c.bf16 %v856_v33, %v855_v31  ;;  %v577_v40 = vadd.f32 %v2052_v17, %v576_v34  ;;  %v705_v41 = vadd.f32 %v2052_v17, %v704_v35 }
 0x10b   :  { %v578_v38 = vpop.f32.mrf.mxu0  ;;  %v706_v39 = vpop.f32.mrf.mxu1 }
 0x10c   :  { %1424 = vst [vmem:[%s2217_s3] sm:$0xff] %v1423_v36   ;;  %1595 = vst [vmem:[%s2217_s3 + $0x80] sm:$0xff] %v1503_v37   ;;  %v825_v48 = vmax.f32 %v577_v40, 0.0  ;;  %v857_v49 = vmax.f32 %v705_v41, 0.0 }
 0x10d   :  { %v579_v42 = vpop.f32.mrf.mxu0  ;;  %v707_v43 = vpop.f32.mrf.mxu1 }
 0x10e   :  { %v580_v44 = vadd.f32 %v2052_v17, %v579_v42  ;;  %v708_v45 = vadd.f32 %v2052_v17, %v707_v43 }
 0x10f   :  { %v581_v46 = vpop.f32.mrf.mxu0  ;;  %v709_v47 = vpop.f32.mrf.mxu1 }
 0x110   :  { %v826_v50 = vmax.f32 %v580_v44, 0.0  ;;  %v858_v51 = vmax.f32 %v708_v45, 0.0 }
 0x111   :  { %v584_v52 = vpop.f32.mrf.mxu0  ;;  %v712_v53 = vpop.f32.mrf.mxu1 }
 0x112   :  { %v1428_v54 = vpack.c.bf16 %v826_v50, %v825_v48  ;;  %v1508_v55 = vpack.c.bf16 %v858_v51, %v857_v49  ;;  %v585_v58 = vadd.f32 %v2052_v17, %v584_v52  ;;  %v713_v59 = vadd.f32 %v2052_v17, %v712_v53 }
 0x113   :  { %v586_v56 = vpop.f32.mrf.mxu0  ;;  %v714_v57 = vpop.f32.mrf.mxu1 }
 0x114   :  { %1580 = vst [vmem:[%s2217_s3 + $0x8] sm:$0xff] %v1428_v54   ;;  %1596 = vst [vmem:[%s2217_s3 + $0x88] sm:$0xff] %v1508_v55   ;;  %v827_v2 = vmax.f32 %v585_v58, 0.0  ;;  %v859_v3 = vmax.f32 %v713_v59, 0.0 }
 0x115   :  { %v587_v60 = vpop.f32.mrf.mxu0  ;;  %v715_v61 = vpop.f32.mrf.mxu1 }
 0x116   :  { %v588_v62 = vadd.f32 %v2052_v17, %v587_v60  ;;  %v716_v63 = vadd.f32 %v2052_v17, %v715_v61 }
 0x117   :  { %v589_v0 = vpop.f32.mrf.mxu0  ;;  %v717_v1 = vpop.f32.mrf.mxu1 }
 0x118   :  { %v828_v4 = vmax.f32 %v588_v62, 0.0  ;;  %v860_v5 = vmax.f32 %v716_v63, 0.0 }
 0x119   :  { %v592_v6 = vpop.f32.mrf.mxu0  ;;  %v720_v7 = vpop.f32.mrf.mxu1 }
 0x11a   :  { %v1433_v8 = vpack.c.bf16 %v828_v4, %v827_v2  ;;  %v1513_v9 = vpack.c.bf16 %v860_v5, %v859_v3  ;;  %v593_v12 = vadd.f32 %v2052_v17, %v592_v6  ;;  %v721_v13 = vadd.f32 %v2052_v17, %v720_v7 }
 0x11b   :  { %v594_v10 = vpop.f32.mrf.mxu0  ;;  %v722_v11 = vpop.f32.mrf.mxu1 }
 0x11c   :  { %1581 = vst [vmem:[%s2217_s3 + $0x10] sm:$0xff] %v1433_v8   ;;  %1597 = vst [vmem:[%s2217_s3 + $0x90] sm:$0xff] %v1513_v9   ;;  %v829_v21 = vmax.f32 %v593_v12, 0.0  ;;  %v861_v22 = vmax.f32 %v721_v13, 0.0 }
 0x11d   :  { %v595_v14 = vpop.f32.mrf.mxu0  ;;  %v723_v15 = vpop.f32.mrf.mxu1 }
 0x11e   :  { %v596_v16 = vadd.f32 %v2052_v17, %v595_v14  ;;  %v724_v18 = vadd.f32 %v2052_v17, %v723_v15 }
 0x11f   :  { %v597_v19 = vpop.f32.mrf.mxu0  ;;  %v725_v20 = vpop.f32.mrf.mxu1 }
 0x120   :  { %v830_v23 = vmax.f32 %v596_v16, 0.0  ;;  %v862_v24 = vmax.f32 %v724_v18, 0.0 }
 0x121   :  { %v600_v25 = vpop.f32.mrf.mxu0  ;;  %v728_v26 = vpop.f32.mrf.mxu1 }
 0x122   :  { %v1438_v27 = vpack.c.bf16 %v830_v23, %v829_v21  ;;  %v1518_v28 = vpack.c.bf16 %v862_v24, %v861_v22  ;;  %v601_v31 = vadd.f32 %v2052_v17, %v600_v25  ;;  %v729_v32 = vadd.f32 %v2052_v17, %v728_v26 }
 0x123   :  { %v602_v29 = vpop.f32.mrf.mxu0  ;;  %v730_v30 = vpop.f32.mrf.mxu1 }
 0x124   :  { %1582 = vst [vmem:[%s2217_s3 + $0x18] sm:$0xff] %v1438_v27   ;;  %1598 = vst [vmem:[%s2217_s3 + $0x98] sm:$0xff] %v1518_v28   ;;  %v831_v39 = vmax.f32 %v601_v31, 0.0  ;;  %v863_v40 = vmax.f32 %v729_v32, 0.0 }
 0x125   :  { %v603_v33 = vpop.f32.mrf.mxu0  ;;  %v731_v34 = vpop.f32.mrf.mxu1 }
 0x126   :  { %v604_v35 = vadd.f32 %v2052_v17, %v603_v33  ;;  %v732_v36 = vadd.f32 %v2052_v17, %v731_v34 }
 0x127   :  { %v605_v37 = vpop.f32.mrf.mxu0  ;;  %v733_v38 = vpop.f32.mrf.mxu1 }
 0x128   :  { %v832_v41 = vmax.f32 %v604_v35, 0.0  ;;  %v864_v42 = vmax.f32 %v732_v36, 0.0 }
 0x129   :  { %v608_v43 = vpop.f32.mrf.mxu0  ;;  %v736_v44 = vpop.f32.mrf.mxu1 }
 0x12a   :  { %v1443_v45 = vpack.c.bf16 %v832_v41, %v831_v39  ;;  %v1523_v46 = vpack.c.bf16 %v864_v42, %v863_v40  ;;  %v609_v49 = vadd.f32 %v2052_v17, %v608_v43  ;;  %v737_v50 = vadd.f32 %v2052_v17, %v736_v44 }
 0x12b   :  { %v610_v47 = vpop.f32.mrf.mxu0  ;;  %v738_v48 = vpop.f32.mrf.mxu1 }
 0x12c   :  { %1583 = vst [vmem:[%s2217_s3 + $0x20] sm:$0xff] %v1443_v45   ;;  %1599 = vst [vmem:[%s2217_s3 + $0xa0] sm:$0xff] %v1523_v46   ;;  %v833_v57 = vmax.f32 %v609_v49, 0.0  ;;  %v865_v58 = vmax.f32 %v737_v50, 0.0 }
 0x12d   :  { %v611_v51 = vpop.f32.mrf.mxu0  ;;  %v739_v52 = vpop.f32.mrf.mxu1 }
 0x12e   :  { %v612_v53 = vadd.f32 %v2052_v17, %v611_v51  ;;  %v740_v54 = vadd.f32 %v2052_v17, %v739_v52 }
 0x12f   :  { %v613_v55 = vpop.f32.mrf.mxu0  ;;  %v741_v56 = vpop.f32.mrf.mxu1 }
 0x130   :  { %v834_v59 = vmax.f32 %v612_v53, 0.0  ;;  %v866_v60 = vmax.f32 %v740_v54, 0.0 }
 0x131   :  { %v616_v61 = vpop.f32.mrf.mxu0  ;;  %v744_v62 = vpop.f32.mrf.mxu1 }
 0x132   :  { %v1448_v63 = vpack.c.bf16 %v834_v59, %v833_v57  ;;  %v1528_v0 = vpack.c.bf16 %v866_v60, %v865_v58  ;;  %v617_v3 = vadd.f32 %v2052_v17, %v616_v61  ;;  %v745_v4 = vadd.f32 %v2052_v17, %v744_v62 }
 0x133   :  { %v618_v1 = vpop.f32.mrf.mxu0  ;;  %v746_v2 = vpop.f32.mrf.mxu1 }
 0x134   :  { %1584 = vst [vmem:[%s2217_s3 + $0x28] sm:$0xff] %v1448_v63   ;;  %1600 = vst [vmem:[%s2217_s3 + $0xa8] sm:$0xff] %v1528_v0   ;;  %v835_v11 = vmax.f32 %v617_v3, 0.0  ;;  %v867_v12 = vmax.f32 %v745_v4, 0.0 }
 0x135   :  { %v619_v5 = vpop.f32.mrf.mxu0  ;;  %v747_v6 = vpop.f32.mrf.mxu1 }
 0x136   :  { %v620_v7 = vadd.f32 %v2052_v17, %v619_v5  ;;  %v748_v8 = vadd.f32 %v2052_v17, %v747_v6 }
 0x137   :  { %v621_v9 = vpop.f32.mrf.mxu0  ;;  %v749_v10 = vpop.f32.mrf.mxu1 }
 0x138   :  { %v836_v13 = vmax.f32 %v620_v7, 0.0  ;;  %v868_v14 = vmax.f32 %v748_v8, 0.0 }
 0x139   :  { %v624_v15 = vpop.f32.mrf.mxu0  ;;  %v752_v16 = vpop.f32.mrf.mxu1 }
 0x13a   :  { %v1453_v18 = vpack.c.bf16 %v836_v13, %v835_v11  ;;  %v1533_v19 = vpack.c.bf16 %v868_v14, %v867_v12  ;;  %v625_v22 = vadd.f32 %v2052_v17, %v624_v15  ;;  %v753_v23 = vadd.f32 %v2052_v17, %v752_v16 }
 0x13b   :  { %v626_v20 = vpop.f32.mrf.mxu0  ;;  %v754_v21 = vpop.f32.mrf.mxu1 }
 0x13c   :  { %1585 = vst [vmem:[%s2217_s3 + $0x30] sm:$0xff] %v1453_v18   ;;  %1601 = vst [vmem:[%s2217_s3 + $0xb0] sm:$0xff] %v1533_v19   ;;  %v837_v30 = vmax.f32 %v625_v22, 0.0  ;;  %v869_v31 = vmax.f32 %v753_v23, 0.0 }
 0x13d   :  { %v627_v24 = vpop.f32.mrf.mxu0  ;;  %v755_v25 = vpop.f32.mrf.mxu1 }
 0x13e   :  { %v628_v26 = vadd.f32 %v2052_v17, %v627_v24  ;;  %v756_v27 = vadd.f32 %v2052_v17, %v755_v25 }
 0x13f   :  { %v629_v28 = vpop.f32.mrf.mxu0  ;;  %v757_v29 = vpop.f32.mrf.mxu1 }
 0x140   :  { %v838_v32 = vmax.f32 %v628_v26, 0.0  ;;  %v870_v33 = vmax.f32 %v756_v27, 0.0 }
 0x141   :  { %v632_v34 = vpop.f32.mrf.mxu0  ;;  %v760_v35 = vpop.f32.mrf.mxu1 }
 0x142   :  { %v1458_v36 = vpack.c.bf16 %v838_v32, %v837_v30  ;;  %v1538_v37 = vpack.c.bf16 %v870_v33, %v869_v31  ;;  %v633_v40 = vadd.f32 %v2052_v17, %v632_v34  ;;  %v761_v41 = vadd.f32 %v2052_v17, %v760_v35 }
 0x143   :  { %v634_v38 = vpop.f32.mrf.mxu0  ;;  %v762_v39 = vpop.f32.mrf.mxu1 }
 0x144   :  { %1586 = vst [vmem:[%s2217_s3 + $0x38] sm:$0xff] %v1458_v36   ;;  %1602 = vst [vmem:[%s2217_s3 + $0xb8] sm:$0xff] %v1538_v37   ;;  %v839_v48 = vmax.f32 %v633_v40, 0.0  ;;  %v871_v49 = vmax.f32 %v761_v41, 0.0 }
 0x145   :  { %v635_v42 = vpop.f32.mrf.mxu0  ;;  %v763_v43 = vpop.f32.mrf.mxu1 }
 0x146   :  { %v636_v44 = vadd.f32 %v2052_v17, %v635_v42  ;;  %v764_v45 = vadd.f32 %v2052_v17, %v763_v43 }
 0x147   :  { %v637_v46 = vpop.f32.mrf.mxu0  ;;  %v765_v47 = vpop.f32.mrf.mxu1 }
 0x148   :  { %v840_v50 = vmax.f32 %v636_v44, 0.0  ;;  %v872_v51 = vmax.f32 %v764_v45, 0.0 }
 0x149   :  { %v640_v52 = vpop.f32.mrf.mxu0  ;;  %v768_v53 = vpop.f32.mrf.mxu1 }
 0x14a   :  { %v1463_v54 = vpack.c.bf16 %v840_v50, %v839_v48  ;;  %v1543_v55 = vpack.c.bf16 %v872_v51, %v871_v49  ;;  %v641_v58 = vadd.f32 %v2052_v17, %v640_v52  ;;  %v769_v59 = vadd.f32 %v2052_v17, %v768_v53 }
 0x14b   :  { %v642_v56 = vpop.f32.mrf.mxu0  ;;  %v770_v57 = vpop.f32.mrf.mxu1 }
 0x14c   :  { %1587 = vst [vmem:[%s2217_s3 + $0x40] sm:$0xff] %v1463_v54   ;;  %1603 = vst [vmem:[%s2217_s3 + $0xc0] sm:$0xff] %v1543_v55   ;;  %v841_v2 = vmax.f32 %v641_v58, 0.0  ;;  %v873_v3 = vmax.f32 %v769_v59, 0.0 }
 0x14d   :  { %v643_v60 = vpop.f32.mrf.mxu0  ;;  %v771_v61 = vpop.f32.mrf.mxu1 }
 0x14e   :  { %v644_v62 = vadd.f32 %v2052_v17, %v643_v60  ;;  %v772_v63 = vadd.f32 %v2052_v17, %v771_v61 }
 0x14f   :  { %v645_v0 = vpop.f32.mrf.mxu0  ;;  %v773_v1 = vpop.f32.mrf.mxu1 }
 0x150   :  { %v842_v4 = vmax.f32 %v644_v62, 0.0  ;;  %v874_v5 = vmax.f32 %v772_v63, 0.0 }
 0x151   :  { %v648_v6 = vpop.f32.mrf.mxu0  ;;  %v776_v7 = vpop.f32.mrf.mxu1 }
 0x152   :  { %v1468_v8 = vpack.c.bf16 %v842_v4, %v841_v2  ;;  %v1548_v9 = vpack.c.bf16 %v874_v5, %v873_v3  ;;  %v649_v12 = vadd.f32 %v2052_v17, %v648_v6  ;;  %v777_v13 = vadd.f32 %v2052_v17, %v776_v7 }
 0x153   :  { %v650_v10 = vpop.f32.mrf.mxu0  ;;  %v778_v11 = vpop.f32.mrf.mxu1 }
 0x154   :  { %1588 = vst [vmem:[%s2217_s3 + $0x48] sm:$0xff] %v1468_v8   ;;  %1604 = vst [vmem:[%s2217_s3 + $0xc8] sm:$0xff] %v1548_v9   ;;  %v843_v21 = vmax.f32 %v649_v12, 0.0  ;;  %v875_v22 = vmax.f32 %v777_v13, 0.0 }
 0x155   :  { %v651_v14 = vpop.f32.mrf.mxu0  ;;  %v779_v15 = vpop.f32.mrf.mxu1 }
 0x156   :  { %v652_v16 = vadd.f32 %v2052_v17, %v651_v14  ;;  %v780_v18 = vadd.f32 %v2052_v17, %v779_v15 }
 0x157   :  { %v653_v19 = vpop.f32.mrf.mxu0  ;;  %v781_v20 = vpop.f32.mrf.mxu1 }
 0x158   :  { %v844_v23 = vmax.f32 %v652_v16, 0.0  ;;  %v876_v24 = vmax.f32 %v780_v18, 0.0 }
 0x159   :  { %v656_v25 = vpop.f32.mrf.mxu0  ;;  %v784_v26 = vpop.f32.mrf.mxu1 }
 0x15a   :  { %v1473_v27 = vpack.c.bf16 %v844_v23, %v843_v21  ;;  %v1553_v28 = vpack.c.bf16 %v876_v24, %v875_v22  ;;  %v657_v31 = vadd.f32 %v2052_v17, %v656_v25  ;;  %v785_v32 = vadd.f32 %v2052_v17, %v784_v26 }
 0x15b   :  { %v658_v29 = vpop.f32.mrf.mxu0  ;;  %v786_v30 = vpop.f32.mrf.mxu1 }
 0x15c   :  { %1589 = vst [vmem:[%s2217_s3 + $0x50] sm:$0xff] %v1473_v27   ;;  %1605 = vst [vmem:[%s2217_s3 + $0xd0] sm:$0xff] %v1553_v28   ;;  %v845_v39 = vmax.f32 %v657_v31, 0.0  ;;  %v877_v40 = vmax.f32 %v785_v32, 0.0 }
 0x15d   :  { %v659_v33 = vpop.f32.mrf.mxu0  ;;  %v787_v34 = vpop.f32.mrf.mxu1 }
 0x15e   :  { %v660_v35 = vadd.f32 %v2052_v17, %v659_v33  ;;  %v788_v36 = vadd.f32 %v2052_v17, %v787_v34 }
 0x15f   :  { %v661_v37 = vpop.f32.mrf.mxu0  ;;  %v789_v38 = vpop.f32.mrf.mxu1 }
 0x160   :  { %v846_v41 = vmax.f32 %v660_v35, 0.0  ;;  %v878_v42 = vmax.f32 %v788_v36, 0.0 }
 0x161   :  { %v664_v43 = vpop.f32.mrf.mxu0  ;;  %v792_v44 = vpop.f32.mrf.mxu1 }
 0x162   :  { %v1478_v45 = vpack.c.bf16 %v846_v41, %v845_v39  ;;  %v1558_v46 = vpack.c.bf16 %v878_v42, %v877_v40  ;;  %v665_v49 = vadd.f32 %v2052_v17, %v664_v43  ;;  %v793_v50 = vadd.f32 %v2052_v17, %v792_v44 }
 0x163   :  { %v666_v47 = vpop.f32.mrf.mxu0  ;;  %v794_v48 = vpop.f32.mrf.mxu1 }
 0x164   :  { %1590 = vst [vmem:[%s2217_s3 + $0x58] sm:$0xff] %v1478_v45   ;;  %1606 = vst [vmem:[%s2217_s3 + $0xd8] sm:$0xff] %v1558_v46   ;;  %v847_v57 = vmax.f32 %v665_v49, 0.0  ;;  %v879_v58 = vmax.f32 %v793_v50, 0.0 }
 0x165   :  { %v667_v51 = vpop.f32.mrf.mxu0  ;;  %v795_v52 = vpop.f32.mrf.mxu1 }
 0x166   :  { %v668_v53 = vadd.f32 %v2052_v17, %v667_v51  ;;  %v796_v54 = vadd.f32 %v2052_v17, %v795_v52 }
 0x167   :  { %v669_v55 = vpop.f32.mrf.mxu0  ;;  %v797_v56 = vpop.f32.mrf.mxu1 }
 0x168   :  { %v848_v59 = vmax.f32 %v668_v53, 0.0  ;;  %v880_v60 = vmax.f32 %v796_v54, 0.0 }
 0x169   :  { %v672_v61 = vpop.f32.mrf.mxu0  ;;  %v800_v62 = vpop.f32.mrf.mxu1 }
 0x16a   :  { %v1483_v63 = vpack.c.bf16 %v848_v59, %v847_v57  ;;  %v1563_v0 = vpack.c.bf16 %v880_v60, %v879_v58  ;;  %v673_v3 = vadd.f32 %v2052_v17, %v672_v61  ;;  %v801_v4 = vadd.f32 %v2052_v17, %v800_v62 }
 0x16b   :  { %v674_v1 = vpop.f32.mrf.mxu0  ;;  %v802_v2 = vpop.f32.mrf.mxu1 }
 0x16c   :  { %1591 = vst [vmem:[%s2217_s3 + $0x60] sm:$0xff] %v1483_v63   ;;  %1607 = vst [vmem:[%s2217_s3 + $0xe0] sm:$0xff] %v1563_v0   ;;  %v849_v11 = vmax.f32 %v673_v3, 0.0  ;;  %v881_v12 = vmax.f32 %v801_v4, 0.0 }
 0x16d   :  { %v675_v5 = vpop.f32.mrf.mxu0  ;;  %v803_v6 = vpop.f32.mrf.mxu1 }
 0x16e   :  { %v676_v7 = vadd.f32 %v2052_v17, %v675_v5  ;;  %v804_v8 = vadd.f32 %v2052_v17, %v803_v6 }
 0x16f   :  { %v677_v9 = vpop.f32.mrf.mxu0  ;;  %v805_v10 = vpop.f32.mrf.mxu1 }
 0x170   :  { %v850_v13 = vmax.f32 %v676_v7, 0.0  ;;  %v882_v14 = vmax.f32 %v804_v8, 0.0 }
 0x171   :  { %v680_v15 = vpop.f32.mrf.mxu0  ;;  %v808_v16 = vpop.f32.mrf.mxu1 }
 0x172   :  { %v1488_v18 = vpack.c.bf16 %v850_v13, %v849_v11  ;;  %v1568_v19 = vpack.c.bf16 %v882_v14, %v881_v12  ;;  %v681_v22 = vadd.f32 %v2052_v17, %v680_v15  ;;  %v809_v23 = vadd.f32 %v2052_v17, %v808_v16 }
 0x173   :  { %v682_v20 = vpop.f32.mrf.mxu0  ;;  %v810_v21 = vpop.f32.mrf.mxu1 }
 0x174   :  { %1592 = vst [vmem:[%s2217_s3 + $0x68] sm:$0xff] %v1488_v18   ;;  %1608 = vst [vmem:[%s2217_s3 + $0xe8] sm:$0xff] %v1568_v19   ;;  %v851_v30 = vmax.f32 %v681_v22, 0.0  ;;  %v883_v31 = vmax.f32 %v809_v23, 0.0 }
 0x175   :  { %v683_v24 = vpop.f32.mrf.mxu0  ;;  %v811_v25 = vpop.f32.mrf.mxu1 }
 0x176   :  { %v684_v26 = vadd.f32 %v2052_v17, %v683_v24  ;;  %v812_v27 = vadd.f32 %v2052_v17, %v811_v25 }
 0x177   :  { %v685_v28 = vpop.f32.mrf.mxu0  ;;  %v813_v29 = vpop.f32.mrf.mxu1 }
 0x178   :  { %v852_v32 = vmax.f32 %v684_v26, 0.0  ;;  %v884_v33 = vmax.f32 %v812_v27, 0.0 }
 0x179   :  { %v688_v34 = vpop.f32.mrf.mxu0  ;;  %v816_v35 = vpop.f32.mrf.mxu1 }
 0x17a   :  { %v1493_v36 = vpack.c.bf16 %v852_v32, %v851_v30  ;;  %v1573_v37 = vpack.c.bf16 %v884_v33, %v883_v31  ;;  %v689_v40 = vadd.f32 %v2052_v17, %v688_v34  ;;  %v817_v41 = vadd.f32 %v2052_v17, %v816_v35 }
 0x17b   :  { %v690_v38 = vpop.f32.mrf.mxu0  ;;  %v818_v39 = vpop.f32.mrf.mxu1 }
 0x17c   :  { %1593 = vst [vmem:[%s2217_s3 + $0x70] sm:$0xff] %v1493_v36   ;;  %1609 = vst [vmem:[%s2217_s3 + $0xf0] sm:$0xff] %v1573_v37   ;;  %v853_v48 = vmax.f32 %v689_v40, 0.0  ;;  %v885_v49 = vmax.f32 %v817_v41, 0.0 }
 0x17d   :  { %v691_v42 = vpop.f32.mrf.mxu0  ;;  %v819_v43 = vpop.f32.mrf.mxu1 }
 0x17e   :  { %v692_v44 = vadd.f32 %v2052_v17, %v691_v42  ;;  %v820_v45 = vadd.f32 %v2052_v17, %v819_v43 }
 0x17f   :  { %v693_v46 = vpop.f32.mrf.mxu0  ;;  %v821_v47 = vpop.f32.mrf.mxu1 }
 0x180   :  { %v854_v50 = vmax.f32 %v692_v44, 0.0  ;;  %v886_v51 = vmax.f32 %v820_v45, 0.0 }
 0x182   :  { %v1498_v52 = vpack.c.bf16 %v854_v50, %v853_v48  ;;  %v1578_v53 = vpack.c.bf16 %v886_v51, %v885_v49 }
 0x184   :  { %1594 = vst [vmem:[%s2217_s3 + $0x78] sm:$0xff] %v1498_v52   ;;  %1610 = vst [vmem:[%s2217_s3 + $0xf8] sm:$0xff] %v1578_v53  }

// kernel: backbone_forward.20
= control target key start
LH: loop header
LB: loop body
LE: loop exit
PB: predicated region body
PF: predicated region fallthrough
CT: control target
= control target key end

     0   :  { %v521_v1 = vmov 0   ;;  %v49_v25 = vlaneseq  ;;  %s709_s1 = inlined_call_operand.vmem [shape: bf16[128,256], index: 1, kind: input, shape index: {}]   ;;  %s710_s0 = inlined_call_operand.vmem [shape: bf16[128,128], index: 0, kind: input, shape index: {}]   ;;  %s711_s2 = inlined_call_operand.vmem [shape: f32[1,256], index: 2, kind: input, shape index: {}]   ;;  %s712_s3 = inlined_call_operand.vmem [shape: bf16[128,256], index: 3, kind: output, shape index: {}]  }
   0x1   :  { %v489_v0 = vld [vmem:[%s709_s1 + $0x74] ss:$8 sps:$4 sm:$0xff]   ;;  %219 = vmatprep.mubr.bf16.mxu0 %v521_v1  ;;  %259 = vmatprep.mubr.bf16.mxu1 %v521_v1  ;;  %v491_v2 = vld [vmem:[%s709_s1 + $0x70] ss:$8 sps:$4 sm:$0xff]   ;;  %v492_v3 = vld [vmem:[%s709_s1 + $0x64] ss:$8 sps:$4 sm:$0xff]  }
   0x2   :  { %187 = vmatprep.subr.bf16.mxu0 %v489_v0  ;;  %472 = vmatprep.subr.bf16.mxu1 %v489_v0  ;;  %v494_v4 = vld [vmem:[%s709_s1 + $0x60] ss:$8 sps:$4 sm:$0xff]   ;;  %v495_v5 = vld [vmem:[%s709_s1 + $0x54] ss:$8 sps:$4 sm:$0xff]   ;;  %v497_v6 = vld [vmem:[%s709_s1 + $0x50] ss:$8 sps:$4 sm:$0xff]  }
   0x3   :  { %188 = vmatpush1.bf16.msra.mxu0 %v491_v2  ;;  %480 = vmatpush1.bf16.msra.mxu1 %v491_v2  ;;  %v498_v7 = vld [vmem:[%s709_s1 + $0x44] ss:$8 sps:$4 sm:$0xff]   ;;  %v500_v8 = vld [vmem:[%s709_s1 + $0x40] ss:$8 sps:$4 sm:$0xff]   ;;  %v501_v9 = vld [vmem:[%s709_s1 + $0x34] ss:$8 sps:$4 sm:$0xff]  }
   0x4   :  { %189 = vmatprep.subr.bf16.mxu0 %v492_v3  ;;  %473 = vmatprep.subr.bf16.mxu1 %v492_v3  ;;  %v503_v10 = vld [vmem:[%s709_s1 + $0x30] ss:$8 sps:$4 sm:$0xff]   ;;  %v504_v11 = vld [vmem:[%s709_s1 + $0x24] ss:$8 sps:$4 sm:$0xff]   ;;  %v506_v12 = vld [vmem:[%s709_s1 + $0x20] ss:$8 sps:$4 sm:$0xff]  }
   0x5   :  { %v507_v13 = vld [vmem:[%s709_s1 + $0x14] ss:$8 sps:$4 sm:$0xff]   ;;  %v509_v14 = vld [vmem:[%s709_s1 + $0x10] ss:$8 sps:$4 sm:$0xff]   ;;  %v510_v15 = vld [vmem:[%s709_s1 + $0x4] ss:$8 sps:$4 sm:$0xff]  }
   0x6   :  { %v512_v16 = vld [vmem:[%s709_s1] ss:$8 sps:$4 sm:$0xff]   ;;  %v517_v21 = vld [vmem:[%s710_s0 + $0x10] sm:$0xff]   ;;  %v519_v23 = vld [vmem:[%s710_s0 + $0x18] sm:$0xff]   ;;  %v50_v26 = vshrl.u32 %v49_v25, 7 }
   0x7   :  { %190 = vmatpush1.bf16.msra.mxu0 %v494_v4  ;;  %481 = vmatpush1.bf16.msra.mxu1 %v494_v4  ;;  %v513_v17 = vld [vmem:[%s710_s0] sm:$0xff]   ;;  %v515_v19 = vld [vmem:[%s710_s0 + $0x8] sm:$0xff]   ;;  %v518_v22 = vld [vmem:[%s710_s0 + $0x30] sm:$0xff]  }
   0x8   :  { %191 = vmatprep.subr.bf16.mxu0 %v495_v5  ;;  %474 = vmatprep.subr.bf16.mxu1 %v495_v5  ;;  %v514_v18 = vld [vmem:[%s710_s0 + $0x20] sm:$0xff]   ;;  %v516_v20 = vld [vmem:[%s710_s0 + $0x28] sm:$0xff]   ;;  %v520_v24 = vld [vmem:[%s710_s0 + $0x38] sm:$0xff]   ;;  %v51_v27 = vsub.s32 0, %v50_v26  ;;  %v55_v28 = vsub.s32 1, %v50_v26 }
   0x9   :  { %v47_v29 = vld [vmem:[%s711_s2] sm:$0x3] }
   0xa   :  { %v625_v30 = vrot.slane %v47_v29, %v51_v27  ;;  %v627_v31 = vrot.slane %v47_v29, %v55_v28 }
   0xb   :  { %192 = vmatpush1.bf16.msra.mxu0 %v497_v6  ;;  %482 = vmatpush1.bf16.msra.mxu1 %v497_v6 }
   0xc   :  { %193 = vmatprep.subr.bf16.mxu0 %v498_v7  ;;  %475 = vmatprep.subr.bf16.mxu1 %v498_v7 }
   0xf   :  { %194 = vmatpush1.bf16.msra.mxu0 %v500_v8  ;;  %483 = vmatpush1.bf16.msra.mxu1 %v500_v8 }
  0x10   :  { %195 = vmatprep.subr.bf16.mxu0 %v501_v9  ;;  %476 = vmatprep.subr.bf16.mxu1 %v501_v9 }
  0x13   :  { %196 = vmatpush1.bf16.msra.mxu0 %v503_v10  ;;  %484 = vmatpush1.bf16.msra.mxu1 %v503_v10 }
  0x14   :  { %197 = vmatprep.subr.bf16.mxu0 %v504_v11  ;;  %477 = vmatprep.subr.bf16.mxu1 %v504_v11 }
  0x17   :  { %198 = vmatpush1.bf16.msra.mxu0 %v506_v12  ;;  %485 = vmatpush1.bf16.msra.mxu1 %v506_v12 }
  0x18   :  { %199 = vmatprep.subr.bf16.mxu0 %v507_v13  ;;  %478 = vmatprep.subr.bf16.mxu1 %v507_v13 }
  0x1b   :  { %200 = vmatpush1.bf16.msra.mxu0 %v509_v14  ;;  %486 = vmatpush1.bf16.msra.mxu1 %v509_v14 }
  0x1c   :  { %201 = vmatprep.subr.bf16.mxu0 %v510_v15  ;;  %479 = vmatprep.subr.bf16.mxu1 %v510_v15 }
  0x1f   :  { %202 = vmatpush1.bf16.msra.mxu0 %v512_v16  ;;  %487 = vmatpush1.bf16.msra.mxu1 %v512_v16 }
  0x22   :  { %220 = vmatmul.mubr.bf16.vlgmr.msra.gmra.mxu0 %v513_v17  ;;  %260 = vmatmul.mubr.bf16.vlgmr.msra.gmra.mxu1 %v514_v18 }
  0x23   :  { %229 = vmatprep.mubr.bf16.mxu0 %v521_v1  ;;  %269 = vmatprep.mubr.bf16.mxu1 %v521_v1 }
  0x2a   :  { %230 = vmatmul.mubr.bf16.gmra.mxu0 %v515_v19  ;;  %270 = vmatmul.mubr.bf16.gmra.mxu1 %v516_v20 }
  0x2b   :  { %239 = vmatprep.mubr.bf16.mxu0 %v521_v1  ;;  %279 = vmatprep.mubr.bf16.mxu1 %v521_v1 }
  0x32   :  { %240 = vmatmul.mubr.bf16.gmra.mxu0 %v517_v21  ;;  %280 = vmatmul.mubr.bf16.gmra.mxu1 %v518_v22 }
  0x33   :  { %249 = vmatprep.mubr.bf16.mxu0 %v521_v1  ;;  %289 = vmatprep.mubr.bf16.mxu1 %v521_v1 }
  0x3a   :  { %250 = vmatmul.mubr.bf16.gmra.mxu0 %v519_v23  ;;  %290 = vmatmul.mubr.bf16.gmra.mxu1 %v520_v24 }
  0xe2   :  { %v221_v32 = vpop.f32.mrf.mxu0  ;;  %v261_v33 = vpop.f32.mrf.mxu1 }
  0xe3   :  { %v222_v36 = vadd.f32 %v221_v32, %v625_v30  ;;  %v262_v37 = vadd.f32 %v261_v33, %v625_v30 }
  0xe4   :  { %v223_v34 = vpop.f32.mrf.mxu0  ;;  %v263_v35 = vpop.f32.mrf.mxu1 }
  0xe5   :  { %v224_v38 = vadd.f32 %v223_v34, %v627_v31  ;;  %v264_v39 = vadd.f32 %v263_v35, %v627_v31 }
  0xe6   :  { %v225_v40 = vpop.f32.mrf.mxu0  ;;  %v265_v41 = vpop.f32.mrf.mxu1 }
  0xe7   :  { %v456_v42 = vpack.c.bf16 %v224_v38, %v222_v36  ;;  %v464_v43 = vpack.c.bf16 %v264_v39, %v262_v37  ;;  %v226_v46 = vadd.f32 %v225_v40, %v625_v30  ;;  %v266_v47 = vadd.f32 %v265_v41, %v625_v30 }
  0xe8   :  { %v227_v44 = vpop.f32.mrf.mxu0  ;;  %v267_v45 = vpop.f32.mrf.mxu1 }
  0xe9   :  { %396 = vst [vmem:[%s712_s3] sm:$0xff] %v456_v42  ;;  %404 = vst [vmem:[%s712_s3 + $0x40] sm:$0xff] %v464_v43  ;;  %v228_v48 = vadd.f32 %v227_v44, %v627_v31  ;;  %v268_v49 = vadd.f32 %v267_v45, %v627_v31 }
  0xea   :  { %v231_v50 = vpop.f32.mrf.mxu0  ;;  %v271_v51 = vpop.f32.mrf.mxu1 }
  0xeb   :  { %v457_v52 = vpack.c.bf16 %v228_v48, %v226_v46  ;;  %v465_v53 = vpack.c.bf16 %v268_v49, %v266_v47  ;;  %v232_v56 = vadd.f32 %v231_v50, %v625_v30  ;;  %v272_v57 = vadd.f32 %v271_v51, %v625_v30 }
  0xec   :  { %v233_v54 = vpop.f32.mrf.mxu0  ;;  %v273_v55 = vpop.f32.mrf.mxu1 }
  0xed   :  { %397 = vst [vmem:[%s712_s3 + $0x8] sm:$0xff] %v457_v52  ;;  %405 = vst [vmem:[%s712_s3 + $0x48] sm:$0xff] %v465_v53  ;;  %v234_v58 = vadd.f32 %v233_v54, %v627_v31  ;;  %v274_v59 = vadd.f32 %v273_v55, %v627_v31 }
  0xee   :  { %v235_v60 = vpop.f32.mrf.mxu0  ;;  %v275_v61 = vpop.f32.mrf.mxu1 }
  0xef   :  { %v458_v62 = vpack.c.bf16 %v234_v58, %v232_v56  ;;  %v466_v63 = vpack.c.bf16 %v274_v59, %v272_v57  ;;  %v236_v2 = vadd.f32 %v235_v60, %v625_v30  ;;  %v276_v3 = vadd.f32 %v275_v61, %v625_v30 }
  0xf0   :  { %v237_v0 = vpop.f32.mrf.mxu0  ;;  %v277_v1 = vpop.f32.mrf.mxu1 }
  0xf1   :  { %398 = vst [vmem:[%s712_s3 + $0x10] sm:$0xff] %v458_v62  ;;  %406 = vst [vmem:[%s712_s3 + $0x50] sm:$0xff] %v466_v63  ;;  %v238_v4 = vadd.f32 %v237_v0, %v627_v31  ;;  %v278_v5 = vadd.f32 %v277_v1, %v627_v31 }
  0xf2   :  { %v241_v6 = vpop.f32.mrf.mxu0  ;;  %v281_v7 = vpop.f32.mrf.mxu1 }
  0xf3   :  { %v459_v8 = vpack.c.bf16 %v238_v4, %v236_v2  ;;  %v467_v9 = vpack.c.bf16 %v278_v5, %v276_v3  ;;  %v242_v12 = vadd.f32 %v241_v6, %v625_v30  ;;  %v282_v13 = vadd.f32 %v281_v7, %v625_v30 }
  0xf4   :  { %v243_v10 = vpop.f32.mrf.mxu0  ;;  %v283_v11 = vpop.f32.mrf.mxu1 }
  0xf5   :  { %399 = vst [vmem:[%s712_s3 + $0x18] sm:$0xff] %v459_v8  ;;  %407 = vst [vmem:[%s712_s3 + $0x58] sm:$0xff] %v467_v9  ;;  %v244_v14 = vadd.f32 %v243_v10, %v627_v31  ;;  %v284_v15 = vadd.f32 %v283_v11, %v627_v31 }
  0xf6   :  { %v245_v16 = vpop.f32.mrf.mxu0  ;;  %v285_v17 = vpop.f32.mrf.mxu1 }
  0xf7   :  { %v460_v18 = vpack.c.bf16 %v244_v14, %v242_v12  ;;  %v468_v19 = vpack.c.bf16 %v284_v15, %v282_v13  ;;  %v246_v22 = vadd.f32 %v245_v16, %v625_v30  ;;  %v286_v23 = vadd.f32 %v285_v17, %v625_v30 }
  0xf8   :  { %v247_v20 = vpop.f32.mrf.mxu0  ;;  %v287_v21 = vpop.f32.mrf.mxu1 }
  0xf9   :  { %400 = vst [vmem:[%s712_s3 + $0x20] sm:$0xff] %v460_v18  ;;  %408 = vst [vmem:[%s712_s3 + $0x60] sm:$0xff] %v468_v19  ;;  %v248_v24 = vadd.f32 %v247_v20, %v627_v31  ;;  %v288_v25 = vadd.f32 %v287_v21, %v627_v31 }
  0xfa   :  { %v251_v26 = vpop.f32.mrf.mxu0  ;;  %v291_v27 = vpop.f32.mrf.mxu1 }
  0xfb   :  { %v461_v28 = vpack.c.bf16 %v248_v24, %v246_v22  ;;  %v469_v29 = vpack.c.bf16 %v288_v25, %v286_v23  ;;  %v252_v34 = vadd.f32 %v251_v26, %v625_v30  ;;  %v292_v35 = vadd.f32 %v291_v27, %v625_v30 }
  0xfc   :  { %v253_v32 = vpop.f32.mrf.mxu0  ;;  %v293_v33 = vpop.f32.mrf.mxu1 }
  0xfd   :  { %401 = vst [vmem:[%s712_s3 + $0x28] sm:$0xff] %v461_v28  ;;  %409 = vst [vmem:[%s712_s3 + $0x68] sm:$0xff] %v469_v29  ;;  %v254_v36 = vadd.f32 %v253_v32, %v627_v31  ;;  %v294_v37 = vadd.f32 %v293_v33, %v627_v31 }
  0xfe   :  { %v255_v38 = vpop.f32.mrf.mxu0  ;;  %v295_v39 = vpop.f32.mrf.mxu1 }
  0xff   :  { %v462_v40 = vpack.c.bf16 %v254_v36, %v252_v34  ;;  %v470_v41 = vpack.c.bf16 %v294_v37, %v292_v35  ;;  %v256_v44 = vadd.f32 %v255_v38, %v625_v30  ;;  %v296_v45 = vadd.f32 %v295_v39, %v625_v30 }
 0x100   :  { %v257_v42 = vpop.f32.mrf.mxu0  ;;  %v297_v43 = vpop.f32.mrf.mxu1 }
 0x101   :  { %402 = vst [vmem:[%s712_s3 + $0x30] sm:$0xff] %v462_v40  ;;  %410 = vst [vmem:[%s712_s3 + $0x70] sm:$0xff] %v470_v41  ;;  %v258_v46 = vadd.f32 %v257_v42, %v627_v31  ;;  %v298_v47 = vadd.f32 %v297_v43, %v627_v31 }
 0x103   :  { %v463_v48 = vpack.c.bf16 %v258_v46, %v256_v44  ;;  %v471_v49 = vpack.c.bf16 %v298_v47, %v296_v45 }
 0x105   :  { %403 = vst [vmem:[%s712_s3 + $0x38] sm:$0xff] %v463_v48  ;;  %411 = vst [vmem:[%s712_s3 + $0x78] sm:$0xff] %v471_v49 }

// kernel: backbone_forward.24
= control target key start
LH: loop header
LB: loop body
LE: loop exit
PB: predicated region body
PF: predicated region fallthrough
CT: control target
= control target key end

     0   :  { %s1047_s1 = inlined_call_operand.vmem [shape: bf16[256,512], index: 1, kind: input, shape index: {}]   ;;  %s1048_s0 = inlined_call_operand.vmem [shape: bf16[32,256], index: 0, kind: input, shape index: {}]   ;;  %s1049_s2 = inlined_call_operand.vmem [shape: f32[1,512], index: 2, kind: input, shape index: {}]   ;;  %s1050_s3 = inlined_call_operand.vmem [shape: bf16[32,512], index: 3, kind: output, shape index: {}]  }
   0x1   :  { %v694_v0 = vld [vmem:[%s1047_s1 + $0xe4] ss:$16 sps:$4 sm:$0xff]   ;;  %v696_v1 = vld [vmem:[%s1047_s1 + $0xec] ss:$16 sps:$4 sm:$0xff]   ;;  %v698_v2 = vld [vmem:[%s1047_s1 + $0xe0] ss:$16 sps:$4 sm:$0xff]  }
   0x2   :  { %444 = vmatprep.subr.bf16.mxu0 %v694_v0  ;;  %v699_v3 = vld [vmem:[%s1047_s1 + $0xe8] ss:$16 sps:$4 sm:$0xff]   ;;  %497 = vmatprep.subr.bf16.mxu1 %v696_v1  ;;  %v700_v4 = vld [vmem:[%s1047_s1 + $0xc4] ss:$16 sps:$4 sm:$0xff]   ;;  %v702_v5 = vld [vmem:[%s1047_s1 + $0xcc] ss:$16 sps:$4 sm:$0xff]  }
   0x3   :  { %445 = vmatpush1.bf16.msra.mxu0 %v698_v2  ;;  %498 = vmatpush1.bf16.msra.mxu1 %v699_v3  ;;  %v704_v6 = vld [vmem:[%s1047_s1 + $0xc0] ss:$16 sps:$4 sm:$0xff]   ;;  %v705_v7 = vld [vmem:[%s1047_s1 + $0xc8] ss:$16 sps:$4 sm:$0xff]   ;;  %v706_v8 = vld [vmem:[%s1047_s1 + $0xa4] ss:$16 sps:$4 sm:$0xff]  }
   0x4   :  { %446 = vmatprep.subr.bf16.mxu0 %v700_v4  ;;  %499 = vmatprep.subr.bf16.mxu1 %v702_v5  ;;  %v708_v9 = vld [vmem:[%s1047_s1 + $0xac] ss:$16 sps:$4 sm:$0xff]   ;;  %v710_v10 = vld [vmem:[%s1047_s1 + $0xa0] ss:$16 sps:$4 sm:$0xff]   ;;  %v711_v11 = vld [vmem:[%s1047_s1 + $0xa8] ss:$16 sps:$4 sm:$0xff]   ;;  %v84_v4 = vlaneseq }
   0x5   :  { %v712_v12 = vld [vmem:[%s1047_s1 + $0x84] ss:$16 sps:$4 sm:$0xff]   ;;  %v714_v13 = vld [vmem:[%s1047_s1 + $0x8c] ss:$16 sps:$4 sm:$0xff]   ;;  %v716_v14 = vld [vmem:[%s1047_s1 + $0x80] ss:$16 sps:$4 sm:$0xff]  }
   0x6   :  { %v717_v15 = vld [vmem:[%s1047_s1 + $0x88] ss:$16 sps:$4 sm:$0xff]   ;;  %v718_v16 = vld [vmem:[%s1047_s1 + $0x64] ss:$16 sps:$4 sm:$0xff]   ;;  %v720_v17 = vld [vmem:[%s1047_s1 + $0x6c] ss:$16 sps:$4 sm:$0xff]  }
   0x7   :  { %447 = vmatpush1.bf16.msra.mxu0 %v704_v6  ;;  %500 = vmatpush1.bf16.msra.mxu1 %v705_v7  ;;  %v722_v18 = vld [vmem:[%s1047_s1 + $0x60] ss:$16 sps:$4 sm:$0xff]   ;;  %v723_v19 = vld [vmem:[%s1047_s1 + $0x68] ss:$16 sps:$4 sm:$0xff]   ;;  %v724_v20 = vld [vmem:[%s1047_s1 + $0x44] ss:$16 sps:$4 sm:$0xff]  }
   0x8   :  { %448 = vmatprep.subr.bf16.mxu0 %v706_v8  ;;  %501 = vmatprep.subr.bf16.mxu1 %v708_v9  ;;  %v726_v21 = vld [vmem:[%s1047_s1 + $0x4c] ss:$16 sps:$4 sm:$0xff]   ;;  %v728_v22 = vld [vmem:[%s1047_s1 + $0x40] ss:$16 sps:$4 sm:$0xff]   ;;  %v729_v23 = vld [vmem:[%s1047_s1 + $0x48] ss:$16 sps:$4 sm:$0xff]  }
   0x9   :  { %v730_v24 = vld [vmem:[%s1047_s1 + $0x24] ss:$16 sps:$4 sm:$0xff]   ;;  %v732_v25 = vld [vmem:[%s1047_s1 + $0x2c] ss:$16 sps:$4 sm:$0xff]   ;;  %v734_v26 = vld [vmem:[%s1047_s1 + $0x20] ss:$16 sps:$4 sm:$0xff]  }
   0xa   :  { %v735_v27 = vld [vmem:[%s1047_s1 + $0x28] ss:$16 sps:$4 sm:$0xff]   ;;  %v736_v28 = vld [vmem:[%s1047_s1 + $0x4] ss:$16 sps:$4 sm:$0xff]   ;;  %v738_v29 = vld [vmem:[%s1047_s1 + $0xc] ss:$16 sps:$4 sm:$0xff]  }
   0xb   :  { %449 = vmatpush1.bf16.msra.mxu0 %v710_v10  ;;  %502 = vmatpush1.bf16.msra.mxu1 %v711_v11  ;;  %v740_v30 = vld [vmem:[%s1047_s1] ss:$16 sps:$4 sm:$0xff]   ;;  %v741_v31 = vld [vmem:[%s1047_s1 + $0x8] ss:$16 sps:$4 sm:$0xff]   ;;  %v742_v32 = vld [vmem:[%s1047_s1 + $0x1e4] ss:$16 sps:$4 sm:$0xff]  }
   0xc   :  { %450 = vmatprep.subr.bf16.mxu0 %v712_v12  ;;  %503 = vmatprep.subr.bf16.mxu1 %v714_v13  ;;  %v744_v33 = vld [vmem:[%s1047_s1 + $0x1ec] ss:$16 sps:$4 sm:$0xff]   ;;  %v746_v34 = vld [vmem:[%s1047_s1 + $0x1e0] ss:$16 sps:$4 sm:$0xff]   ;;  %v747_v35 = vld [vmem:[%s1047_s1 + $0x1e8] ss:$16 sps:$4 sm:$0xff]  }
   0xd   :  { %v748_v36 = vld [vmem:[%s1047_s1 + $0x1c4] ss:$16 sps:$4 sm:$0xff]   ;;  %v750_v37 = vld [vmem:[%s1047_s1 + $0x1cc] ss:$16 sps:$4 sm:$0xff]   ;;  %v752_v38 = vld [vmem:[%s1047_s1 + $0x1c0] ss:$16 sps:$4 sm:$0xff]  }
   0xe   :  { %v753_v39 = vld [vmem:[%s1047_s1 + $0x1c8] ss:$16 sps:$4 sm:$0xff]   ;;  %v754_v40 = vld [vmem:[%s1047_s1 + $0x1a4] ss:$16 sps:$4 sm:$0xff]   ;;  %v756_v41 = vld [vmem:[%s1047_s1 + $0x1ac] ss:$16 sps:$4 sm:$0xff]  }
   0xf   :  { %451 = vmatpush1.bf16.msra.mxu0 %v716_v14  ;;  %504 = vmatpush1.bf16.msra.mxu1 %v717_v15  ;;  %v758_v42 = vld [vmem:[%s1047_s1 + $0x1a0] ss:$16 sps:$4 sm:$0xff]   ;;  %v759_v43 = vld [vmem:[%s1047_s1 + $0x1a8] ss:$16 sps:$4 sm:$0xff]   ;;  %v760_v44 = vld [vmem:[%s1047_s1 + $0x184] ss:$16 sps:$4 sm:$0xff]  }
  0x10   :  { %452 = vmatprep.subr.bf16.mxu0 %v718_v16  ;;  %505 = vmatprep.subr.bf16.mxu1 %v720_v17  ;;  %v762_v45 = vld [vmem:[%s1047_s1 + $0x18c] ss:$16 sps:$4 sm:$0xff]   ;;  %v764_v46 = vld [vmem:[%s1047_s1 + $0x180] ss:$16 sps:$4 sm:$0xff]   ;;  %v765_v48 = vld [vmem:[%s1047_s1 + $0x188] ss:$16 sps:$4 sm:$0xff]  }
  0x11   :  { %v792_v47 = vld [vmem:[%s1048_s0 + $0x4] ss:$8 sps:$4 sm:$0xff]   ;;  %v770_v51 = vld [vmem:[%s1047_s1 + $0x160] ss:$16 sps:$4 sm:$0xff]   ;;  %v771_v52 = vld [vmem:[%s1047_s1 + $0x168] ss:$16 sps:$4 sm:$0xff]  }
  0x12   :  { %v766_v49 = vld [vmem:[%s1047_s1 + $0x164] ss:$16 sps:$4 sm:$0xff]   ;;  %v768_v50 = vld [vmem:[%s1047_s1 + $0x16c] ss:$16 sps:$4 sm:$0xff]   ;;  %476 = vmatprep.mubr.bf16.mxu0 %v792_v47  ;;  %529 = vmatprep.mubr.bf16.mxu1 %v792_v47  ;;  %v776_v55 = vld [vmem:[%s1047_s1 + $0x140] ss:$16 sps:$4 sm:$0xff]  }
  0x13   :  { %453 = vmatpush1.bf16.msra.mxu0 %v722_v18  ;;  %506 = vmatpush1.bf16.msra.mxu1 %v723_v19  ;;  %v772_v53 = vld [vmem:[%s1047_s1 + $0x144] ss:$16 sps:$4 sm:$0xff]   ;;  %v774_v54 = vld [vmem:[%s1047_s1 + $0x14c] ss:$16 sps:$4 sm:$0xff]   ;;  %v777_v56 = vld [vmem:[%s1047_s1 + $0x148] ss:$16 sps:$4 sm:$0xff]  }
  0x14   :  { %454 = vmatprep.subr.bf16.mxu0 %v724_v20  ;;  %507 = vmatprep.subr.bf16.mxu1 %v726_v21  ;;  %v778_v57 = vld [vmem:[%s1047_s1 + $0x124] ss:$16 sps:$4 sm:$0xff]   ;;  %v780_v58 = vld [vmem:[%s1047_s1 + $0x12c] ss:$16 sps:$4 sm:$0xff]   ;;  %v782_v59 = vld [vmem:[%s1047_s1 + $0x120] ss:$16 sps:$4 sm:$0xff]  }
  0x15   :  { %v783_v60 = vld [vmem:[%s1047_s1 + $0x128] ss:$16 sps:$4 sm:$0xff]   ;;  %v784_v61 = vld [vmem:[%s1047_s1 + $0x104] ss:$16 sps:$4 sm:$0xff]   ;;  %v786_v62 = vld [vmem:[%s1047_s1 + $0x10c] ss:$16 sps:$4 sm:$0xff]  }
  0x16   :  { %v788_v63 = vld [vmem:[%s1047_s1 + $0x100] ss:$16 sps:$4 sm:$0xff]   ;;  %v789_v0 = vld [vmem:[%s1047_s1 + $0x108] ss:$16 sps:$4 sm:$0xff]   ;;  %v793_v2 = vld [vmem:[%s1048_s0 + $0x14] ss:$8 sps:$4 sm:$0xff]  }
  0x17   :  { %455 = vmatpush1.bf16.msra.mxu0 %v728_v22  ;;  %508 = vmatpush1.bf16.msra.mxu1 %v729_v23  ;;  %v790_v1 = vld [vmem:[%s1048_s0] ss:$8 sps:$4 sm:$0xff]   ;;  %v795_v3 = vld [vmem:[%s1048_s0 + $0x10] ss:$8 sps:$4 sm:$0xff]   ;;  %v85_v5 = vshrl.u32 %v84_v4, 7 }
  0x18   :  { %456 = vmatprep.subr.bf16.mxu0 %v730_v24  ;;  %509 = vmatprep.subr.bf16.mxu1 %v732_v25  ;;  %v82_v10 = vld [vmem:[%s1049_s2] sm:$0xf] }
  0x19   :  { %v86_v6 = vsub.s32 0, %v85_v5  ;;  %v94_v7 = vsub.s32 2, %v85_v5  ;;  %v90_v8 = vsub.s32 1, %v85_v5  ;;  %v98_v9 = vsub.s32 3, %v85_v5 }
  0x1b   :  { %457 = vmatpush1.bf16.msra.mxu0 %v734_v26  ;;  %510 = vmatpush1.bf16.msra.mxu1 %v735_v27  ;;  %v87_v11 = vrot.slane %v82_v10, %v86_v6  ;;  %v95_v12 = vrot.slane %v82_v10, %v94_v7  ;;  %v91_v13 = vrot.slane %v82_v10, %v90_v8 }
  0x1c   :  { %458 = vmatprep.subr.bf16.mxu0 %v736_v28  ;;  %511 = vmatprep.subr.bf16.mxu1 %v738_v29  ;;  %v99_v14 = vrot.slane %v82_v10, %v98_v9 }
  0x1f   :  { %459 = vmatpush1.bf16.msra.mxu0 %v740_v30  ;;  %512 = vmatpush1.bf16.msra.mxu1 %v741_v31 }
  0x20   :  { %460 = vmatprep.subr.bf16.mxu0 %v742_v32  ;;  %513 = vmatprep.subr.bf16.mxu1 %v744_v33 }
  0x23   :  { %461 = vmatpush2.bf16.msra.mxu0 %v746_v34  ;;  %514 = vmatpush2.bf16.msra.mxu1 %v747_v35 }
  0x24   :  { %462 = vmatprep.subr.bf16.mxu0 %v748_v36  ;;  %515 = vmatprep.subr.bf16.mxu1 %v750_v37 }
  0x27   :  { %463 = vmatpush2.bf16.msra.mxu0 %v752_v38  ;;  %516 = vmatpush2.bf16.msra.mxu1 %v753_v39 }
  0x28   :  { %464 = vmatprep.subr.bf16.mxu0 %v754_v40  ;;  %517 = vmatprep.subr.bf16.mxu1 %v756_v41 }
  0x2b   :  { %465 = vmatpush2.bf16.msra.mxu0 %v758_v42  ;;  %518 = vmatpush2.bf16.msra.mxu1 %v759_v43 }
  0x2c   :  { %466 = vmatprep.subr.bf16.mxu0 %v760_v44  ;;  %519 = vmatprep.subr.bf16.mxu1 %v762_v45 }
  0x2f   :  { %467 = vmatpush2.bf16.msra.mxu0 %v764_v46  ;;  %520 = vmatpush2.bf16.msra.mxu1 %v765_v48 }
  0x30   :  { %468 = vmatprep.subr.bf16.mxu0 %v766_v49  ;;  %521 = vmatprep.subr.bf16.mxu1 %v768_v50 }
  0x33   :  { %469 = vmatpush2.bf16.msra.mxu0 %v770_v51  ;;  %522 = vmatpush2.bf16.msra.mxu1 %v771_v52 }
  0x34   :  { %470 = vmatprep.subr.bf16.mxu0 %v772_v53  ;;  %523 = vmatprep.subr.bf16.mxu1 %v774_v54 }
  0x37   :  { %471 = vmatpush2.bf16.msra.mxu0 %v776_v55  ;;  %524 = vmatpush2.bf16.msra.mxu1 %v777_v56 }
  0x38   :  { %472 = vmatprep.subr.bf16.mxu0 %v778_v57  ;;  %525 = vmatprep.subr.bf16.mxu1 %v780_v58 }
  0x3b   :  { %473 = vmatpush2.bf16.msra.mxu0 %v782_v59  ;;  %526 = vmatpush2.bf16.msra.mxu1 %v783_v60 }
  0x3c   :  { %474 = vmatprep.subr.bf16.mxu0 %v784_v61  ;;  %527 = vmatprep.subr.bf16.mxu1 %v786_v62 }
  0x3f   :  { %475 = vmatpush2.bf16.msra.mxu0 %v788_v63  ;;  %528 = vmatpush2.bf16.msra.mxu1 %v789_v0 }
  0x42   :  { %477 = vmatmul.mubr.bf16.vlgmr.msra.gmra.mxu0 %v790_v1  ;;  %530 = vmatmul.mubr.bf16.vlgmr.msra.gmra.mxu1 %v790_v1 }
  0x43   :  { %486 = vmatprep.mubr.bf16.mxu0 %v793_v2  ;;  %539 = vmatprep.mubr.bf16.mxu1 %v793_v2 }
  0x4a   :  { %487 = vmatmul.mubr.bf16.gmra.mxu0 %v795_v3  ;;  %540 = vmatmul.mubr.bf16.gmra.mxu1 %v795_v3 }
 0x102   :  { %v478_v15 = vpop.f32.mrf.mxu0  ;;  %v531_v16 = vpop.f32.mrf.mxu1 }
 0x103   :  { %v479_v19 = vadd.f32 %v478_v15, %v87_v11  ;;  %v532_v20 = vadd.f32 %v531_v16, %v95_v12 }
 0x104   :  { %v480_v17 = vpop.f32.mrf.mxu0  ;;  %v533_v18 = vpop.f32.mrf.mxu1 }
 0x105   :  { %v481_v21 = vadd.f32 %v480_v17, %v91_v13  ;;  %v534_v22 = vadd.f32 %v533_v18, %v99_v14 }
 0x106   :  { %v482_v23 = vpop.f32.mrf.mxu0  ;;  %v535_v24 = vpop.f32.mrf.mxu1 }
 0x107   :  { %v686_v25 = vpack.c.bf16 %v481_v21, %v479_v19  ;;  %v687_v26 = vpack.c.bf16 %v534_v22, %v532_v20  ;;  %v483_v29 = vadd.f32 %v482_v23, %v87_v11  ;;  %v536_v30 = vadd.f32 %v535_v24, %v95_v12 }
 0x108   :  { %v484_v27 = vpop.f32.mrf.mxu0  ;;  %v537_v28 = vpop.f32.mrf.mxu1 }
 0x109   :  { %598 = vst [vmem:[%s1050_s3] sm:$0xff] %v686_v25  ;;  %599 = vst [vmem:[%s1050_s3 + $0x8] sm:$0xff] %v687_v26  ;;  %v485_v31 = vadd.f32 %v484_v27, %v91_v13  ;;  %v538_v32 = vadd.f32 %v537_v28, %v99_v14 }
 0x10a   :  { %v488_v33 = vpop.f32.mrf.mxu0  ;;  %v541_v34 = vpop.f32.mrf.mxu1 }
 0x10b   :  { %v688_v35 = vpack.c.bf16 %v485_v31, %v483_v29  ;;  %v689_v36 = vpack.c.bf16 %v538_v32, %v536_v30  ;;  %v489_v39 = vadd.f32 %v488_v33, %v87_v11  ;;  %v542_v40 = vadd.f32 %v541_v34, %v95_v12 }
 0x10c   :  { %v490_v37 = vpop.f32.mrf.mxu0  ;;  %v543_v38 = vpop.f32.mrf.mxu1 }
 0x10d   :  { %600 = vst [vmem:[%s1050_s3 + $0x10] sm:$0xff] %v688_v35  ;;  %601 = vst [vmem:[%s1050_s3 + $0x18] sm:$0xff] %v689_v36  ;;  %v491_v41 = vadd.f32 %v490_v37, %v91_v13  ;;  %v544_v42 = vadd.f32 %v543_v38, %v99_v14 }
 0x10e   :  { %v492_v43 = vpop.f32.mrf.mxu0  ;;  %v545_v44 = vpop.f32.mrf.mxu1 }
 0x10f   :  { %v690_v45 = vpack.c.bf16 %v491_v41, %v489_v39  ;;  %v691_v46 = vpack.c.bf16 %v544_v42, %v542_v40  ;;  %v493_v49 = vadd.f32 %v492_v43, %v87_v11  ;;  %v546_v50 = vadd.f32 %v545_v44, %v95_v12 }
 0x110   :  { %v494_v47 = vpop.f32.mrf.mxu0  ;;  %v547_v48 = vpop.f32.mrf.mxu1 }
 0x111   :  { %602 = vst [vmem:[%s1050_s3 + $0x20] sm:$0xff] %v690_v45  ;;  %603 = vst [vmem:[%s1050_s3 + $0x28] sm:$0xff] %v691_v46  ;;  %v495_v51 = vadd.f32 %v494_v47, %v91_v13  ;;  %v548_v52 = vadd.f32 %v547_v48, %v99_v14 }
 0x113   :  { %v692_v53 = vpack.c.bf16 %v495_v51, %v493_v49  ;;  %v693_v54 = vpack.c.bf16 %v548_v52, %v546_v50 }
 0x115   :  { %604 = vst [vmem:[%s1050_s3 + $0x30] sm:$0xff] %v692_v53  ;;  %605 = vst [vmem:[%s1050_s3 + $0x38] sm:$0xff] %v693_v54 }

// kernel: backbone_forward.21
= control target key start
LH: loop header
LB: loop body
LE: loop exit
PB: predicated region body
PF: predicated region fallthrough
CT: control target
= control target key end

     0   :  { %s4302_s1 = inlined_call_operand.vmem [shape: bf16[1152,128], index: 1, kind: input, shape index: {}]   ;;  %s4303_s0 = inlined_call_operand.vmem [shape: bf16[128,1152], index: 0, kind: input, shape index: {}]   ;;  %s4304_s3 = inlined_call_operand.vmem [shape: bf16[128,256], index: 3, kind: input, shape index: {}]   ;;  %s4305_s2 = inlined_call_operand.vmem [shape: f32[1,128], index: 2, kind: input, shape index: {}]   ;;  %s4306_s6 = inlined_call_operand.vmem [shape: bf16[256,128], index: 6, kind: input, shape index: {}]   ;;  %s4307_s4 = inlined_call_operand.vmem [shape: f32[1,256], index: 4, kind: input, shape index: {}]   ;;  %s4308_s5 = inlined_call_operand.vmem [shape: bf16[128,256], index: 5, kind: input, shape index: {}]   ;;  %s4309_s8 = inlined_call_operand.vmem [shape: bf16[128,256], index: 8, kind: output, shape index: {0}]   ;;  %s4310_s7 = inlined_call_operand.vmem [shape: f32[1,128], index: 7, kind: input, shape index: {}]   ;;  %s4311_s9 = inlined_call_operand.vmem [shape: bf16[128,128], index: 9, kind: output, shape index: {1}]  }
   0x1   :  { %v3027_v0 = vld [vmem:[%s4302_s1 + $0x78] sm:$0xff]   ;;  %v3031_v4 = vld [vmem:[%s4302_s1 + $0x70] sm:$0xff]   ;;  %v3035_v8 = vld [vmem:[%s4302_s1 + $0x68] sm:$0xff]  }
   0x2   :  { %v3028_v1 = vld [vmem:[%s4302_s1 + $0x38] sm:$0xff]   ;;  %2642 = vmatprep.subr.bf16.mxu0 %v3027_v0  ;;  %v3032_v5 = vld [vmem:[%s4302_s1 + $0x30] sm:$0xff]   ;;  %v3036_v9 = vld [vmem:[%s4302_s1 + $0x28] sm:$0xff]  }
   0x3   :  { %v3029_v2 = vld [vmem:[%s4302_s1 + $0xf8] sm:$0xff]   ;;  %2643 = vmatpush3.bf16.msra.mxu0 %v3028_v1  ;;  %v3033_v6 = vld [vmem:[%s4302_s1 + $0xf0] sm:$0xff]   ;;  %v3037_v10 = vld [vmem:[%s4302_s1 + $0xe8] sm:$0xff]  }
   0x4   :  { %v3030_v3 = vld [vmem:[%s4302_s1 + $0xb8] sm:$0xff]   ;;  %2706 = vmatprep.subr.bf16.mxu1 %v3029_v2  ;;  %2644 = vmatprep.subr.bf16.mxu0 %v3031_v4  ;;  %v3034_v7 = vld [vmem:[%s4302_s1 + $0xb0] sm:$0xff]   ;;  %v3038_v11 = vld [vmem:[%s4302_s1 + $0xa8] sm:$0xff]  }
   0x5   :  { %2707 = vmatpush3.bf16.msra.mxu1 %v3030_v3  ;;  %v3039_v12 = vld [vmem:[%s4302_s1 + $0x60] sm:$0xff]   ;;  %v3043_v16 = vld [vmem:[%s4302_s1 + $0x58] sm:$0xff]   ;;  %v3047_v20 = vld [vmem:[%s4302_s1 + $0x50] sm:$0xff]  }
   0x6   :  { %2708 = vmatprep.subr.bf16.mxu1 %v3033_v6  ;;  %v3040_v13 = vld [vmem:[%s4302_s1 + $0x20] sm:$0xff]   ;;  %v3044_v17 = vld [vmem:[%s4302_s1 + $0x18] sm:$0xff]   ;;  %v3048_v21 = vld [vmem:[%s4302_s1 + $0x10] sm:$0xff]  }
   0x7   :  { %2645 = vmatpush3.bf16.msra.mxu0 %v3032_v5  ;;  %v3041_v14 = vld [vmem:[%s4302_s1 + $0xe0] sm:$0xff]   ;;  %v3045_v18 = vld [vmem:[%s4302_s1 + $0xd8] sm:$0xff]   ;;  %v3049_v22 = vld [vmem:[%s4302_s1 + $0xd0] sm:$0xff]  }
   0x8   :  { %2646 = vmatprep.subr.bf16.mxu0 %v3035_v8  ;;  %v3042_v15 = vld [vmem:[%s4302_s1 + $0xa0] sm:$0xff]   ;;  %v3046_v19 = vld [vmem:[%s4302_s1 + $0x98] sm:$0xff]   ;;  %v3050_v23 = vld [vmem:[%s4302_s1 + $0x90] sm:$0xff]  }
   0x9   :  { %2709 = vmatpush3.bf16.msra.mxu1 %v3034_v7  ;;  %v3051_v24 = vld [vmem:[%s4302_s1 + $0x48] sm:$0xff]   ;;  %v3055_v28 = vld [vmem:[%s4302_s1 + $0x40] sm:$0xff]   ;;  %v3062_v34 = vld [vmem:[%s4302_s1 + $0x178] sm:$0xff]  }
   0xa   :  { %2710 = vmatprep.subr.bf16.mxu1 %v3037_v10  ;;  %v3052_v25 = vld [vmem:[%s4302_s1 + $0x8] sm:$0xff]   ;;  %v3056_v29 = vld [vmem:[%s4302_s1] sm:$0xff]   ;;  %v3066_v37 = vld [vmem:[%s4302_s1 + $0x138] sm:$0xff]  }
   0xb   :  { %2647 = vmatpush3.bf16.msra.mxu0 %v3036_v9  ;;  %v3053_v26 = vld [vmem:[%s4302_s1 + $0xc8] sm:$0xff]   ;;  %v3057_v30 = vld [vmem:[%s4302_s1 + $0xc0] sm:$0xff]   ;;  %v3070_v40 = vld [vmem:[%s4302_s1 + $0x170] sm:$0xff]  }
   0xc   :  { %2648 = vmatprep.subr.bf16.mxu0 %v3039_v12  ;;  %v3054_v27 = vld [vmem:[%s4302_s1 + $0x88] sm:$0xff]   ;;  %v3058_v31 = vld [vmem:[%s4303_s0] ss:$36 sps:$4 sm:$0xff]   ;;  %v3071_v41 = vld [vmem:[%s4303_s0 + $0x54] ss:$36 sps:$4 sm:$0xff]  }
   0xd   :  { %2711 = vmatpush3.bf16.msra.mxu1 %v3038_v11  ;;  %v3060_v32 = vld [vmem:[%s4303_s0 + $0x4] ss:$36 sps:$4 sm:$0xff]   ;;  %v3065_v36 = vld [vmem:[%s4303_s0 + $0xc] ss:$36 sps:$4 sm:$0xff]   ;;  %v3075_v44 = vld [vmem:[%s4303_s0 + $0x94] ss:$36 sps:$4 sm:$0xff]  }
   0xe   :  { %2712 = vmatprep.subr.bf16.mxu1 %v3041_v14  ;;  %v3061_v33 = vld [vmem:[%s4302_s1 + $0x80] sm:$0xff]   ;;  %1095 = vmatprep.mubr.bf16.mxu0 %v3060_v32  ;;  %v3063_v35 = vld [vmem:[%s4303_s0 + $0x8] ss:$36 sps:$4 sm:$0xff]   ;;  %v3073_v42 = vld [vmem:[%s4302_s1 + $0x130] sm:$0xff]  }
   0xf   :  { %2649 = vmatpush3.bf16.msra.mxu0 %v3040_v13  ;;  %1192 = vmatprep.mubr.bf16.mxu1 %v3065_v36  ;;  %v3067_v38 = vld [vmem:[%s4303_s0 + $0x4c] ss:$36 sps:$4 sm:$0xff]   ;;  %v3079_v46 = vld [vmem:[%s4303_s0 + $0x9c] ss:$36 sps:$4 sm:$0xff]   ;;  %v3087_v53 = vld [vmem:[%s4303_s0 + $0xe4] ss:$36 sps:$4 sm:$0xff]  }
  0x10   :  { %2650 = vmatprep.subr.bf16.mxu0 %v3043_v16  ;;  %v3069_v39 = vld [vmem:[%s4303_s0 + $0x48] ss:$36 sps:$4 sm:$0xff]   ;;  %v3074_v43 = vld [vmem:[%s4303_s0 + $0x50] ss:$36 sps:$4 sm:$0xff]   ;;  %v3083_v49 = vld [vmem:[%s4303_s0 + $0xdc] ss:$36 sps:$4 sm:$0xff]  }
  0x11   :  { %2713 = vmatpush3.bf16.msra.mxu1 %v3042_v15  ;;  %v3078_v45 = vld [vmem:[%s4302_s1 + $0x168] sm:$0xff]   ;;  %v3077_v48 = vld [vmem:[%s4303_s0 + $0x90] ss:$36 sps:$4 sm:$0xff]   ;;  %v3086_v50 = vld [vmem:[%s4302_s1 + $0x160] sm:$0xff]  }
  0x12   :  { %2714 = vmatprep.subr.bf16.mxu1 %v3045_v18  ;;  %v3081_v47 = vld [vmem:[%s4302_s1 + $0x128] sm:$0xff]   ;;  %v3082_v51 = vld [vmem:[%s4303_s0 + $0x98] ss:$36 sps:$4 sm:$0xff]   ;;  %v3089_v52 = vld [vmem:[%s4302_s1 + $0x120] sm:$0xff]  }
  0x13   :  { %2651 = vmatpush3.bf16.msra.mxu0 %v3044_v17  ;;  %v3094_v54 = vld [vmem:[%s4302_s1 + $0x158] sm:$0xff]   ;;  %v3091_v57 = vld [vmem:[%s4303_s0 + $0x124] ss:$36 sps:$4 sm:$0xff]   ;;  %v3101_v61 = vld [vmem:[%s4302_s1 + $0x1f0] sm:$0xff]  }
  0x14   :  { %2652 = vmatprep.subr.bf16.mxu0 %v3047_v20  ;;  %v3085_v55 = vld [vmem:[%s4303_s0 + $0xd8] ss:$36 sps:$4 sm:$0xff]   ;;  %v3090_v58 = vld [vmem:[%s4303_s0 + $0xe0] ss:$36 sps:$4 sm:$0xff]   ;;  %v3095_v62 = vld [vmem:[%s4303_s0 + $0x12c] ss:$36 sps:$4 sm:$0xff]  }
  0x15   :  { %2715 = vmatpush3.bf16.msra.mxu1 %v3046_v19  ;;  %v3097_v56 = vld [vmem:[%s4302_s1 + $0x118] sm:$0xff]   ;;  %v3104_v63 = vld [vmem:[%s4302_s1 + $0x1b0] sm:$0xff]   ;;  %v3093_v1 = vld [vmem:[%s4303_s0 + $0x120] ss:$36 sps:$4 sm:$0xff]  }
  0x16   :  { %2716 = vmatprep.subr.bf16.mxu1 %v3049_v22  ;;  %v3099_v59 = vld [vmem:[%s4302_s1 + $0x1f8] sm:$0xff]   ;;  %v3106_v0 = vld [vmem:[%s4302_s1 + $0x150] sm:$0xff]   ;;  %v3098_v4 = vld [vmem:[%s4303_s0 + $0x128] ss:$36 sps:$4 sm:$0xff]  }
  0x17   :  { %2653 = vmatpush3.bf16.msra.mxu0 %v3048_v21  ;;  %v3100_v60 = vld [vmem:[%s4302_s1 + $0x1b8] sm:$0xff]   ;;  %v3102_v2 = vld [vmem:[%s4303_s0 + $0x16c] ss:$36 sps:$4 sm:$0xff]   ;;  %v3113_v7 = vld [vmem:[%s4302_s1 + $0x1e0] sm:$0xff]  }
  0x18   :  { %2654 = vmatprep.subr.bf16.mxu0 %v3051_v24  ;;  %v3109_v3 = vld [vmem:[%s4302_s1 + $0x110] sm:$0xff]   ;;  %v3111_v5 = vld [vmem:[%s4302_s1 + $0x1e8] sm:$0xff]   ;;  %v3116_v9 = vld [vmem:[%s4302_s1 + $0x1a0] sm:$0xff]  }
  0x19   :  { %2717 = vmatpush3.bf16.msra.mxu1 %v3050_v23  ;;  %v3112_v6 = vld [vmem:[%s4302_s1 + $0x1a8] sm:$0xff]   ;;  %v3107_v8 = vld [vmem:[%s4303_s0 + $0x174] ss:$36 sps:$4 sm:$0xff]   ;;  %v3119_v15 = vld [vmem:[%s4303_s0 + $0x1bc] ss:$36 sps:$4 sm:$0xff]  }
  0x1a   :  { %2718 = vmatprep.subr.bf16.mxu1 %v3053_v26  ;;  %v3118_v10 = vld [vmem:[%s4302_s1 + $0x148] sm:$0xff]   ;;  %v3110_v12 = vld [vmem:[%s4303_s0 + $0x170] ss:$36 sps:$4 sm:$0xff]   ;;  %v3123_v16 = vld [vmem:[%s4302_s1 + $0x1d8] sm:$0xff]  }
  0x1b   :  { %2655 = vmatpush3.bf16.msra.mxu0 %v3052_v25  ;;  %v3105_v11 = vld [vmem:[%s4303_s0 + $0x168] ss:$36 sps:$4 sm:$0xff]   ;;  %v3114_v13 = vld [vmem:[%s4303_s0 + $0x1b4] ss:$36 sps:$4 sm:$0xff]   ;;  %v3130_v21 = vld [vmem:[%s4302_s1 + $0x140] sm:$0xff]  }
  0x1c   :  { %2656 = vmatprep.subr.bf16.mxu0 %v3055_v28  ;;  %v3121_v14 = vld [vmem:[%s4302_s1 + $0x108] sm:$0xff]   ;;  %v3124_v17 = vld [vmem:[%s4302_s1 + $0x198] sm:$0xff]   ;;  %v3125_v18 = vld [vmem:[%s4302_s1 + $0x1d0] sm:$0xff]  }
  0x1d   :  { %2719 = vmatpush3.bf16.msra.mxu1 %v3054_v27  ;;  %v3117_v19 = vld [vmem:[%s4303_s0 + $0x1b0] ss:$36 sps:$4 sm:$0xff]   ;;  %v3126_v22 = vld [vmem:[%s4303_s0 + $0x1fc] ss:$36 sps:$4 sm:$0xff]   ;;  %v3131_v25 = vld [vmem:[%s4303_s0 + $0x204] ss:$36 sps:$4 sm:$0xff]  }
  0x1e   :  { %2720 = vmatprep.subr.bf16.mxu1 %v3057_v30  ;;  %v3128_v20 = vld [vmem:[%s4302_s1 + $0x190] sm:$0xff]   ;;  %v3122_v23 = vld [vmem:[%s4303_s0 + $0x1b8] ss:$36 sps:$4 sm:$0xff]   ;;  %v3133_v24 = vld [vmem:[%s4302_s1 + $0x100] sm:$0xff]  }
  0x1f   :  { %2657 = vmatpush3.bf16.msra.mxu0 %v3056_v29  ;;  %v3135_v26 = vld [vmem:[%s4302_s1 + $0x1c8] sm:$0xff]   ;;  %v3137_v28 = vld [vmem:[%s4302_s1 + $0x1c0] sm:$0xff]   ;;  %v3129_v29 = vld [vmem:[%s4303_s0 + $0x1f8] ss:$36 sps:$4 sm:$0xff]  }
  0x20   :  { %2770 = vmatprep.subr.bf16.mxu0 %v3062_v34  ;;  %v3136_v27 = vld [vmem:[%s4302_s1 + $0x188] sm:$0xff]   ;;  %v3141_v30 = vld [vmem:[%s4302_s1 + $0x180] sm:$0xff]   ;;  %v3140_v32 = vld [vmem:[%s4303_s0 + $0x14] ss:$36 sps:$4 sm:$0xff]  }
  0x21   :  { %2721 = vmatpush3.bf16.msra.mxu1 %v3061_v33  ;;  %v3134_v33 = vld [vmem:[%s4303_s0 + $0x200] ss:$36 sps:$4 sm:$0xff]  }
  0x22   :  { %1096 = vmatmul.mubr.bf16.vlgmr.msra.gmra.mxu0 %v3058_v31  ;;  %2834 = vmatprep.subr.bf16.mxu1 %v3099_v59  ;;  %v3142_v31 = vld [vmem:[%s4302_s1 + $0x238] sm:$0xff]  }
  0x23   :  { %2771 = vmatpush3.bf16.msra.mxu0 %v3066_v37  ;;  %1103 = vmatprep.mubr.bf16.mxu0 %v3067_v38  ;;  %v3145_v34 = vld [vmem:[%s4303_s0 + $0x1c] ss:$36 sps:$4 sm:$0xff]   ;;  %v3149_v37 = vld [vmem:[%s4302_s1 + $0x230] sm:$0xff]  }
  0x24   :  { %1193 = vmatmul.mubr.bf16.vlgmr.msra.gmra.mxu1 %v3063_v35  ;;  %2772 = vmatprep.subr.bf16.mxu0 %v3070_v40  ;;  %v3138_v35 = vld [vmem:[%s4303_s0 + $0x10] ss:$36 sps:$4 sm:$0xff]   ;;  %v3146_v36 = vld [vmem:[%s4303_s0 + $0x5c] ss:$36 sps:$4 sm:$0xff]   ;;  %v3156_v40 = vld [vmem:[%s4302_s1 + $0x228] sm:$0xff]  }
  0x25   :  { %1200 = vmatprep.mubr.bf16.mxu1 %v3071_v41  ;;  %2835 = vmatpush3.bf16.msra.mxu1 %v3100_v60  ;;  %v3143_v38 = vld [vmem:[%s4303_s0 + $0x18] ss:$36 sps:$4 sm:$0xff]  }
  0x26   :  { %2836 = vmatprep.subr.bf16.mxu1 %v3101_v61  ;;  %v3148_v41 = vld [vmem:[%s4303_s0 + $0x58] ss:$36 sps:$4 sm:$0xff]   ;;  %v3178_v61 = vld [vmem:[%s4303_s0 + $0x184] ss:$36 sps:$4 sm:$0xff]  }
  0x27   :  { %2773 = vmatpush3.bf16.msra.mxu0 %v3073_v42  ;;  %v3153_v42 = vld [vmem:[%s4303_s0 + $0xa4] ss:$36 sps:$4 sm:$0xff]   ;;  %v3174_v59 = vld [vmem:[%s4303_s0 + $0x17c] ss:$36 sps:$4 sm:$0xff]  }
  0x28   :  { %2774 = vmatprep.subr.bf16.mxu0 %v3078_v45  ;;  %v3157_v45 = vld [vmem:[%s4303_s0 + $0xac] ss:$36 sps:$4 sm:$0xff]   ;;  %v3173_v60 = vld [vmem:[%s4303_s0 + $0x138] ss:$36 sps:$4 sm:$0xff]  }
  0x29   :  { %2837 = vmatpush3.bf16.msra.mxu1 %v3104_v63  ;;  %v3181_v63 = vld [vmem:[%s4303_s0 + $0x1c4] ss:$36 sps:$4 sm:$0xff]  }
  0x2a   :  { %1104 = vmatmul.mubr.bf16.gmra.mxu0 %v3069_v39  ;;  %2838 = vmatprep.subr.bf16.mxu1 %v3111_v5  ;;  %v3150_v39 = vld [vmem:[%s4303_s0 + $0x64] ss:$36 sps:$4 sm:$0xff]   ;;  %v3192_v5 = vld [vmem:[%s4303_s0 + $0x214] ss:$36 sps:$4 sm:$0xff]  }
  0x2b   :  { %1111 = vmatprep.mubr.bf16.mxu0 %v3075_v44  ;;  %2775 = vmatpush3.bf16.msra.mxu0 %v3081_v47  ;;  %v3152_v44 = vld [vmem:[%s4303_s0 + $0x60] ss:$36 sps:$4 sm:$0xff]  }
  0x2c   :  { %1201 = vmatmul.mubr.bf16.gmra.mxu1 %v3074_v43  ;;  %2776 = vmatprep.subr.bf16.mxu0 %v3086_v50  ;;  %v3163_v43 = vld [vmem:[%s4302_s1 + $0x220] sm:$0xff]   ;;  %v3159_v50 = vld [vmem:[%s4303_s0 + $0xa8] ss:$36 sps:$4 sm:$0xff]  }
  0x2d   :  { %1208 = vmatprep.mubr.bf16.mxu1 %v3079_v46  ;;  %2839 = vmatpush3.bf16.msra.mxu1 %v3112_v6  ;;  %v3170_v46 = vld [vmem:[%s4302_s1 + $0x218] sm:$0xff]   ;;  %v3155_v47 = vld [vmem:[%s4303_s0 + $0xa0] ss:$36 sps:$4 sm:$0xff]   ;;  %v3190_v6 = vld [vmem:[%s4303_s0 + $0x208] ss:$36 sps:$4 sm:$0xff]  }
  0x2e   :  { %2840 = vmatprep.subr.bf16.mxu1 %v3113_v7  ;;  %v3195_v7 = vld [vmem:[%s4303_s0 + $0x20] ss:$36 sps:$4 sm:$0xff]  }
  0x2f   :  { %2777 = vmatpush3.bf16.msra.mxu0 %v3089_v52  ;;  %v3184_v52 = vld [vmem:[%s4302_s1 + $0x208] sm:$0xff]  }
  0x30   :  { %2778 = vmatprep.subr.bf16.mxu0 %v3094_v54  ;;  %v3167_v54 = vld [vmem:[%s4303_s0 + $0x134] ss:$36 sps:$4 sm:$0xff]  }
  0x31   :  { %2841 = vmatpush3.bf16.msra.mxu1 %v3116_v9  ;;  %v3196_v9 = vld [vmem:[%s4303_s0 + $0x68] ss:$36 sps:$4 sm:$0xff]  }
  0x32   :  { %1112 = vmatmul.mubr.bf16.gmra.mxu0 %v3077_v48  ;;  %2842 = vmatprep.subr.bf16.mxu1 %v3123_v16  ;;  %v3160_v48 = vld [vmem:[%s4303_s0 + $0xec] ss:$36 sps:$4 sm:$0xff]   ;;  %v3205_v16 = vld [vmem:[%s4304_s3 + $0x74] ss:$8 sps:$4 sm:$0xff]  }
  0x33   :  { %1119 = vmatprep.mubr.bf16.mxu0 %v3083_v49  ;;  %2779 = vmatpush3.bf16.msra.mxu0 %v3097_v56  ;;  %v3177_v49 = vld [vmem:[%s4302_s1 + $0x210] sm:$0xff]  }
  0x34   :  { %1209 = vmatmul.mubr.bf16.gmra.mxu1 %v3082_v51  ;;  %2780 = vmatprep.subr.bf16.mxu0 %v3106_v0  ;;  %v3164_v51 = vld [vmem:[%s4303_s0 + $0xf4] ss:$36 sps:$4 sm:$0xff]   ;;  %v3180_v0 = vld [vmem:[%s4303_s0 + $0x180] ss:$36 sps:$4 sm:$0xff]  }
  0x35   :  { %1216 = vmatprep.mubr.bf16.mxu1 %v3087_v53  ;;  %2843 = vmatpush3.bf16.msra.mxu1 %v3124_v17  ;;  %v3162_v53 = vld [vmem:[%s4303_s0 + $0xe8] ss:$36 sps:$4 sm:$0xff]   ;;  %v3166_v56 = vld [vmem:[%s4303_s0 + $0xf0] ss:$36 sps:$4 sm:$0xff]   ;;  %v3202_v17 = vld [vmem:[%s4303_s0 + $0x218] ss:$36 sps:$4 sm:$0xff]  }
  0x36   :  { %2844 = vmatprep.subr.bf16.mxu1 %v3125_v18  ;;  %v3206_v18 = vld [vmem:[%s4304_s3 + $0x60] ss:$8 sps:$4 sm:$0xff]  }
  0x37   :  { %2781 = vmatpush3.bf16.msra.mxu0 %v3109_v3  ;;  %v3188_v3 = vld [vmem:[%s4303_s0 + $0x20c] ss:$36 sps:$4 sm:$0xff]  }
  0x38   :  { %2782 = vmatprep.subr.bf16.mxu0 %v3118_v10  ;;  %v3197_v10 = vld [vmem:[%s4303_s0 + $0xb0] ss:$36 sps:$4 sm:$0xff]  }
  0x39   :  { %2845 = vmatpush3.bf16.msra.mxu1 %v3128_v20  ;;  %v3209_v20 = vld [vmem:[%s4304_s3 + $0x50] ss:$8 sps:$4 sm:$0xff]  }
  0x3a   :  { %1120 = vmatmul.mubr.bf16.gmra.mxu0 %v3085_v55  ;;  %2846 = vmatprep.subr.bf16.mxu1 %v3135_v26  ;;  %v3191_v55 = vld [vmem:[%s4302_s1 + $0x200] sm:$0xff]  }
  0x3b   :  { %1127 = vmatprep.mubr.bf16.mxu0 %v3091_v57  ;;  %2783 = vmatpush3.bf16.msra.mxu0 %v3121_v14  ;;  %v3171_v57 = vld [vmem:[%s4303_s0 + $0x13c] ss:$36 sps:$4 sm:$0xff]   ;;  %v3201_v14 = vld [vmem:[%s4303_s0 + $0x1d0] ss:$36 sps:$4 sm:$0xff]  }
  0x3c   :  { %1217 = vmatmul.mubr.bf16.gmra.mxu1 %v3090_v58  ;;  %2784 = vmatprep.subr.bf16.mxu0 %v3130_v21  ;;  %v3169_v58 = vld [vmem:[%s4303_s0 + $0x130] ss:$36 sps:$4 sm:$0xff]   ;;  %v3218_v26 = vld [vmem:[%s4304_s3 + $0x20] ss:$8 sps:$4 sm:$0xff]  }
  0x3d   :  { %1224 = vmatprep.mubr.bf16.mxu1 %v3095_v62  ;;  %2847 = vmatpush3.bf16.msra.mxu1 %v3136_v27  ;;  %v3176_v62 = vld [vmem:[%s4303_s0 + $0x178] ss:$36 sps:$4 sm:$0xff]   ;;  %v3220_v27 = vld [vmem:[%s4304_s3 + $0x24] ss:$8 sps:$4 sm:$0xff]  }
  0x3e   :  { %2848 = vmatprep.subr.bf16.mxu1 %v3137_v28  ;;  %v3211_v21 = vld [vmem:[%s4304_s3 + $0x54] ss:$8 sps:$4 sm:$0xff]   ;;  %v3221_v28 = vld [vmem:[%s4304_s3 + $0x10] ss:$8 sps:$4 sm:$0xff]  }
  0x3f   :  { %2785 = vmatpush3.bf16.msra.mxu0 %v3133_v24  ;;  %v3215_v24 = vld [vmem:[%s4304_s3 + $0x30] ss:$8 sps:$4 sm:$0xff]  }
  0x40   :  { %2978 = vmatprep.subr.bf16.mxu0 %v3142_v31 }
  0x41   :  { %2849 = vmatpush3.bf16.msra.mxu1 %v3141_v30 }
  0x42   :  { %1128 = vmatmul.mubr.bf16.gmra.mxu0 %v3093_v1  ;;  %v3185_v1 = vld [vmem:[%s4303_s0 + $0x1cc] ss:$36 sps:$4 sm:$0xff]   ;;  %1680 = vmatprep.subr.bf16.mxu1 %v3205_v16 }
  0x43   :  { %1135 = vmatprep.mubr.bf16.mxu0 %v3102_v2  ;;  %v3183_v2 = vld [vmem:[%s4303_s0 + $0x1c0] ss:$36 sps:$4 sm:$0xff]  }
  0x44   :  { %1225 = vmatmul.mubr.bf16.gmra.mxu1 %v3098_v4  ;;  %v3187_v4 = vld [vmem:[%s4303_s0 + $0x1c8] ss:$36 sps:$4 sm:$0xff]  }
  0x45   :  { %1232 = vmatprep.mubr.bf16.mxu1 %v3107_v8  ;;  %v3194_v8 = vld [vmem:[%s4303_s0 + $0x210] ss:$36 sps:$4 sm:$0xff]  }
  0x4a   :  { %1136 = vmatmul.mubr.bf16.gmra.mxu0 %v3105_v11  ;;  %v3198_v11 = vld [vmem:[%s4303_s0 + $0xf8] ss:$36 sps:$4 sm:$0xff]  }
  0x4b   :  { %1143 = vmatprep.mubr.bf16.mxu0 %v3114_v13  ;;  %v3200_v13 = vld [vmem:[%s4303_s0 + $0x188] ss:$36 sps:$4 sm:$0xff]  }
  0x4c   :  { %1233 = vmatmul.mubr.bf16.gmra.mxu1 %v3110_v12  ;;  %v3199_v12 = vld [vmem:[%s4303_s0 + $0x140] ss:$36 sps:$4 sm:$0xff]  }
  0x4d   :  { %1240 = vmatprep.mubr.bf16.mxu1 %v3119_v15  ;;  %v3203_v15 = vld [vmem:[%s4304_s3 + $0x70] ss:$8 sps:$4 sm:$0xff]  }
  0x52   :  { %1144 = vmatmul.mubr.bf16.gmra.mxu0 %v3117_v19  ;;  %v3208_v19 = vld [vmem:[%s4304_s3 + $0x64] ss:$8 sps:$4 sm:$0xff]  }
  0x53   :  { %1151 = vmatprep.mubr.bf16.mxu0 %v3126_v22  ;;  %v3212_v22 = vld [vmem:[%s4304_s3 + $0x40] ss:$8 sps:$4 sm:$0xff]  }
  0x54   :  { %1241 = vmatmul.mubr.bf16.gmra.mxu1 %v3122_v23  ;;  %v3214_v23 = vld [vmem:[%s4304_s3 + $0x44] ss:$8 sps:$4 sm:$0xff]  }
  0x55   :  { %1248 = vmatprep.mubr.bf16.mxu1 %v3131_v25  ;;  %v3217_v25 = vld [vmem:[%s4304_s3 + $0x34] ss:$8 sps:$4 sm:$0xff]  }
  0x5a   :  { %1152 = vmatmul.mubr.bf16.gmra.mxu0 %v3129_v29  ;;  %v3223_v29 = vld [vmem:[%s4304_s3 + $0x14] ss:$8 sps:$4 sm:$0xff]  }
  0x5b   :  { %1289 = vmatprep.mubr.bf16.mxu0 %v3140_v32 }
  0x5c   :  { %1249 = vmatmul.mubr.bf16.gmra.mxu1 %v3134_v33 }
  0x5d   :  { %1386 = vmatprep.mubr.bf16.mxu1 %v3145_v34 }
  0x62   :  { %1290 = vmatmul.mubr.bf16.vlgmr.msra.gmra.mxu0 %v3138_v35 }
  0x63   :  { %2979 = vmatpush3.bf16.msra.mxu0 %v3142_v31  ;;  %1297 = vmatprep.mubr.bf16.mxu0 %v3146_v36  ;;  %v3771_v31 = vld [vmem:[%s4305_s2] ss:$0 sm:$0xff] }
  0x64   :  { %2980 = vmatprep.subr.bf16.mxu0 %v3149_v37  ;;  %1387 = vmatmul.mubr.bf16.vlgmr.msra.gmra.mxu1 %v3143_v38 }
  0x65   :  { %1394 = vmatprep.mubr.bf16.mxu1 %v3150_v39  ;;  %1681 = vmatpush1.bf16.msra.mxu1 %v3203_v15 }
  0x66   :  { %1682 = vmatprep.subr.bf16.mxu1 %v3208_v19 }
  0x67   :  { %2981 = vmatpush3.bf16.msra.mxu0 %v3149_v37 }
  0x68   :  { %2982 = vmatprep.subr.bf16.mxu0 %v3156_v40 }
  0x69   :  { %1683 = vmatpush1.bf16.msra.mxu1 %v3206_v18 }
  0x6a   :  { %1298 = vmatmul.mubr.bf16.gmra.mxu0 %v3148_v41  ;;  %1684 = vmatprep.subr.bf16.mxu1 %v3211_v21 }
  0x6b   :  { %1305 = vmatprep.mubr.bf16.mxu0 %v3153_v42  ;;  %2983 = vmatpush3.bf16.msra.mxu0 %v3156_v40 }
  0x6c   :  { %2984 = vmatprep.subr.bf16.mxu0 %v3163_v43  ;;  %1395 = vmatmul.mubr.bf16.gmra.mxu1 %v3152_v44  ;;  %v3226_v44 = vld [vmem:[%s4304_s3 + $0x4] ss:$8 sps:$4 sm:$0xff]  }
  0x6d   :  { %1402 = vmatprep.mubr.bf16.mxu1 %v3157_v45  ;;  %1685 = vmatpush1.bf16.msra.mxu1 %v3209_v20 }
  0x6e   :  { %1686 = vmatprep.subr.bf16.mxu1 %v3214_v23 }
  0x6f   :  { %2985 = vmatpush3.bf16.msra.mxu0 %v3163_v43 }
  0x70   :  { %2986 = vmatprep.subr.bf16.mxu0 %v3170_v46 }
  0x71   :  { %1687 = vmatpush1.bf16.msra.mxu1 %v3212_v22 }
  0x72   :  { %1306 = vmatmul.mubr.bf16.gmra.mxu0 %v3155_v47  ;;  %1688 = vmatprep.subr.bf16.mxu1 %v3217_v25 }
  0x73   :  { %1313 = vmatprep.mubr.bf16.mxu0 %v3160_v48  ;;  %2987 = vmatpush3.bf16.msra.mxu0 %v3170_v46  ;;  %v3224_v46 = vld [vmem:[%s4304_s3] ss:$8 sps:$4 sm:$0xff]  }
  0x74   :  { %2988 = vmatprep.subr.bf16.mxu0 %v3177_v49  ;;  %1403 = vmatmul.mubr.bf16.gmra.mxu1 %v3159_v50 }
  0x75   :  { %1410 = vmatprep.mubr.bf16.mxu1 %v3164_v51  ;;  %1689 = vmatpush1.bf16.msra.mxu1 %v3215_v24 }
  0x76   :  { %1690 = vmatprep.subr.bf16.mxu1 %v3220_v27 }
  0x77   :  { %2989 = vmatpush3.bf16.msra.mxu0 %v3177_v49 }
  0x78   :  { %2990 = vmatprep.subr.bf16.mxu0 %v3184_v52 }
  0x79   :  { %1691 = vmatpush1.bf16.msra.mxu1 %v3218_v26 }
  0x7a   :  { %1314 = vmatmul.mubr.bf16.gmra.mxu0 %v3162_v53  ;;  %1692 = vmatprep.subr.bf16.mxu1 %v3223_v29  ;;  %v4312_v53 = vmov 0  }
  0x7b   :  { %1321 = vmatprep.mubr.bf16.mxu0 %v3167_v54  ;;  %2991 = vmatpush3.bf16.msra.mxu0 %v3184_v52 }
  0x7c   :  { %2992 = vmatprep.subr.bf16.mxu0 %v3191_v55  ;;  %1411 = vmatmul.mubr.bf16.gmra.mxu1 %v3166_v56 }
  0x7d   :  { %1418 = vmatprep.mubr.bf16.mxu1 %v3171_v57  ;;  %1693 = vmatpush1.bf16.msra.mxu1 %v3221_v28 }
  0x7e   :  { %1694 = vmatprep.subr.bf16.mxu1 %v3226_v44 }
  0x7f   :  { %2993 = vmatpush3.bf16.msra.mxu0 %v3191_v55 }
  0x81   :  { %1695 = vmatpush1.bf16.msra.mxu1 %v3224_v46 }
  0x82   :  { %1322 = vmatmul.mubr.bf16.gmra.mxu0 %v3169_v58 }
  0x83   :  { %1329 = vmatprep.mubr.bf16.mxu0 %v3174_v59 }
  0x84   :  { %1419 = vmatmul.mubr.bf16.gmra.mxu1 %v3173_v60 }
  0x85   :  { %1426 = vmatprep.mubr.bf16.mxu1 %v3178_v61 }
  0x8a   :  { %1330 = vmatmul.mubr.bf16.gmra.mxu0 %v3176_v62 }
  0x8b   :  { %1337 = vmatprep.mubr.bf16.mxu0 %v3181_v63 }
  0x8c   :  { %1427 = vmatmul.mubr.bf16.gmra.mxu1 %v3180_v0 }
  0x8d   :  { %1434 = vmatprep.mubr.bf16.mxu1 %v3185_v1 }
  0x92   :  { %1338 = vmatmul.mubr.bf16.gmra.mxu0 %v3183_v2 }
  0x93   :  { %1345 = vmatprep.mubr.bf16.mxu0 %v3188_v3 }
  0x94   :  { %1435 = vmatmul.mubr.bf16.gmra.mxu1 %v3187_v4 }
  0x95   :  { %1442 = vmatprep.mubr.bf16.mxu1 %v3192_v5 }
  0x9a   :  { %1346 = vmatmul.mubr.bf16.gmra.mxu0 %v3190_v6 }
  0x9b   :  { %2994 = vmatprep.mubr.bf16.mxu0 %v3195_v7 }
  0x9c   :  { %1443 = vmatmul.mubr.bf16.gmra.mxu1 %v3194_v8 }
  0x9d   :  { %1712 = vmatprep.mubr.bf16.mxu1 %v4312_v53 }
  0xa2   :  { %2995 = vmatmul.mubr.bf16.vlgmr.msra.gmra.mxu0 %v3196_v9 }
  0xa3   :  { %2998 = vmatprep.mubr.bf16.mxu0 %v3197_v10 }
  0xaa   :  { %2999 = vmatmul.mubr.bf16.gmra.mxu0 %v3198_v11 }
  0xab   :  { %3002 = vmatprep.mubr.bf16.mxu0 %v3199_v12 }
  0xb2   :  { %3003 = vmatmul.mubr.bf16.gmra.mxu0 %v3200_v13 }
  0xb3   :  { %3006 = vmatprep.mubr.bf16.mxu0 %v3201_v14 }
  0xba   :  { %3007 = vmatmul.mubr.bf16.gmra.mxu0 %v3202_v17 }
  0xe2   :  { %v2658_v30 = vpop.f32.mrf.mxu0 }
  0xe4   :  { %v2659_v32 = vpop.f32.mrf.mxu0  ;;  %v2722_v34 = vpop.f32.mrf.mxu1 }
  0xe5   :  { %v2660_v33 = vadd.f32 %v2659_v32, %v2658_v30 }
  0xe6   :  { %v2661_v35 = vpop.f32.mrf.mxu0  ;;  %v2723_v37 = vpop.f32.mrf.mxu1 }
  0xe7   :  { %v1098_v36 = vadd.f32 %v2660_v33, %v3771_v31  ;;  %v2724_v38 = vadd.f32 %v2723_v37, %v2722_v34 }
  0xe8   :  { %v2662_v39 = vpop.f32.mrf.mxu0  ;;  %v3776_v41 = vpop.f32.mrf.mxu1 }
  0xe9   :  { %v3774_v40 = vadd.f32 %v2662_v39, %v2661_v35  ;;  %v3778_v42 = vadd.f32 %v2724_v38, %v1098_v36 }
  0xea   :  { %v2664_v43 = vpop.f32.mrf.mxu0  ;;  %v3783_v45 = vpop.f32.mrf.mxu1 }
  0xec   :  { %v2665_v47 = vpop.f32.mrf.mxu0  ;;  %v2728_v49 = vpop.f32.mrf.mxu1 }
  0xed   :  { %v2666_v48 = vadd.f32 %v2665_v47, %v2664_v43 }
  0xee   :  { %v2667_v50 = vpop.f32.mrf.mxu0  ;;  %v2729_v52 = vpop.f32.mrf.mxu1 }
  0xef   :  { %v1106_v51 = vadd.f32 %v2666_v48, %v3771_v31  ;;  %v2730_v54 = vadd.f32 %v2729_v52, %v2728_v49 }
  0xf0   :  { %v2668_v55 = vpop.f32.mrf.mxu0  ;;  %v3792_v57 = vpop.f32.mrf.mxu1 }
  0xf1   :  { %v3790_v56 = vadd.f32 %v2668_v55, %v2667_v50  ;;  %v3794_v58 = vadd.f32 %v2730_v54, %v1106_v51 }
  0xf2   :  { %v2670_v59 = vpop.f32.mrf.mxu0  ;;  %v3796_v60 = vpop.f32.mrf.mxu1 }
  0xf4   :  { %v2671_v61 = vpop.f32.mrf.mxu0  ;;  %v2734_v63 = vpop.f32.mrf.mxu1 }
  0xf5   :  { %v2672_v62 = vadd.f32 %v2671_v61, %v2670_v59 }
  0xf6   :  { %v2673_v0 = vpop.f32.mrf.mxu0  ;;  %v2735_v2 = vpop.f32.mrf.mxu1 }
  0xf7   :  { %v1114_v1 = vadd.f32 %v2672_v62, %v3771_v31  ;;  %v2736_v3 = vadd.f32 %v2735_v2, %v2734_v63 }
  0xf8   :  { %v2674_v4 = vpop.f32.mrf.mxu0  ;;  %v3801_v6 = vpop.f32.mrf.mxu1 }
  0xf9   :  { %v3799_v5 = vadd.f32 %v2674_v4, %v2673_v0  ;;  %v3803_v7 = vadd.f32 %v2736_v3, %v1114_v1 }
  0xfa   :  { %v2676_v8 = vpop.f32.mrf.mxu0  ;;  %v3805_v9 = vpop.f32.mrf.mxu1 }
  0xfc   :  { %v2677_v10 = vpop.f32.mrf.mxu0  ;;  %v2740_v12 = vpop.f32.mrf.mxu1 }
  0xfd   :  { %v2678_v11 = vadd.f32 %v2677_v10, %v2676_v8 }
  0xfe   :  { %v2679_v13 = vpop.f32.mrf.mxu0  ;;  %v2741_v15 = vpop.f32.mrf.mxu1 }
  0xff   :  { %v1122_v14 = vadd.f32 %v2678_v11, %v3771_v31  ;;  %v2742_v16 = vadd.f32 %v2741_v15, %v2740_v12 }
 0x100   :  { %v2680_v17 = vpop.f32.mrf.mxu0  ;;  %v3810_v19 = vpop.f32.mrf.mxu1 }
 0x101   :  { %v3808_v18 = vadd.f32 %v2680_v17, %v2679_v13  ;;  %v3812_v20 = vadd.f32 %v2742_v16, %v1122_v14 }
 0x102   :  { %v2682_v21 = vpop.f32.mrf.mxu0  ;;  %v3814_v22 = vpop.f32.mrf.mxu1 }
 0x104   :  { %v2683_v23 = vpop.f32.mrf.mxu0  ;;  %v2746_v25 = vpop.f32.mrf.mxu1 }
 0x105   :  { %v2684_v24 = vadd.f32 %v2683_v23, %v2682_v21 }
 0x106   :  { %v2685_v26 = vpop.f32.mrf.mxu0  ;;  %v2747_v28 = vpop.f32.mrf.mxu1 }
 0x107   :  { %v1130_v27 = vadd.f32 %v2684_v24, %v3771_v31  ;;  %v2748_v29 = vadd.f32 %v2747_v28, %v2746_v25 }
 0x108   :  { %v2686_v30 = vpop.f32.mrf.mxu0  ;;  %v3819_v33 = vpop.f32.mrf.mxu1 }
 0x109   :  { %v3817_v32 = vadd.f32 %v2686_v30, %v2685_v26  ;;  %v3821_v34 = vadd.f32 %v2748_v29, %v1130_v27 }
 0x10a   :  { %v2688_v35 = vpop.f32.mrf.mxu0  ;;  %v3823_v36 = vpop.f32.mrf.mxu1 }
 0x10c   :  { %v2689_v37 = vpop.f32.mrf.mxu0  ;;  %v2752_v39 = vpop.f32.mrf.mxu1 }
 0x10d   :  { %v2690_v38 = vadd.f32 %v2689_v37, %v2688_v35 }
 0x10e   :  { %v2691_v43 = vpop.f32.mrf.mxu0  ;;  %v2753_v46 = vpop.f32.mrf.mxu1 }
 0x10f   :  { %v1138_v44 = vadd.f32 %v2690_v38, %v3771_v31  ;;  %v2754_v47 = vadd.f32 %v2753_v46, %v2752_v39 }
 0x110   :  { %v2692_v48 = vpop.f32.mrf.mxu0  ;;  %v3828_v50 = vpop.f32.mrf.mxu1 }
 0x111   :  { %v3826_v49 = vadd.f32 %v2692_v48, %v2691_v43  ;;  %v3830_v51 = vadd.f32 %v2754_v47, %v1138_v44  ;;  %v3227_v44 = vld [vmem:[%s4306_s6 + $0x78] sm:$0xff]  }
 0x112   :  { %v2694_v52 = vpop.f32.mrf.mxu0  ;;  %v3832_v54 = vpop.f32.mrf.mxu1  ;;  %v3871_v47 = vld [vmem:[%s4306_s6 + $0x38] sm:$0xff]   ;;  %2914 = vmatprep.subr.bf16.mxu0 %v3227_v44  ;;  %3010 = vmatprep.subr.bf16.mxu1 %v3227_v44 }
 0x113   :  { %4327 = vst [vmem:[#allocation8_spill] sm:$0xff] %v3871_v47  ;;  %2915 = vmatpush3.bf16.msra.mxu0 %v3871_v47 }
 0x114   :  { %v2695_v55 = vpop.f32.mrf.mxu0  ;;  %v2758_v61 = vpop.f32.mrf.mxu1 }
 0x115   :  { %v2696_v59 = vadd.f32 %v2695_v55, %v2694_v52  ;;  %v3884_v55 = vld [vmem:[%s4306_s6 + $0x30] sm:$0xff]  }
 0x116   :  { %v2697_v62 = vpop.f32.mrf.mxu0  ;;  %v2759_v0 = vpop.f32.mrf.mxu1  ;;  %4329 = vst [vmem:[#allocation10_spill] sm:$0xff] %v3884_v55 }
 0x117   :  { %v1146_v63 = vadd.f32 %v2696_v59, %v3771_v31  ;;  %v2760_v1 = vadd.f32 %v2759_v0, %v2758_v61  ;;  %v3890_v61 = vld [vmem:[%s4306_s6 + $0x68] sm:$0xff]  }
 0x118   :  { %v2698_v2 = vpop.f32.mrf.mxu0  ;;  %v3837_v4 = vpop.f32.mrf.mxu1  ;;  %4330 = vst [vmem:[#allocation11_spill] sm:$0xff] %v3890_v61 }
 0x119   :  { %v3835_v3 = vadd.f32 %v2698_v2, %v2697_v62  ;;  %4322 = vst [vmem:[#allocation3_spill] sm:$0xff] %v3837_v4  ;;  %v3839_v8 = vadd.f32 %v2760_v1, %v1146_v63 }
 0x11a   :  { %v2700_v10 = vpop.f32.mrf.mxu0  ;;  %v3841_v11 = vpop.f32.mrf.mxu1 }
 0x11b   :  { %4321 = vst [vmem:[#allocation2_spill] sm:$0xff] %v3835_v3  ;;  %4323 = vst [vmem:[#allocation4_spill] sm:$0xff] %v3841_v11 }
 0x11c   :  { %v2701_v12 = vpop.f32.mrf.mxu0  ;;  %v2764_v14 = vpop.f32.mrf.mxu1 }
 0x11d   :  { %v2702_v13 = vadd.f32 %v2701_v12, %v2700_v10  ;;  %v3905_v10 = vld [vmem:[%s4306_s6 + $0x28] sm:$0xff]  }
 0x11e   :  { %v2703_v15 = vpop.f32.mrf.mxu0  ;;  %v2765_v17 = vpop.f32.mrf.mxu1  ;;  %4331 = vst [vmem:[#allocation12_spill] sm:$0xff] %v3905_v10 }
 0x11f   :  { %v1154_v16 = vadd.f32 %v2702_v13, %v3771_v31  ;;  %v2766_v21 = vadd.f32 %v2765_v17, %v2764_v14  ;;  %v3911_v13 = vld [vmem:[%s4306_s6 + $0x60] sm:$0xff]  }
 0x120   :  { %v2704_v23 = vpop.f32.mrf.mxu0  ;;  %v3846_v25 = vpop.f32.mrf.mxu1  ;;  %4332 = vst [vmem:[#allocation13_spill] sm:$0xff] %v3911_v13 }
 0x121   :  { %v3844_v24 = vadd.f32 %v2704_v23, %v2703_v15  ;;  %4325 = vst [vmem:[#allocation6_spill] sm:$0xff] %v3846_v25  ;;  %v3848_v26 = vadd.f32 %v2766_v21, %v1154_v16 }
 0x122   :  { %v2786_v27 = vpop.f32.mrf.mxu0  ;;  %v3850_v28 = vpop.f32.mrf.mxu1 }
 0x123   :  { %4324 = vst [vmem:[#allocation5_spill] sm:$0xff] %v3844_v24  ;;  %4326 = vst [vmem:[#allocation7_spill] sm:$0xff] %v3850_v28 }
 0x124   :  { %v2787_v29 = vpop.f32.mrf.mxu0  ;;  %v3852_v35 = vpop.f32.mrf.mxu1 }
 0x125   :  { %v2788_v30 = vadd.f32 %v2787_v29, %v2786_v27 }
 0x126   :  { %v3854_v37 = vpop.f32.mrf.mxu0  ;;  %v3859_v39 = vpop.f32.mrf.mxu1 }
 0x127   :  { %v3857_v38 = vadd.f32 %v2788_v30, %v3778_v42  ;;  %v3876_v42 = vld [vmem:[%s4306_s6 + $0x70] sm:$0xff]  }
 0x128   :  { %v3861_v43 = vpop.f32.mrf.mxu0  ;;  %v3866_v46 = vpop.f32.mrf.mxu1  ;;  %4328 = vst [vmem:[#allocation9_spill] sm:$0xff] %v3876_v42  ;;  %2916 = vmatprep.subr.bf16.mxu0 %v3876_v42 }
 0x129   :  { %2917 = vmatpush3.bf16.msra.mxu0 %v3884_v55 }
 0x12a   :  { %v2792_v48 = vpop.f32.mrf.mxu0  ;;  %v3878_v52 = vpop.f32.mrf.mxu1  ;;  %2918 = vmatprep.subr.bf16.mxu0 %v3890_v61 }
 0x12c   :  { %v2793_v59 = vpop.f32.mrf.mxu0  ;;  %v3892_v63 = vpop.f32.mrf.mxu1 }
 0x12d   :  { %v2794_v62 = vadd.f32 %v2793_v59, %v2792_v48  ;;  %2919 = vmatpush3.bf16.msra.mxu0 %v3905_v10 }
 0x12e   :  { %v3894_v0 = vpop.f32.mrf.mxu0  ;;  %v3899_v2 = vpop.f32.mrf.mxu1  ;;  %2920 = vmatprep.subr.bf16.mxu0 %v3911_v13 }
 0x12f   :  { %v3897_v1 = vadd.f32 %v2794_v62, %v3794_v58  ;;  %v3918_v58 = vld [vmem:[%s4306_s6 + $0x20] sm:$0xff]  }
 0x130   :  { %v2796_v12 = vpop.f32.mrf.mxu0  ;;  %v3913_v14 = vpop.f32.mrf.mxu1  ;;  %4333 = vst [vmem:[#allocation14_spill] sm:$0xff] %v3918_v58 }
 0x131   :  { %2921 = vmatpush3.bf16.msra.mxu0 %v3918_v58 }
 0x132   :  { %v2798_v15 = vpop.f32.mrf.mxu0  ;;  %v3920_v16 = vpop.f32.mrf.mxu1 }
 0x134   :  { %v2799_v17 = vpop.f32.mrf.mxu0  ;;  %v3924_v23 = vpop.f32.mrf.mxu1 }
 0x135   :  { %v2800_v21 = vadd.f32 %v2799_v17, %v2798_v15 }
 0x136   :  { %v3926_v27 = vpop.f32.mrf.mxu0  ;;  %v3931_v30 = vpop.f32.mrf.mxu1 }
 0x137   :  { %v3929_v29 = vadd.f32 %v2800_v21, %v3803_v7 }
 0x138   :  { %v3934_v44 = vpop.f32.mrf.mxu0  ;;  %v3936_v48 = vpop.f32.mrf.mxu1 }
 0x139   :  { %4334 = vst [vmem:[#allocation15_spill] sm:$0xff] %v3929_v29 }
 0x13a   :  { %v2804_v59 = vpop.f32.mrf.mxu0  ;;  %v3938_v62 = vpop.f32.mrf.mxu1 }
 0x13c   :  { %v2805_v53 = vpop.f32.mrf.mxu0  ;;  %v3940_v17 = vpop.f32.mrf.mxu1 }
 0x13d   :  { %v2806_v15 = vadd.f32 %v2805_v53, %v2804_v59 }
 0x13e   :  { %v2807_v13 = vpop.f32.mrf.mxu0  ;;  %v3945_v7 = vpop.f32.mrf.mxu1 }
 0x13f   :  { %v3943_v10 = vadd.f32 %v2806_v15, %v3812_v20 }
 0x140   :  { %v2808_v21 = vpop.f32.mrf.mxu0  ;;  %v3947_v61 = vpop.f32.mrf.mxu1 }
 0x142   :  { %v2810_v58 = vpop.f32.mrf.mxu0  ;;  %v3949_v55 = vpop.f32.mrf.mxu1 }
 0x144   :  { %v2811_v11 = vpop.f32.mrf.mxu0  ;;  %v3951_v3 = vpop.f32.mrf.mxu1 }
 0x145   :  { %v2812_v4 = vadd.f32 %v2811_v11, %v2810_v58  ;;  %4335 = vst [vmem:[#allocation16_spill] sm:$0xff] %v3951_v3 }
 0x146   :  { %v3953_v28 = vpop.f32.mrf.mxu0  ;;  %v3958_v59 = vpop.f32.mrf.mxu1 }
 0x147   :  { %v3956_v53 = vadd.f32 %v2812_v4, %v3821_v34  ;;  %4337 = vst [vmem:[#allocation18_spill] sm:$0xff] %v3958_v59 }
 0x148   :  { %v3960_v20 = vpop.f32.mrf.mxu0  ;;  %v3962_v15 = vpop.f32.mrf.mxu1 }
 0x149   :  { %4336 = vst [vmem:[#allocation17_spill] sm:$0xff] %v3956_v53  ;;  %4338 = vst [vmem:[#allocation19_spill] sm:$0xff] %v3960_v20 }
 0x14a   :  { %4339 = vst [vmem:[#allocation20_spill] sm:$0xff] %v3962_v15  ;;  %v2816_v25 = vpop.f32.mrf.mxu0  ;;  %v3964_v24 = vpop.f32.mrf.mxu1 }
 0x14b   :  { %4340 = vst [vmem:[#allocation21_spill] sm:$0xff] %v3964_v24 }
 0x14c   :  { %v2817_v42 = vpop.f32.mrf.mxu0  ;;  %v3966_v29 = vpop.f32.mrf.mxu1 }
 0x14d   :  { %v2818_v47 = vadd.f32 %v2817_v42, %v2816_v25 }
 0x14e   :  { %v3968_v11 = vpop.f32.mrf.mxu0  ;;  %v3973_v34 = vpop.f32.mrf.mxu1 }
 0x14f   :  { %v3971_v58 = vadd.f32 %v2818_v47, %v3830_v51  ;;  %4342 = vst [vmem:[#allocation23_spill] sm:$0xff] %v3973_v34 }
 0x150   :  { %v3975_v4 = vpop.f32.mrf.mxu0  ;;  %v3977_v53 = vpop.f32.mrf.mxu1 }
 0x151   :  { %4341 = vst [vmem:[#allocation22_spill] sm:$0xff] %v3971_v58  ;;  %4343 = vst [vmem:[#allocation24_spill] sm:$0xff] %v3977_v53  ;;  %v1109_v58 = vadd.f32 %v3790_v56, %v3771_v31  ;;  %v2733_v53 = vadd.f32 %v3796_v60, %v3792_v57  ;;  %v2791_v56 = vadd.f32 %v3861_v43, %v3854_v37 }
 0x152   :  { %v2822_v59 = vpop.f32.mrf.mxu0  ;;  %v3979_v20 = vpop.f32.mrf.mxu1  ;;  %v2858_v57 = vadd.f32 %v3899_v2, %v3892_v63  ;;  %v2745_v37 = vadd.f32 %v3814_v22, %v3810_v19  ;;  %v2855_v2 = vadd.f32 %v3878_v52, %v3866_v46  ;;  %v2870_v52 = vadd.f32 %v3945_v7, %v3940_v17 }
 0x153   :  { %v2757_v17 = vadd.f32 %v3832_v54, %v3828_v50  ;;  %v2821_v50 = vadd.f32 %v3975_v4, %v3968_v11  ;;  %v4350_v4 = vld [vmem:[#allocation16_spill] sm:$0xff] }
 0x154   :  { %v2823_v15 = vpop.f32.mrf.mxu0  ;;  %v3988_v51 = vpop.f32.mrf.mxu1 }
 0x155   :  { %v2824_v3 = vadd.f32 %v2823_v15, %v2822_v59  ;;  %4346 = vst [vmem:[#allocation27_spill] sm:$0xff] %v3988_v51  ;;  %v1101_v59 = vadd.f32 %v3774_v40, %v3771_v31  ;;  %v2727_v15 = vadd.f32 %v3783_v45, %v3776_v41  ;;  %v2852_v45 = vadd.f32 %v3859_v39, %v3852_v35 }
 0x156   :  { %v3981_v24 = vpop.f32.mrf.mxu0  ;;  %v1117_v35 = vadd.f32 %v3799_v5, %v3771_v31  ;;  %v2739_v39 = vadd.f32 %v3805_v9, %v3801_v6  ;;  %v2864_v9 = vadd.f32 %v3931_v30, %v3924_v23 }
 0x157   :  { %v3984_v25 = vadd.f32 %v2824_v3, %v3839_v8  ;;  %v2797_v3 = vadd.f32 %v2796_v12, %v3894_v0  ;;  %v1198_v41 = vadd.f32 %v2727_v15, %v1101_v59  ;;  %v2861_v12 = vadd.f32 %v3920_v16, %v3913_v14 }
 0x158   :  { %v3986_v42 = vpop.f32.mrf.mxu0  ;;  %v2809_v14 = vadd.f32 %v2808_v21, %v2807_v13  ;;  %v1389_v19 = vadd.f32 %v2852_v45, %v3857_v38  ;;  %v1214_v6 = vadd.f32 %v2739_v39, %v1117_v35  ;;  %v2873_v21 = vadd.f32 %v3949_v55, %v3947_v61  ;;  %v4351_v35 = vld [vmem:[#allocation18_spill] sm:$0xff] }
 0x159   :  { %4344 = vst [vmem:[#allocation25_spill] sm:$0xff] %v3984_v25  ;;  %4345 = vst [vmem:[#allocation26_spill] sm:$0xff] %v3986_v42  ;;  %v3999_v25 = vpop.f32.mrf.mxu1  ;;  %v1206_v42 = vadd.f32 %v2733_v53, %v1109_v58  ;;  %v1125_v53 = vadd.f32 %v3808_v18, %v3771_v31  ;;  %v1295_v63 = vadd.f32 %v2791_v56, %v1198_v41 }
 0x15a   :  { %v2828_v47 = vpop.f32.mrf.mxu0  ;;  %v1397_v58 = vadd.f32 %v2858_v57, %v3897_v1  ;;  %v1413_v55 = vadd.f32 %v2870_v52, %v3943_v10  ;;  %v1133_v61 = vadd.f32 %v3817_v32, %v3771_v31  ;;  %v4349_v32 = vld [vmem:[#allocation23_spill] sm:$0xff]  ;;  %v2876_v39 = vadd.f32 %v4351_v35, %v4350_v4  ;;  %v4356_v52 = vld [vmem:[#allocation5_spill] sm:$0xff]  ;;  %v4370_v35 = vld [vmem:[#allocation12_spill] sm:$0xff] }
 0x15b   :  { %v1303_v0 = vadd.f32 %v2797_v3, %v1206_v42  ;;  %v4020_v43 = vpop.f32.mrf.mxu1  ;;  %v2803_v42 = vadd.f32 %v3934_v44, %v3926_v27  ;;  %v1392_v59 = vadd.f32 %v2855_v2, %v1295_v63  ;;  %v1141_v3 = vadd.f32 %v3826_v49, %v3771_v31 }
 0x15c   :  { %v2829_v34 = vpop.f32.mrf.mxu0  ;;  %v2751_v49 = vadd.f32 %v3823_v36, %v3819_v33  ;;  %v2882_v2 = vadd.f32 %v4349_v32, %v3966_v29 }
 0x15d   :  { %v2830_v8 = vadd.f32 %v2829_v34, %v2828_v47  ;;  %v1400_v22 = vadd.f32 %v2861_v12, %v1303_v0  ;;  %v1222_v34 = vadd.f32 %v2745_v37, %v1125_v53  ;;  %v4032_v47 = vpop.f32.mrf.mxu1  ;;  %v1311_v7 = vadd.f32 %v2803_v42, %v1214_v6  ;;  %v4348_v37 = vld [vmem:[#allocation19_spill] sm:$0xff] }
 0x15e   :  { %v4001_v51 = vpop.f32.mrf.mxu0  ;;  %v1238_v53 = vadd.f32 %v2757_v17, %v1141_v3  ;;  %v1230_v11 = vadd.f32 %v2751_v49, %v1133_v61  ;;  %v4361_v17 = vld [vmem:[#allocation22_spill] sm:$0xff] }
 0x15f   :  { %v4008_v60 = vadd.f32 %v2830_v8, %v3848_v26  ;;  %v1319_v13 = vadd.f32 %v2809_v14, %v1222_v34  ;;  %v2867_v8 = vadd.f32 %v3938_v62, %v3936_v48  ;;  %v2892_v56 = vpop.f32.mrf.mxu1  ;;  %v4347_v48 = vld [vmem:[#allocation15_spill] sm:$0xff] }
 0x160   :  { %v4010_v40 = vpop.f32.mrf.mxu0  ;;  %v1405_v62 = vadd.f32 %v2864_v9, %v4347_v48  ;;  %v1335_v14 = vadd.f32 %v2821_v50, %v1238_v53  ;;  %v4365_v50 = vld [vmem:[#allocation10_spill] sm:$0xff] }
 0x161   :  { %v1416_v12 = vadd.f32 %v2873_v21, %v1319_v13  ;;  %v2893_v10 = vpop.f32.mrf.mxu1  ;;  %v1408_v36 = vadd.f32 %v2867_v8, %v1311_v7  ;;  %v4359_v13 = vld [vmem:[#allocation20_spill] sm:$0xff]  ;;  %v1429_v7 = vadd.f32 %v2882_v2, %v4361_v17  ;;  %v4362_v8 = vld [vmem:[#allocation2_spill] sm:$0xff]  ;;  %v2833_v61 = vadd.f32 %v4010_v40, %v4001_v51  ;;  %v3235_v17 = vld [vmem:[%s4306_s6 + $0x58] sm:$0xff]  }
 0x162   :  { %v2996_v26 = vpop.f32.mrf.mxu0  ;;  %v2894_v32 = vadd.f32 %v2893_v10, %v2892_v56  ;;  %2922 = vmatprep.subr.bf16.mxu0 %v3235_v17 }
 0x163   :  { %v1494_v16 = vadd.f32 %v2996_v26, %v1397_v58  ;;  %v2815_v26 = vadd.f32 %v4348_v37, %v3953_v28  ;;  %v4354_v28 = vld [vmem:[#allocation24_spill] sm:$0xff]  ;;  %v4368_v37 = vld [vmem:[#allocation26_spill] sm:$0xff] }
 0x164   :  { %v1485_v18 = vpop.f32.mrf.mxu0 }
 0x165   :  { %v1486_v5 = vadd.f32 %v1485_v18, %v1389_v19  ;;  %v1550_v15 = vmax.f32 %v1494_v16, 0.0  ;;  %v4352_v16 = vmov 0   ;;  %v4353_v19 = vld [vmem:[#allocation8_spill] sm:$0xff]  ;;  %v1327_v9 = vadd.f32 %v2815_v26, %v1230_v11 }
 0x166   :  { %v2997_v46 = vpop.f32.mrf.mxu0 }
 0x167   :  { %v1497_v1 = vadd.f32 %v2997_v46, %v1400_v22  ;;  %v1548_v30 = vmax.f32 %v1486_v5, 0.0  ;;  %v2885_v22 = vadd.f32 %v3979_v20, %v4354_v28  ;;  %v4355_v46 = vld [vmem:[#allocation9_spill] sm:$0xff]  ;;  %v1157_v5 = vadd.f32 %v4356_v52, %v3771_v31 }
 0x168   :  { %v1488_v38 = vpop.f32.mrf.mxu0 }
 0x169   :  { %v1551_v27 = vmax.f32 %v1497_v1, 0.0  ;;  %v1489_v44 = vadd.f32 %v1488_v38, %v1392_v59  ;;  %v4357_v1 = vld [vmem:[#allocation6_spill] sm:$0xff]  ;;  %v4358_v59 = vld [vmem:[#allocation7_spill] sm:$0xff]  ;;  %v4360_v38 = vld [vmem:[#allocation21_spill] sm:$0xff] }
 0x16a   :  { %v3000_v23 = vpop.f32.mrf.mxu0  ;;  %v2769_v6 = vadd.f32 %v4358_v59, %v4357_v1  ;;  %v2879_v21 = vadd.f32 %v4360_v38, %v4359_v13 }
 0x16b   :  { %v1565_v57 = vpack.c.bf16 %v1551_v27, %v1550_v15  ;;  %v1549_v41 = vmax.f32 %v1489_v44, 0.0  ;;  %v1510_v0 = vadd.f32 %v3000_v23, %v1413_v55  ;;  %v2895_v15 = vpop.f32.mrf.mxu1  ;;  %v1149_v23 = vadd.f32 %v4362_v8, %v3771_v31  ;;  %v3239_v8 = vld [vmem:[%s4306_s6 + $0x48] sm:$0xff]  }
 0x16c   :  { %v1501_v54 = vpop.f32.mrf.mxu0  ;;  %v1254_v53 = vadd.f32 %v2769_v6, %v1157_v5  ;;  %v2827_v31 = vadd.f32 %v4368_v37, %v3981_v24  ;;  %v1424_v51 = vadd.f32 %v2879_v21, %v1327_v9  ;;  %v4373_v5 = vld [vmem:[#allocation25_spill] sm:$0xff] }
 0x16d   :  { %v1564_v45 = vpack.c.bf16 %v1549_v41, %v1548_v30  ;;  %v1502_v58 = vadd.f32 %v1501_v54, %v1405_v62  ;;  %v1554_v34 = vmax.f32 %v1510_v0, 0.0  ;;  %v4363_v30 = vld [vmem:[#allocation3_spill] sm:$0xff]  ;;  %v4364_v41 = vld [vmem:[#allocation4_spill] sm:$0xff]  ;;  %v4366_v0 = vld [vmem:[#allocation17_spill] sm:$0xff]  ;;  %v1432_v62 = vadd.f32 %v2885_v22, %v1335_v14  ;;  %v2896_v26 = vpop.f32.mrf.mxu1 }
 0x16e   :  { %v3001_v63 = vpop.f32.mrf.mxu0  ;;  %v2763_v55 = vadd.f32 %v4364_v41, %v4363_v30  ;;  %v1421_v48 = vadd.f32 %v2876_v39, %v4366_v0  ;;  %v1351_v11 = vadd.f32 %v2833_v61, %v1254_v53  ;;  %v2897_v39 = vadd.f32 %v2896_v26, %v2895_v15  ;;  %v3241_v30 = vld [vmem:[%s4306_s6 + $0x40] sm:$0xff]   ;;  %v1794_v53 = vld [vmem:[%s4308_s5 + $0x8] sm:$0xff] }
 0x16f   :  { %v1513_v33 = vadd.f32 %v3001_v63, %v1416_v12  ;;  %1713 = vmatmul.mubr.bf16.vlgmr.msra.gmra.mxu1 %v1564_v45  ;;  %v1552_v44 = vmax.f32 %v1502_v58, 0.0  ;;  %v4367_v12 = vld [vmem:[#allocation11_spill] sm:$0xff]  ;;  %v3242_v41 = vld [vmem:[%s4306_s6] sm:$0xff]  }
 0x170   :  { %v1504_v18 = vpop.f32.mrf.mxu0  ;;  %1722 = vmatprep.mubr.bf16.mxu1 %v4352_v16  ;;  %3018 = vmatpush3.bf16.msra.mxu1 %v4353_v19  ;;  %v1246_v40 = vadd.f32 %v2763_v55, %v1149_v23  ;;  %v4371_v19 = vld [vmem:[#allocation13_spill] sm:$0xff]  ;;  %v1448_v59 = vadd.f32 %v2897_v39, %v1351_v11  ;;  %v3240_v23 = vld [vmem:[%s4306_s6 + $0x8] sm:$0xff]   ;;  %v1590_v55 = vlaneseq }
 0x171   :  { %v1555_v42 = vmax.f32 %v1513_v33, 0.0  ;;  %v1505_v29 = vadd.f32 %v1504_v18, %v1408_v36  ;;  %3011 = vmatprep.subr.bf16.mxu1 %v4355_v46  ;;  %v4369_v33 = vld [vmem:[#allocation27_spill] sm:$0xff] }
 0x172   :  { %v3004_v27 = vpop.f32.mrf.mxu0  ;;  %v2888_v36 = vadd.f32 %v3999_v25, %v4369_v33  ;;  %v1343_v56 = vadd.f32 %v2827_v31, %v1246_v40  ;;  %v1591_v61 = vshrl.u32 %v1590_v55, 7 }
 0x173   :  { %v1567_v3 = vpack.c.bf16 %v1555_v42, %v1554_v34  ;;  %v1553_v20 = vmax.f32 %v1505_v29, 0.0  ;;  %v1526_v45 = vadd.f32 %v3004_v27, %v1429_v7  ;;  %v1445_v34 = vadd.f32 %v2894_v32, %v4008_v60  ;;  %v4372_v29 = vld [vmem:[#allocation14_spill] sm:$0xff]  ;;  %v3237_v7 = vld [vmem:[%s4306_s6 + $0x50] sm:$0xff]  }
 0x174   :  { %v1517_v49 = vpop.f32.mrf.mxu0  ;;  %3019 = vmatpush3.bf16.msra.mxu1 %v4365_v50  ;;  %v1437_v1 = vadd.f32 %v2888_v36, %v4373_v5  ;;  %v1588_v50 = vld [vmem:[%s4307_s4] sm:$0x3]  ;;  %v1812_v36 = vunpack.c.h.bf16 %v1794_v53 }
 0x175   :  { %v1566_v54 = vpack.c.bf16 %v1553_v20, %v1552_v44  ;;  %3012 = vmatprep.subr.bf16.mxu1 %v4367_v12  ;;  %v1518_v2 = vadd.f32 %v1517_v49, %v1421_v48  ;;  %v1558_v14 = vmax.f32 %v1526_v45, 0.0  ;;  %v1592_v49 = vsub.s32 0, %v1591_v61  ;;  %v1793_v45 = vld [vmem:[%s4308_s5] sm:$0xff] }
 0x176   :  { %v3005_v63 = vpop.f32.mrf.mxu0  ;;  %v1809_v48 = vunpack.c.l.bf16 %v1793_v45  ;;  %v1810_v31 = vunpack.c.h.bf16 %v1793_v45 }
 0x177   :  { %v1529_v58 = vadd.f32 %v3005_v63, %v1432_v62  ;;  %1723 = vmatmul.mubr.bf16.gmra.mxu1 %v1565_v57  ;;  %v2891_v57 = vadd.f32 %v4032_v47, %v4020_v43  ;;  %v1556_v28 = vmax.f32 %v1518_v2, 0.0  ;;  %v4128_v0 = vrot.slane %v1588_v50, %v1592_v49  ;;  %v1799_v49 = vld [vmem:[%s4308_s5 + $0x30] sm:$0xff] }
 0x178   :  { %v1520_v4 = vpop.f32.mrf.mxu0  ;;  %1732 = vmatprep.mubr.bf16.mxu1 %v4352_v16  ;;  %3020 = vmatpush3.bf16.msra.mxu1 %v4370_v35  ;;  %v1811_v2 = vunpack.c.l.bf16 %v1794_v53 }
 0x179   :  { %v1559_v24 = vmax.f32 %v1529_v58, 0.0  ;;  %v1521_v18 = vadd.f32 %v1520_v4, %v1424_v51  ;;  %3013 = vmatprep.subr.bf16.mxu1 %v4371_v19  ;;  %v1440_v38 = vadd.f32 %v2891_v57, %v1343_v56  ;;  %v1795_v58 = vld [vmem:[%s4308_s5 + $0x10] sm:$0xff]  ;;  %v1796_v19 = vld [vmem:[%s4308_s5 + $0x18] sm:$0xff] }
 0x17a   :  { %v3008_v10 = vpop.f32.mrf.mxu0  ;;  %v1813_v4 = vunpack.c.l.bf16 %v1795_v58 }
 0x17b   :  { %v1569_v22 = vpack.c.bf16 %v1559_v24, %v1558_v14  ;;  %v1557_v25 = vmax.f32 %v1521_v18, 0.0  ;;  %v1542_v52 = vadd.f32 %v3008_v10, %v1445_v34 }
 0x17c   :  { %v1533_v42 = vpop.f32.mrf.mxu0  ;;  %3021 = vmatpush3.bf16.msra.mxu1 %v4372_v29 }
 0x17d   :  { %v1568_v46 = vpack.c.bf16 %v1557_v25, %v1556_v28  ;;  %v1534_v9 = vadd.f32 %v1533_v42, %v1437_v1  ;;  %v1562_v47 = vmax.f32 %v1542_v52, 0.0  ;;  %3014 = vmatprep.subr.bf16.mxu1 %v3235_v17  ;;  %v1814_v28 = vunpack.c.h.bf16 %v1795_v58  ;;  %v1797_v52 = vld [vmem:[%s4308_s5 + $0x20] sm:$0xff] }
 0x17e   :  { %v3009_v6 = vpop.f32.mrf.mxu0 }
 0x17f   :  { %v1545_v13 = vadd.f32 %v3009_v6, %v1448_v59  ;;  %1733 = vmatmul.mubr.bf16.gmra.mxu1 %v1566_v54  ;;  %v1560_v60 = vmax.f32 %v1534_v9, 0.0  ;;  %v1596_v54 = vsub.s32 1, %v1591_v61  ;;  %v1816_v9 = vunpack.c.h.bf16 %v1796_v19 }
 0x180   :  { %v1536_v43 = vpop.f32.mrf.mxu0  ;;  %1742 = vmatprep.mubr.bf16.mxu1 %v4352_v16 }
 0x181   :  { %v1563_v21 = vmax.f32 %v1545_v13, 0.0  ;;  %v1537_v15 = vadd.f32 %v1536_v43, %v1440_v38  ;;  %v4130_v62 = vrot.slane %v1588_v50, %v1596_v54 }
 0x183   :  { %v1571_v27 = vpack.c.bf16 %v1563_v21, %v1562_v47  ;;  %v1561_v44 = vmax.f32 %v1537_v15, 0.0  ;;  %v1817_v47 = vunpack.c.l.bf16 %v1797_v52 }
 0x185   :  { %v1570_v20 = vpack.c.bf16 %v1561_v44, %v1560_v60 }
 0x187   :  { %1743 = vmatmul.mubr.bf16.gmra.mxu1 %v1567_v3  ;;  %v3236_v3 = vld [vmem:[%s4306_s6 + $0x18] sm:$0xff]  }
 0x188   :  { %1752 = vmatprep.mubr.bf16.mxu1 %v4352_v16  ;;  %2923 = vmatpush3.bf16.msra.mxu0 %v3236_v3 }
 0x189   :  { %3022 = vmatpush3.bf16.msra.mxu1 %v3236_v3  ;;  %2924 = vmatprep.subr.bf16.mxu0 %v3237_v7 }
 0x18a   :  { %3015 = vmatprep.subr.bf16.mxu1 %v3237_v7 }
 0x18f   :  { %1753 = vmatmul.mubr.bf16.gmra.mxu1 %v1568_v46  ;;  %v1815_v46 = vunpack.c.l.bf16 %v1796_v19 }
 0x190   :  { %1762 = vmatprep.mubr.bf16.mxu1 %v4352_v16 }
 0x197   :  { %1763 = vmatmul.mubr.bf16.gmra.mxu1 %v1569_v22 }
 0x198   :  { %1772 = vmatprep.mubr.bf16.mxu1 %v4352_v16 }
 0x19f   :  { %1773 = vmatmul.mubr.bf16.gmra.mxu1 %v1570_v20  ;;  %v1798_v20 = vld [vmem:[%s4308_s5 + $0x28] sm:$0xff] }
 0x1a0   :  { %1782 = vmatprep.mubr.bf16.mxu1 %v4352_v16  ;;  %v3238_v16 = vld [vmem:[%s4306_s6 + $0x10] sm:$0xff]   ;;  %v1819_v61 = vunpack.c.l.bf16 %v1798_v20 }
 0x1a1   :  { %2925 = vmatpush3.bf16.msra.mxu0 %v3238_v16  ;;  %3023 = vmatpush3.bf16.msra.mxu1 %v3238_v16  ;;  %v1818_v16 = vunpack.c.h.bf16 %v1797_v52 }
 0x1a2   :  { %2926 = vmatprep.subr.bf16.mxu0 %v3239_v8  ;;  %3016 = vmatprep.subr.bf16.mxu1 %v3239_v8 }
 0x1a5   :  { %2927 = vmatpush3.bf16.msra.mxu0 %v3240_v23  ;;  %3024 = vmatpush3.bf16.msra.mxu1 %v3240_v23 }
 0x1a6   :  { %2928 = vmatprep.subr.bf16.mxu0 %v3241_v30  ;;  %3017 = vmatprep.subr.bf16.mxu1 %v3241_v30 }
 0x1a7   :  { %1783 = vmatmul.mubr.bf16.gmra.mxu1 %v1571_v27 }
 0x1a9   :  { %2929 = vmatpush3.bf16.msra.mxu0 %v3242_v41  ;;  %3025 = vmatpush3.bf16.msra.mxu1 %v3242_v41 }
 0x22f   :  { %v1714_v12 = vpop.f32.mrf.mxu1 }
 0x230   :  { %v1715_v37 = vadd.f32 %v1714_v12, %v4128_v0  ;;  %v1820_v12 = vunpack.c.h.bf16 %v1798_v20 }
 0x231   :  { %v1716_v26 = vpop.f32.mrf.mxu1 }
 0x232   :  { %v1841_v63 = vadd.f32 %v1809_v48, %v1715_v37  ;;  %v1717_v32 = vadd.f32 %v1716_v26, %v4130_v62 }
 0x233   :  { %v1718_v51 = vpop.f32.mrf.mxu1 }
 0x234   :  { %v1842_v40 = vadd.f32 %v1810_v31, %v1717_v32  ;;  %v1719_v33 = vadd.f32 %v1718_v51, %v4128_v0  ;;  %v1873_v35 = vmax.f32 %v1841_v63, 0.0  ;;  %v1821_v31 = vunpack.c.l.bf16 %v1799_v49 }
 0x235   :  { %v1720_v11 = vpop.f32.mrf.mxu1 }
 0x236   :  { %v1874_v39 = vmax.f32 %v1842_v40, 0.0  ;;  %v1843_v14 = vadd.f32 %v1811_v2, %v1719_v33  ;;  %v1721_v24 = vadd.f32 %v1720_v11, %v4130_v62  ;;  %v1800_v40 = vld [vmem:[%s4308_s5 + $0x38] sm:$0xff] }
 0x237   :  { %v1724_v18 = vpop.f32.mrf.mxu1  ;;  %v1823_v19 = vunpack.c.l.bf16 %v1800_v40 }
 0x238   :  { %v2563_v56 = vpack.c.bf16 %v1874_v39, %v1873_v35  ;;  %v1844_v57 = vadd.f32 %v1812_v36, %v1721_v24  ;;  %v1725_v10 = vadd.f32 %v1724_v18, %v4128_v0  ;;  %v1875_v22 = vmax.f32 %v1843_v14, 0.0 }
 0x239   :  { %v1726_v25 = vpop.f32.mrf.mxu1 }
 0x23a   :  { %2001 = vst [vmem:[%s4309_s8] sm:$0xff] %v2563_v56  ;;  %v1876_v34 = vmax.f32 %v1844_v57, 0.0  ;;  %v1845_v42 = vadd.f32 %v1813_v4, %v1725_v10  ;;  %v1727_v29 = vadd.f32 %v1726_v25, %v4130_v62  ;;  %v1905_v13 = vpack.c.bf16 %v1875_v22, %v1873_v35  ;;  %v1801_v56 = vld [vmem:[%s4308_s5 + $0x40] sm:$0xff] }
 0x23b   :  { %v1728_v5 = vpop.f32.mrf.mxu1  ;;  %v1822_v4 = vunpack.c.h.bf16 %v1799_v49  ;;  %v1824_v25 = vunpack.c.h.bf16 %v1800_v40 }
 0x23c   :  { %v2564_v1 = vpack.c.bf16 %v1876_v34, %v1875_v22  ;;  %v1846_v59 = vadd.f32 %v1814_v28, %v1727_v29  ;;  %v1729_v6 = vadd.f32 %v1728_v5, %v4128_v0  ;;  %v1906_v43 = vpack.c.bf16 %v1876_v34, %v1874_v39 }
 0x23d   :  { %v1730_v38 = vpop.f32.mrf.mxu1  ;;  %v1877_v21 = vmax.f32 %v1845_v42, 0.0  ;;  %v1825_v29 = vunpack.c.l.bf16 %v1801_v56 }
 0x23e   :  { %2002 = vst [vmem:[%s4309_s8 + $0x8] sm:$0xff] %v2564_v1  ;;  %v1878_v15 = vmax.f32 %v1846_v59, 0.0  ;;  %v1847_v60 = vadd.f32 %v1815_v46, %v1729_v6  ;;  %v1731_v27 = vadd.f32 %v1730_v38, %v4130_v62  ;;  %2184 = vmatprep.mubr.bf16.mxu0 %v1906_v43 }
 0x23f   :  { %v1734_v44 = vpop.f32.mrf.mxu1  ;;  %2185 = vmatmul.mubr.bf16.vlgmr.msra.gmra.mxu0 %v1905_v13 }
 0x240   :  { %v2565_v17 = vpack.c.bf16 %v1878_v15, %v1877_v21  ;;  %v1848_v3 = vadd.f32 %v1816_v9, %v1731_v27  ;;  %v1735_v7 = vadd.f32 %v1734_v44, %v4128_v0  ;;  %v1879_v8 = vmax.f32 %v1847_v60, 0.0  ;;  %v1802_v9 = vld [vmem:[%s4308_s5 + $0x48] sm:$0xff] }
 0x241   :  { %v1736_v23 = vpop.f32.mrf.mxu1  ;;  %v1827_v20 = vunpack.c.l.bf16 %v1802_v9 }
 0x242   :  { %2003 = vst [vmem:[%s4309_s8 + $0x10] sm:$0xff] %v2565_v17  ;;  %v1880_v30 = vmax.f32 %v1848_v3, 0.0  ;;  %v1849_v41 = vadd.f32 %v1817_v47, %v1735_v7  ;;  %v1737_v55 = vadd.f32 %v1736_v23, %v4130_v62  ;;  %v1907_v26 = vpack.c.bf16 %v1879_v8, %v1877_v21  ;;  %v1803_v17 = vld [vmem:[%s4308_s5 + $0x50] sm:$0xff] }
 0x243   :  { %v1738_v50 = vpop.f32.mrf.mxu1  ;;  %v1826_v47 = vunpack.c.h.bf16 %v1801_v56  ;;  %v1828_v23 = vunpack.c.h.bf16 %v1802_v9 }
 0x244   :  { %v2566_v54 = vpack.c.bf16 %v1880_v30, %v1879_v8  ;;  %v1850_v45 = vadd.f32 %v1818_v16, %v1737_v55  ;;  %v1739_v48 = vadd.f32 %v1738_v50, %v4128_v0  ;;  %v1908_v37 = vpack.c.bf16 %v1880_v30, %v1878_v15 }
 0x245   :  { %v1740_v53 = vpop.f32.mrf.mxu1  ;;  %v1881_v63 = vmax.f32 %v1849_v41, 0.0  ;;  %v1829_v55 = vunpack.c.l.bf16 %v1803_v17 }
 0x246   :  { %2004 = vst [vmem:[%s4309_s8 + $0x18] sm:$0xff] %v2566_v54  ;;  %v1882_v32 = vmax.f32 %v1850_v45, 0.0  ;;  %v1851_v2 = vadd.f32 %v1819_v61, %v1739_v48  ;;  %v1741_v58 = vadd.f32 %v1740_v53, %v4130_v62  ;;  %2192 = vmatprep.mubr.bf16.mxu0 %v1908_v37 }
 0x247   :  { %v1744_v51 = vpop.f32.mrf.mxu1  ;;  %2193 = vmatmul.mubr.bf16.gmra.mxu0 %v1907_v26  ;;  %v1830_v26 = vunpack.c.h.bf16 %v1803_v17 }
 0x248   :  { %v2567_v33 = vpack.c.bf16 %v1882_v32, %v1881_v63  ;;  %v1852_v36 = vadd.f32 %v1820_v12, %v1741_v58  ;;  %v1745_v11 = vadd.f32 %v1744_v51, %v4128_v0  ;;  %v1883_v35 = vmax.f32 %v1851_v2, 0.0  ;;  %v1804_v12 = vld [vmem:[%s4308_s5 + $0x58] sm:$0xff] }
 0x249   :  { %v1746_v39 = vpop.f32.mrf.mxu1  ;;  %v1831_v40 = vunpack.c.l.bf16 %v1804_v12 }
 0x24a   :  { %2005 = vst [vmem:[%s4309_s8 + $0x20] sm:$0xff] %v2567_v33  ;;  %v1884_v14 = vmax.f32 %v1852_v36, 0.0  ;;  %v1853_v24 = vadd.f32 %v1821_v31, %v1745_v11  ;;  %v1747_v18 = vadd.f32 %v1746_v39, %v4130_v62  ;;  %v1909_v46 = vpack.c.bf16 %v1883_v35, %v1881_v63  ;;  %v1805_v33 = vld [vmem:[%s4308_s5 + $0x60] sm:$0xff] }
 0x24b   :  { %v1748_v57 = vpop.f32.mrf.mxu1  ;;  %v1832_v39 = vunpack.c.h.bf16 %v1804_v12 }
 0x24c   :  { %v2568_v10 = vpack.c.bf16 %v1884_v14, %v1883_v35  ;;  %v1854_v28 = vadd.f32 %v1822_v4, %v1747_v18  ;;  %v1749_v22 = vadd.f32 %v1748_v57, %v4128_v0  ;;  %v1910_v42 = vpack.c.bf16 %v1884_v14, %v1882_v32 }
 0x24d   :  { %v1750_v34 = vpop.f32.mrf.mxu1  ;;  %v1885_v52 = vmax.f32 %v1853_v24, 0.0  ;;  %v1833_v18 = vunpack.c.l.bf16 %v1805_v33 }
 0x24e   :  { %2006 = vst [vmem:[%s4309_s8 + $0x28] sm:$0xff] %v2568_v10  ;;  %v1886_v5 = vmax.f32 %v1854_v28, 0.0  ;;  %v1855_v1 = vadd.f32 %v1823_v19, %v1749_v22  ;;  %v1751_v59 = vadd.f32 %v1750_v34, %v4130_v62  ;;  %2200 = vmatprep.mubr.bf16.mxu0 %v1910_v42 }
 0x24f   :  { %v1754_v6 = vpop.f32.mrf.mxu1  ;;  %2201 = vmatmul.mubr.bf16.gmra.mxu0 %v1909_v46  ;;  %v1834_v46 = vunpack.c.h.bf16 %v1805_v33 }
 0x250   :  { %v2569_v13 = vpack.c.bf16 %v1886_v5, %v1885_v52  ;;  %v1856_v38 = vadd.f32 %v1824_v25, %v1751_v59  ;;  %v1755_v43 = vadd.f32 %v1754_v6, %v4128_v0  ;;  %v1887_v21 = vmax.f32 %v1855_v1, 0.0  ;;  %v1806_v25 = vld [vmem:[%s4308_s5 + $0x68] sm:$0xff] }
 0x251   :  { %v1756_v15 = vpop.f32.mrf.mxu1  ;;  %v1835_v9 = vunpack.c.l.bf16 %v1806_v25 }
 0x252   :  { %2007 = vst [vmem:[%s4309_s8 + $0x30] sm:$0xff] %v2569_v13  ;;  %v1888_v60 = vmax.f32 %v1856_v38, 0.0  ;;  %v1857_v27 = vadd.f32 %v1825_v29, %v1755_v43  ;;  %v1757_v44 = vadd.f32 %v1756_v15, %v4130_v62  ;;  %v1911_v61 = vpack.c.bf16 %v1887_v21, %v1885_v52  ;;  %v1807_v13 = vld [vmem:[%s4308_s5 + $0x70] sm:$0xff] }
 0x253   :  { %v1758_v3 = vpop.f32.mrf.mxu1  ;;  %v1836_v15 = vunpack.c.h.bf16 %v1806_v25 }
 0x254   :  { %v2570_v7 = vpack.c.bf16 %v1888_v60, %v1887_v21  ;;  %v1858_v16 = vadd.f32 %v1826_v47, %v1757_v44  ;;  %v1759_v8 = vadd.f32 %v1758_v3, %v4128_v0  ;;  %v1912_v41 = vpack.c.bf16 %v1888_v60, %v1886_v5 }
 0x255   :  { %v1760_v30 = vpop.f32.mrf.mxu1  ;;  %v1889_v49 = vmax.f32 %v1857_v27, 0.0  ;;  %v1837_v44 = vunpack.c.l.bf16 %v1807_v13 }
 0x256   :  { %2008 = vst [vmem:[%s4309_s8 + $0x38] sm:$0xff] %v2570_v7  ;;  %v1890_v50 = vmax.f32 %v1858_v16, 0.0  ;;  %v1859_v54 = vadd.f32 %v1827_v20, %v1759_v8  ;;  %v1761_v45 = vadd.f32 %v1760_v30, %v4130_v62  ;;  %2208 = vmatprep.mubr.bf16.mxu0 %v1912_v41 }
 0x257   :  { %v1764_v48 = vpop.f32.mrf.mxu1  ;;  %2209 = vmatmul.mubr.bf16.gmra.mxu0 %v1911_v61  ;;  %v1838_v61 = vunpack.c.h.bf16 %v1807_v13 }
 0x258   :  { %v2571_v53 = vpack.c.bf16 %v1890_v50, %v1889_v49  ;;  %v1860_v37 = vadd.f32 %v1828_v23, %v1761_v45  ;;  %v1765_v31 = vadd.f32 %v1764_v48, %v4128_v0  ;;  %v1891_v63 = vmax.f32 %v1859_v54, 0.0  ;;  %v1808_v23 = vld [vmem:[%s4308_s5 + $0x78] sm:$0xff] }
 0x259   :  { %v1766_v32 = vpop.f32.mrf.mxu1  ;;  %v1839_v12 = vunpack.c.l.bf16 %v1808_v23 }
 0x25a   :  { %2009 = vst [vmem:[%s4309_s8 + $0x40] sm:$0xff] %v2571_v53  ;;  %v1892_v2 = vmax.f32 %v1860_v37, 0.0  ;;  %v1861_v58 = vadd.f32 %v1829_v55, %v1765_v31  ;;  %v1767_v51 = vadd.f32 %v1766_v32, %v4130_v62  ;;  %v1913_v19 = vpack.c.bf16 %v1891_v63, %v1889_v49 }
 0x25b   :  { %v1768_v36 = vpop.f32.mrf.mxu1 }
 0x25c   :  { %v2572_v11 = vpack.c.bf16 %v1892_v2, %v1891_v63  ;;  %v1862_v4 = vadd.f32 %v1830_v26, %v1767_v51  ;;  %v1769_v35 = vadd.f32 %v1768_v36, %v4128_v0  ;;  %v1914_v24 = vpack.c.bf16 %v1892_v2, %v1890_v50 }
 0x25d   :  { %v1770_v14 = vpop.f32.mrf.mxu1  ;;  %v1893_v56 = vmax.f32 %v1861_v58, 0.0  ;;  %v1840_v63 = vunpack.c.h.bf16 %v1808_v23 }
 0x25e   :  { %2010 = vst [vmem:[%s4309_s8 + $0x48] sm:$0xff] %v2572_v11  ;;  %v1894_v57 = vmax.f32 %v1862_v4, 0.0  ;;  %v1863_v10 = vadd.f32 %v1831_v40, %v1769_v35  ;;  %v1771_v28 = vadd.f32 %v1770_v14, %v4130_v62  ;;  %2216 = vmatprep.mubr.bf16.mxu0 %v1914_v24 }
 0x25f   :  { %v1774_v22 = vpop.f32.mrf.mxu1  ;;  %2217 = vmatmul.mubr.bf16.gmra.mxu0 %v1913_v19 }
 0x260   :  { %v2573_v34 = vpack.c.bf16 %v1894_v57, %v1893_v56  ;;  %v1864_v42 = vadd.f32 %v1832_v39, %v1771_v28  ;;  %v1775_v29 = vadd.f32 %v1774_v22, %v4128_v0  ;;  %v1895_v52 = vmax.f32 %v1863_v10, 0.0 }
 0x261   :  { %v1776_v5 = vpop.f32.mrf.mxu1 }
 0x262   :  { %2011 = vst [vmem:[%s4309_s8 + $0x50] sm:$0xff] %v2573_v34  ;;  %v1896_v1 = vmax.f32 %v1864_v42, 0.0  ;;  %v1865_v59 = vadd.f32 %v1833_v18, %v1775_v29  ;;  %v1777_v6 = vadd.f32 %v1776_v5, %v4130_v62  ;;  %v1915_v20 = vpack.c.bf16 %v1895_v52, %v1893_v56  ;;  %v4260_v56 = vld [vmem:[%s4310_s7] ss:$0 sm:$0xff] }
 0x263   :  { %v1778_v38 = vpop.f32.mrf.mxu1 }
 0x264   :  { %v2574_v43 = vpack.c.bf16 %v1896_v1, %v1895_v52  ;;  %v1866_v47 = vadd.f32 %v1834_v46, %v1777_v6  ;;  %v1779_v21 = vadd.f32 %v1778_v38, %v4128_v0  ;;  %v1916_v27 = vpack.c.bf16 %v1896_v1, %v1894_v57 }
 0x265   :  { %v1780_v60 = vpop.f32.mrf.mxu1  ;;  %v1897_v17 = vmax.f32 %v1865_v59, 0.0 }
 0x266   :  { %2012 = vst [vmem:[%s4309_s8 + $0x58] sm:$0xff] %v2574_v43  ;;  %v1898_v3 = vmax.f32 %v1866_v47, 0.0  ;;  %v1867_v7 = vadd.f32 %v1835_v9, %v1779_v21  ;;  %v1781_v16 = vadd.f32 %v1780_v60, %v4130_v62  ;;  %2224 = vmatprep.mubr.bf16.mxu0 %v1916_v27 }
 0x267   :  { %v1784_v8 = vpop.f32.mrf.mxu1  ;;  %2225 = vmatmul.mubr.bf16.gmra.mxu0 %v1915_v20 }
 0x268   :  { %v2575_v30 = vpack.c.bf16 %v1898_v3, %v1897_v17  ;;  %v1868_v41 = vadd.f32 %v1836_v15, %v1781_v16  ;;  %v1785_v55 = vadd.f32 %v1784_v8, %v4128_v0  ;;  %v1899_v49 = vmax.f32 %v1867_v7, 0.0 }
 0x269   :  { %v1786_v50 = vpop.f32.mrf.mxu1 }
 0x26a   :  { %2013 = vst [vmem:[%s4309_s8 + $0x60] sm:$0xff] %v2575_v30  ;;  %v1900_v54 = vmax.f32 %v1868_v41, 0.0  ;;  %v1869_v45 = vadd.f32 %v1837_v44, %v1785_v55  ;;  %v1787_v48 = vadd.f32 %v1786_v50, %v4130_v62  ;;  %v1917_v32 = vpack.c.bf16 %v1899_v49, %v1897_v17 }
 0x26b   :  { %v1788_v53 = vpop.f32.mrf.mxu1 }
 0x26c   :  { %v2576_v37 = vpack.c.bf16 %v1900_v54, %v1899_v49  ;;  %v1870_v31 = vadd.f32 %v1838_v61, %v1787_v48  ;;  %v1789_v26 = vadd.f32 %v1788_v53, %v4128_v0  ;;  %v1918_v58 = vpack.c.bf16 %v1900_v54, %v1898_v3 }
 0x26d   :  { %v1790_v2 = vpop.f32.mrf.mxu1  ;;  %v1901_v51 = vmax.f32 %v1869_v45, 0.0 }
 0x26e   :  { %2014 = vst [vmem:[%s4309_s8 + $0x68] sm:$0xff] %v2576_v37  ;;  %v1902_v40 = vmax.f32 %v1870_v31, 0.0  ;;  %v1871_v33 = vadd.f32 %v1839_v12, %v1789_v26  ;;  %v1791_v36 = vadd.f32 %v1790_v2, %v4130_v62  ;;  %2232 = vmatprep.mubr.bf16.mxu1 %v1918_v58 }
 0x26f   :  { %2233 = vmatmul.mubr.bf16.vlgmr.msra.gmra.mxu1 %v1917_v32 }
 0x270   :  { %v2577_v11 = vpack.c.bf16 %v1902_v40, %v1901_v51  ;;  %v1872_v4 = vadd.f32 %v1840_v63, %v1791_v36  ;;  %v1903_v0 = vmax.f32 %v1871_v33, 0.0 }
 0x272   :  { %2015 = vst [vmem:[%s4309_s8 + $0x70] sm:$0xff] %v2577_v11  ;;  %v1904_v35 = vmax.f32 %v1872_v4, 0.0  ;;  %v1919_v24 = vpack.c.bf16 %v1903_v0, %v1901_v51 }
 0x274   :  { %v2578_v39 = vpack.c.bf16 %v1904_v35, %v1903_v0  ;;  %v1920_v14 = vpack.c.bf16 %v1904_v35, %v1902_v40 }
 0x276   :  { %2016 = vst [vmem:[%s4309_s8 + $0x78] sm:$0xff] %v2578_v39  ;;  %2240 = vmatprep.mubr.bf16.mxu1 %v1920_v14 }
 0x277   :  { %2241 = vmatmul.mubr.bf16.gmra.mxu1 %v1919_v24 }
 0x2ff   :  { %v2930_v62 = vpop.f32.mrf.mxu0 }
 0x301   :  { %v2931_v18 = vpop.f32.mrf.mxu0 }
 0x302   :  { %v2932_v19 = vadd.f32 %v2931_v18, %v2930_v62 }
 0x303   :  { %v2933_v57 = vpop.f32.mrf.mxu0 }
 0x304   :  { %v2187_v28 = vadd.f32 %v2932_v19, %v4260_v56 }
 0x305   :  { %v2934_v10 = vpop.f32.mrf.mxu0 }
 0x306   :  { %v2935_v22 = vadd.f32 %v2934_v10, %v2933_v57  ;;  %v2249_v29 = vmax.f32 %v2187_v28, 0.0 }
 0x307   :  { %v2936_v25 = vpop.f32.mrf.mxu0 }
 0x308   :  { %v2190_v34 = vadd.f32 %v2935_v22, %v4260_v56 }
 0x309   :  { %v2937_v42 = vpop.f32.mrf.mxu0 }
 0x30a   :  { %v2250_v46 = vmax.f32 %v2190_v34, 0.0  ;;  %v2938_v52 = vadd.f32 %v2937_v42, %v2936_v25 }
 0x30b   :  { %v2939_v5 = vpop.f32.mrf.mxu0 }
 0x30c   :  { %v2598_v1 = vpack.c.bf16 %v2250_v46, %v2249_v29  ;;  %v2195_v6 = vadd.f32 %v2938_v52, %v4260_v56 }
 0x30d   :  { %v2940_v59 = vpop.f32.mrf.mxu0 }
 0x30e   :  { %2599 = vst [vmem:[%s4311_s9] sm:$0xff] %v2598_v1   ;;  %v2941_v9 = vadd.f32 %v2940_v59, %v2939_v5  ;;  %v2251_v47 = vmax.f32 %v2195_v6, 0.0 }
 0x30f   :  { %v2942_v13 = vpop.f32.mrf.mxu0 }
 0x310   :  { %v2198_v38 = vadd.f32 %v2941_v9, %v4260_v56 }
 0x311   :  { %v2943_v43 = vpop.f32.mrf.mxu0 }
 0x312   :  { %v2252_v21 = vmax.f32 %v2198_v38, 0.0  ;;  %v2944_v15 = vadd.f32 %v2943_v43, %v2942_v13 }
 0x313   :  { %v2945_v60 = vpop.f32.mrf.mxu0 }
 0x314   :  { %v2603_v27 = vpack.c.bf16 %v2252_v21, %v2251_v47  ;;  %v2203_v20 = vadd.f32 %v2944_v15, %v4260_v56 }
 0x315   :  { %v2946_v44 = vpop.f32.mrf.mxu0 }
 0x316   :  { %2635 = vst [vmem:[%s4311_s9 + $0x8] sm:$0xff] %v2603_v27   ;;  %v2947_v17 = vadd.f32 %v2946_v44, %v2945_v60  ;;  %v2253_v8 = vmax.f32 %v2203_v20, 0.0 }
 0x317   :  { %v2948_v3 = vpop.f32.mrf.mxu0 }
 0x318   :  { %v2206_v7 = vadd.f32 %v2947_v17, %v4260_v56 }
 0x319   :  { %v2949_v16 = vpop.f32.mrf.mxu0 }
 0x31a   :  { %v2254_v23 = vmax.f32 %v2206_v7, 0.0  ;;  %v2950_v30 = vadd.f32 %v2949_v16, %v2948_v3 }
 0x31b   :  { %v2951_v41 = vpop.f32.mrf.mxu0 }
 0x31c   :  { %v2608_v55 = vpack.c.bf16 %v2254_v23, %v2253_v8  ;;  %v2211_v49 = vadd.f32 %v2950_v30, %v4260_v56 }
 0x31d   :  { %v2952_v61 = vpop.f32.mrf.mxu0 }
 0x31e   :  { %2636 = vst [vmem:[%s4311_s9 + $0x10] sm:$0xff] %v2608_v55   ;;  %v2953_v50 = vadd.f32 %v2952_v61, %v2951_v41  ;;  %v2255_v12 = vmax.f32 %v2211_v49, 0.0 }
 0x31f   :  { %v2954_v54 = vpop.f32.mrf.mxu0 }
 0x320   :  { %v2214_v45 = vadd.f32 %v2953_v50, %v4260_v56 }
 0x321   :  { %v2955_v48 = vpop.f32.mrf.mxu0 }
 0x322   :  { %v2256_v53 = vmax.f32 %v2214_v45, 0.0  ;;  %v2956_v37 = vadd.f32 %v2955_v48, %v2954_v54 }
 0x323   :  { %v2957_v31 = vpop.f32.mrf.mxu0 }
 0x324   :  { %v2613_v26 = vpack.c.bf16 %v2256_v53, %v2255_v12  ;;  %v2219_v32 = vadd.f32 %v2956_v37, %v4260_v56 }
 0x325   :  { %v2958_v63 = vpop.f32.mrf.mxu0 }
 0x326   :  { %2637 = vst [vmem:[%s4311_s9 + $0x18] sm:$0xff] %v2613_v26   ;;  %v2959_v2 = vadd.f32 %v2958_v63, %v2957_v31  ;;  %v2257_v33 = vmax.f32 %v2219_v32, 0.0 }
 0x327   :  { %v2960_v58 = vpop.f32.mrf.mxu0 }
 0x328   :  { %v2222_v51 = vadd.f32 %v2959_v2, %v4260_v56 }
 0x329   :  { %v2961_v40 = vpop.f32.mrf.mxu0 }
 0x32a   :  { %v2258_v36 = vmax.f32 %v2222_v51, 0.0  ;;  %v2962_v11 = vadd.f32 %v2961_v40, %v2960_v58 }
 0x32b   :  { %v2963_v4 = vpop.f32.mrf.mxu0 }
 0x32c   :  { %v2618_v0 = vpack.c.bf16 %v2258_v36, %v2257_v33  ;;  %v2227_v39 = vadd.f32 %v2962_v11, %v4260_v56 }
 0x32d   :  { %v2964_v35 = vpop.f32.mrf.mxu0 }
 0x32e   :  { %2638 = vst [vmem:[%s4311_s9 + $0x20] sm:$0xff] %v2618_v0   ;;  %v2965_v14 = vadd.f32 %v2964_v35, %v2963_v4  ;;  %v2259_v19 = vmax.f32 %v2227_v39, 0.0 }
 0x32f   :  { %v2966_v24 = vpop.f32.mrf.mxu1 }
 0x330   :  { %v2230_v62 = vadd.f32 %v2965_v14, %v4260_v56 }
 0x331   :  { %v2967_v18 = vpop.f32.mrf.mxu1 }
 0x332   :  { %v2260_v57 = vmax.f32 %v2230_v62, 0.0  ;;  %v2968_v10 = vadd.f32 %v2967_v18, %v2966_v24 }
 0x333   :  { %v2969_v28 = vpop.f32.mrf.mxu1 }
 0x334   :  { %v2623_v22 = vpack.c.bf16 %v2260_v57, %v2259_v19  ;;  %v2235_v34 = vadd.f32 %v2968_v10, %v4260_v56 }
 0x335   :  { %v2970_v25 = vpop.f32.mrf.mxu1 }
 0x336   :  { %2639 = vst [vmem:[%s4311_s9 + $0x28] sm:$0xff] %v2623_v22   ;;  %v2971_v42 = vadd.f32 %v2970_v25, %v2969_v28  ;;  %v2261_v5 = vmax.f32 %v2235_v34, 0.0 }
 0x337   :  { %v2972_v29 = vpop.f32.mrf.mxu1 }
 0x338   :  { %v2238_v46 = vadd.f32 %v2971_v42, %v4260_v56 }
 0x339   :  { %v2973_v52 = vpop.f32.mrf.mxu1 }
 0x33a   :  { %v2262_v1 = vmax.f32 %v2238_v46, 0.0  ;;  %v2974_v59 = vadd.f32 %v2973_v52, %v2972_v29 }
 0x33b   :  { %v2975_v6 = vpop.f32.mrf.mxu1 }
 0x33c   :  { %v2628_v9 = vpack.c.bf16 %v2262_v1, %v2261_v5  ;;  %v2243_v38 = vadd.f32 %v2974_v59, %v4260_v56 }
 0x33d   :  { %v2976_v13 = vpop.f32.mrf.mxu1 }
 0x33e   :  { %2640 = vst [vmem:[%s4311_s9 + $0x30] sm:$0xff] %v2628_v9   ;;  %v2977_v43 = vadd.f32 %v2976_v13, %v2975_v6  ;;  %v2263_v21 = vmax.f32 %v2243_v38, 0.0 }
 0x340   :  { %v2246_v47 = vadd.f32 %v2977_v43, %v4260_v56 }
 0x342   :  { %v2264_v15 = vmax.f32 %v2246_v47, 0.0 }
 0x344   :  { %v2633_v60 = vpack.c.bf16 %v2264_v15, %v2263_v21 }
 0x346   :  { %2641 = vst [vmem:[%s4311_s9 + $0x38] sm:$0xff] %v2633_v60  }

// kernel: backbone_forward.25
= control target key start
LH: loop header
LB: loop body
LE: loop exit
PB: predicated region body
PF: predicated region fallthrough
CT: control target
= control target key end

     0   :  { %s3074_s1 = inlined_call_operand.vmem [shape: bf16[1152,128], index: 1, kind: input, shape index: {}]   ;;  %s3075_s0 = inlined_call_operand.vmem [shape: bf16[32,1152], index: 0, kind: input, shape index: {}]   ;;  %s3076_s3 = inlined_call_operand.vmem [shape: bf16[128,512], index: 3, kind: input, shape index: {}]   ;;  %s3077_s6 = inlined_call_operand.vmem [shape: bf16[512,128], index: 6, kind: input, shape index: {}]   ;;  %s3078_s2 = inlined_call_operand.vmem [shape: f32[1,128], index: 2, kind: input, shape index: {}]   ;;  %s3079_s4 = inlined_call_operand.vmem [shape: f32[1,512], index: 4, kind: input, shape index: {}]   ;;  %s3080_s5 = inlined_call_operand.vmem [shape: bf16[32,512], index: 5, kind: input, shape index: {}]   ;;  %s3081_s8 = inlined_call_operand.vmem [shape: bf16[32,512], index: 8, kind: output, shape index: {0}]   ;;  %s3082_s7 = inlined_call_operand.vmem [shape: f32[1,128], index: 7, kind: input, shape index: {}]   ;;  %s3083_s9 = inlined_call_operand.vmem [shape: bf16[32,128], index: 9, kind: output, shape index: {1}]  }
   0x1   :  { %v2209_v0 = vld [vmem:[%s3074_s1 + $0x78] sm:$0xff]   ;;  %v2213_v4 = vld [vmem:[%s3074_s1 + $0x70] sm:$0xff]   ;;  %v2217_v8 = vld [vmem:[%s3074_s1 + $0x68] sm:$0xff]  }
   0x2   :  { %v2210_v1 = vld [vmem:[%s3074_s1 + $0x38] sm:$0xff]   ;;  %1994 = vmatprep.subr.bf16.mxu0 %v2209_v0  ;;  %v2214_v5 = vld [vmem:[%s3074_s1 + $0x30] sm:$0xff]   ;;  %v2218_v9 = vld [vmem:[%s3074_s1 + $0x28] sm:$0xff]  }
   0x3   :  { %v2211_v2 = vld [vmem:[%s3074_s1 + $0xf8] sm:$0xff]   ;;  %1995 = vmatpush3.bf16.msra.mxu0 %v2210_v1  ;;  %v2215_v6 = vld [vmem:[%s3074_s1 + $0xf0] sm:$0xff]   ;;  %v2219_v10 = vld [vmem:[%s3074_s1 + $0xe8] sm:$0xff]  }
   0x4   :  { %v2212_v3 = vld [vmem:[%s3074_s1 + $0xb8] sm:$0xff]   ;;  %2022 = vmatprep.subr.bf16.mxu1 %v2211_v2  ;;  %1996 = vmatprep.subr.bf16.mxu0 %v2213_v4  ;;  %v2216_v7 = vld [vmem:[%s3074_s1 + $0xb0] sm:$0xff]   ;;  %v2220_v11 = vld [vmem:[%s3074_s1 + $0xa8] sm:$0xff]  }
   0x5   :  { %2023 = vmatpush3.bf16.msra.mxu1 %v2212_v3  ;;  %v2221_v12 = vld [vmem:[%s3074_s1 + $0x60] sm:$0xff]   ;;  %v2225_v16 = vld [vmem:[%s3074_s1 + $0x58] sm:$0xff]   ;;  %v2229_v20 = vld [vmem:[%s3074_s1 + $0x50] sm:$0xff]  }
   0x6   :  { %2024 = vmatprep.subr.bf16.mxu1 %v2215_v6  ;;  %v2222_v13 = vld [vmem:[%s3074_s1 + $0x20] sm:$0xff]   ;;  %v2226_v17 = vld [vmem:[%s3074_s1 + $0x18] sm:$0xff]   ;;  %v2230_v21 = vld [vmem:[%s3074_s1 + $0x10] sm:$0xff]  }
   0x7   :  { %1997 = vmatpush3.bf16.msra.mxu0 %v2214_v5  ;;  %v2223_v14 = vld [vmem:[%s3074_s1 + $0xe0] sm:$0xff]   ;;  %v2227_v18 = vld [vmem:[%s3074_s1 + $0xd8] sm:$0xff]   ;;  %v2231_v22 = vld [vmem:[%s3074_s1 + $0xd0] sm:$0xff]  }
   0x8   :  { %1998 = vmatprep.subr.bf16.mxu0 %v2217_v8  ;;  %v2224_v15 = vld [vmem:[%s3074_s1 + $0xa0] sm:$0xff]   ;;  %v2228_v19 = vld [vmem:[%s3074_s1 + $0x98] sm:$0xff]   ;;  %v2232_v23 = vld [vmem:[%s3074_s1 + $0x90] sm:$0xff]  }
   0x9   :  { %2025 = vmatpush3.bf16.msra.mxu1 %v2216_v7  ;;  %v2233_v24 = vld [vmem:[%s3074_s1 + $0x48] sm:$0xff]   ;;  %v2237_v28 = vld [vmem:[%s3074_s1 + $0x40] sm:$0xff]   ;;  %v2244_v34 = vld [vmem:[%s3074_s1 + $0x178] sm:$0xff]  }
   0xa   :  { %2026 = vmatprep.subr.bf16.mxu1 %v2219_v10  ;;  %v2234_v25 = vld [vmem:[%s3074_s1 + $0x8] sm:$0xff]   ;;  %v2238_v29 = vld [vmem:[%s3074_s1] sm:$0xff]   ;;  %v2248_v37 = vld [vmem:[%s3074_s1 + $0x138] sm:$0xff]  }
   0xb   :  { %1999 = vmatpush3.bf16.msra.mxu0 %v2218_v9  ;;  %v2235_v26 = vld [vmem:[%s3074_s1 + $0xc8] sm:$0xff]   ;;  %v2239_v30 = vld [vmem:[%s3074_s1 + $0xc0] sm:$0xff]   ;;  %v2249_v38 = vld [vmem:[%s3074_s1 + $0x1f8] sm:$0xff]  }
   0xc   :  { %2000 = vmatprep.subr.bf16.mxu0 %v2221_v12  ;;  %v2236_v27 = vld [vmem:[%s3074_s1 + $0x88] sm:$0xff]   ;;  %v2240_v31 = vld [vmem:[%s3075_s0] ss:$36 sps:$4 sm:$0xff]   ;;  %v2250_v39 = vld [vmem:[%s3074_s1 + $0x1b8] sm:$0xff]  }
   0xd   :  { %2027 = vmatpush3.bf16.msra.mxu1 %v2220_v11  ;;  %v2242_v32 = vld [vmem:[%s3075_s0 + $0x4] ss:$36 sps:$4 sm:$0xff]   ;;  %v2247_v36 = vld [vmem:[%s3075_s0 + $0xc] ss:$36 sps:$4 sm:$0xff]   ;;  %v2263_v52 = vld [vmem:[%s3074_s1 + $0x158] sm:$0xff]  }
   0xe   :  { %2028 = vmatprep.subr.bf16.mxu1 %v2223_v14  ;;  %v2243_v33 = vld [vmem:[%s3074_s1 + $0x80] sm:$0xff]   ;;  %759 = vmatprep.mubr.bf16.mxu0 %v2242_v32  ;;  %v2245_v35 = vld [vmem:[%s3075_s0 + $0x8] ss:$36 sps:$4 sm:$0xff]   ;;  %v2251_v40 = vld [vmem:[%s3074_s1 + $0x170] sm:$0xff]  }
   0xf   :  { %2001 = vmatpush3.bf16.msra.mxu0 %v2222_v13  ;;  %808 = vmatprep.mubr.bf16.mxu1 %v2247_v36  ;;  %v2252_v41 = vld [vmem:[%s3074_s1 + $0x130] sm:$0xff]   ;;  %v2255_v44 = vld [vmem:[%s3074_s1 + $0x168] sm:$0xff]   ;;  %v2259_v48 = vld [vmem:[%s3074_s1 + $0x160] sm:$0xff]  }
  0x10   :  { %2002 = vmatprep.subr.bf16.mxu0 %v2225_v16  ;;  %v2253_v42 = vld [vmem:[%s3074_s1 + $0x1f0] sm:$0xff]   ;;  %v2256_v45 = vld [vmem:[%s3074_s1 + $0x128] sm:$0xff]   ;;  %v2260_v49 = vld [vmem:[%s3074_s1 + $0x120] sm:$0xff]  }
  0x11   :  { %2029 = vmatpush3.bf16.msra.mxu1 %v2224_v15  ;;  %v2254_v43 = vld [vmem:[%s3074_s1 + $0x1b0] sm:$0xff]   ;;  %v2257_v46 = vld [vmem:[%s3074_s1 + $0x1e8] sm:$0xff]   ;;  %v2261_v50 = vld [vmem:[%s3074_s1 + $0x1e0] sm:$0xff]  }
  0x12   :  { %2030 = vmatprep.subr.bf16.mxu1 %v2227_v18  ;;  %v2258_v47 = vld [vmem:[%s3074_s1 + $0x1a8] sm:$0xff]   ;;  %v2262_v51 = vld [vmem:[%s3074_s1 + $0x1a0] sm:$0xff]   ;;  %v2264_v53 = vld [vmem:[%s3074_s1 + $0x118] sm:$0xff]  }
  0x13   :  { %2003 = vmatpush3.bf16.msra.mxu0 %v2226_v17  ;;  %v2265_v54 = vld [vmem:[%s3075_s0 + $0x4c] ss:$36 sps:$4 sm:$0xff]   ;;  %v2267_v55 = vld [vmem:[%s3074_s1 + $0x1d8] sm:$0xff]   ;;  %v2281_v4 = vld [vmem:[%s3074_s1 + $0x140] sm:$0xff]  }
  0x14   :  { %2004 = vmatprep.subr.bf16.mxu0 %v2229_v20  ;;  %v2268_v56 = vld [vmem:[%s3075_s0 + $0x48] ss:$36 sps:$4 sm:$0xff]   ;;  %v2269_v57 = vld [vmem:[%s3074_s1 + $0x198] sm:$0xff]   ;;  %v2272_v59 = vld [vmem:[%s3074_s1 + $0x150] sm:$0xff]  }
  0x15   :  { %2031 = vmatpush3.bf16.msra.mxu1 %v2228_v19  ;;  %v2270_v58 = vld [vmem:[%s3075_s0 + $0x54] ss:$36 sps:$4 sm:$0xff]   ;;  %v2277_v0 = vld [vmem:[%s3074_s1 + $0x148] sm:$0xff]   ;;  %v2282_v5 = vld [vmem:[%s3074_s1 + $0x100] sm:$0xff]  }
  0x16   :  { %2032 = vmatprep.subr.bf16.mxu1 %v2231_v22  ;;  %v2273_v60 = vld [vmem:[%s3075_s0 + $0x50] ss:$36 sps:$4 sm:$0xff]   ;;  %v2278_v1 = vld [vmem:[%s3074_s1 + $0x108] sm:$0xff]   ;;  %v2283_v6 = vld [vmem:[%s3074_s1 + $0x1c0] sm:$0xff]  }
  0x17   :  { %2005 = vmatpush3.bf16.msra.mxu0 %v2230_v21  ;;  %v2274_v61 = vld [vmem:[%s3074_s1 + $0x110] sm:$0xff]   ;;  %v2279_v2 = vld [vmem:[%s3074_s1 + $0x1c8] sm:$0xff]   ;;  %v2287_v9 = vld [vmem:[%s3074_s1 + $0x180] sm:$0xff]  }
  0x18   :  { %2006 = vmatprep.subr.bf16.mxu0 %v2233_v24  ;;  %v2275_v62 = vld [vmem:[%s3074_s1 + $0x1d0] sm:$0xff]   ;;  %v2280_v3 = vld [vmem:[%s3074_s1 + $0x188] sm:$0xff]   ;;  %v2288_v10 = vld [vmem:[%s3074_s1 + $0x238] sm:$0xff]  }
  0x19   :  { %2033 = vmatpush3.bf16.msra.mxu1 %v2232_v23  ;;  %v2276_v63 = vld [vmem:[%s3074_s1 + $0x190] sm:$0xff]   ;;  %v2289_v11 = vld [vmem:[%s3075_s0 + $0x18] ss:$36 sps:$4 sm:$0xff]   ;;  %v2296_v16 = vld [vmem:[%s3074_s1 + $0x228] sm:$0xff]  }
  0x1a   :  { %2034 = vmatprep.subr.bf16.mxu1 %v2235_v26  ;;  %v2284_v7 = vld [vmem:[%s3075_s0 + $0x10] ss:$36 sps:$4 sm:$0xff]   ;;  %v2291_v12 = vld [vmem:[%s3075_s0 + $0x1c] ss:$36 sps:$4 sm:$0xff]   ;;  %v2297_v17 = vld [vmem:[%s3075_s0 + $0x64] ss:$36 sps:$4 sm:$0xff]  }
  0x1b   :  { %2007 = vmatpush3.bf16.msra.mxu0 %v2234_v25  ;;  %v2286_v8 = vld [vmem:[%s3075_s0 + $0x14] ss:$36 sps:$4 sm:$0xff]   ;;  %v2293_v14 = vld [vmem:[%s3075_s0 + $0x5c] ss:$36 sps:$4 sm:$0xff]   ;;  %v2303_v23 = vld [vmem:[%s3074_s1 + $0x208] sm:$0xff]  }
  0x1c   :  { %2008 = vmatprep.subr.bf16.mxu0 %v2237_v28  ;;  %v2292_v13 = vld [vmem:[%s3074_s1 + $0x230] sm:$0xff]   ;;  %v2295_v15 = vld [vmem:[%s3075_s0 + $0x58] ss:$36 sps:$4 sm:$0xff]   ;;  %v2299_v18 = vld [vmem:[%s3075_s0 + $0x60] ss:$36 sps:$4 sm:$0xff]  }
  0x1d   :  { %2035 = vmatpush3.bf16.msra.mxu1 %v2236_v27  ;;  %v2300_v19 = vld [vmem:[%s3074_s1 + $0x220] sm:$0xff]   ;;  %v2301_v20 = vld [vmem:[%s3074_s1 + $0x218] sm:$0xff]   ;;  %v2302_v22 = vld [vmem:[%s3074_s1 + $0x210] sm:$0xff]  }
  0x1e   :  { %2036 = vmatprep.subr.bf16.mxu1 %v2239_v30  ;;  %v2305_v21 = vld [vmem:[%s3075_s0 + $0x20] ss:$36 sps:$4 sm:$0xff]   ;;  %v2306_v25 = vld [vmem:[%s3075_s0 + $0x68] ss:$36 sps:$4 sm:$0xff]  }
  0x1f   :  { %2009 = vmatpush3.bf16.msra.mxu0 %v2238_v29  ;;  %v2304_v24 = vld [vmem:[%s3074_s1 + $0x200] sm:$0xff]   ;;  %v2310_v28 = vld [vmem:[%s3076_s3 + $0xe8] ss:$16 sps:$4 sm:$0xff]   ;;  %v2312_v29 = vld [vmem:[%s3076_s3 + $0xec] ss:$16 sps:$4 sm:$0xff]  }
  0x20   :  { %2050 = vmatprep.subr.bf16.mxu0 %v2244_v34  ;;  %v2309_v26 = vld [vmem:[%s3076_s3 + $0xe4] ss:$16 sps:$4 sm:$0xff]   ;;  %v2307_v27 = vld [vmem:[%s3076_s3 + $0xe0] ss:$16 sps:$4 sm:$0xff]   ;;  %v2324_v36 = vld [vmem:[%s3076_s3 + $0xac] ss:$16 sps:$4 sm:$0xff]  }
  0x21   :  { %2037 = vmatpush3.bf16.msra.mxu1 %v2243_v33  ;;  %v2315_v30 = vld [vmem:[%s3076_s3 + $0xc4] ss:$16 sps:$4 sm:$0xff]   ;;  %v2313_v32 = vld [vmem:[%s3076_s3 + $0xc0] ss:$16 sps:$4 sm:$0xff]   ;;  %v2316_v33 = vld [vmem:[%s3076_s3 + $0xc8] ss:$16 sps:$4 sm:$0xff]  }
  0x22   :  { %760 = vmatmul.mubr.bf16.vlgmr.msra.gmra.mxu0 %v2240_v31  ;;  %2078 = vmatprep.subr.bf16.mxu1 %v2249_v38  ;;  %v2318_v31 = vld [vmem:[%s3076_s3 + $0xcc] ss:$16 sps:$4 sm:$0xff]   ;;  %v2321_v34 = vld [vmem:[%s3076_s3 + $0xa4] ss:$16 sps:$4 sm:$0xff]  }
  0x23   :  { %2051 = vmatpush3.bf16.msra.mxu0 %v2248_v37  ;;  %767 = vmatprep.mubr.bf16.mxu0 %v2265_v54  ;;  %v2322_v37 = vld [vmem:[%s3076_s3 + $0xa8] ss:$16 sps:$4 sm:$0xff]   ;;  %v2327_v38 = vld [vmem:[%s3076_s3 + $0x84] ss:$16 sps:$4 sm:$0xff]  }
  0x24   :  { %809 = vmatmul.mubr.bf16.vlgmr.msra.gmra.mxu1 %v2245_v35  ;;  %2052 = vmatprep.subr.bf16.mxu0 %v2251_v40  ;;  %v2319_v35 = vld [vmem:[%s3076_s3 + $0xa0] ss:$16 sps:$4 sm:$0xff]   ;;  %v2351_v54 = vld [vmem:[%s3076_s3 + $0x4] ss:$16 sps:$4 sm:$0xff]  }
  0x25   :  { %2079 = vmatpush3.bf16.msra.mxu1 %v2250_v39  ;;  %816 = vmatprep.mubr.bf16.mxu1 %v2270_v58  ;;  %v2330_v39 = vld [vmem:[%s3076_s3 + $0x8c] ss:$16 sps:$4 sm:$0xff]   ;;  %v2325_v40 = vld [vmem:[%s3076_s3 + $0x80] ss:$16 sps:$4 sm:$0xff]   ;;  %v2387_v58 = vmov 0  }
  0x26   :  { %2080 = vmatprep.subr.bf16.mxu1 %v2253_v42  ;;  %v2333_v42 = vld [vmem:[%s3076_s3 + $0x64] ss:$16 sps:$4 sm:$0xff]  }
  0x27   :  { %2053 = vmatpush3.bf16.msra.mxu0 %v2252_v41  ;;  %v2328_v41 = vld [vmem:[%s3076_s3 + $0x88] ss:$16 sps:$4 sm:$0xff]  }
  0x28   :  { %2054 = vmatprep.subr.bf16.mxu0 %v2255_v44  ;;  %v2336_v44 = vld [vmem:[%s3076_s3 + $0x6c] ss:$16 sps:$4 sm:$0xff]  }
  0x29   :  { %2081 = vmatpush3.bf16.msra.mxu1 %v2254_v43  ;;  %v2331_v43 = vld [vmem:[%s3076_s3 + $0x60] ss:$16 sps:$4 sm:$0xff]  }
  0x2a   :  { %2082 = vmatprep.subr.bf16.mxu1 %v2257_v46  ;;  %768 = vmatmul.mubr.bf16.gmra.mxu0 %v2268_v56  ;;  %v2339_v46 = vld [vmem:[%s3076_s3 + $0x44] ss:$16 sps:$4 sm:$0xff]   ;;  %v2349_v56 = vld [vmem:[%s3076_s3] ss:$16 sps:$4 sm:$0xff]  }
  0x2b   :  { %2055 = vmatpush3.bf16.msra.mxu0 %v2256_v45  ;;  %857 = vmatprep.mubr.bf16.mxu0 %v2286_v8  ;;  %v2334_v45 = vld [vmem:[%s3076_s3 + $0x68] ss:$16 sps:$4 sm:$0xff]  }
  0x2c   :  { %2056 = vmatprep.subr.bf16.mxu0 %v2259_v48  ;;  %817 = vmatmul.mubr.bf16.gmra.mxu1 %v2273_v60  ;;  %v2337_v48 = vld [vmem:[%s3076_s3 + $0x40] ss:$16 sps:$4 sm:$0xff]   ;;  %v2812_v60 = vld [vmem:[%s3077_s6 + $0xf8] sm:$0xff]  }
  0x2d   :  { %2083 = vmatpush3.bf16.msra.mxu1 %v2258_v47  ;;  %906 = vmatprep.mubr.bf16.mxu1 %v2291_v12  ;;  %v2342_v47 = vld [vmem:[%s3076_s3 + $0x4c] ss:$16 sps:$4 sm:$0xff]  }
  0x2e   :  { %2084 = vmatprep.subr.bf16.mxu1 %v2261_v50  ;;  %v2345_v50 = vld [vmem:[%s3076_s3 + $0x24] ss:$16 sps:$4 sm:$0xff]  }
  0x2f   :  { %2057 = vmatpush3.bf16.msra.mxu0 %v2260_v49  ;;  %v2340_v49 = vld [vmem:[%s3076_s3 + $0x48] ss:$16 sps:$4 sm:$0xff]  }
  0x30   :  { %2058 = vmatprep.subr.bf16.mxu0 %v2263_v52  ;;  %v2343_v52 = vld [vmem:[%s3076_s3 + $0x20] ss:$16 sps:$4 sm:$0xff]  }
  0x31   :  { %2085 = vmatpush3.bf16.msra.mxu1 %v2262_v51  ;;  %v2348_v51 = vld [vmem:[%s3076_s3 + $0x2c] ss:$16 sps:$4 sm:$0xff]  }
  0x32   :  { %2086 = vmatprep.subr.bf16.mxu1 %v2267_v55  ;;  %v2354_v55 = vld [vmem:[%s3076_s3 + $0xc] ss:$16 sps:$4 sm:$0xff]  }
  0x33   :  { %2059 = vmatpush3.bf16.msra.mxu0 %v2264_v53  ;;  %v2346_v53 = vld [vmem:[%s3076_s3 + $0x28] ss:$16 sps:$4 sm:$0xff]  }
  0x34   :  { %2060 = vmatprep.subr.bf16.mxu0 %v2272_v59  ;;  %v2355_v59 = vld [vmem:[%s3077_s6 + $0x78] sm:$0xff]  }
  0x35   :  { %2087 = vmatpush3.bf16.msra.mxu1 %v2269_v57  ;;  %v2352_v57 = vld [vmem:[%s3076_s3 + $0x8] ss:$16 sps:$4 sm:$0xff]  }
  0x36   :  { %2088 = vmatprep.subr.bf16.mxu1 %v2275_v62 }
  0x37   :  { %2061 = vmatpush3.bf16.msra.mxu0 %v2274_v61 }
  0x38   :  { %2062 = vmatprep.subr.bf16.mxu0 %v2277_v0 }
  0x39   :  { %2089 = vmatpush3.bf16.msra.mxu1 %v2276_v63 }
  0x3a   :  { %2090 = vmatprep.subr.bf16.mxu1 %v2279_v2 }
  0x3b   :  { %2063 = vmatpush3.bf16.msra.mxu0 %v2278_v1 }
  0x3c   :  { %2064 = vmatprep.subr.bf16.mxu0 %v2281_v4 }
  0x3d   :  { %2091 = vmatpush3.bf16.msra.mxu1 %v2280_v3 }
  0x3e   :  { %2092 = vmatprep.subr.bf16.mxu1 %v2283_v6 }
  0x3f   :  { %2065 = vmatpush3.bf16.msra.mxu0 %v2282_v5 }
  0x40   :  { %2172 = vmatprep.subr.bf16.mxu0 %v2288_v10 }
  0x41   :  { %2093 = vmatpush3.bf16.msra.mxu1 %v2287_v9 }
  0x42   :  { %858 = vmatmul.mubr.bf16.vlgmr.msra.gmra.mxu0 %v2284_v7  ;;  %1192 = vmatprep.subr.bf16.mxu1 %v2309_v26 }
  0x43   :  { %2173 = vmatpush3.bf16.msra.mxu0 %v2288_v10  ;;  %865 = vmatprep.mubr.bf16.mxu0 %v2293_v14 }
  0x44   :  { %907 = vmatmul.mubr.bf16.vlgmr.msra.gmra.mxu1 %v2289_v11  ;;  %2174 = vmatprep.subr.bf16.mxu0 %v2292_v13 }
  0x45   :  { %914 = vmatprep.mubr.bf16.mxu1 %v2297_v17  ;;  %1193 = vmatpush1.bf16.msra.mxu1 %v2307_v27 }
  0x46   :  { %1194 = vmatprep.subr.bf16.mxu1 %v2315_v30 }
  0x47   :  { %2175 = vmatpush3.bf16.msra.mxu0 %v2292_v13 }
  0x48   :  { %2176 = vmatprep.subr.bf16.mxu0 %v2296_v16 }
  0x49   :  { %1195 = vmatpush1.bf16.msra.mxu1 %v2313_v32 }
  0x4a   :  { %866 = vmatmul.mubr.bf16.gmra.mxu0 %v2295_v15  ;;  %1196 = vmatprep.subr.bf16.mxu1 %v2321_v34 }
  0x4b   :  { %2177 = vmatpush3.bf16.msra.mxu0 %v2296_v16  ;;  %2188 = vmatprep.mubr.bf16.mxu0 %v2305_v21 }
  0x4c   :  { %915 = vmatmul.mubr.bf16.gmra.mxu1 %v2299_v18  ;;  %2178 = vmatprep.subr.bf16.mxu0 %v2300_v19 }
  0x4d   :  { %1197 = vmatpush1.bf16.msra.mxu1 %v2319_v35  ;;  %1224 = vmatprep.mubr.bf16.mxu1 %v2387_v58 }
  0x4e   :  { %1198 = vmatprep.subr.bf16.mxu1 %v2327_v38 }
  0x4f   :  { %2179 = vmatpush3.bf16.msra.mxu0 %v2300_v19 }
  0x50   :  { %2180 = vmatprep.subr.bf16.mxu0 %v2301_v20 }
  0x51   :  { %1199 = vmatpush1.bf16.msra.mxu1 %v2325_v40 }
  0x52   :  { %1200 = vmatprep.subr.bf16.mxu1 %v2333_v42 }
  0x53   :  { %2181 = vmatpush3.bf16.msra.mxu0 %v2301_v20 }
  0x54   :  { %2182 = vmatprep.subr.bf16.mxu0 %v2302_v22 }
  0x55   :  { %1201 = vmatpush1.bf16.msra.mxu1 %v2331_v43 }
  0x56   :  { %1202 = vmatprep.subr.bf16.mxu1 %v2339_v46 }
  0x57   :  { %2183 = vmatpush3.bf16.msra.mxu0 %v2302_v22 }
  0x58   :  { %2184 = vmatprep.subr.bf16.mxu0 %v2303_v23 }
  0x59   :  { %1203 = vmatpush1.bf16.msra.mxu1 %v2337_v48 }
  0x5a   :  { %1204 = vmatprep.subr.bf16.mxu1 %v2345_v50 }
  0x5b   :  { %2185 = vmatpush3.bf16.msra.mxu0 %v2303_v23  ;;  %v1803_v23 = vld [vmem:[%s3078_s2] ss:$0 sm:$0xff] }
  0x5c   :  { %2186 = vmatprep.subr.bf16.mxu0 %v2304_v24 }
  0x5d   :  { %1205 = vmatpush1.bf16.msra.mxu1 %v2343_v52 }
  0x5e   :  { %1206 = vmatprep.subr.bf16.mxu1 %v2351_v54 }
  0x5f   :  { %2187 = vmatpush3.bf16.msra.mxu0 %v2304_v24 }
  0x60   :  { %1245 = vmatprep.subr.bf16.mxu0 %v2312_v29 }
  0x61   :  { %1207 = vmatpush1.bf16.msra.mxu1 %v2349_v56 }
  0x62   :  { %2189 = vmatmul.mubr.bf16.vlgmr.msra.gmra.mxu0 %v2306_v25  ;;  %2116 = vmatprep.subr.bf16.mxu1 %v2355_v59 }
  0x63   :  { %1246 = vmatpush1.bf16.msra.mxu0 %v2310_v28  ;;  %1277 = vmatprep.mubr.bf16.mxu0 %v2387_v58 }
  0x64   :  { %1247 = vmatprep.subr.bf16.mxu0 %v2318_v31 }
  0x67   :  { %1248 = vmatpush1.bf16.msra.mxu0 %v2316_v33 }
  0x68   :  { %1249 = vmatprep.subr.bf16.mxu0 %v2324_v36 }
  0x6b   :  { %1250 = vmatpush1.bf16.msra.mxu0 %v2322_v37 }
  0x6c   :  { %1251 = vmatprep.subr.bf16.mxu0 %v2330_v39 }
  0x6f   :  { %1252 = vmatpush1.bf16.msra.mxu0 %v2328_v41 }
  0x70   :  { %1253 = vmatprep.subr.bf16.mxu0 %v2336_v44 }
  0x73   :  { %1254 = vmatpush1.bf16.msra.mxu0 %v2334_v45 }
  0x74   :  { %1255 = vmatprep.subr.bf16.mxu0 %v2342_v47 }
  0x77   :  { %1256 = vmatpush1.bf16.msra.mxu0 %v2340_v49 }
  0x78   :  { %1257 = vmatprep.subr.bf16.mxu0 %v2348_v51 }
  0x7b   :  { %1258 = vmatpush1.bf16.msra.mxu0 %v2346_v53 }
  0x7c   :  { %1259 = vmatprep.subr.bf16.mxu0 %v2354_v55 }
  0x7f   :  { %1260 = vmatpush1.bf16.msra.mxu0 %v2352_v57 }
  0x80   :  { %2144 = vmatprep.subr.bf16.mxu0 %v2812_v60 }
  0xe2   :  { %v2010_v61 = vpop.f32.mrf.mxu0 }
  0xe4   :  { %v2011_v62 = vpop.f32.mrf.mxu0  ;;  %v2038_v63 = vpop.f32.mrf.mxu1 }
  0xe5   :  { %v2012_v22 = vadd.f32 %v2011_v62, %v2010_v61 }
  0xe6   :  { %v2013_v0 = vpop.f32.mrf.mxu0  ;;  %v2039_v1 = vpop.f32.mrf.mxu1 }
  0xe7   :  { %v762_v27 = vadd.f32 %v2012_v22, %v1803_v23  ;;  %v2040_v28 = vadd.f32 %v2039_v1, %v2038_v63  ;;  %v2861_v22 = vld [vmem:[%s3077_s6 + $0xa8] sm:$0xff]  }
  0xe8   :  { %v2014_v2 = vpop.f32.mrf.mxu0  ;;  %v2041_v3 = vpop.f32.mrf.mxu1 }
  0xe9   :  { %v2015_v24 = vadd.f32 %v2014_v2, %v2013_v0  ;;  %v811_v36 = vadd.f32 %v2040_v28, %v762_v27  ;;  %v2371_v27 = vld [vmem:[%s3077_s6 + $0x58] sm:$0xff]  }
  0xea   :  { %v2016_v4 = vpop.f32.mrf.mxu0  ;;  %v2042_v5 = vpop.f32.mrf.mxu1  ;;  %v2372_v28 = vld [vmem:[%s3077_s6 + $0x18] sm:$0xff]  }
  0xeb   :  { %v765_v29 = vadd.f32 %v2015_v24, %v1803_v23  ;;  %v2043_v30 = vadd.f32 %v2042_v5, %v2041_v3  ;;  %v2870_v24 = vld [vmem:[%s3077_s6 + $0xe0] sm:$0xff]  }
  0xec   :  { %v2017_v6 = vpop.f32.mrf.mxu0  ;;  %v2044_v7 = vpop.f32.mrf.mxu1 }
  0xed   :  { %v2018_v35 = vadd.f32 %v2017_v6, %v2016_v4  ;;  %v814_v38 = vadd.f32 %v2043_v30, %v765_v29  ;;  %v2892_v29 = vld [vmem:[%s3077_s6 + $0xd8] sm:$0xff]  }
  0xee   :  { %v2019_v8 = vpop.f32.mrf.mxu0  ;;  %v2045_v9 = vpop.f32.mrf.mxu1  ;;  %v2897_v30 = vld [vmem:[%s3077_s6 + $0x98] sm:$0xff]  }
  0xef   :  { %v770_v45 = vadd.f32 %v2018_v35, %v1803_v23  ;;  %v2046_v46 = vadd.f32 %v2045_v9, %v2044_v7  ;;  %v2379_v35 = vld [vmem:[%s3077_s6 + $0x48] sm:$0xff]  }
  0xf0   :  { %v2020_v10 = vpop.f32.mrf.mxu0  ;;  %v2047_v11 = vpop.f32.mrf.mxu1 }
  0xf1   :  { %v2021_v33 = vadd.f32 %v2020_v10, %v2019_v8  ;;  %v819_v56 = vadd.f32 %v2046_v46, %v770_v45  ;;  %v2356_v10 = vld [vmem:[%s3077_s6 + $0x38] sm:$0xff]  }
  0xf2   :  { %v2048_v13 = vpop.f32.mrf.mxu1 }
  0xf3   :  { %v773_v41 = vadd.f32 %v2021_v33, %v1803_v23  ;;  %v2049_v42 = vadd.f32 %v2048_v13, %v2047_v11  ;;  %v2824_v11 = vld [vmem:[%s3077_s6 + $0xb8] sm:$0xff]   ;;  %v2832_v13 = vld [vmem:[%s3077_s6 + $0xf0] sm:$0xff]   ;;  %v2367_v23 = vld [vmem:[%s3077_s6 + $0x60] sm:$0xff]  }
  0xf4   :  { %v2910_v33 = vld [vmem:[%s3077_s6 + $0xd0] sm:$0xff]  }
  0xf5   :  { %v822_v53 = vadd.f32 %v2049_v42, %v773_v41  ;;  %v2946_v41 = vld [vmem:[%s3077_s6 + $0xc0] sm:$0xff]  }
  0xf6   :  { %v2951_v42 = vld [vmem:[%s3077_s6 + $0x80] sm:$0xff]  }
 0x102   :  { %v2066_v12 = vpop.f32.mrf.mxu0 }
 0x104   :  { %v2067_v14 = vpop.f32.mrf.mxu0  ;;  %v2094_v15 = vpop.f32.mrf.mxu1 }
 0x105   :  { %v2068_v34 = vadd.f32 %v2067_v14, %v2066_v12  ;;  %v2359_v12 = vld [vmem:[%s3077_s6 + $0x70] sm:$0xff]  }
 0x106   :  { %v2069_v16 = vpop.f32.mrf.mxu0  ;;  %v2095_v17 = vpop.f32.mrf.mxu1 }
 0x107   :  { %v860_v43 = vadd.f32 %v2068_v34, %v811_v36  ;;  %v2096_v44 = vadd.f32 %v2095_v17, %v2094_v15  ;;  %v2843_v17 = vld [vmem:[%s3077_s6 + $0xb0] sm:$0xff]   ;;  %v2380_v36 = vld [vmem:[%s3077_s6 + $0x8] sm:$0xff]  }
 0x108   :  { %v2070_v18 = vpop.f32.mrf.mxu0  ;;  %v2097_v19 = vpop.f32.mrf.mxu1  ;;  %v2915_v34 = vld [vmem:[%s3077_s6 + $0x90] sm:$0xff]  }
 0x109   :  { %v2071_v37 = vadd.f32 %v2070_v18, %v2069_v16  ;;  %v909_v55 = vadd.f32 %v2096_v44, %v860_v43  ;;  %v2360_v16 = vld [vmem:[%s3077_s6 + $0x30] sm:$0xff]   ;;  %v2852_v18 = vld [vmem:[%s3077_s6 + $0xe8] sm:$0xff]   ;;  %v1012_v43 = vlaneseq }
 0x10a   :  { %v2072_v20 = vpop.f32.mrf.mxu0  ;;  %v2098_v21 = vpop.f32.mrf.mxu1 }
 0x10b   :  { %v863_v48 = vadd.f32 %v2071_v37, %v814_v38  ;;  %v2099_v49 = vadd.f32 %v2098_v21, %v2097_v19  ;;  %v2364_v21 = vld [vmem:[%s3077_s6 + $0x28] sm:$0xff]   ;;  %v1013_v44 = vshrl.u32 %v1012_v43, 7 }
 0x10c   :  { %v2073_v25 = vpop.f32.mrf.mxu0  ;;  %v2100_v26 = vpop.f32.mrf.mxu1  ;;  %v2928_v37 = vld [vmem:[%s3077_s6 + $0xc8] sm:$0xff]  }
 0x10d   :  { %v2074_v54 = vadd.f32 %v2073_v25, %v2072_v20  ;;  %v912_v63 = vadd.f32 %v2099_v49, %v863_v48  ;;  %v2368_v25 = vld [vmem:[%s3077_s6 + $0x20] sm:$0xff]   ;;  %v2933_v38 = vld [vmem:[%s3077_s6 + $0x88] sm:$0xff]   ;;  %v1014_v45 = vsub.s32 0, %v1013_v44  ;;  %v1022_v46 = vsub.s32 2, %v1013_v44 }
 0x10e   :  { %v2075_v31 = vpop.f32.mrf.mxu0  ;;  %v2101_v32 = vpop.f32.mrf.mxu1  ;;  %v1018_v48 = vsub.s32 1, %v1013_v44  ;;  %v1026_v49 = vsub.s32 3, %v1013_v44 }
 0x10f   :  { %v868_v1 = vadd.f32 %v2074_v54, %v819_v56  ;;  %v2102_v2 = vadd.f32 %v2101_v32, %v2100_v26  ;;  %v2879_v26 = vld [vmem:[%s3077_s6 + $0xa0] sm:$0xff]   ;;  %v2376_v32 = vld [vmem:[%s3077_s6 + $0x10] sm:$0xff]  }
 0x110   :  { %v2076_v39 = vpop.f32.mrf.mxu0  ;;  %v2103_v40 = vpop.f32.mrf.mxu1 }
 0x111   :  { %v2077_v50 = vadd.f32 %v2076_v39, %v2075_v31  ;;  %v917_v7 = vadd.f32 %v2102_v2, %v868_v1  ;;  %v2375_v31 = vld [vmem:[%s3077_s6 + $0x50] sm:$0xff]   ;;  %v2383_v39 = vld [vmem:[%s3077_s6 + $0x40] sm:$0xff]  }
 0x112   :  { %v2104_v51 = vpop.f32.mrf.mxu1 }
 0x113   :  { %v871_v59 = vadd.f32 %v2077_v50, %v822_v53  ;;  %v2105_v61 = vadd.f32 %v2104_v51, %v2103_v40  ;;  %v2384_v40 = vld [vmem:[%s3077_s6] sm:$0xff]   ;;  %v1299_v51 = vld [vmem:[%s3080_s5 + $0x8] sm:$0xff] }
 0x114   :  { %v1298_v50 = vld [vmem:[%s3080_s5] sm:$0xff]  ;;  %v1308_v54 = vunpack.c.l.bf16 %v1299_v51  ;;  %v1309_v2 = vunpack.c.h.bf16 %v1299_v51 }
 0x115   :  { %v920_v5 = vadd.f32 %v2105_v61, %v871_v59  ;;  %v1306_v53 = vunpack.c.l.bf16 %v1298_v50  ;;  %v1301_v59 = vld [vmem:[%s3080_s5 + $0x18] sm:$0xff]  ;;  %v1307_v1 = vunpack.c.h.bf16 %v1298_v50 }
 0x122   :  { %v2190_v47 = vpop.f32.mrf.mxu0 }
 0x123   :  { %v966_v14 = vadd.f32 %v2190_v47, %v917_v7  ;;  %v1010_v47 = vld [vmem:[%s3079_s4] sm:$0xf] }
 0x124   :  { %v957_v52 = vpop.f32.mrf.mxu0  ;;  %v2971_v56 = vrot.slane %v1010_v47, %v1026_v49 }
 0x125   :  { %v958_v62 = vadd.f32 %v957_v52, %v909_v55  ;;  %v974_v19 = vmax.f32 %v966_v14, 0.0  ;;  %v2965_v52 = vrot.slane %v1010_v47, %v1014_v45  ;;  %v2969_v55 = vrot.slane %v1010_v47, %v1018_v48  ;;  %v2999_v14 = vld [vmem:[%s3080_s5 + $0x38] sm:$0xff] }
 0x126   :  { %v2191_v57 = vpop.f32.mrf.mxu0 }
 0x127   :  { %v972_v4 = vmax.f32 %v958_v62, 0.0  ;;  %v969_v8 = vadd.f32 %v2191_v57, %v920_v5  ;;  %v1300_v57 = vld [vmem:[%s3080_s5 + $0x10] sm:$0xff] }
 0x128   :  { %v960_v0 = vpop.f32.mrf.mxu0  ;;  %v1310_v7 = vunpack.c.l.bf16 %v1300_v57 }
 0x129   :  { %v961_v3 = vadd.f32 %v960_v0, %v912_v63  ;;  %v975_v15 = vmax.f32 %v969_v8, 0.0  ;;  %v1312_v8 = vunpack.c.l.bf16 %v1301_v59 }
 0x12b   :  { %v973_v6 = vmax.f32 %v961_v3, 0.0  ;;  %v977_v20 = vpack.c.bf16 %v975_v15, %v974_v19  ;;  %v2984_v3 = vld [vmem:[%s3080_s5 + $0x20] sm:$0xff] }
 0x12d   :  { %v976_v9 = vpack.c.bf16 %v973_v6, %v972_v4  ;;  %v2989_v4 = vld [vmem:[%s3080_s5 + $0x28] sm:$0xff] }
 0x12f   :  { %1225 = vmatmul.mubr.bf16.vlgmr.msra.gmra.mxu1 %v976_v9  ;;  %1278 = vmatmul.mubr.bf16.vlgmr.msra.gmra.mxu0 %v976_v9  ;;  %v1311_v9 = vunpack.c.h.bf16 %v1300_v57 }
 0x130   :  { %1234 = vmatprep.mubr.bf16.mxu1 %v2387_v58  ;;  %1287 = vmatprep.mubr.bf16.mxu0 %v2387_v58  ;;  %v2363_v58 = vld [vmem:[%s3077_s6 + $0x68] sm:$0xff]  }
 0x131   :  { %2117 = vmatpush3.bf16.msra.mxu1 %v2356_v10  ;;  %2145 = vmatpush3.bf16.msra.mxu0 %v2824_v11  ;;  %v1313_v10 = vunpack.c.h.bf16 %v1301_v59 }
 0x132   :  { %2118 = vmatprep.subr.bf16.mxu1 %v2359_v12  ;;  %2146 = vmatprep.subr.bf16.mxu0 %v2832_v13  ;;  %v2994_v12 = vld [vmem:[%s3080_s5 + $0x30] sm:$0xff] }
 0x133   :  { %v1319_v59 = vunpack.c.h.bf16 %v2994_v12 }
 0x135   :  { %2119 = vmatpush3.bf16.msra.mxu1 %v2360_v16  ;;  %2147 = vmatpush3.bf16.msra.mxu0 %v2843_v17 }
 0x136   :  { %2120 = vmatprep.subr.bf16.mxu1 %v2363_v58  ;;  %2148 = vmatprep.subr.bf16.mxu0 %v2852_v18 }
 0x137   :  { %1235 = vmatmul.mubr.bf16.gmra.mxu1 %v977_v20  ;;  %1288 = vmatmul.mubr.bf16.gmra.mxu0 %v977_v20 }
 0x139   :  { %2121 = vmatpush3.bf16.msra.mxu1 %v2364_v21  ;;  %2149 = vmatpush3.bf16.msra.mxu0 %v2861_v22 }
 0x13a   :  { %2122 = vmatprep.subr.bf16.mxu1 %v2367_v23  ;;  %2150 = vmatprep.subr.bf16.mxu0 %v2870_v24  ;;  %v1314_v23 = vunpack.c.l.bf16 %v2984_v3 }
 0x13d   :  { %2123 = vmatpush3.bf16.msra.mxu1 %v2368_v25  ;;  %2151 = vmatpush3.bf16.msra.mxu0 %v2879_v26  ;;  %v1316_v25 = vunpack.c.l.bf16 %v2989_v4 }
 0x13e   :  { %2124 = vmatprep.subr.bf16.mxu1 %v2371_v27  ;;  %2152 = vmatprep.subr.bf16.mxu0 %v2892_v29  ;;  %v1315_v27 = vunpack.c.h.bf16 %v2984_v3 }
 0x141   :  { %2125 = vmatpush3.bf16.msra.mxu1 %v2372_v28  ;;  %2153 = vmatpush3.bf16.msra.mxu0 %v2897_v30  ;;  %v1317_v28 = vunpack.c.h.bf16 %v2989_v4 }
 0x142   :  { %2126 = vmatprep.subr.bf16.mxu1 %v2375_v31  ;;  %2154 = vmatprep.subr.bf16.mxu0 %v2910_v33 }
 0x145   :  { %2127 = vmatpush3.bf16.msra.mxu1 %v2376_v32  ;;  %2155 = vmatpush3.bf16.msra.mxu0 %v2915_v34 }
 0x146   :  { %2128 = vmatprep.subr.bf16.mxu1 %v2379_v35  ;;  %2156 = vmatprep.subr.bf16.mxu0 %v2928_v37  ;;  %v1318_v35 = vunpack.c.l.bf16 %v2994_v12 }
 0x149   :  { %2129 = vmatpush3.bf16.msra.mxu1 %v2380_v36  ;;  %2157 = vmatpush3.bf16.msra.mxu0 %v2933_v38  ;;  %v1320_v36 = vunpack.c.l.bf16 %v2999_v14 }
 0x14a   :  { %2130 = vmatprep.subr.bf16.mxu1 %v2383_v39  ;;  %2158 = vmatprep.subr.bf16.mxu0 %v2946_v41 }
 0x14d   :  { %2131 = vmatpush3.bf16.msra.mxu1 %v2384_v40  ;;  %2159 = vmatpush3.bf16.msra.mxu0 %v2951_v42 }
 0x14e   :  { %2192 = vmatprep.subr.bf16.mxu1 %v2812_v60  ;;  %v2967_v60 = vrot.slane %v1010_v47, %v1022_v46 }
 0x1ef   :  { %v1226_v61 = vpop.f32.mrf.mxu1  ;;  %v1279_v62 = vpop.f32.mrf.mxu0 }
 0x1f0   :  { %v1227_v63 = vadd.f32 %v1226_v61, %v2965_v52  ;;  %v1280_v0 = vadd.f32 %v1279_v62, %v2967_v60  ;;  %v1321_v61 = vunpack.c.h.bf16 %v2999_v14 }
 0x1f1   :  { %v1228_v5 = vpop.f32.mrf.mxu1  ;;  %v1281_v6 = vpop.f32.mrf.mxu0 }
 0x1f2   :  { %v1322_v15 = vadd.f32 %v1306_v53, %v1227_v63  ;;  %v1324_v16 = vadd.f32 %v1308_v54, %v1280_v0  ;;  %v1229_v58 = vadd.f32 %v1228_v5, %v2969_v55  ;;  %v1282_v19 = vadd.f32 %v1281_v6, %v2971_v56 }
 0x1f3   :  { %v1230_v20 = vpop.f32.mrf.mxu1  ;;  %v1283_v21 = vpop.f32.mrf.mxu0 }
 0x1f4   :  { %v1323_v31 = vadd.f32 %v1307_v1, %v1229_v58  ;;  %v1325_v32 = vadd.f32 %v1309_v2, %v1282_v19  ;;  %v1338_v39 = vmax.f32 %v1322_v15, 0.0  ;;  %v1340_v40 = vmax.f32 %v1324_v16, 0.0 }
 0x1f5   :  { %v1231_v43 = vadd.f32 %v1230_v20, %v2965_v52  ;;  %v1284_v44 = vadd.f32 %v1283_v21, %v2967_v60  ;;  %v1232_v45 = vpop.f32.mrf.mxu1  ;;  %v1285_v46 = vpop.f32.mrf.mxu0 }
 0x1f6   :  { %v1339_v47 = vmax.f32 %v1323_v31, 0.0  ;;  %v1341_v48 = vmax.f32 %v1325_v32, 0.0  ;;  %v1233_v49 = vadd.f32 %v1232_v45, %v2969_v55  ;;  %v1286_v50 = vadd.f32 %v1285_v46, %v2971_v56 }
 0x1f7   :  { %v1326_v51 = vadd.f32 %v1310_v7, %v1231_v43  ;;  %v1328_v53 = vadd.f32 %v1312_v8, %v1284_v44  ;;  %v1236_v54 = vpop.f32.mrf.mxu1  ;;  %v1289_v57 = vpop.f32.mrf.mxu0 }
 0x1f8   :  { %v1971_v62 = vpack.c.bf16 %v1339_v47, %v1338_v39  ;;  %v1972_v63 = vpack.c.bf16 %v1341_v48, %v1340_v40  ;;  %v1327_v0 = vadd.f32 %v1311_v9, %v1233_v49  ;;  %v1329_v1 = vadd.f32 %v1313_v10, %v1286_v50 }
 0x1f9   :  { %v1342_v2 = vmax.f32 %v1326_v51, 0.0  ;;  %v1344_v3 = vmax.f32 %v1328_v53, 0.0  ;;  %v1237_v4 = vadd.f32 %v1236_v54, %v2965_v52  ;;  %v1290_v5 = vadd.f32 %v1289_v57, %v2967_v60  ;;  %v1238_v6 = vpop.f32.mrf.mxu1  ;;  %v1291_v15 = vpop.f32.mrf.mxu0 }
 0x1fa   :  { %1402 = vst [vmem:[%s3081_s8] sm:$0xff] %v1971_v62  ;;  %1403 = vst [vmem:[%s3081_s8 + $0x8] sm:$0xff] %v1972_v63  ;;  %v1343_v7 = vmax.f32 %v1327_v0, 0.0  ;;  %v1345_v8 = vmax.f32 %v1329_v1, 0.0  ;;  %v1239_v9 = vadd.f32 %v1238_v6, %v2969_v55  ;;  %v1292_v10 = vadd.f32 %v1291_v15, %v2971_v56 }
 0x1fb   :  { %v1354_v12 = vpack.c.bf16 %v1342_v2, %v1338_v39  ;;  %v1356_v14 = vpack.c.bf16 %v1344_v3, %v1340_v40  ;;  %v1330_v16 = vadd.f32 %v1314_v23, %v1237_v4  ;;  %v3025_v58 = vadd.f32 %v1316_v25, %v1290_v5  ;;  %v1240_v19 = vpop.f32.mrf.mxu1  ;;  %v1293_v20 = vpop.f32.mrf.mxu0 }
 0x1fc   :  { %v1973_v21 = vpack.c.bf16 %v1343_v7, %v1342_v2  ;;  %v1974_v31 = vpack.c.bf16 %v1345_v8, %v1344_v3  ;;  %v1331_v32 = vadd.f32 %v1315_v27, %v1239_v9  ;;  %v1333_v43 = vadd.f32 %v1317_v28, %v1292_v10 }
 0x1fd   :  { %v1346_v44 = vmax.f32 %v1330_v16, 0.0  ;;  %v1348_v45 = vmax.f32 %v3025_v58, 0.0  ;;  %v1241_v46 = vadd.f32 %v1240_v19, %v2965_v52  ;;  %v1294_v49 = vadd.f32 %v1293_v20, %v2967_v60  ;;  %v1242_v50 = vpop.f32.mrf.mxu1  ;;  %v1295_v51 = vpop.f32.mrf.mxu0 }
 0x1fe   :  { %1404 = vst [vmem:[%s3081_s8 + $0x10] sm:$0xff] %v1973_v21  ;;  %1405 = vst [vmem:[%s3081_s8 + $0x18] sm:$0xff] %v1974_v31  ;;  %v1347_v23 = vmax.f32 %v1331_v32, 0.0  ;;  %v1349_v25 = vmax.f32 %v1333_v43, 0.0  ;;  %v1243_v27 = vadd.f32 %v1242_v50, %v2969_v55  ;;  %v1296_v28 = vadd.f32 %v1295_v51, %v2971_v56 }
 0x1ff   :  { %v1334_v39 = vadd.f32 %v1318_v35, %v1241_v46  ;;  %v1336_v52 = vadd.f32 %v1320_v36, %v1294_v49  ;;  %v1355_v40 = vpack.c.bf16 %v1343_v7, %v1339_v47  ;;  %v1357_v60 = vpack.c.bf16 %v1345_v8, %v1341_v48 }
 0x200   :  { %v1975_v53 = vpack.c.bf16 %v1347_v23, %v1346_v44  ;;  %v1976_v54 = vpack.c.bf16 %v1349_v25, %v1348_v45  ;;  %v1335_v57 = vadd.f32 %v1319_v59, %v1243_v27  ;;  %v1337_v62 = vadd.f32 %v1321_v61, %v1296_v28 }
 0x201   :  { %1705 = vmatprep.mubr.bf16.mxu1 %v1355_v40  ;;  %1754 = vmatprep.mubr.bf16.mxu0 %v1357_v60  ;;  %v1350_v55 = vmax.f32 %v1334_v39, 0.0  ;;  %v1352_v56 = vmax.f32 %v1336_v52, 0.0 }
 0x202   :  { %1406 = vst [vmem:[%s3081_s8 + $0x20] sm:$0xff] %v1975_v53  ;;  %1407 = vst [vmem:[%s3081_s8 + $0x28] sm:$0xff] %v1976_v54  ;;  %v1351_v35 = vmax.f32 %v1335_v57, 0.0  ;;  %v1353_v36 = vmax.f32 %v1337_v62, 0.0  ;;  %1706 = vmatmul.mubr.bf16.vlgmr.msra.gmra.mxu1 %v1354_v12  ;;  %1755 = vmatmul.mubr.bf16.vlgmr.msra.gmra.mxu0 %v1356_v14 }
 0x203   :  { %2200 = vmatpush3.bf16.msra.mxu1 %v2824_v11  ;;  %v1358_v61 = vpack.c.bf16 %v1350_v55, %v1346_v44 }
 0x204   :  { %v1977_v47 = vpack.c.bf16 %v1351_v35, %v1350_v55  ;;  %v1978_v48 = vpack.c.bf16 %v1353_v36, %v1352_v56  ;;  %2193 = vmatprep.subr.bf16.mxu1 %v2832_v13  ;;  %v1359_v59 = vpack.c.bf16 %v1351_v35, %v1347_v23  ;;  %v1361_v11 = vpack.c.bf16 %v1353_v36, %v1349_v25 }
 0x205   :  { %v1360_v13 = vpack.c.bf16 %v1352_v56, %v1348_v45 }
 0x206   :  { %1408 = vst [vmem:[%s3081_s8 + $0x30] sm:$0xff] %v1977_v47  ;;  %1409 = vst [vmem:[%s3081_s8 + $0x38] sm:$0xff] %v1978_v48  ;;  %1713 = vmatprep.mubr.bf16.mxu1 %v1359_v59 }
 0x207   :  { %2201 = vmatpush3.bf16.msra.mxu1 %v2843_v17 }
 0x208   :  { %2194 = vmatprep.subr.bf16.mxu1 %v2852_v18 }
 0x20a   :  { %1714 = vmatmul.mubr.bf16.gmra.mxu1 %v1358_v61 }
 0x20b   :  { %2202 = vmatpush3.bf16.msra.mxu1 %v2861_v22  ;;  %1762 = vmatprep.mubr.bf16.mxu1 %v1361_v11  ;;  %v1934_v22 = vld [vmem:[%s3082_s7] ss:$0 sm:$0xff] }
 0x20c   :  { %2195 = vmatprep.subr.bf16.mxu1 %v2870_v24 }
 0x20f   :  { %2203 = vmatpush3.bf16.msra.mxu1 %v2879_v26 }
 0x210   :  { %2196 = vmatprep.subr.bf16.mxu1 %v2892_v29 }
 0x213   :  { %2204 = vmatpush3.bf16.msra.mxu1 %v2897_v30 }
 0x214   :  { %2197 = vmatprep.subr.bf16.mxu1 %v2910_v33 }
 0x217   :  { %2205 = vmatpush3.bf16.msra.mxu1 %v2915_v34 }
 0x218   :  { %2198 = vmatprep.subr.bf16.mxu1 %v2928_v37 }
 0x21b   :  { %2206 = vmatpush3.bf16.msra.mxu1 %v2933_v38 }
 0x21c   :  { %2199 = vmatprep.subr.bf16.mxu1 %v2946_v41 }
 0x21f   :  { %2207 = vmatpush3.bf16.msra.mxu1 %v2951_v42 }
 0x222   :  { %1763 = vmatmul.mubr.bf16.vlgmr.msra.gmra.mxu1 %v1360_v13 }
 0x2c2   :  { %v2132_v17 = vpop.f32.mrf.mxu1  ;;  %v2160_v18 = vpop.f32.mrf.mxu0 }
 0x2c4   :  { %v2133_v24 = vpop.f32.mrf.mxu1  ;;  %v2161_v26 = vpop.f32.mrf.mxu0 }
 0x2c5   :  { %v2134_v29 = vadd.f32 %v2133_v24, %v2132_v17  ;;  %v2162_v63 = vadd.f32 %v2161_v26, %v2160_v18 }
 0x2c6   :  { %v2135_v30 = vpop.f32.mrf.mxu1  ;;  %v2163_v33 = vpop.f32.mrf.mxu0 }
 0x2c7   :  { %v1708_v34 = vadd.f32 %v2134_v29, %v1934_v22 }
 0x2c8   :  { %v2136_v37 = vpop.f32.mrf.mxu1  ;;  %v2164_v38 = vpop.f32.mrf.mxu0 }
 0x2c9   :  { %v2137_v41 = vadd.f32 %v2136_v37, %v2135_v30  ;;  %v1757_v0 = vadd.f32 %v2162_v63, %v1708_v34  ;;  %v2165_v1 = vadd.f32 %v2164_v38, %v2163_v33 }
 0x2ca   :  { %v2138_v6 = vpop.f32.mrf.mxu1 }
 0x2cb   :  { %v1711_v42 = vadd.f32 %v2137_v41, %v1934_v22  ;;  %v1771_v3 = vmax.f32 %v1757_v0, 0.0 }
 0x2cc   :  { %v2139_v15 = vpop.f32.mrf.mxu1 }
 0x2cd   :  { %v1760_v2 = vadd.f32 %v2165_v1, %v1711_v42  ;;  %v2140_v10 = vadd.f32 %v2139_v15, %v2138_v6 }
 0x2ce   :  { %v2141_v7 = vpop.f32.mrf.mxu1 }
 0x2cf   :  { %v1772_v4 = vmax.f32 %v1760_v2, 0.0  ;;  %v1716_v19 = vadd.f32 %v2140_v10, %v1934_v22 }
 0x2d0   :  { %v2142_v8 = vpop.f32.mrf.mxu1 }
 0x2d1   :  { %v1986_v5 = vpack.c.bf16 %v1772_v4, %v1771_v3  ;;  %v2143_v14 = vadd.f32 %v2142_v8, %v2141_v7 }
 0x2d3   :  { %1987 = vst [vmem:[%s3083_s9] sm:$0xff] %v1986_v5   ;;  %v1719_v21 = vadd.f32 %v2143_v14, %v1934_v22 }
 0x2e2   :  { %v2166_v9 = vpop.f32.mrf.mxu1 }
 0x2e4   :  { %v2167_v12 = vpop.f32.mrf.mxu1 }
 0x2e5   :  { %v2168_v16 = vadd.f32 %v2167_v12, %v2166_v9 }
 0x2e6   :  { %v2169_v58 = vpop.f32.mrf.mxu1 }
 0x2e7   :  { %v1765_v31 = vadd.f32 %v2168_v16, %v1716_v19 }
 0x2e8   :  { %v2170_v20 = vpop.f32.mrf.mxu1 }
 0x2e9   :  { %v2171_v32 = vadd.f32 %v2170_v20, %v2169_v58  ;;  %v1773_v44 = vmax.f32 %v1765_v31, 0.0 }
 0x2eb   :  { %v1768_v43 = vadd.f32 %v2171_v32, %v1719_v21 }
 0x2ed   :  { %v1774_v45 = vmax.f32 %v1768_v43, 0.0 }
 0x2ef   :  { %v1991_v46 = vpack.c.bf16 %v1774_v45, %v1773_v44 }
 0x2f1   :  { %1993 = vst [vmem:[%s3083_s9 + $0x8] sm:$0xff] %v1991_v46  }

// kernel: backbone_forward.28
= control target key start
LH: loop header
LB: loop body
LE: loop exit
PB: predicated region body
PF: predicated region fallthrough
CT: control target
= control target key end

     0   :  { %s3288_s1 = inlined_call_operand.vmem [shape: bf16[1152,128], index: 1, kind: input, shape index: {}]   ;;  %s3289_s0 = inlined_call_operand.vmem [shape: bf16[32,1152], index: 0, kind: input, shape index: {}]   ;;  %s3290_s3 = inlined_call_operand.vmem [shape: bf16[128,512], index: 3, kind: input, shape index: {}]   ;;  %s3291_s6 = inlined_call_operand.vmem [shape: bf16[512,256], index: 6, kind: input, shape index: {}]   ;;  %s3292_s2 = inlined_call_operand.vmem [shape: f32[1,128], index: 2, kind: input, shape index: {}]   ;;  %s3293_s4 = inlined_call_operand.vmem [shape: f32[1,512], index: 4, kind: input, shape index: {}]   ;;  %s3294_s5 = inlined_call_operand.vmem [shape: bf16[32,512], index: 5, kind: input, shape index: {}]   ;;  %s3295_s8 = inlined_call_operand.vmem [shape: bf16[32,512], index: 8, kind: output, shape index: {0}]   ;;  %s3296_s7 = inlined_call_operand.vmem [shape: f32[1,256], index: 7, kind: input, shape index: {}]   ;;  %s3297_s9 = inlined_call_operand.vmem [shape: bf16[32,256], index: 9, kind: output, shape index: {1}]  }
   0x1   :  { %v2310_v0 = vld [vmem:[%s3288_s1 + $0x78] sm:$0xff]   ;;  %v2314_v4 = vld [vmem:[%s3288_s1 + $0x70] sm:$0xff]   ;;  %v2318_v8 = vld [vmem:[%s3288_s1 + $0x68] sm:$0xff]  }
   0x2   :  { %v2311_v1 = vld [vmem:[%s3288_s1 + $0x38] sm:$0xff]   ;;  %2167 = vmatprep.subr.bf16.mxu0 %v2310_v0  ;;  %v2315_v5 = vld [vmem:[%s3288_s1 + $0x30] sm:$0xff]   ;;  %v2319_v9 = vld [vmem:[%s3288_s1 + $0x28] sm:$0xff]  }
   0x3   :  { %v2312_v2 = vld [vmem:[%s3288_s1 + $0xf8] sm:$0xff]   ;;  %2168 = vmatpush3.bf16.msra.mxu0 %v2311_v1  ;;  %v2316_v6 = vld [vmem:[%s3288_s1 + $0xf0] sm:$0xff]   ;;  %v2320_v10 = vld [vmem:[%s3288_s1 + $0xe8] sm:$0xff]  }
   0x4   :  { %v2313_v3 = vld [vmem:[%s3288_s1 + $0xb8] sm:$0xff]   ;;  %2195 = vmatprep.subr.bf16.mxu1 %v2312_v2  ;;  %2169 = vmatprep.subr.bf16.mxu0 %v2314_v4  ;;  %v2317_v7 = vld [vmem:[%s3288_s1 + $0xb0] sm:$0xff]   ;;  %v2321_v11 = vld [vmem:[%s3288_s1 + $0xa8] sm:$0xff]  }
   0x5   :  { %2196 = vmatpush3.bf16.msra.mxu1 %v2313_v3  ;;  %v2322_v12 = vld [vmem:[%s3288_s1 + $0x60] sm:$0xff]   ;;  %v2326_v16 = vld [vmem:[%s3288_s1 + $0x58] sm:$0xff]   ;;  %v2330_v20 = vld [vmem:[%s3288_s1 + $0x50] sm:$0xff]  }
   0x6   :  { %2197 = vmatprep.subr.bf16.mxu1 %v2316_v6  ;;  %v2323_v13 = vld [vmem:[%s3288_s1 + $0x20] sm:$0xff]   ;;  %v2327_v17 = vld [vmem:[%s3288_s1 + $0x18] sm:$0xff]   ;;  %v2331_v21 = vld [vmem:[%s3288_s1 + $0x10] sm:$0xff]  }
   0x7   :  { %2170 = vmatpush3.bf16.msra.mxu0 %v2315_v5  ;;  %v2324_v14 = vld [vmem:[%s3288_s1 + $0xe0] sm:$0xff]   ;;  %v2328_v18 = vld [vmem:[%s3288_s1 + $0xd8] sm:$0xff]   ;;  %v2332_v22 = vld [vmem:[%s3288_s1 + $0xd0] sm:$0xff]  }
   0x8   :  { %2171 = vmatprep.subr.bf16.mxu0 %v2318_v8  ;;  %v2325_v15 = vld [vmem:[%s3288_s1 + $0xa0] sm:$0xff]   ;;  %v2329_v19 = vld [vmem:[%s3288_s1 + $0x98] sm:$0xff]   ;;  %v2333_v23 = vld [vmem:[%s3288_s1 + $0x90] sm:$0xff]  }
   0x9   :  { %2198 = vmatpush3.bf16.msra.mxu1 %v2317_v7  ;;  %v2334_v24 = vld [vmem:[%s3288_s1 + $0x48] sm:$0xff]   ;;  %v2338_v28 = vld [vmem:[%s3288_s1 + $0x40] sm:$0xff]   ;;  %v2345_v34 = vld [vmem:[%s3288_s1 + $0x178] sm:$0xff]  }
   0xa   :  { %2199 = vmatprep.subr.bf16.mxu1 %v2320_v10  ;;  %v2335_v25 = vld [vmem:[%s3288_s1 + $0x8] sm:$0xff]   ;;  %v2339_v29 = vld [vmem:[%s3288_s1] sm:$0xff]   ;;  %v2349_v37 = vld [vmem:[%s3288_s1 + $0x138] sm:$0xff]  }
   0xb   :  { %2172 = vmatpush3.bf16.msra.mxu0 %v2319_v9  ;;  %v2336_v26 = vld [vmem:[%s3288_s1 + $0xc8] sm:$0xff]   ;;  %v2340_v30 = vld [vmem:[%s3288_s1 + $0xc0] sm:$0xff]   ;;  %v2350_v38 = vld [vmem:[%s3288_s1 + $0x1f8] sm:$0xff]  }
   0xc   :  { %2173 = vmatprep.subr.bf16.mxu0 %v2322_v12  ;;  %v2337_v27 = vld [vmem:[%s3288_s1 + $0x88] sm:$0xff]   ;;  %v2341_v31 = vld [vmem:[%s3289_s0] ss:$36 sps:$4 sm:$0xff]   ;;  %v2351_v39 = vld [vmem:[%s3288_s1 + $0x1b8] sm:$0xff]  }
   0xd   :  { %2200 = vmatpush3.bf16.msra.mxu1 %v2321_v11  ;;  %v2343_v32 = vld [vmem:[%s3289_s0 + $0x4] ss:$36 sps:$4 sm:$0xff]   ;;  %v2348_v36 = vld [vmem:[%s3289_s0 + $0xc] ss:$36 sps:$4 sm:$0xff]   ;;  %v2364_v52 = vld [vmem:[%s3288_s1 + $0x158] sm:$0xff]  }
   0xe   :  { %2201 = vmatprep.subr.bf16.mxu1 %v2324_v14  ;;  %v2344_v33 = vld [vmem:[%s3288_s1 + $0x80] sm:$0xff]   ;;  %759 = vmatprep.mubr.bf16.mxu0 %v2343_v32  ;;  %v2346_v35 = vld [vmem:[%s3289_s0 + $0x8] ss:$36 sps:$4 sm:$0xff]   ;;  %v2352_v40 = vld [vmem:[%s3288_s1 + $0x170] sm:$0xff]  }
   0xf   :  { %2174 = vmatpush3.bf16.msra.mxu0 %v2323_v13  ;;  %808 = vmatprep.mubr.bf16.mxu1 %v2348_v36  ;;  %v2353_v41 = vld [vmem:[%s3288_s1 + $0x130] sm:$0xff]   ;;  %v2356_v44 = vld [vmem:[%s3288_s1 + $0x168] sm:$0xff]   ;;  %v2360_v48 = vld [vmem:[%s3288_s1 + $0x160] sm:$0xff]  }
  0x10   :  { %2175 = vmatprep.subr.bf16.mxu0 %v2326_v16  ;;  %v2354_v42 = vld [vmem:[%s3288_s1 + $0x1f0] sm:$0xff]   ;;  %v2357_v45 = vld [vmem:[%s3288_s1 + $0x128] sm:$0xff]   ;;  %v2361_v49 = vld [vmem:[%s3288_s1 + $0x120] sm:$0xff]  }
  0x11   :  { %2202 = vmatpush3.bf16.msra.mxu1 %v2325_v15  ;;  %v2355_v43 = vld [vmem:[%s3288_s1 + $0x1b0] sm:$0xff]   ;;  %v2358_v46 = vld [vmem:[%s3288_s1 + $0x1e8] sm:$0xff]   ;;  %v2362_v50 = vld [vmem:[%s3288_s1 + $0x1e0] sm:$0xff]  }
  0x12   :  { %2203 = vmatprep.subr.bf16.mxu1 %v2328_v18  ;;  %v2359_v47 = vld [vmem:[%s3288_s1 + $0x1a8] sm:$0xff]   ;;  %v2363_v51 = vld [vmem:[%s3288_s1 + $0x1a0] sm:$0xff]   ;;  %v2365_v53 = vld [vmem:[%s3288_s1 + $0x118] sm:$0xff]  }
  0x13   :  { %2176 = vmatpush3.bf16.msra.mxu0 %v2327_v17  ;;  %v2366_v54 = vld [vmem:[%s3289_s0 + $0x4c] ss:$36 sps:$4 sm:$0xff]   ;;  %v2368_v55 = vld [vmem:[%s3288_s1 + $0x1d8] sm:$0xff]   ;;  %v2382_v4 = vld [vmem:[%s3288_s1 + $0x140] sm:$0xff]  }
  0x14   :  { %2177 = vmatprep.subr.bf16.mxu0 %v2330_v20  ;;  %v2369_v56 = vld [vmem:[%s3289_s0 + $0x48] ss:$36 sps:$4 sm:$0xff]   ;;  %v2370_v57 = vld [vmem:[%s3288_s1 + $0x198] sm:$0xff]   ;;  %v2373_v59 = vld [vmem:[%s3288_s1 + $0x150] sm:$0xff]  }
  0x15   :  { %2204 = vmatpush3.bf16.msra.mxu1 %v2329_v19  ;;  %v2371_v58 = vld [vmem:[%s3289_s0 + $0x54] ss:$36 sps:$4 sm:$0xff]   ;;  %v2378_v0 = vld [vmem:[%s3288_s1 + $0x148] sm:$0xff]   ;;  %v2383_v5 = vld [vmem:[%s3288_s1 + $0x100] sm:$0xff]  }
  0x16   :  { %2205 = vmatprep.subr.bf16.mxu1 %v2332_v22  ;;  %v2374_v60 = vld [vmem:[%s3289_s0 + $0x50] ss:$36 sps:$4 sm:$0xff]   ;;  %v2379_v1 = vld [vmem:[%s3288_s1 + $0x108] sm:$0xff]   ;;  %v2384_v6 = vld [vmem:[%s3288_s1 + $0x1c0] sm:$0xff]  }
  0x17   :  { %2178 = vmatpush3.bf16.msra.mxu0 %v2331_v21  ;;  %v2375_v61 = vld [vmem:[%s3288_s1 + $0x110] sm:$0xff]   ;;  %v2380_v2 = vld [vmem:[%s3288_s1 + $0x1c8] sm:$0xff]   ;;  %v2388_v9 = vld [vmem:[%s3288_s1 + $0x180] sm:$0xff]  }
  0x18   :  { %2179 = vmatprep.subr.bf16.mxu0 %v2334_v24  ;;  %v2376_v62 = vld [vmem:[%s3288_s1 + $0x1d0] sm:$0xff]   ;;  %v2381_v3 = vld [vmem:[%s3288_s1 + $0x188] sm:$0xff]   ;;  %v2389_v10 = vld [vmem:[%s3288_s1 + $0x238] sm:$0xff]  }
  0x19   :  { %2206 = vmatpush3.bf16.msra.mxu1 %v2333_v23  ;;  %v2377_v63 = vld [vmem:[%s3288_s1 + $0x190] sm:$0xff]   ;;  %v2390_v11 = vld [vmem:[%s3289_s0 + $0x18] ss:$36 sps:$4 sm:$0xff]   ;;  %v2397_v16 = vld [vmem:[%s3288_s1 + $0x228] sm:$0xff]  }
  0x1a   :  { %2207 = vmatprep.subr.bf16.mxu1 %v2336_v26  ;;  %v2385_v7 = vld [vmem:[%s3289_s0 + $0x10] ss:$36 sps:$4 sm:$0xff]   ;;  %v2392_v12 = vld [vmem:[%s3289_s0 + $0x1c] ss:$36 sps:$4 sm:$0xff]   ;;  %v2398_v17 = vld [vmem:[%s3289_s0 + $0x64] ss:$36 sps:$4 sm:$0xff]  }
  0x1b   :  { %2180 = vmatpush3.bf16.msra.mxu0 %v2335_v25  ;;  %v2387_v8 = vld [vmem:[%s3289_s0 + $0x14] ss:$36 sps:$4 sm:$0xff]   ;;  %v2394_v14 = vld [vmem:[%s3289_s0 + $0x5c] ss:$36 sps:$4 sm:$0xff]   ;;  %v2404_v23 = vld [vmem:[%s3288_s1 + $0x208] sm:$0xff]  }
  0x1c   :  { %2181 = vmatprep.subr.bf16.mxu0 %v2338_v28  ;;  %v2393_v13 = vld [vmem:[%s3288_s1 + $0x230] sm:$0xff]   ;;  %v2396_v15 = vld [vmem:[%s3289_s0 + $0x58] ss:$36 sps:$4 sm:$0xff]   ;;  %v2400_v18 = vld [vmem:[%s3289_s0 + $0x60] ss:$36 sps:$4 sm:$0xff]  }
  0x1d   :  { %2208 = vmatpush3.bf16.msra.mxu1 %v2337_v27  ;;  %v2401_v19 = vld [vmem:[%s3288_s1 + $0x220] sm:$0xff]   ;;  %v2402_v20 = vld [vmem:[%s3288_s1 + $0x218] sm:$0xff]   ;;  %v2403_v22 = vld [vmem:[%s3288_s1 + $0x210] sm:$0xff]  }
  0x1e   :  { %2209 = vmatprep.subr.bf16.mxu1 %v2340_v30  ;;  %v2406_v21 = vld [vmem:[%s3289_s0 + $0x20] ss:$36 sps:$4 sm:$0xff]   ;;  %v2407_v25 = vld [vmem:[%s3289_s0 + $0x68] ss:$36 sps:$4 sm:$0xff]  }
  0x1f   :  { %2182 = vmatpush3.bf16.msra.mxu0 %v2339_v29  ;;  %v2405_v24 = vld [vmem:[%s3288_s1 + $0x200] sm:$0xff]   ;;  %v2411_v28 = vld [vmem:[%s3290_s3 + $0xe8] ss:$16 sps:$4 sm:$0xff]   ;;  %v2413_v29 = vld [vmem:[%s3290_s3 + $0xec] ss:$16 sps:$4 sm:$0xff]  }
  0x20   :  { %2223 = vmatprep.subr.bf16.mxu0 %v2345_v34  ;;  %v2410_v26 = vld [vmem:[%s3290_s3 + $0xe4] ss:$16 sps:$4 sm:$0xff]   ;;  %v2408_v27 = vld [vmem:[%s3290_s3 + $0xe0] ss:$16 sps:$4 sm:$0xff]   ;;  %v2425_v36 = vld [vmem:[%s3290_s3 + $0xac] ss:$16 sps:$4 sm:$0xff]  }
  0x21   :  { %2210 = vmatpush3.bf16.msra.mxu1 %v2344_v33  ;;  %v2416_v30 = vld [vmem:[%s3290_s3 + $0xc4] ss:$16 sps:$4 sm:$0xff]   ;;  %v2414_v32 = vld [vmem:[%s3290_s3 + $0xc0] ss:$16 sps:$4 sm:$0xff]   ;;  %v2417_v33 = vld [vmem:[%s3290_s3 + $0xc8] ss:$16 sps:$4 sm:$0xff]  }
  0x22   :  { %760 = vmatmul.mubr.bf16.vlgmr.msra.gmra.mxu0 %v2341_v31  ;;  %2251 = vmatprep.subr.bf16.mxu1 %v2350_v38  ;;  %v2419_v31 = vld [vmem:[%s3290_s3 + $0xcc] ss:$16 sps:$4 sm:$0xff]   ;;  %v2422_v34 = vld [vmem:[%s3290_s3 + $0xa4] ss:$16 sps:$4 sm:$0xff]  }
  0x23   :  { %2224 = vmatpush3.bf16.msra.mxu0 %v2349_v37  ;;  %767 = vmatprep.mubr.bf16.mxu0 %v2366_v54  ;;  %v2423_v37 = vld [vmem:[%s3290_s3 + $0xa8] ss:$16 sps:$4 sm:$0xff]   ;;  %v2428_v38 = vld [vmem:[%s3290_s3 + $0x84] ss:$16 sps:$4 sm:$0xff]  }
  0x24   :  { %809 = vmatmul.mubr.bf16.vlgmr.msra.gmra.mxu1 %v2346_v35  ;;  %2225 = vmatprep.subr.bf16.mxu0 %v2352_v40  ;;  %v2420_v35 = vld [vmem:[%s3290_s3 + $0xa0] ss:$16 sps:$4 sm:$0xff]   ;;  %v2452_v54 = vld [vmem:[%s3290_s3 + $0x4] ss:$16 sps:$4 sm:$0xff]  }
  0x25   :  { %2252 = vmatpush3.bf16.msra.mxu1 %v2351_v39  ;;  %816 = vmatprep.mubr.bf16.mxu1 %v2371_v58  ;;  %v2431_v39 = vld [vmem:[%s3290_s3 + $0x8c] ss:$16 sps:$4 sm:$0xff]   ;;  %v2426_v40 = vld [vmem:[%s3290_s3 + $0x80] ss:$16 sps:$4 sm:$0xff]   ;;  %v2552_v58 = vmov 0  }
  0x26   :  { %2253 = vmatprep.subr.bf16.mxu1 %v2354_v42  ;;  %v2434_v42 = vld [vmem:[%s3290_s3 + $0x64] ss:$16 sps:$4 sm:$0xff]  }
  0x27   :  { %2226 = vmatpush3.bf16.msra.mxu0 %v2353_v41  ;;  %v2429_v41 = vld [vmem:[%s3290_s3 + $0x88] ss:$16 sps:$4 sm:$0xff]  }
  0x28   :  { %2227 = vmatprep.subr.bf16.mxu0 %v2356_v44  ;;  %v2437_v44 = vld [vmem:[%s3290_s3 + $0x6c] ss:$16 sps:$4 sm:$0xff]  }
  0x29   :  { %2254 = vmatpush3.bf16.msra.mxu1 %v2355_v43  ;;  %v2432_v43 = vld [vmem:[%s3290_s3 + $0x60] ss:$16 sps:$4 sm:$0xff]  }
  0x2a   :  { %2255 = vmatprep.subr.bf16.mxu1 %v2358_v46  ;;  %768 = vmatmul.mubr.bf16.gmra.mxu0 %v2369_v56  ;;  %v2440_v46 = vld [vmem:[%s3290_s3 + $0x44] ss:$16 sps:$4 sm:$0xff]   ;;  %v2450_v56 = vld [vmem:[%s3290_s3] ss:$16 sps:$4 sm:$0xff]  }
  0x2b   :  { %2228 = vmatpush3.bf16.msra.mxu0 %v2357_v45  ;;  %857 = vmatprep.mubr.bf16.mxu0 %v2387_v8  ;;  %v2435_v45 = vld [vmem:[%s3290_s3 + $0x68] ss:$16 sps:$4 sm:$0xff]  }
  0x2c   :  { %2229 = vmatprep.subr.bf16.mxu0 %v2360_v48  ;;  %817 = vmatmul.mubr.bf16.gmra.mxu1 %v2374_v60  ;;  %v2438_v48 = vld [vmem:[%s3290_s3 + $0x40] ss:$16 sps:$4 sm:$0xff]   ;;  %v2461_v60 = vld [vmem:[%s3291_s6 + $0x174] ss:$8 sps:$4 sm:$0xff]  }
  0x2d   :  { %2256 = vmatpush3.bf16.msra.mxu1 %v2359_v47  ;;  %906 = vmatprep.mubr.bf16.mxu1 %v2392_v12  ;;  %v2443_v47 = vld [vmem:[%s3290_s3 + $0x4c] ss:$16 sps:$4 sm:$0xff]  }
  0x2e   :  { %2257 = vmatprep.subr.bf16.mxu1 %v2362_v50  ;;  %v2446_v50 = vld [vmem:[%s3290_s3 + $0x24] ss:$16 sps:$4 sm:$0xff]  }
  0x2f   :  { %2230 = vmatpush3.bf16.msra.mxu0 %v2361_v49  ;;  %v2441_v49 = vld [vmem:[%s3290_s3 + $0x48] ss:$16 sps:$4 sm:$0xff]  }
  0x30   :  { %2231 = vmatprep.subr.bf16.mxu0 %v2364_v52  ;;  %v2444_v52 = vld [vmem:[%s3290_s3 + $0x20] ss:$16 sps:$4 sm:$0xff]  }
  0x31   :  { %2258 = vmatpush3.bf16.msra.mxu1 %v2363_v51  ;;  %v2449_v51 = vld [vmem:[%s3290_s3 + $0x2c] ss:$16 sps:$4 sm:$0xff]  }
  0x32   :  { %2259 = vmatprep.subr.bf16.mxu1 %v2368_v55  ;;  %v2455_v55 = vld [vmem:[%s3290_s3 + $0xc] ss:$16 sps:$4 sm:$0xff]  }
  0x33   :  { %2232 = vmatpush3.bf16.msra.mxu0 %v2365_v53  ;;  %v2447_v53 = vld [vmem:[%s3290_s3 + $0x28] ss:$16 sps:$4 sm:$0xff]  }
  0x34   :  { %2233 = vmatprep.subr.bf16.mxu0 %v2373_v59  ;;  %v2458_v59 = vld [vmem:[%s3291_s6 + $0x74] ss:$8 sps:$4 sm:$0xff]  }
  0x35   :  { %2260 = vmatpush3.bf16.msra.mxu1 %v2370_v57  ;;  %v2453_v57 = vld [vmem:[%s3290_s3 + $0x8] ss:$16 sps:$4 sm:$0xff]  }
  0x36   :  { %2261 = vmatprep.subr.bf16.mxu1 %v2376_v62 }
  0x37   :  { %2234 = vmatpush3.bf16.msra.mxu0 %v2375_v61 }
  0x38   :  { %2235 = vmatprep.subr.bf16.mxu0 %v2378_v0 }
  0x39   :  { %2262 = vmatpush3.bf16.msra.mxu1 %v2377_v63 }
  0x3a   :  { %2263 = vmatprep.subr.bf16.mxu1 %v2380_v2 }
  0x3b   :  { %2236 = vmatpush3.bf16.msra.mxu0 %v2379_v1 }
  0x3c   :  { %2237 = vmatprep.subr.bf16.mxu0 %v2382_v4 }
  0x3d   :  { %2264 = vmatpush3.bf16.msra.mxu1 %v2381_v3 }
  0x3e   :  { %2265 = vmatprep.subr.bf16.mxu1 %v2384_v6 }
  0x3f   :  { %2238 = vmatpush3.bf16.msra.mxu0 %v2383_v5 }
  0x40   :  { %2289 = vmatprep.subr.bf16.mxu0 %v2389_v10 }
  0x41   :  { %2266 = vmatpush3.bf16.msra.mxu1 %v2388_v9 }
  0x42   :  { %858 = vmatmul.mubr.bf16.vlgmr.msra.gmra.mxu0 %v2385_v7  ;;  %1192 = vmatprep.subr.bf16.mxu1 %v2410_v26 }
  0x43   :  { %2290 = vmatpush3.bf16.msra.mxu0 %v2389_v10  ;;  %865 = vmatprep.mubr.bf16.mxu0 %v2394_v14 }
  0x44   :  { %907 = vmatmul.mubr.bf16.vlgmr.msra.gmra.mxu1 %v2390_v11  ;;  %2291 = vmatprep.subr.bf16.mxu0 %v2393_v13 }
  0x45   :  { %914 = vmatprep.mubr.bf16.mxu1 %v2398_v17  ;;  %1193 = vmatpush1.bf16.msra.mxu1 %v2408_v27 }
  0x46   :  { %1194 = vmatprep.subr.bf16.mxu1 %v2416_v30 }
  0x47   :  { %2292 = vmatpush3.bf16.msra.mxu0 %v2393_v13 }
  0x48   :  { %2293 = vmatprep.subr.bf16.mxu0 %v2397_v16 }
  0x49   :  { %1195 = vmatpush1.bf16.msra.mxu1 %v2414_v32 }
  0x4a   :  { %866 = vmatmul.mubr.bf16.gmra.mxu0 %v2396_v15  ;;  %1196 = vmatprep.subr.bf16.mxu1 %v2422_v34 }
  0x4b   :  { %2294 = vmatpush3.bf16.msra.mxu0 %v2397_v16  ;;  %2305 = vmatprep.mubr.bf16.mxu0 %v2406_v21 }
  0x4c   :  { %915 = vmatmul.mubr.bf16.gmra.mxu1 %v2400_v18  ;;  %2295 = vmatprep.subr.bf16.mxu0 %v2401_v19 }
  0x4d   :  { %1197 = vmatpush1.bf16.msra.mxu1 %v2420_v35  ;;  %1224 = vmatprep.mubr.bf16.mxu1 %v2552_v58 }
  0x4e   :  { %1198 = vmatprep.subr.bf16.mxu1 %v2428_v38 }
  0x4f   :  { %2296 = vmatpush3.bf16.msra.mxu0 %v2401_v19 }
  0x50   :  { %2297 = vmatprep.subr.bf16.mxu0 %v2402_v20 }
  0x51   :  { %1199 = vmatpush1.bf16.msra.mxu1 %v2426_v40 }
  0x52   :  { %1200 = vmatprep.subr.bf16.mxu1 %v2434_v42 }
  0x53   :  { %2298 = vmatpush3.bf16.msra.mxu0 %v2402_v20 }
  0x54   :  { %2299 = vmatprep.subr.bf16.mxu0 %v2403_v22 }
  0x55   :  { %1201 = vmatpush1.bf16.msra.mxu1 %v2432_v43 }
  0x56   :  { %1202 = vmatprep.subr.bf16.mxu1 %v2440_v46 }
  0x57   :  { %2300 = vmatpush3.bf16.msra.mxu0 %v2403_v22 }
  0x58   :  { %2301 = vmatprep.subr.bf16.mxu0 %v2404_v23 }
  0x59   :  { %1203 = vmatpush1.bf16.msra.mxu1 %v2438_v48 }
  0x5a   :  { %1204 = vmatprep.subr.bf16.mxu1 %v2446_v50 }
  0x5b   :  { %2302 = vmatpush3.bf16.msra.mxu0 %v2404_v23  ;;  %v1956_v23 = vld [vmem:[%s3292_s2] ss:$0 sm:$0xff] }
  0x5c   :  { %2303 = vmatprep.subr.bf16.mxu0 %v2405_v24 }
  0x5d   :  { %1205 = vmatpush1.bf16.msra.mxu1 %v2444_v52 }
  0x5e   :  { %1206 = vmatprep.subr.bf16.mxu1 %v2452_v54 }
  0x5f   :  { %2304 = vmatpush3.bf16.msra.mxu0 %v2405_v24 }
  0x60   :  { %1245 = vmatprep.subr.bf16.mxu0 %v2413_v29 }
  0x61   :  { %1207 = vmatpush1.bf16.msra.mxu1 %v2450_v56 }
  0x62   :  { %2306 = vmatmul.mubr.bf16.vlgmr.msra.gmra.mxu0 %v2407_v25  ;;  %1806 = vmatprep.subr.bf16.mxu1 %v2458_v59 }
  0x63   :  { %1246 = vmatpush1.bf16.msra.mxu0 %v2411_v28  ;;  %1277 = vmatprep.mubr.bf16.mxu0 %v2552_v58 }
  0x64   :  { %1247 = vmatprep.subr.bf16.mxu0 %v2419_v31 }
  0x67   :  { %1248 = vmatpush1.bf16.msra.mxu0 %v2417_v33 }
  0x68   :  { %1249 = vmatprep.subr.bf16.mxu0 %v2425_v36 }
  0x6b   :  { %1250 = vmatpush1.bf16.msra.mxu0 %v2423_v37 }
  0x6c   :  { %1251 = vmatprep.subr.bf16.mxu0 %v2431_v39 }
  0x6f   :  { %1252 = vmatpush1.bf16.msra.mxu0 %v2429_v41 }
  0x70   :  { %1253 = vmatprep.subr.bf16.mxu0 %v2437_v44 }
  0x73   :  { %1254 = vmatpush1.bf16.msra.mxu0 %v2435_v45 }
  0x74   :  { %1255 = vmatprep.subr.bf16.mxu0 %v2443_v47 }
  0x77   :  { %1256 = vmatpush1.bf16.msra.mxu0 %v2441_v49 }
  0x78   :  { %1257 = vmatprep.subr.bf16.mxu0 %v2449_v51 }
  0x7b   :  { %1258 = vmatpush1.bf16.msra.mxu0 %v2447_v53 }
  0x7c   :  { %1259 = vmatprep.subr.bf16.mxu0 %v2455_v55 }
  0x7f   :  { %1260 = vmatpush1.bf16.msra.mxu0 %v2453_v57 }
  0x80   :  { %1859 = vmatprep.subr.bf16.mxu0 %v2461_v60 }
  0xe2   :  { %v2183_v61 = vpop.f32.mrf.mxu0 }
  0xe4   :  { %v2184_v62 = vpop.f32.mrf.mxu0  ;;  %v2211_v63 = vpop.f32.mrf.mxu1 }
  0xe5   :  { %v2185_v22 = vadd.f32 %v2184_v62, %v2183_v61 }
  0xe6   :  { %v2186_v0 = vpop.f32.mrf.mxu0  ;;  %v2212_v1 = vpop.f32.mrf.mxu1 }
  0xe7   :  { %v762_v27 = vadd.f32 %v2185_v22, %v1956_v23  ;;  %v2213_v28 = vadd.f32 %v2212_v1, %v2211_v63  ;;  %v2476_v22 = vld [vmem:[%s3291_s6 + $0x44] ss:$8 sps:$4 sm:$0xff]  }
  0xe8   :  { %v2187_v2 = vpop.f32.mrf.mxu0  ;;  %v2214_v3 = vpop.f32.mrf.mxu1 }
  0xe9   :  { %v2188_v24 = vadd.f32 %v2187_v2, %v2186_v0  ;;  %v811_v36 = vadd.f32 %v2213_v28, %v762_v27  ;;  %v2485_v27 = vld [vmem:[%s3291_s6 + $0x134] ss:$8 sps:$4 sm:$0xff]   ;;  %v2480_v28 = vld [vmem:[%s3291_s6 + $0x30] ss:$8 sps:$4 sm:$0xff]  }
  0xea   :  { %v2189_v4 = vpop.f32.mrf.mxu0  ;;  %v2215_v5 = vpop.f32.mrf.mxu1 }
  0xeb   :  { %v765_v29 = vadd.f32 %v2188_v24, %v1956_v23  ;;  %v2216_v30 = vadd.f32 %v2215_v5, %v2214_v3  ;;  %v2474_v24 = vld [vmem:[%s3291_s6 + $0x40] ss:$8 sps:$4 sm:$0xff]  }
  0xec   :  { %v2190_v6 = vpop.f32.mrf.mxu0  ;;  %v2217_v7 = vpop.f32.mrf.mxu1 }
  0xed   :  { %v2191_v35 = vadd.f32 %v2190_v6, %v2189_v4  ;;  %v814_v38 = vadd.f32 %v2216_v30, %v765_v29  ;;  %v2483_v29 = vld [vmem:[%s3291_s6 + $0x130] ss:$8 sps:$4 sm:$0xff]   ;;  %v2488_v30 = vld [vmem:[%s3291_s6 + $0x24] ss:$8 sps:$4 sm:$0xff]  }
  0xee   :  { %v2192_v8 = vpop.f32.mrf.mxu0  ;;  %v2218_v9 = vpop.f32.mrf.mxu1 }
  0xef   :  { %v770_v45 = vadd.f32 %v2191_v35, %v1956_v23  ;;  %v2219_v46 = vadd.f32 %v2218_v9, %v2217_v7  ;;  %v2456_v9 = vld [vmem:[%s3291_s6 + $0x70] ss:$8 sps:$4 sm:$0xff]   ;;  %v2497_v35 = vld [vmem:[%s3291_s6 + $0x114] ss:$8 sps:$4 sm:$0xff]  }
  0xf0   :  { %v2193_v10 = vpop.f32.mrf.mxu0  ;;  %v2220_v11 = vpop.f32.mrf.mxu1 }
  0xf1   :  { %v2194_v33 = vadd.f32 %v2193_v10, %v2192_v8  ;;  %v819_v56 = vadd.f32 %v2219_v46, %v770_v45  ;;  %v2459_v10 = vld [vmem:[%s3291_s6 + $0x170] ss:$8 sps:$4 sm:$0xff]   ;;  %v2512_v46 = vld [vmem:[%s3291_s6 + $0xe4] ss:$8 sps:$4 sm:$0xff]  }
  0xf2   :  { %v2221_v13 = vpop.f32.mrf.mxu1  ;;  %v2507_v45 = vld [vmem:[%s3291_s6 + $0x1f0] ss:$8 sps:$4 sm:$0xff]  }
  0xf3   :  { %v773_v41 = vadd.f32 %v2194_v33, %v1956_v23  ;;  %v2222_v42 = vadd.f32 %v2221_v13, %v2220_v11  ;;  %v2464_v11 = vld [vmem:[%s3291_s6 + $0x64] ss:$8 sps:$4 sm:$0xff]   ;;  %v2489_v33 = vld [vmem:[%s3291_s6 + $0x120] ss:$8 sps:$4 sm:$0xff]  }
  0xf4   :  { %v2479_v23 = vld [vmem:[%s3291_s6 + $0x144] ss:$8 sps:$4 sm:$0xff]  }
  0xf5   :  { %v822_v53 = vadd.f32 %v2222_v42, %v773_v41  ;;  %v2501_v41 = vld [vmem:[%s3291_s6 + $0x100] ss:$8 sps:$4 sm:$0xff]   ;;  %v2506_v42 = vld [vmem:[%s3291_s6 + $0xf4] ss:$8 sps:$4 sm:$0xff]  }
 0x102   :  { %v2239_v12 = vpop.f32.mrf.mxu0 }
 0x104   :  { %v2240_v14 = vpop.f32.mrf.mxu0  ;;  %v2267_v15 = vpop.f32.mrf.mxu1 }
 0x105   :  { %v2241_v34 = vadd.f32 %v2240_v14, %v2239_v12  ;;  %v2467_v12 = vld [vmem:[%s3291_s6 + $0x164] ss:$8 sps:$4 sm:$0xff]  }
 0x106   :  { %v2242_v16 = vpop.f32.mrf.mxu0  ;;  %v2268_v17 = vpop.f32.mrf.mxu1 }
 0x107   :  { %v860_v43 = vadd.f32 %v2241_v34, %v811_v36  ;;  %v2269_v44 = vadd.f32 %v2268_v17, %v2267_v15  ;;  %v2462_v15 = vld [vmem:[%s3291_s6 + $0x60] ss:$8 sps:$4 sm:$0xff]   ;;  %v2470_v17 = vld [vmem:[%s3291_s6 + $0x54] ss:$8 sps:$4 sm:$0xff]   ;;  %v2492_v36 = vld [vmem:[%s3291_s6 + $0x10] ss:$8 sps:$4 sm:$0xff]  }
 0x108   :  { %v2243_v18 = vpop.f32.mrf.mxu0  ;;  %v2270_v19 = vpop.f32.mrf.mxu1  ;;  %v2494_v34 = vld [vmem:[%s3291_s6 + $0x14] ss:$8 sps:$4 sm:$0xff]  }
 0x109   :  { %v2244_v37 = vadd.f32 %v2243_v18, %v2242_v16  ;;  %v909_v55 = vadd.f32 %v2269_v44, %v860_v43  ;;  %v2465_v16 = vld [vmem:[%s3291_s6 + $0x160] ss:$8 sps:$4 sm:$0xff]   ;;  %v2509_v43 = vld [vmem:[%s3291_s6 + $0x1f4] ss:$8 sps:$4 sm:$0xff]   ;;  %v2504_v44 = vld [vmem:[%s3291_s6 + $0xf0] ss:$8 sps:$4 sm:$0xff]  }
 0x10a   :  { %v2245_v20 = vpop.f32.mrf.mxu0  ;;  %v2271_v21 = vpop.f32.mrf.mxu1 }
 0x10b   :  { %v863_v48 = vadd.f32 %v2244_v37, %v814_v38  ;;  %v2272_v49 = vadd.f32 %v2271_v21, %v2270_v19  ;;  %v2471_v21 = vld [vmem:[%s3291_s6 + $0x150] ss:$8 sps:$4 sm:$0xff]   ;;  %v2500_v38 = vld [vmem:[%s3291_s6 + $0x4] ss:$8 sps:$4 sm:$0xff]  }
 0x10c   :  { %v2246_v25 = vpop.f32.mrf.mxu0  ;;  %v2273_v26 = vpop.f32.mrf.mxu1  ;;  %v2495_v37 = vld [vmem:[%s3291_s6 + $0x110] ss:$8 sps:$4 sm:$0xff]  }
 0x10d   :  { %v2247_v54 = vadd.f32 %v2246_v25, %v2245_v20  ;;  %v912_v62 = vadd.f32 %v2272_v49, %v863_v48  ;;  %v2468_v20 = vld [vmem:[%s3291_s6 + $0x50] ss:$8 sps:$4 sm:$0xff]   ;;  %v2477_v25 = vld [vmem:[%s3291_s6 + $0x140] ss:$8 sps:$4 sm:$0xff]  }
 0x10e   :  { %v2248_v31 = vpop.f32.mrf.mxu0  ;;  %v2274_v32 = vpop.f32.mrf.mxu1  ;;  %v2510_v48 = vld [vmem:[%s3291_s6 + $0xe0] ss:$8 sps:$4 sm:$0xff]  }
 0x10f   :  { %v868_v0 = vadd.f32 %v2247_v54, %v819_v56  ;;  %v2275_v1 = vadd.f32 %v2274_v32, %v2273_v26  ;;  %v2482_v26 = vld [vmem:[%s3291_s6 + $0x34] ss:$8 sps:$4 sm:$0xff]   ;;  %v2486_v32 = vld [vmem:[%s3291_s6 + $0x20] ss:$8 sps:$4 sm:$0xff]   ;;  %v2524_v54 = vld [vmem:[%s3291_s6 + $0xc4] ss:$8 sps:$4 sm:$0xff]  }
 0x110   :  { %v2249_v39 = vpop.f32.mrf.mxu0  ;;  %v2276_v40 = vpop.f32.mrf.mxu1  ;;  %v2513_v49 = vld [vmem:[%s3291_s6 + $0x1e0] ss:$8 sps:$4 sm:$0xff]  }
 0x111   :  { %v2250_v50 = vadd.f32 %v2249_v39, %v2248_v31  ;;  %v917_v6 = vadd.f32 %v2275_v1, %v868_v0  ;;  %v2491_v31 = vld [vmem:[%s3291_s6 + $0x124] ss:$8 sps:$4 sm:$0xff]   ;;  %v2522_v56 = vld [vmem:[%s3291_s6 + $0xc0] ss:$8 sps:$4 sm:$0xff]  }
 0x112   :  { %v2277_v51 = vpop.f32.mrf.mxu1  ;;  %v2503_v39 = vld [vmem:[%s3291_s6 + $0x104] ss:$8 sps:$4 sm:$0xff]   ;;  %v2534_v1 = vld [vmem:[%s3291_s6 + $0xa0] ss:$8 sps:$4 sm:$0xff]  }
 0x113   :  { %v871_v59 = vadd.f32 %v2250_v50, %v822_v53  ;;  %v2278_v60 = vadd.f32 %v2277_v51, %v2276_v40  ;;  %v2498_v40 = vld [vmem:[%s3291_s6] ss:$8 sps:$4 sm:$0xff]   ;;  %v2518_v50 = vld [vmem:[%s3291_s6 + $0xd4] ss:$8 sps:$4 sm:$0xff]   ;;  %v2519_v53 = vld [vmem:[%s3291_s6 + $0x1d0] ss:$8 sps:$4 sm:$0xff]  }
 0x114   :  { %v2521_v51 = vld [vmem:[%s3291_s6 + $0x1d4] ss:$8 sps:$4 sm:$0xff]   ;;  %v2539_v0 = vld [vmem:[%s3291_s6 + $0x1a4] ss:$8 sps:$4 sm:$0xff]  }
 0x115   :  { %v920_v4 = vadd.f32 %v2278_v60, %v871_v59  ;;  %v2530_v59 = vld [vmem:[%s3291_s6 + $0xb4] ss:$8 sps:$4 sm:$0xff]  }
 0x116   :  { %v2533_v60 = vld [vmem:[%s3291_s6 + $0x1b4] ss:$8 sps:$4 sm:$0xff]  }
 0x122   :  { %v2307_v47 = vpop.f32.mrf.mxu0 }
 0x123   :  { %v966_v13 = vadd.f32 %v2307_v47, %v917_v6  ;;  %v2515_v47 = vld [vmem:[%s3291_s6 + $0x1e4] ss:$8 sps:$4 sm:$0xff]   ;;  %v2543_v6 = vld [vmem:[%s3291_s6 + $0x190] ss:$8 sps:$4 sm:$0xff]  }
 0x124   :  { %v957_v52 = vpop.f32.mrf.mxu0 }
 0x125   :  { %v958_v61 = vadd.f32 %v957_v52, %v909_v55  ;;  %v974_v18 = vmax.f32 %v966_v13, 0.0  ;;  %v2516_v52 = vld [vmem:[%s3291_s6 + $0xd0] ss:$8 sps:$4 sm:$0xff]   ;;  %v2527_v55 = vld [vmem:[%s3291_s6 + $0x1c4] ss:$8 sps:$4 sm:$0xff]  }
 0x126   :  { %v2308_v57 = vpop.f32.mrf.mxu0 }
 0x127   :  { %v972_v3 = vmax.f32 %v958_v61, 0.0  ;;  %v969_v7 = vadd.f32 %v2308_v57, %v920_v4  ;;  %v2525_v57 = vld [vmem:[%s3291_s6 + $0x1c0] ss:$8 sps:$4 sm:$0xff]   ;;  %v2528_v61 = vld [vmem:[%s3291_s6 + $0xb0] ss:$8 sps:$4 sm:$0xff]  }
 0x128   :  { %v960_v63 = vpop.f32.mrf.mxu0  ;;  %v2545_v4 = vld [vmem:[%s3291_s6 + $0x194] ss:$8 sps:$4 sm:$0xff]  }
 0x129   :  { %v961_v2 = vadd.f32 %v960_v63, %v912_v62  ;;  %v975_v14 = vmax.f32 %v969_v7, 0.0  ;;  %v2531_v62 = vld [vmem:[%s3291_s6 + $0x1b0] ss:$8 sps:$4 sm:$0xff]   ;;  %v2536_v63 = vld [vmem:[%s3291_s6 + $0xa4] ss:$8 sps:$4 sm:$0xff]  }
 0x12a   :  { %v2548_v7 = vld [vmem:[%s3291_s6 + $0x84] ss:$8 sps:$4 sm:$0xff]  }
 0x12b   :  { %v973_v5 = vmax.f32 %v961_v2, 0.0  ;;  %v977_v19 = vpack.c.bf16 %v975_v14, %v974_v18  ;;  %v2537_v2 = vld [vmem:[%s3291_s6 + $0x1a0] ss:$8 sps:$4 sm:$0xff]  }
 0x12c   :  { %v1299_v18 = vld [vmem:[%s3294_s5 + $0x8] sm:$0xff] }
 0x12d   :  { %v976_v8 = vpack.c.bf16 %v973_v5, %v972_v3  ;;  %v2542_v3 = vld [vmem:[%s3291_s6 + $0x94] ss:$8 sps:$4 sm:$0xff]   ;;  %v2540_v5 = vld [vmem:[%s3291_s6 + $0x90] ss:$8 sps:$4 sm:$0xff]  }
 0x12f   :  { %1225 = vmatmul.mubr.bf16.vlgmr.msra.gmra.mxu1 %v976_v8  ;;  %1278 = vmatmul.mubr.bf16.vlgmr.msra.gmra.mxu0 %v976_v8  ;;  %v2551_v8 = vld [vmem:[%s3291_s6 + $0x184] ss:$8 sps:$4 sm:$0xff]  }
 0x130   :  { %1234 = vmatprep.mubr.bf16.mxu1 %v2552_v58  ;;  %1287 = vmatprep.mubr.bf16.mxu0 %v2552_v58  ;;  %v2473_v58 = vld [vmem:[%s3291_s6 + $0x154] ss:$8 sps:$4 sm:$0xff]  }
 0x131   :  { %1807 = vmatpush1.bf16.msra.mxu1 %v2456_v9  ;;  %1860 = vmatpush1.bf16.msra.mxu0 %v2459_v10  ;;  %v2546_v9 = vld [vmem:[%s3291_s6 + $0x80] ss:$8 sps:$4 sm:$0xff]  }
 0x132   :  { %1808 = vmatprep.subr.bf16.mxu1 %v2464_v11  ;;  %1861 = vmatprep.subr.bf16.mxu0 %v2467_v12  ;;  %v2549_v10 = vld [vmem:[%s3291_s6 + $0x180] ss:$8 sps:$4 sm:$0xff]   ;;  %v1012_v11 = vlaneseq }
 0x134   :  { %v3168_v12 = vshrl.u32 %v1012_v11, 7 }
 0x135   :  { %1809 = vmatpush1.bf16.msra.mxu1 %v2462_v15  ;;  %1862 = vmatpush1.bf16.msra.mxu0 %v2465_v16  ;;  %v1010_v15 = vld [vmem:[%s3293_s4] sm:$0xf] }
 0x136   :  { %1810 = vmatprep.subr.bf16.mxu1 %v2470_v17  ;;  %1863 = vmatprep.subr.bf16.mxu0 %v2473_v58  ;;  %v1014_v13 = vsub.s32 0, %v3168_v12  ;;  %v1022_v14 = vsub.s32 2, %v3168_v12  ;;  %v1018_v16 = vsub.s32 1, %v3168_v12  ;;  %v1026_v17 = vsub.s32 3, %v3168_v12  ;;  %v1298_v58 = vld [vmem:[%s3294_s5] sm:$0xff] }
 0x137   :  { %1235 = vmatmul.mubr.bf16.gmra.mxu1 %v977_v19  ;;  %1288 = vmatmul.mubr.bf16.gmra.mxu0 %v977_v19 }
 0x138   :  { %v3185_v19 = vrot.slane %v1010_v15, %v1014_v13 }
 0x139   :  { %1811 = vmatpush1.bf16.msra.mxu1 %v2468_v20  ;;  %1864 = vmatpush1.bf16.msra.mxu0 %v2471_v21  ;;  %v3187_v20 = vrot.slane %v1010_v15, %v1022_v14  ;;  %v1306_v21 = vunpack.c.l.bf16 %v1298_v58 }
 0x13a   :  { %1812 = vmatprep.subr.bf16.mxu1 %v2476_v22  ;;  %1865 = vmatprep.subr.bf16.mxu0 %v2479_v23  ;;  %v1308_v22 = vunpack.c.l.bf16 %v1299_v18  ;;  %v3191_v23 = vrot.slane %v1010_v15, %v1018_v16 }
 0x13d   :  { %1813 = vmatpush1.bf16.msra.mxu1 %v2474_v24  ;;  %1866 = vmatpush1.bf16.msra.mxu0 %v2477_v25  ;;  %v3193_v24 = vrot.slane %v1010_v15, %v1026_v17  ;;  %v1300_v25 = vld [vmem:[%s3294_s5 + $0x10] sm:$0xff] }
 0x13e   :  { %1814 = vmatprep.subr.bf16.mxu1 %v2482_v26  ;;  %1867 = vmatprep.subr.bf16.mxu0 %v2485_v27  ;;  %v1301_v26 = vld [vmem:[%s3294_s5 + $0x18] sm:$0xff] }
 0x141   :  { %1815 = vmatpush1.bf16.msra.mxu1 %v2480_v28  ;;  %1868 = vmatpush1.bf16.msra.mxu0 %v2483_v29 }
 0x142   :  { %1816 = vmatprep.subr.bf16.mxu1 %v2488_v30  ;;  %1869 = vmatprep.subr.bf16.mxu0 %v2491_v31  ;;  %v1307_v31 = vunpack.c.h.bf16 %v1298_v58 }
 0x145   :  { %1817 = vmatpush1.bf16.msra.mxu1 %v2486_v32  ;;  %1870 = vmatpush1.bf16.msra.mxu0 %v2489_v33  ;;  %v1309_v32 = vunpack.c.h.bf16 %v1299_v18  ;;  %v3206_v33 = vld [vmem:[%s3294_s5 + $0x20] sm:$0xff] }
 0x146   :  { %1818 = vmatprep.subr.bf16.mxu1 %v2494_v34  ;;  %1871 = vmatprep.subr.bf16.mxu0 %v2497_v35  ;;  %v3211_v34 = vld [vmem:[%s3294_s5 + $0x28] sm:$0xff] }
 0x149   :  { %1819 = vmatpush1.bf16.msra.mxu1 %v2492_v36  ;;  %1872 = vmatpush1.bf16.msra.mxu0 %v2495_v37  ;;  %v1310_v37 = vunpack.c.l.bf16 %v1300_v25 }
 0x14a   :  { %1820 = vmatprep.subr.bf16.mxu1 %v2500_v38  ;;  %1873 = vmatprep.subr.bf16.mxu0 %v2503_v39  ;;  %v1312_v38 = vunpack.c.l.bf16 %v1301_v26  ;;  %v1311_v39 = vunpack.c.h.bf16 %v1300_v25 }
 0x14d   :  { %1821 = vmatpush1.bf16.msra.mxu1 %v2498_v40  ;;  %1874 = vmatpush1.bf16.msra.mxu0 %v2501_v41  ;;  %v1313_v40 = vunpack.c.h.bf16 %v1301_v26  ;;  %v3216_v41 = vld [vmem:[%s3294_s5 + $0x30] sm:$0xff] }
 0x14e   :  { %1822 = vmatprep.subr.bf16.mxu1 %v2506_v42  ;;  %1875 = vmatprep.subr.bf16.mxu0 %v2509_v43  ;;  %v3221_v42 = vld [vmem:[%s3294_s5 + $0x38] sm:$0xff] }
 0x151   :  { %1823 = vmatpush2.bf16.msra.mxu1 %v2504_v44  ;;  %1876 = vmatpush2.bf16.msra.mxu0 %v2507_v45 }
 0x152   :  { %1824 = vmatprep.subr.bf16.mxu1 %v2512_v46  ;;  %1877 = vmatprep.subr.bf16.mxu0 %v2515_v47 }
 0x155   :  { %1825 = vmatpush2.bf16.msra.mxu1 %v2510_v48  ;;  %1878 = vmatpush2.bf16.msra.mxu0 %v2513_v49  ;;  %v1314_v49 = vunpack.c.l.bf16 %v3206_v33 }
 0x156   :  { %1826 = vmatprep.subr.bf16.mxu1 %v2518_v50  ;;  %1879 = vmatprep.subr.bf16.mxu0 %v2521_v51  ;;  %v1316_v50 = vunpack.c.l.bf16 %v3211_v34  ;;  %v1315_v51 = vunpack.c.h.bf16 %v3206_v33 }
 0x159   :  { %1827 = vmatpush2.bf16.msra.mxu1 %v2516_v52  ;;  %1880 = vmatpush2.bf16.msra.mxu0 %v2519_v53  ;;  %v1317_v52 = vunpack.c.h.bf16 %v3211_v34 }
 0x15a   :  { %1828 = vmatprep.subr.bf16.mxu1 %v2524_v54  ;;  %1881 = vmatprep.subr.bf16.mxu0 %v2527_v55  ;;  %v1318_v55 = vunpack.c.l.bf16 %v3216_v41 }
 0x15d   :  { %1829 = vmatpush2.bf16.msra.mxu1 %v2522_v56  ;;  %1882 = vmatpush2.bf16.msra.mxu0 %v2525_v57  ;;  %v1320_v56 = vunpack.c.l.bf16 %v3221_v42 }
 0x15e   :  { %1830 = vmatprep.subr.bf16.mxu1 %v2530_v59  ;;  %1883 = vmatprep.subr.bf16.mxu0 %v2533_v60 }
 0x161   :  { %1831 = vmatpush2.bf16.msra.mxu1 %v2528_v61  ;;  %1884 = vmatpush2.bf16.msra.mxu0 %v2531_v62 }
 0x162   :  { %1832 = vmatprep.subr.bf16.mxu1 %v2536_v63  ;;  %1885 = vmatprep.subr.bf16.mxu0 %v2539_v0 }
 0x165   :  { %1833 = vmatpush2.bf16.msra.mxu1 %v2534_v1  ;;  %1886 = vmatpush2.bf16.msra.mxu0 %v2537_v2 }
 0x166   :  { %1834 = vmatprep.subr.bf16.mxu1 %v2542_v3  ;;  %1887 = vmatprep.subr.bf16.mxu0 %v2545_v4 }
 0x169   :  { %1835 = vmatpush2.bf16.msra.mxu1 %v2540_v5  ;;  %1888 = vmatpush2.bf16.msra.mxu0 %v2543_v6 }
 0x16a   :  { %1836 = vmatprep.subr.bf16.mxu1 %v2548_v7  ;;  %1889 = vmatprep.subr.bf16.mxu0 %v2551_v8  ;;  %v1319_v8 = vunpack.c.h.bf16 %v3216_v41 }
 0x16d   :  { %1837 = vmatpush2.bf16.msra.mxu1 %v2546_v9  ;;  %1890 = vmatpush2.bf16.msra.mxu0 %v2549_v10  ;;  %v1321_v9 = vunpack.c.h.bf16 %v3221_v42 }
 0x1ef   :  { %v1226_v27 = vpop.f32.mrf.mxu1  ;;  %v1279_v28 = vpop.f32.mrf.mxu0 }
 0x1f0   :  { %v1227_v29 = vadd.f32 %v1226_v27, %v3185_v19  ;;  %v1280_v30 = vadd.f32 %v1279_v28, %v3187_v20 }
 0x1f1   :  { %v1228_v35 = vpop.f32.mrf.mxu1  ;;  %v1281_v36 = vpop.f32.mrf.mxu0 }
 0x1f2   :  { %v1322_v43 = vadd.f32 %v1306_v21, %v1227_v29  ;;  %v1324_v44 = vadd.f32 %v1308_v22, %v1280_v30  ;;  %v1229_v45 = vadd.f32 %v1228_v35, %v3191_v23  ;;  %v1282_v46 = vadd.f32 %v1281_v36, %v3193_v24 }
 0x1f3   :  { %v1230_v47 = vpop.f32.mrf.mxu1  ;;  %v1283_v48 = vpop.f32.mrf.mxu0 }
 0x1f4   :  { %v1323_v53 = vadd.f32 %v1307_v31, %v1229_v45  ;;  %v1325_v54 = vadd.f32 %v1309_v32, %v1282_v46  ;;  %v1338_v57 = vmax.f32 %v1322_v43, 0.0  ;;  %v1340_v59 = vmax.f32 %v1324_v44, 0.0 }
 0x1f5   :  { %v1231_v60 = vadd.f32 %v1230_v47, %v3185_v19  ;;  %v1284_v61 = vadd.f32 %v1283_v48, %v3187_v20  ;;  %v1232_v62 = vpop.f32.mrf.mxu1  ;;  %v1285_v63 = vpop.f32.mrf.mxu0 }
 0x1f6   :  { %v1339_v0 = vmax.f32 %v1323_v53, 0.0  ;;  %v1341_v1 = vmax.f32 %v1325_v54, 0.0  ;;  %v1233_v2 = vadd.f32 %v1232_v62, %v3191_v23  ;;  %v1286_v3 = vadd.f32 %v1285_v63, %v3193_v24 }
 0x1f7   :  { %v1326_v4 = vadd.f32 %v1310_v37, %v1231_v60  ;;  %v1328_v5 = vadd.f32 %v1312_v38, %v1284_v61  ;;  %v1236_v6 = vpop.f32.mrf.mxu1  ;;  %v1289_v7 = vpop.f32.mrf.mxu0 }
 0x1f8   :  { %v2155_v10 = vpack.c.bf16 %v1339_v0, %v1338_v57  ;;  %v2156_v11 = vpack.c.bf16 %v1341_v1, %v1340_v59  ;;  %v1327_v14 = vadd.f32 %v1311_v39, %v1233_v2  ;;  %v1329_v15 = vadd.f32 %v1313_v40, %v1286_v3 }
 0x1f9   :  { %v1342_v17 = vmax.f32 %v1326_v4, 0.0  ;;  %v1344_v58 = vmax.f32 %v1328_v5, 0.0  ;;  %v1237_v18 = vadd.f32 %v1236_v6, %v3185_v19  ;;  %v1290_v21 = vadd.f32 %v1289_v7, %v3187_v20  ;;  %v1238_v22 = vpop.f32.mrf.mxu1  ;;  %v1291_v25 = vpop.f32.mrf.mxu0 }
 0x1fa   :  { %1402 = vst [vmem:[%s3295_s8] sm:$0xff] %v2155_v10  ;;  %1403 = vst [vmem:[%s3295_s8 + $0x8] sm:$0xff] %v2156_v11  ;;  %v1343_v26 = vmax.f32 %v1327_v14, 0.0  ;;  %v1345_v27 = vmax.f32 %v1329_v15, 0.0  ;;  %v1239_v28 = vadd.f32 %v1238_v22, %v3191_v23  ;;  %v1292_v29 = vadd.f32 %v1291_v25, %v3193_v24 }
 0x1fb   :  { %v1354_v30 = vpack.c.bf16 %v1342_v17, %v1338_v57  ;;  %v1356_v31 = vpack.c.bf16 %v1344_v58, %v1340_v59  ;;  %v1330_v32 = vadd.f32 %v1314_v49, %v1237_v18  ;;  %v1332_v33 = vadd.f32 %v1316_v50, %v1290_v21  ;;  %v1240_v34 = vpop.f32.mrf.mxu1  ;;  %v1293_v35 = vpop.f32.mrf.mxu0 }
 0x1fc   :  { %v2157_v36 = vpack.c.bf16 %v1343_v26, %v1342_v17  ;;  %v2158_v37 = vpack.c.bf16 %v1345_v27, %v1344_v58  ;;  %v1331_v38 = vadd.f32 %v1315_v51, %v1239_v28  ;;  %v1333_v39 = vadd.f32 %v1317_v52, %v1292_v29 }
 0x1fd   :  { %v1346_v40 = vmax.f32 %v1330_v32, 0.0  ;;  %v1348_v41 = vmax.f32 %v1332_v33, 0.0  ;;  %v1241_v42 = vadd.f32 %v1240_v34, %v3185_v19  ;;  %v1294_v43 = vadd.f32 %v1293_v35, %v3187_v20  ;;  %v1242_v44 = vpop.f32.mrf.mxu1  ;;  %v1295_v45 = vpop.f32.mrf.mxu0 }
 0x1fe   :  { %1404 = vst [vmem:[%s3295_s8 + $0x10] sm:$0xff] %v2157_v36  ;;  %1405 = vst [vmem:[%s3295_s8 + $0x18] sm:$0xff] %v2158_v37  ;;  %v1347_v46 = vmax.f32 %v1331_v38, 0.0  ;;  %v1349_v47 = vmax.f32 %v1333_v39, 0.0  ;;  %v1243_v48 = vadd.f32 %v1242_v44, %v3191_v23  ;;  %v1296_v49 = vadd.f32 %v1295_v45, %v3193_v24 }
 0x1ff   :  { %v1334_v50 = vadd.f32 %v1318_v55, %v1241_v42  ;;  %v1336_v19 = vadd.f32 %v1320_v56, %v1294_v43  ;;  %v1355_v51 = vpack.c.bf16 %v1343_v26, %v1339_v0  ;;  %v1357_v20 = vpack.c.bf16 %v1345_v27, %v1341_v1  ;;  %v1474_v1 = vld [vmem:[%s3296_s7] sm:$0x3] }
 0x200   :  { %v2159_v52 = vpack.c.bf16 %v1347_v46, %v1346_v40  ;;  %v2160_v53 = vpack.c.bf16 %v1349_v47, %v1348_v41  ;;  %v1335_v54 = vadd.f32 %v1319_v8, %v1243_v48  ;;  %v1337_v57 = vadd.f32 %v1321_v9, %v1296_v49 }
 0x201   :  { %1838 = vmatprep.mubr.bf16.mxu1 %v1355_v51  ;;  %1891 = vmatprep.mubr.bf16.mxu0 %v1357_v20  ;;  %v1350_v23 = vmax.f32 %v1334_v50, 0.0  ;;  %v1352_v24 = vmax.f32 %v1336_v19, 0.0  ;;  %v1479_v2 = vrot.slane %v1474_v1, %v1014_v13  ;;  %v1483_v3 = vrot.slane %v1474_v1, %v1018_v16 }
 0x202   :  { %1406 = vst [vmem:[%s3295_s8 + $0x20] sm:$0xff] %v2159_v52  ;;  %1407 = vst [vmem:[%s3295_s8 + $0x28] sm:$0xff] %v2160_v53  ;;  %v1351_v55 = vmax.f32 %v1335_v54, 0.0  ;;  %v1353_v56 = vmax.f32 %v1337_v57, 0.0  ;;  %1839 = vmatmul.mubr.bf16.vlgmr.msra.gmra.mxu1 %v1354_v30  ;;  %1892 = vmatmul.mubr.bf16.vlgmr.msra.gmra.mxu0 %v1356_v31 }
 0x203   :  { %v1358_v63 = vpack.c.bf16 %v1350_v23, %v1346_v40  ;;  %v1360_v0 = vpack.c.bf16 %v1352_v24, %v1348_v41 }
 0x204   :  { %v2161_v59 = vpack.c.bf16 %v1351_v55, %v1350_v23  ;;  %v2162_v60 = vpack.c.bf16 %v1353_v56, %v1352_v24  ;;  %v1359_v61 = vpack.c.bf16 %v1351_v55, %v1347_v46  ;;  %v1361_v62 = vpack.c.bf16 %v1353_v56, %v1349_v47 }
 0x206   :  { %1408 = vst [vmem:[%s3295_s8 + $0x30] sm:$0xff] %v2161_v59  ;;  %1409 = vst [vmem:[%s3295_s8 + $0x38] sm:$0xff] %v2162_v60  ;;  %1848 = vmatprep.mubr.bf16.mxu1 %v1359_v61  ;;  %1901 = vmatprep.mubr.bf16.mxu0 %v1361_v62 }
 0x20a   :  { %1849 = vmatmul.mubr.bf16.gmra.mxu1 %v1358_v63  ;;  %1902 = vmatmul.mubr.bf16.gmra.mxu0 %v1360_v0 }
 0x2c2   :  { %v1840_v4 = vpop.f32.mrf.mxu1  ;;  %v1893_v5 = vpop.f32.mrf.mxu0 }
 0x2c3   :  { %v1841_v6 = vadd.f32 %v1840_v4, %v1479_v2 }
 0x2c4   :  { %v1842_v7 = vpop.f32.mrf.mxu1  ;;  %v1895_v8 = vpop.f32.mrf.mxu0 }
 0x2c5   :  { %v1894_v9 = vadd.f32 %v1893_v5, %v1841_v6  ;;  %v1843_v10 = vadd.f32 %v1842_v7, %v1483_v3 }
 0x2c6   :  { %v1844_v11 = vpop.f32.mrf.mxu1  ;;  %v1897_v14 = vpop.f32.mrf.mxu0 }
 0x2c7   :  { %v1896_v15 = vadd.f32 %v1895_v8, %v1843_v10  ;;  %v1845_v17 = vadd.f32 %v1844_v11, %v1479_v2  ;;  %v1912_v21 = vmax.f32 %v1894_v9, 0.0 }
 0x2c8   :  { %v1846_v58 = vpop.f32.mrf.mxu1  ;;  %v1899_v18 = vpop.f32.mrf.mxu0 }
 0x2c9   :  { %v1913_v22 = vmax.f32 %v1896_v15, 0.0  ;;  %v1898_v25 = vadd.f32 %v1897_v14, %v1845_v17  ;;  %v1847_v13 = vadd.f32 %v1846_v58, %v1483_v3 }
 0x2ca   :  { %v1850_v26 = vpop.f32.mrf.mxu1  ;;  %v1903_v12 = vpop.f32.mrf.mxu0 }
 0x2cb   :  { %v2163_v16 = vpack.c.bf16 %v1913_v22, %v1912_v21  ;;  %v1900_v27 = vadd.f32 %v1899_v18, %v1847_v13  ;;  %v1851_v28 = vadd.f32 %v1850_v26, %v1479_v2  ;;  %v1914_v31 = vmax.f32 %v1898_v25, 0.0 }
 0x2cc   :  { %v1852_v29 = vpop.f32.mrf.mxu1  ;;  %v1905_v30 = vpop.f32.mrf.mxu0 }
 0x2cd   :  { %1944 = vst [vmem:[%s3297_s9] sm:$0xff] %v2163_v16  ;;  %v1915_v32 = vmax.f32 %v1900_v27, 0.0  ;;  %v1904_v33 = vadd.f32 %v1903_v12, %v1851_v28  ;;  %v1853_v34 = vadd.f32 %v1852_v29, %v1483_v3 }
 0x2ce   :  { %v1854_v35 = vpop.f32.mrf.mxu1  ;;  %v1907_v36 = vpop.f32.mrf.mxu0 }
 0x2cf   :  { %v2164_v37 = vpack.c.bf16 %v1915_v32, %v1914_v31  ;;  %v1906_v38 = vadd.f32 %v1905_v30, %v1853_v34  ;;  %v1855_v39 = vadd.f32 %v1854_v35, %v1479_v2  ;;  %v1916_v41 = vmax.f32 %v1904_v33, 0.0 }
 0x2d0   :  { %v1856_v40 = vpop.f32.mrf.mxu1  ;;  %v1909_v45 = vpop.f32.mrf.mxu0 }
 0x2d1   :  { %1945 = vst [vmem:[%s3297_s9 + $0x8] sm:$0xff] %v2164_v37  ;;  %v1917_v42 = vmax.f32 %v1906_v38, 0.0  ;;  %v1908_v43 = vadd.f32 %v1907_v36, %v1855_v39  ;;  %v1857_v44 = vadd.f32 %v1856_v40, %v1483_v3 }
 0x2d3   :  { %v2165_v46 = vpack.c.bf16 %v1917_v42, %v1916_v41  ;;  %v1910_v47 = vadd.f32 %v1909_v45, %v1857_v44  ;;  %v1918_v48 = vmax.f32 %v1908_v43, 0.0 }
 0x2d5   :  { %1946 = vst [vmem:[%s3297_s9 + $0x10] sm:$0xff] %v2165_v46  ;;  %v1919_v49 = vmax.f32 %v1910_v47, 0.0 }
 0x2d7   :  { %v2166_v50 = vpack.c.bf16 %v1919_v49, %v1918_v48 }
 0x2d9   :  { %1947 = vst [vmem:[%s3297_s9 + $0x18] sm:$0xff] %v2166_v50 }

// kernel: backbone_forward.29
= control target key start
LH: loop header
LB: loop body
LE: loop exit
PB: predicated region body
PF: predicated region fallthrough
CT: control target
= control target key end

     0   :  { %s3113_s1 = inlined_call_operand.vmem [shape: bf16[512,1024], index: 1, kind: input, shape index: {}]   ;;  %s3114_s0 = inlined_call_operand.vmem [shape: bf16[8,512], index: 0, kind: input, shape index: {}]   ;;  %s3115_s2 = inlined_call_operand.vmem [shape: f32[1,1024], index: 2, kind: input, shape index: {}]   ;;  %s3116_s3 = inlined_call_operand.vmem [shape: bf16[8,1024], index: 3, kind: output, shape index: {}]  }
   0x1   :  { %v72_v0 = vld [vmem:[%s3113_s1 + $0x1c0] sm:$0xff]  ;;  %v2360_v54 = vld [vmem:[%s3114_s0 + $0x8] sm:$0xff] }
   0x2   :  { %v76_v1 = vld [vmem:[%s3113_s1 + $0x1e0] sm:$0xff]  ;;  %v2374_v59 = vcombine.high %v2360_v54, %v2360_v54 }
   0x3   :  { %v200_v2 = vld [vmem:[%s3113_s1 + $0x5c0] sm:$0xff]  ;;  %v2037_v3 = vcombine.high %v72_v0, %v76_v1  ;;  %v2036_v5 = vcombine.low %v72_v0, %v76_v1 }
   0x4   :  { %v204_v4 = vld [vmem:[%s3113_s1 + $0x5e0] sm:$0xff]  ;;  %1681 = vmatprep.mubr.bf16.mxu1 %v2374_v59 }
   0x5   :  { %v64_v6 = vld [vmem:[%s3113_s1 + $0x180] sm:$0xff]  ;;  %v2165_v8 = vcombine.high %v200_v2, %v204_v4  ;;  %v2164_v9 = vcombine.low %v200_v2, %v204_v4  ;;  %1608 = vmatprep.subr.bf16.mxu0 %v2037_v3 }
   0x6   :  { %v68_v7 = vld [vmem:[%s3113_s1 + $0x1a0] sm:$0xff]  ;;  %1609 = vmatpush1.bf16.msra.mxu0 %v2036_v5 }
   0x7   :  { %v2029_v10 = vcombine.high %v64_v6, %v68_v7  ;;  %v192_v11 = vld [vmem:[%s3113_s1 + $0x580] sm:$0xff]  ;;  %1649 = vmatprep.subr.bf16.mxu1 %v2165_v8  ;;  %v2028_v18 = vcombine.low %v64_v6, %v68_v7 }
   0x8   :  { %v196_v12 = vld [vmem:[%s3113_s1 + $0x5a0] sm:$0xff]  ;;  %1650 = vmatpush1.bf16.msra.mxu1 %v2164_v9 }
   0x9   :  { %v56_v13 = vld [vmem:[%s3113_s1 + $0x140] sm:$0xff]  ;;  %v2157_v14 = vcombine.high %v192_v11, %v196_v12  ;;  %1610 = vmatprep.subr.bf16.mxu0 %v2029_v10  ;;  %v2156_v19 = vcombine.low %v192_v11, %v196_v12 }
   0xa   :  { %v60_v15 = vld [vmem:[%s3113_s1 + $0x160] sm:$0xff]  ;;  %1611 = vmatpush1.bf16.msra.mxu0 %v2028_v18 }
   0xb   :  { %v184_v16 = vld [vmem:[%s3113_s1 + $0x540] sm:$0xff]  ;;  %v2021_v20 = vcombine.high %v56_v13, %v60_v15  ;;  %1651 = vmatprep.subr.bf16.mxu1 %v2157_v14  ;;  %v2020_v26 = vcombine.low %v56_v13, %v60_v15 }
   0xc   :  { %v188_v17 = vld [vmem:[%s3113_s1 + $0x560] sm:$0xff]  ;;  %1652 = vmatpush1.bf16.msra.mxu1 %v2156_v19 }
   0xd   :  { %v2149_v21 = vcombine.high %v184_v16, %v188_v17  ;;  %v48_v22 = vld [vmem:[%s3113_s1 + $0x100] sm:$0xff]  ;;  %1612 = vmatprep.subr.bf16.mxu0 %v2021_v20  ;;  %v2148_v27 = vcombine.low %v184_v16, %v188_v17 }
   0xe   :  { %v52_v23 = vld [vmem:[%s3113_s1 + $0x120] sm:$0xff]  ;;  %1613 = vmatpush1.bf16.msra.mxu0 %v2020_v26 }
   0xf   :  { %v176_v24 = vld [vmem:[%s3113_s1 + $0x500] sm:$0xff]  ;;  %v2013_v28 = vcombine.high %v48_v22, %v52_v23  ;;  %1653 = vmatprep.subr.bf16.mxu1 %v2149_v21  ;;  %v2012_v34 = vcombine.low %v48_v22, %v52_v23 }
  0x10   :  { %v180_v25 = vld [vmem:[%s3113_s1 + $0x520] sm:$0xff]  ;;  %1654 = vmatpush1.bf16.msra.mxu1 %v2148_v27 }
  0x11   :  { %v2141_v29 = vcombine.high %v176_v24, %v180_v25  ;;  %v40_v30 = vld [vmem:[%s3113_s1 + $0xc0] sm:$0xff]  ;;  %1614 = vmatprep.subr.bf16.mxu0 %v2013_v28  ;;  %v2140_v35 = vcombine.low %v176_v24, %v180_v25 }
  0x12   :  { %v44_v31 = vld [vmem:[%s3113_s1 + $0xe0] sm:$0xff]  ;;  %1615 = vmatpush1.bf16.msra.mxu0 %v2012_v34 }
  0x13   :  { %v168_v32 = vld [vmem:[%s3113_s1 + $0x4c0] sm:$0xff]  ;;  %v2005_v36 = vcombine.high %v40_v30, %v44_v31  ;;  %1655 = vmatprep.subr.bf16.mxu1 %v2141_v29  ;;  %v2004_v42 = vcombine.low %v40_v30, %v44_v31 }
  0x14   :  { %v172_v33 = vld [vmem:[%s3113_s1 + $0x4e0] sm:$0xff]  ;;  %1656 = vmatpush1.bf16.msra.mxu1 %v2140_v35 }
  0x15   :  { %v2133_v37 = vcombine.high %v168_v32, %v172_v33  ;;  %v32_v38 = vld [vmem:[%s3113_s1 + $0x80] sm:$0xff]  ;;  %1616 = vmatprep.subr.bf16.mxu0 %v2005_v36  ;;  %v2132_v43 = vcombine.low %v168_v32, %v172_v33 }
  0x16   :  { %v36_v39 = vld [vmem:[%s3113_s1 + $0xa0] sm:$0xff]  ;;  %1617 = vmatpush1.bf16.msra.mxu0 %v2004_v42 }
  0x17   :  { %v160_v40 = vld [vmem:[%s3113_s1 + $0x480] sm:$0xff]  ;;  %v1997_v44 = vcombine.high %v32_v38, %v36_v39  ;;  %1657 = vmatprep.subr.bf16.mxu1 %v2133_v37  ;;  %v1996_v50 = vcombine.low %v32_v38, %v36_v39 }
  0x18   :  { %v164_v41 = vld [vmem:[%s3113_s1 + $0x4a0] sm:$0xff]  ;;  %1658 = vmatpush1.bf16.msra.mxu1 %v2132_v43 }
  0x19   :  { %v2125_v45 = vcombine.high %v160_v40, %v164_v41  ;;  %v24_v46 = vld [vmem:[%s3113_s1 + $0x40] sm:$0xff]  ;;  %1618 = vmatprep.subr.bf16.mxu0 %v1997_v44  ;;  %v2124_v51 = vcombine.low %v160_v40, %v164_v41 }
  0x1a   :  { %v28_v47 = vld [vmem:[%s3113_s1 + $0x60] sm:$0xff]  ;;  %1619 = vmatpush1.bf16.msra.mxu0 %v1996_v50 }
  0x1b   :  { %v152_v48 = vld [vmem:[%s3113_s1 + $0x440] sm:$0xff]  ;;  %v1989_v52 = vcombine.high %v24_v46, %v28_v47  ;;  %1659 = vmatprep.subr.bf16.mxu1 %v2125_v45  ;;  %v1988_v62 = vcombine.low %v24_v46, %v28_v47 }
  0x1c   :  { %v156_v49 = vld [vmem:[%s3113_s1 + $0x460] sm:$0xff]  ;;  %1660 = vmatpush1.bf16.msra.mxu1 %v2124_v51 }
  0x1d   :  { %v2355_v53 = vld [vmem:[%s3114_s0] sm:$0xff]  ;;  %v2117_v55 = vcombine.high %v152_v48, %v156_v49  ;;  %1620 = vmatprep.subr.bf16.mxu0 %v1989_v52  ;;  %v2116_v63 = vcombine.low %v152_v48, %v156_v49 }
  0x1e   :  { %v16_v56 = vld [vmem:[%s3113_s1] sm:$0xff]  ;;  %v2370_v58 = vcombine.high %v2355_v53, %v2355_v53  ;;  %1621 = vmatpush1.bf16.msra.mxu0 %v1988_v62 }
  0x1f   :  { %v20_v57 = vld [vmem:[%s3113_s1 + $0x20] sm:$0xff]  ;;  %1661 = vmatprep.subr.bf16.mxu1 %v2117_v55 }
  0x20   :  { %v144_v60 = vld [vmem:[%s3113_s1 + $0x400] sm:$0xff]  ;;  %1640 = vmatprep.mubr.bf16.mxu0 %v2370_v58  ;;  %v1981_v0 = vcombine.high %v16_v56, %v20_v57  ;;  %v1980_v6 = vcombine.low %v16_v56, %v20_v57  ;;  %1662 = vmatpush1.bf16.msra.mxu1 %v2116_v63 }
  0x21   :  { %v148_v61 = vld [vmem:[%s3113_s1 + $0x420] sm:$0xff] }
  0x22   :  { %v2109_v1 = vcombine.high %v144_v60, %v148_v61  ;;  %v136_v2 = vld [vmem:[%s3113_s1 + $0x3c0] sm:$0xff]  ;;  %1622 = vmatprep.subr.bf16.mxu0 %v1981_v0  ;;  %v2108_v7 = vcombine.low %v144_v60, %v148_v61 }
  0x23   :  { %v140_v3 = vld [vmem:[%s3113_s1 + $0x3e0] sm:$0xff]  ;;  %1623 = vmatpush1.bf16.msra.mxu0 %v1980_v6  ;;  %v73_v6 = vld [vmem:[%s3113_s1 + $0x1c8] sm:$0xff] }
  0x24   :  { %v264_v4 = vld [vmem:[%s3113_s1 + $0x7c0] sm:$0xff]  ;;  %v2101_v8 = vcombine.high %v136_v2, %v140_v3  ;;  %1663 = vmatprep.subr.bf16.mxu1 %v2109_v1  ;;  %v2100_v14 = vcombine.low %v136_v2, %v140_v3 }
  0x25   :  { %v268_v5 = vld [vmem:[%s3113_s1 + $0x7e0] sm:$0xff]  ;;  %1664 = vmatpush1.bf16.msra.mxu1 %v2108_v7  ;;  %v77_v7 = vld [vmem:[%s3113_s1 + $0x1e8] sm:$0xff] }
  0x26   :  { %v2229_v9 = vcombine.high %v264_v4, %v268_v5  ;;  %v128_v10 = vld [vmem:[%s3113_s1 + $0x380] sm:$0xff]  ;;  %1624 = vmatprep.subr.bf16.mxu0 %v2101_v8  ;;  %v2228_v15 = vcombine.low %v264_v4, %v268_v5  ;;  %v201_v8 = vld [vmem:[%s3113_s1 + $0x5c8] sm:$0xff] }
  0x27   :  { %v132_v11 = vld [vmem:[%s3113_s1 + $0x3a0] sm:$0xff]  ;;  %1625 = vmatpush2.bf16.msra.mxu0 %v2100_v14  ;;  %v65_v14 = vld [vmem:[%s3113_s1 + $0x188] sm:$0xff] }
  0x28   :  { %v256_v12 = vld [vmem:[%s3113_s1 + $0x780] sm:$0xff]  ;;  %v2093_v16 = vcombine.high %v128_v10, %v132_v11  ;;  %1665 = vmatprep.subr.bf16.mxu1 %v2229_v9  ;;  %v2092_v22 = vcombine.low %v128_v10, %v132_v11  ;;  %v205_v9 = vld [vmem:[%s3113_s1 + $0x5e8] sm:$0xff] }
  0x29   :  { %v260_v13 = vld [vmem:[%s3113_s1 + $0x7a0] sm:$0xff]  ;;  %1666 = vmatpush2.bf16.msra.mxu1 %v2228_v15  ;;  %v69_v15 = vld [vmem:[%s3113_s1 + $0x1a8] sm:$0xff] }
  0x2a   :  { %v2221_v17 = vcombine.high %v256_v12, %v260_v13  ;;  %v120_v18 = vld [vmem:[%s3113_s1 + $0x340] sm:$0xff]  ;;  %1626 = vmatprep.subr.bf16.mxu0 %v2093_v16  ;;  %v2220_v23 = vcombine.low %v256_v12, %v260_v13  ;;  %v2039_v12 = vcombine.high %v73_v6, %v77_v7  ;;  %v2167_v13 = vcombine.high %v201_v8, %v205_v9 }
  0x2b   :  { %v124_v19 = vld [vmem:[%s3113_s1 + $0x360] sm:$0xff]  ;;  %1627 = vmatpush2.bf16.msra.mxu0 %v2092_v22  ;;  %v2500_v16 = vcombine.low %v2355_v53, %v2355_v53  ;;  %v2031_v22 = vcombine.high %v65_v14, %v69_v15 }
  0x2c   :  { %v248_v20 = vld [vmem:[%s3113_s1 + $0x740] sm:$0xff]  ;;  %v2085_v24 = vcombine.high %v120_v18, %v124_v19  ;;  %1667 = vmatprep.subr.bf16.mxu1 %v2221_v17  ;;  %v2084_v30 = vcombine.low %v120_v18, %v124_v19  ;;  %v193_v17 = vld [vmem:[%s3113_s1 + $0x588] sm:$0xff]  ;;  %v2510_v19 = vcombine.low %v2360_v54, %v2360_v54 }
  0x2d   :  { %v252_v21 = vld [vmem:[%s3113_s1 + $0x760] sm:$0xff]  ;;  %1668 = vmatpush2.bf16.msra.mxu1 %v2220_v23  ;;  %v197_v18 = vld [vmem:[%s3113_s1 + $0x5a8] sm:$0xff] }
  0x2e   :  { %v2213_v25 = vcombine.high %v248_v20, %v252_v21  ;;  %v112_v26 = vld [vmem:[%s3113_s1 + $0x300] sm:$0xff]  ;;  %1628 = vmatprep.subr.bf16.mxu0 %v2085_v24  ;;  %v2212_v31 = vcombine.low %v248_v20, %v252_v21  ;;  %v2038_v20 = vcombine.low %v73_v6, %v77_v7  ;;  %v2166_v21 = vcombine.low %v201_v8, %v205_v9  ;;  %v57_v23 = vld [vmem:[%s3113_s1 + $0x148] sm:$0xff] }
  0x2f   :  { %v116_v27 = vld [vmem:[%s3113_s1 + $0x320] sm:$0xff]  ;;  %1629 = vmatpush2.bf16.msra.mxu0 %v2084_v30  ;;  %v2159_v53 = vcombine.high %v193_v17, %v197_v18  ;;  %v61_v24 = vld [vmem:[%s3113_s1 + $0x168] sm:$0xff] }
  0x30   :  { %v240_v28 = vld [vmem:[%s3113_s1 + $0x700] sm:$0xff]  ;;  %v2077_v32 = vcombine.high %v112_v26, %v116_v27  ;;  %1669 = vmatprep.subr.bf16.mxu1 %v2213_v25  ;;  %v2076_v38 = vcombine.low %v112_v26, %v116_v27  ;;  %v185_v54 = vld [vmem:[%s3113_s1 + $0x548] sm:$0xff]  ;;  %v2030_v26 = vcombine.low %v65_v14, %v69_v15  ;;  %v2158_v27 = vcombine.low %v193_v17, %v197_v18 }
  0x31   :  { %v244_v29 = vld [vmem:[%s3113_s1 + $0x720] sm:$0xff]  ;;  %1670 = vmatpush2.bf16.msra.mxu1 %v2212_v31  ;;  %v189_v25 = vld [vmem:[%s3113_s1 + $0x568] sm:$0xff] }
  0x32   :  { %v2205_v33 = vcombine.high %v240_v28, %v244_v29  ;;  %v104_v34 = vld [vmem:[%s3113_s1 + $0x2c0] sm:$0xff]  ;;  %1630 = vmatprep.subr.bf16.mxu0 %v2077_v32  ;;  %v2204_v39 = vcombine.low %v240_v28, %v244_v29  ;;  %v2023_v28 = vcombine.high %v57_v23, %v61_v24  ;;  %v2151_v29 = vcombine.high %v185_v54, %v189_v25  ;;  %v49_v30 = vld [vmem:[%s3113_s1 + $0x108] sm:$0xff] }
  0x33   :  { %v108_v35 = vld [vmem:[%s3113_s1 + $0x2e0] sm:$0xff]  ;;  %1631 = vmatpush2.bf16.msra.mxu0 %v2076_v38  ;;  %v53_v31 = vld [vmem:[%s3113_s1 + $0x128] sm:$0xff] }
  0x34   :  { %v232_v36 = vld [vmem:[%s3113_s1 + $0x6c0] sm:$0xff]  ;;  %v2069_v40 = vcombine.high %v104_v34, %v108_v35  ;;  %1671 = vmatprep.subr.bf16.mxu1 %v2205_v33  ;;  %v2068_v46 = vcombine.low %v104_v34, %v108_v35  ;;  %v177_v32 = vld [vmem:[%s3113_s1 + $0x508] sm:$0xff]  ;;  %v2022_v34 = vcombine.low %v57_v23, %v61_v24  ;;  %v2150_v35 = vcombine.low %v185_v54, %v189_v25 }
  0x35   :  { %v236_v37 = vld [vmem:[%s3113_s1 + $0x6e0] sm:$0xff]  ;;  %1672 = vmatpush2.bf16.msra.mxu1 %v2204_v39  ;;  %v181_v33 = vld [vmem:[%s3113_s1 + $0x528] sm:$0xff] }
  0x36   :  { %v2197_v41 = vcombine.high %v232_v36, %v236_v37  ;;  %v96_v42 = vld [vmem:[%s3113_s1 + $0x280] sm:$0xff]  ;;  %1632 = vmatprep.subr.bf16.mxu0 %v2069_v40  ;;  %v2196_v47 = vcombine.low %v232_v36, %v236_v37  ;;  %v2015_v36 = vcombine.high %v49_v30, %v53_v31  ;;  %v2143_v37 = vcombine.high %v177_v32, %v181_v33  ;;  %v41_v38 = vld [vmem:[%s3113_s1 + $0xc8] sm:$0xff] }
  0x37   :  { %v100_v43 = vld [vmem:[%s3113_s1 + $0x2a0] sm:$0xff]  ;;  %1633 = vmatpush2.bf16.msra.mxu0 %v2068_v46  ;;  %v45_v39 = vld [vmem:[%s3113_s1 + $0xe8] sm:$0xff] }
  0x38   :  { %v224_v44 = vld [vmem:[%s3113_s1 + $0x680] sm:$0xff]  ;;  %v2061_v48 = vcombine.high %v96_v42, %v100_v43  ;;  %1673 = vmatprep.subr.bf16.mxu1 %v2197_v41  ;;  %v2060_v56 = vcombine.low %v96_v42, %v100_v43  ;;  %v169_v40 = vld [vmem:[%s3113_s1 + $0x4c8] sm:$0xff]  ;;  %v2014_v42 = vcombine.low %v49_v30, %v53_v31  ;;  %v2142_v43 = vcombine.low %v177_v32, %v181_v33 }
  0x39   :  { %v228_v45 = vld [vmem:[%s3113_s1 + $0x6a0] sm:$0xff]  ;;  %1674 = vmatpush2.bf16.msra.mxu1 %v2196_v47  ;;  %v173_v41 = vld [vmem:[%s3113_s1 + $0x4e8] sm:$0xff] }
  0x3a   :  { %v2189_v49 = vcombine.high %v224_v44, %v228_v45  ;;  %v88_v50 = vld [vmem:[%s3113_s1 + $0x240] sm:$0xff]  ;;  %1634 = vmatprep.subr.bf16.mxu0 %v2061_v48  ;;  %v2188_v57 = vcombine.low %v224_v44, %v228_v45  ;;  %v2007_v44 = vcombine.high %v41_v38, %v45_v39  ;;  %v2135_v45 = vcombine.high %v169_v40, %v173_v41  ;;  %v33_v46 = vld [vmem:[%s3113_s1 + $0x88] sm:$0xff] }
  0x3b   :  { %v92_v51 = vld [vmem:[%s3113_s1 + $0x260] sm:$0xff]  ;;  %1635 = vmatpush2.bf16.msra.mxu0 %v2060_v56  ;;  %v37_v47 = vld [vmem:[%s3113_s1 + $0xa8] sm:$0xff] }
  0x3c   :  { %v216_v52 = vld [vmem:[%s3113_s1 + $0x640] sm:$0xff]  ;;  %v2053_v60 = vcombine.high %v88_v50, %v92_v51  ;;  %1675 = vmatprep.subr.bf16.mxu1 %v2189_v49  ;;  %v2052_v2 = vcombine.low %v88_v50, %v92_v51  ;;  %v161_v48 = vld [vmem:[%s3113_s1 + $0x488] sm:$0xff]  ;;  %v2006_v50 = vcombine.low %v41_v38, %v45_v39  ;;  %v2134_v51 = vcombine.low %v169_v40, %v173_v41 }
  0x3d   :  { %v220_v55 = vld [vmem:[%s3113_s1 + $0x660] sm:$0xff]  ;;  %1676 = vmatpush2.bf16.msra.mxu1 %v2188_v57  ;;  %v165_v49 = vld [vmem:[%s3113_s1 + $0x4a8] sm:$0xff] }
  0x3e   :  { %v2181_v61 = vcombine.high %v216_v52, %v220_v55  ;;  %v80_v62 = vld [vmem:[%s3113_s1 + $0x200] sm:$0xff]  ;;  %1636 = vmatprep.subr.bf16.mxu0 %v2053_v60  ;;  %v2180_v3 = vcombine.low %v216_v52, %v220_v55  ;;  %v1999_v52 = vcombine.high %v33_v46, %v37_v47  ;;  %v2127_v55 = vcombine.high %v161_v48, %v165_v49  ;;  %v25_v56 = vld [vmem:[%s3113_s1 + $0x48] sm:$0xff] }
  0x3f   :  { %v84_v63 = vld [vmem:[%s3113_s1 + $0x220] sm:$0xff]  ;;  %1637 = vmatpush2.bf16.msra.mxu0 %v2052_v2  ;;  %v29_v57 = vld [vmem:[%s3113_s1 + $0x68] sm:$0xff] }
  0x40   :  { %v208_v0 = vld [vmem:[%s3113_s1 + $0x600] sm:$0xff]  ;;  %v2045_v4 = vcombine.high %v80_v62, %v84_v63  ;;  %1677 = vmatprep.subr.bf16.mxu1 %v2181_v61  ;;  %v2044_v10 = vcombine.low %v80_v62, %v84_v63  ;;  %v153_v60 = vld [vmem:[%s3113_s1 + $0x448] sm:$0xff]  ;;  %v1998_v62 = vcombine.low %v33_v46, %v37_v47  ;;  %v2126_v63 = vcombine.low %v161_v48, %v165_v49 }
  0x41   :  { %v212_v1 = vld [vmem:[%s3113_s1 + $0x620] sm:$0xff]  ;;  %1678 = vmatpush2.bf16.msra.mxu1 %v2180_v3  ;;  %v157_v61 = vld [vmem:[%s3113_s1 + $0x468] sm:$0xff]  ;;  %v1990_v6 = vcombine.low %v25_v56, %v29_v57 }
  0x42   :  { %v2173_v5 = vcombine.high %v208_v0, %v212_v1  ;;  %1638 = vmatprep.subr.bf16.mxu0 %v2045_v4  ;;  %v2172_v11 = vcombine.low %v208_v0, %v212_v1  ;;  %v1991_v0 = vcombine.high %v25_v56, %v29_v57  ;;  %v2119_v1 = vcombine.high %v153_v60, %v157_v61  ;;  %v17_v2 = vld [vmem:[%s3113_s1 + $0x8] sm:$0xff] }
  0x43   :  { %1639 = vmatpush2.bf16.msra.mxu0 %v2044_v10  ;;  %v21_v3 = vld [vmem:[%s3113_s1 + $0x28] sm:$0xff]  ;;  %v2118_v7 = vcombine.low %v153_v60, %v157_v61 }
  0x44   :  { %1679 = vmatprep.subr.bf16.mxu1 %v2173_v5  ;;  %1690 = vmatprep.subr.bf16.mxu0 %v2039_v12  ;;  %v145_v4 = vld [vmem:[%s3113_s1 + $0x408] sm:$0xff]  ;;  %v1983_v8 = vcombine.high %v17_v2, %v21_v3  ;;  %v1982_v14 = vcombine.low %v17_v2, %v21_v3 }
  0x45   :  { %1680 = vmatpush2.bf16.msra.mxu1 %v2172_v11  ;;  %v149_v5 = vld [vmem:[%s3113_s1 + $0x428] sm:$0xff] }
  0x46   :  { %1731 = vmatprep.subr.bf16.mxu1 %v2167_v13  ;;  %1641 = vmatmul.mubr.bf16.vlgmr.msra.gmra.mxu0 %v2500_v16  ;;  %v2111_v9 = vcombine.high %v145_v4, %v149_v5  ;;  %v137_v10 = vld [vmem:[%s3113_s1 + $0x3c8] sm:$0xff]  ;;  %v2110_v15 = vcombine.low %v145_v4, %v149_v5 }
  0x47   :  { %1691 = vmatpush1.bf16.msra.mxu0 %v2038_v20  ;;  %1722 = vmatprep.mubr.bf16.mxu0 %v2370_v58  ;;  %v141_v11 = vld [vmem:[%s3113_s1 + $0x3e8] sm:$0xff] }
  0x48   :  { %1682 = vmatmul.mubr.bf16.vlgmr.msra.gmra.mxu1 %v2510_v19  ;;  %1692 = vmatprep.subr.bf16.mxu0 %v2031_v22  ;;  %v265_v12 = vld [vmem:[%s3113_s1 + $0x7c8] sm:$0xff]  ;;  %v2103_v17 = vcombine.high %v137_v10, %v141_v11  ;;  %v2102_v23 = vcombine.low %v137_v10, %v141_v11 }
  0x49   :  { %1732 = vmatpush1.bf16.msra.mxu1 %v2166_v21  ;;  %1763 = vmatprep.mubr.bf16.mxu1 %v2374_v59  ;;  %v269_v13 = vld [vmem:[%s3113_s1 + $0x7e8] sm:$0xff] }
  0x4a   :  { %1733 = vmatprep.subr.bf16.mxu1 %v2159_v53  ;;  %v2231_v18 = vcombine.high %v265_v12, %v269_v13  ;;  %v129_v20 = vld [vmem:[%s3113_s1 + $0x388] sm:$0xff]  ;;  %v2230_v24 = vcombine.low %v265_v12, %v269_v13 }
  0x4b   :  { %1693 = vmatpush1.bf16.msra.mxu0 %v2030_v26  ;;  %v133_v21 = vld [vmem:[%s3113_s1 + $0x3a8] sm:$0xff] }
  0x4c   :  { %1694 = vmatprep.subr.bf16.mxu0 %v2023_v28  ;;  %v257_v22 = vld [vmem:[%s3113_s1 + $0x788] sm:$0xff]  ;;  %v2095_v54 = vcombine.high %v129_v20, %v133_v21  ;;  %v2094_v30 = vcombine.low %v129_v20, %v133_v21 }
  0x4d   :  { %1734 = vmatpush1.bf16.msra.mxu1 %v2158_v27  ;;  %v261_v53 = vld [vmem:[%s3113_s1 + $0x7a8] sm:$0xff] }
  0x4e   :  { %1735 = vmatprep.subr.bf16.mxu1 %v2151_v29  ;;  %v2223_v25 = vcombine.high %v257_v22, %v261_v53  ;;  %v121_v26 = vld [vmem:[%s3113_s1 + $0x348] sm:$0xff]  ;;  %v2222_v31 = vcombine.low %v257_v22, %v261_v53 }
  0x4f   :  { %1695 = vmatpush1.bf16.msra.mxu0 %v2022_v34  ;;  %v125_v27 = vld [vmem:[%s3113_s1 + $0x368] sm:$0xff] }
  0x50   :  { %1696 = vmatprep.subr.bf16.mxu0 %v2015_v36  ;;  %v249_v28 = vld [vmem:[%s3113_s1 + $0x748] sm:$0xff]  ;;  %v2087_v32 = vcombine.high %v121_v26, %v125_v27  ;;  %v2086_v38 = vcombine.low %v121_v26, %v125_v27 }
  0x51   :  { %1736 = vmatpush1.bf16.msra.mxu1 %v2150_v35  ;;  %v253_v29 = vld [vmem:[%s3113_s1 + $0x768] sm:$0xff] }
  0x52   :  { %1737 = vmatprep.subr.bf16.mxu1 %v2143_v37  ;;  %v2215_v33 = vcombine.high %v249_v28, %v253_v29  ;;  %v113_v34 = vld [vmem:[%s3113_s1 + $0x308] sm:$0xff]  ;;  %v2214_v39 = vcombine.low %v249_v28, %v253_v29 }
  0x53   :  { %1697 = vmatpush1.bf16.msra.mxu0 %v2014_v42  ;;  %v117_v35 = vld [vmem:[%s3113_s1 + $0x328] sm:$0xff] }
  0x54   :  { %1698 = vmatprep.subr.bf16.mxu0 %v2007_v44  ;;  %v241_v36 = vld [vmem:[%s3113_s1 + $0x708] sm:$0xff]  ;;  %v2079_v40 = vcombine.high %v113_v34, %v117_v35  ;;  %v2078_v46 = vcombine.low %v113_v34, %v117_v35 }
  0x55   :  { %1738 = vmatpush1.bf16.msra.mxu1 %v2142_v43  ;;  %v245_v37 = vld [vmem:[%s3113_s1 + $0x728] sm:$0xff] }
  0x56   :  { %1739 = vmatprep.subr.bf16.mxu1 %v2135_v45  ;;  %v2207_v41 = vcombine.high %v241_v36, %v245_v37  ;;  %v105_v42 = vld [vmem:[%s3113_s1 + $0x2c8] sm:$0xff]  ;;  %v2206_v47 = vcombine.low %v241_v36, %v245_v37 }
  0x57   :  { %1699 = vmatpush1.bf16.msra.mxu0 %v2006_v50  ;;  %v109_v43 = vld [vmem:[%s3113_s1 + $0x2e8] sm:$0xff] }
  0x58   :  { %1700 = vmatprep.subr.bf16.mxu0 %v1999_v52  ;;  %v233_v44 = vld [vmem:[%s3113_s1 + $0x6c8] sm:$0xff]  ;;  %v2071_v48 = vcombine.high %v105_v42, %v109_v43  ;;  %v2070_v56 = vcombine.low %v105_v42, %v109_v43 }
  0x59   :  { %1740 = vmatpush1.bf16.msra.mxu1 %v2134_v51  ;;  %v237_v45 = vld [vmem:[%s3113_s1 + $0x6e8] sm:$0xff] }
  0x5a   :  { %1741 = vmatprep.subr.bf16.mxu1 %v2127_v55  ;;  %v2199_v49 = vcombine.high %v233_v44, %v237_v45  ;;  %v97_v50 = vld [vmem:[%s3113_s1 + $0x288] sm:$0xff]  ;;  %v2198_v57 = vcombine.low %v233_v44, %v237_v45 }
  0x5b   :  { %1701 = vmatpush1.bf16.msra.mxu0 %v1998_v62  ;;  %v101_v51 = vld [vmem:[%s3113_s1 + $0x2a8] sm:$0xff] }
  0x5c   :  { %1702 = vmatprep.subr.bf16.mxu0 %v1991_v0  ;;  %v225_v52 = vld [vmem:[%s3113_s1 + $0x688] sm:$0xff]  ;;  %v2063_v60 = vcombine.high %v97_v50, %v101_v51  ;;  %v2062_v2 = vcombine.low %v97_v50, %v101_v51 }
  0x5d   :  { %1742 = vmatpush1.bf16.msra.mxu1 %v2126_v63  ;;  %v229_v55 = vld [vmem:[%s3113_s1 + $0x6a8] sm:$0xff] }
  0x5e   :  { %1743 = vmatprep.subr.bf16.mxu1 %v2119_v1  ;;  %v2191_v61 = vcombine.high %v225_v52, %v229_v55  ;;  %v89_v62 = vld [vmem:[%s3113_s1 + $0x248] sm:$0xff]  ;;  %v2190_v3 = vcombine.low %v225_v52, %v229_v55 }
  0x5f   :  { %1703 = vmatpush1.bf16.msra.mxu0 %v1990_v6  ;;  %v93_v63 = vld [vmem:[%s3113_s1 + $0x268] sm:$0xff] }
  0x60   :  { %1704 = vmatprep.subr.bf16.mxu0 %v1983_v8  ;;  %v217_v0 = vld [vmem:[%s3113_s1 + $0x648] sm:$0xff]  ;;  %v2055_v4 = vcombine.high %v89_v62, %v93_v63  ;;  %v2054_v10 = vcombine.low %v89_v62, %v93_v63 }
  0x61   :  { %1744 = vmatpush1.bf16.msra.mxu1 %v2118_v7  ;;  %v221_v1 = vld [vmem:[%s3113_s1 + $0x668] sm:$0xff] }
  0x62   :  { %1745 = vmatprep.subr.bf16.mxu1 %v2111_v9  ;;  %v2183_v5 = vcombine.high %v217_v0, %v221_v1  ;;  %v81_v6 = vld [vmem:[%s3113_s1 + $0x208] sm:$0xff]  ;;  %v2182_v11 = vcombine.low %v217_v0, %v221_v1 }
  0x63   :  { %1705 = vmatpush1.bf16.msra.mxu0 %v1982_v14  ;;  %v85_v7 = vld [vmem:[%s3113_s1 + $0x228] sm:$0xff]  ;;  %v74_v14 = vld [vmem:[%s3113_s1 + $0x1d0] sm:$0xff] }
  0x64   :  { %1706 = vmatprep.subr.bf16.mxu0 %v2103_v17  ;;  %v209_v8 = vld [vmem:[%s3113_s1 + $0x608] sm:$0xff]  ;;  %v2047_v12 = vcombine.high %v81_v6, %v85_v7  ;;  %v202_v17 = vld [vmem:[%s3113_s1 + $0x5d0] sm:$0xff]  ;;  %v2046_v20 = vcombine.low %v81_v6, %v85_v7 }
  0x65   :  { %1746 = vmatpush1.bf16.msra.mxu1 %v2110_v15  ;;  %v213_v9 = vld [vmem:[%s3113_s1 + $0x628] sm:$0xff]  ;;  %v78_v15 = vld [vmem:[%s3113_s1 + $0x1f0] sm:$0xff] }
  0x66   :  { %1747 = vmatprep.subr.bf16.mxu1 %v2231_v18  ;;  %v2175_v13 = vcombine.high %v209_v8, %v213_v9  ;;  %v206_v18 = vld [vmem:[%s3113_s1 + $0x5f0] sm:$0xff]  ;;  %v2174_v21 = vcombine.low %v209_v8, %v213_v9  ;;  %v2041_v22 = vcombine.high %v74_v14, %v78_v15  ;;  %v2040_v26 = vcombine.low %v74_v14, %v78_v15 }
  0x67   :  { %1707 = vmatpush2.bf16.msra.mxu0 %v2102_v23  ;;  %v2169_v53 = vcombine.high %v202_v17, %v206_v18  ;;  %v66_v23 = vld [vmem:[%s3113_s1 + $0x190] sm:$0xff]  ;;  %v2168_v27 = vcombine.low %v202_v17, %v206_v18 }
  0x68   :  { %1708 = vmatprep.subr.bf16.mxu0 %v2095_v54  ;;  %v194_v54 = vld [vmem:[%s3113_s1 + $0x590] sm:$0xff] }
  0x69   :  { %1748 = vmatpush2.bf16.msra.mxu1 %v2230_v24  ;;  %v70_v24 = vld [vmem:[%s3113_s1 + $0x1b0] sm:$0xff] }
  0x6a   :  { %1749 = vmatprep.subr.bf16.mxu1 %v2223_v25  ;;  %v198_v25 = vld [vmem:[%s3113_s1 + $0x5b0] sm:$0xff]  ;;  %v2033_v28 = vcombine.high %v66_v23, %v70_v24  ;;  %v2032_v34 = vcombine.low %v66_v23, %v70_v24 }
  0x6b   :  { %1709 = vmatpush2.bf16.msra.mxu0 %v2094_v30  ;;  %v2161_v29 = vcombine.high %v194_v54, %v198_v25  ;;  %v58_v30 = vld [vmem:[%s3113_s1 + $0x150] sm:$0xff]  ;;  %v2160_v35 = vcombine.low %v194_v54, %v198_v25 }
  0x6c   :  { %1710 = vmatprep.subr.bf16.mxu0 %v2087_v32  ;;  %v186_v32 = vld [vmem:[%s3113_s1 + $0x550] sm:$0xff] }
  0x6d   :  { %1750 = vmatpush2.bf16.msra.mxu1 %v2222_v31  ;;  %v62_v31 = vld [vmem:[%s3113_s1 + $0x170] sm:$0xff] }
  0x6e   :  { %1751 = vmatprep.subr.bf16.mxu1 %v2215_v33  ;;  %v190_v33 = vld [vmem:[%s3113_s1 + $0x570] sm:$0xff]  ;;  %v2025_v36 = vcombine.high %v58_v30, %v62_v31  ;;  %v2024_v42 = vcombine.low %v58_v30, %v62_v31 }
  0x6f   :  { %1711 = vmatpush2.bf16.msra.mxu0 %v2086_v38  ;;  %v2153_v37 = vcombine.high %v186_v32, %v190_v33  ;;  %v50_v38 = vld [vmem:[%s3113_s1 + $0x110] sm:$0xff]  ;;  %v2152_v43 = vcombine.low %v186_v32, %v190_v33 }
  0x70   :  { %1712 = vmatprep.subr.bf16.mxu0 %v2079_v40  ;;  %v178_v40 = vld [vmem:[%s3113_s1 + $0x510] sm:$0xff] }
  0x71   :  { %1752 = vmatpush2.bf16.msra.mxu1 %v2214_v39  ;;  %v54_v39 = vld [vmem:[%s3113_s1 + $0x130] sm:$0xff] }
  0x72   :  { %1753 = vmatprep.subr.bf16.mxu1 %v2207_v41  ;;  %v182_v41 = vld [vmem:[%s3113_s1 + $0x530] sm:$0xff]  ;;  %v2017_v44 = vcombine.high %v50_v38, %v54_v39  ;;  %v2016_v50 = vcombine.low %v50_v38, %v54_v39 }
  0x73   :  { %1713 = vmatpush2.bf16.msra.mxu0 %v2078_v46  ;;  %v2145_v45 = vcombine.high %v178_v40, %v182_v41  ;;  %v42_v46 = vld [vmem:[%s3113_s1 + $0xd0] sm:$0xff]  ;;  %v2144_v51 = vcombine.low %v178_v40, %v182_v41 }
  0x74   :  { %1714 = vmatprep.subr.bf16.mxu0 %v2071_v48  ;;  %v170_v48 = vld [vmem:[%s3113_s1 + $0x4d0] sm:$0xff] }
  0x75   :  { %1754 = vmatpush2.bf16.msra.mxu1 %v2206_v47  ;;  %v46_v47 = vld [vmem:[%s3113_s1 + $0xf0] sm:$0xff] }
  0x76   :  { %1755 = vmatprep.subr.bf16.mxu1 %v2199_v49  ;;  %v174_v49 = vld [vmem:[%s3113_s1 + $0x4f0] sm:$0xff]  ;;  %v2009_v52 = vcombine.high %v42_v46, %v46_v47  ;;  %v2008_v62 = vcombine.low %v42_v46, %v46_v47 }
  0x77   :  { %1715 = vmatpush2.bf16.msra.mxu0 %v2070_v56  ;;  %v2137_v55 = vcombine.high %v170_v48, %v174_v49  ;;  %v34_v56 = vld [vmem:[%s3113_s1 + $0x90] sm:$0xff]  ;;  %v2136_v63 = vcombine.low %v170_v48, %v174_v49 }
  0x78   :  { %1716 = vmatprep.subr.bf16.mxu0 %v2063_v60  ;;  %v162_v60 = vld [vmem:[%s3113_s1 + $0x490] sm:$0xff] }
  0x79   :  { %1756 = vmatpush2.bf16.msra.mxu1 %v2198_v57  ;;  %v38_v57 = vld [vmem:[%s3113_s1 + $0xb0] sm:$0xff] }
  0x7a   :  { %1757 = vmatprep.subr.bf16.mxu1 %v2191_v61  ;;  %v166_v61 = vld [vmem:[%s3113_s1 + $0x4b0] sm:$0xff]  ;;  %v2001_v0 = vcombine.high %v34_v56, %v38_v57  ;;  %v2000_v6 = vcombine.low %v34_v56, %v38_v57 }
  0x7b   :  { %1717 = vmatpush2.bf16.msra.mxu0 %v2062_v2  ;;  %v2129_v1 = vcombine.high %v162_v60, %v166_v61  ;;  %v26_v2 = vld [vmem:[%s3113_s1 + $0x50] sm:$0xff]  ;;  %v2128_v7 = vcombine.low %v162_v60, %v166_v61 }
  0x7c   :  { %1718 = vmatprep.subr.bf16.mxu0 %v2055_v4  ;;  %v154_v4 = vld [vmem:[%s3113_s1 + $0x450] sm:$0xff] }
  0x7d   :  { %1758 = vmatpush2.bf16.msra.mxu1 %v2190_v3  ;;  %v30_v3 = vld [vmem:[%s3113_s1 + $0x70] sm:$0xff] }
  0x7e   :  { %1759 = vmatprep.subr.bf16.mxu1 %v2183_v5  ;;  %v158_v5 = vld [vmem:[%s3113_s1 + $0x470] sm:$0xff]  ;;  %v1993_v8 = vcombine.high %v26_v2, %v30_v3  ;;  %v1992_v14 = vcombine.low %v26_v2, %v30_v3 }
  0x7f   :  { %1719 = vmatpush2.bf16.msra.mxu0 %v2054_v10  ;;  %v2121_v9 = vcombine.high %v154_v4, %v158_v5  ;;  %v18_v10 = vld [vmem:[%s3113_s1 + $0x10] sm:$0xff]  ;;  %v2120_v15 = vcombine.low %v154_v4, %v158_v5 }
  0x80   :  { %1720 = vmatprep.subr.bf16.mxu0 %v2047_v12  ;;  %v146_v12 = vld [vmem:[%s3113_s1 + $0x410] sm:$0xff] }
  0x81   :  { %1760 = vmatpush2.bf16.msra.mxu1 %v2182_v11  ;;  %v22_v11 = vld [vmem:[%s3113_s1 + $0x30] sm:$0xff] }
  0x82   :  { %1761 = vmatprep.subr.bf16.mxu1 %v2175_v13  ;;  %v150_v13 = vld [vmem:[%s3113_s1 + $0x430] sm:$0xff]  ;;  %v1985_v17 = vcombine.high %v18_v10, %v22_v11  ;;  %v1984_v23 = vcombine.low %v18_v10, %v22_v11 }
  0x83   :  { %1721 = vmatpush2.bf16.msra.mxu0 %v2046_v20  ;;  %v2113_v18 = vcombine.high %v146_v12, %v150_v13  ;;  %v138_v20 = vld [vmem:[%s3113_s1 + $0x3d0] sm:$0xff]  ;;  %v2112_v24 = vcombine.low %v146_v12, %v150_v13 }
  0x84   :  { %1772 = vmatprep.subr.bf16.mxu0 %v2041_v22  ;;  %v266_v22 = vld [vmem:[%s3113_s1 + $0x7d0] sm:$0xff] }
  0x85   :  { %1762 = vmatpush2.bf16.msra.mxu1 %v2174_v21  ;;  %v142_v21 = vld [vmem:[%s3113_s1 + $0x3f0] sm:$0xff] }
  0x86   :  { %1813 = vmatprep.subr.bf16.mxu1 %v2169_v53  ;;  %1723 = vmatmul.mubr.bf16.vlgmr.msra.gmra.mxu0 %v2500_v16  ;;  %v270_v53 = vld [vmem:[%s3113_s1 + $0x7f0] sm:$0xff]  ;;  %v2105_v54 = vcombine.high %v138_v20, %v142_v21  ;;  %v2104_v30 = vcombine.low %v138_v20, %v142_v21 }
  0x87   :  { %1773 = vmatpush1.bf16.msra.mxu0 %v2040_v26  ;;  %1804 = vmatprep.mubr.bf16.mxu0 %v2370_v58  ;;  %v2233_v25 = vcombine.high %v266_v22, %v270_v53  ;;  %v130_v26 = vld [vmem:[%s3113_s1 + $0x390] sm:$0xff]  ;;  %v2232_v31 = vcombine.low %v266_v22, %v270_v53 }
  0x88   :  { %1764 = vmatmul.mubr.bf16.vlgmr.msra.gmra.mxu1 %v2510_v19  ;;  %1774 = vmatprep.subr.bf16.mxu0 %v2033_v28  ;;  %v258_v28 = vld [vmem:[%s3113_s1 + $0x790] sm:$0xff] }
  0x89   :  { %1814 = vmatpush1.bf16.msra.mxu1 %v2168_v27  ;;  %1845 = vmatprep.mubr.bf16.mxu1 %v2374_v59  ;;  %v134_v27 = vld [vmem:[%s3113_s1 + $0x3b0] sm:$0xff] }
  0x8a   :  { %1815 = vmatprep.subr.bf16.mxu1 %v2161_v29  ;;  %v262_v29 = vld [vmem:[%s3113_s1 + $0x7b0] sm:$0xff]  ;;  %v2097_v32 = vcombine.high %v130_v26, %v134_v27  ;;  %v2096_v38 = vcombine.low %v130_v26, %v134_v27 }
  0x8b   :  { %1775 = vmatpush1.bf16.msra.mxu0 %v2032_v34  ;;  %v2225_v33 = vcombine.high %v258_v28, %v262_v29  ;;  %v122_v34 = vld [vmem:[%s3113_s1 + $0x350] sm:$0xff]  ;;  %v2224_v39 = vcombine.low %v258_v28, %v262_v29 }
  0x8c   :  { %1776 = vmatprep.subr.bf16.mxu0 %v2025_v36  ;;  %v250_v36 = vld [vmem:[%s3113_s1 + $0x750] sm:$0xff] }
  0x8d   :  { %1816 = vmatpush1.bf16.msra.mxu1 %v2160_v35  ;;  %v126_v35 = vld [vmem:[%s3113_s1 + $0x370] sm:$0xff] }
  0x8e   :  { %1817 = vmatprep.subr.bf16.mxu1 %v2153_v37  ;;  %v254_v37 = vld [vmem:[%s3113_s1 + $0x770] sm:$0xff]  ;;  %v2089_v40 = vcombine.high %v122_v34, %v126_v35  ;;  %v2088_v46 = vcombine.low %v122_v34, %v126_v35 }
  0x8f   :  { %1777 = vmatpush1.bf16.msra.mxu0 %v2024_v42  ;;  %v2217_v41 = vcombine.high %v250_v36, %v254_v37  ;;  %v114_v42 = vld [vmem:[%s3113_s1 + $0x310] sm:$0xff]  ;;  %v2216_v47 = vcombine.low %v250_v36, %v254_v37 }
  0x90   :  { %1778 = vmatprep.subr.bf16.mxu0 %v2017_v44  ;;  %v242_v44 = vld [vmem:[%s3113_s1 + $0x710] sm:$0xff] }
  0x91   :  { %1818 = vmatpush1.bf16.msra.mxu1 %v2152_v43  ;;  %v118_v43 = vld [vmem:[%s3113_s1 + $0x330] sm:$0xff] }
  0x92   :  { %1819 = vmatprep.subr.bf16.mxu1 %v2145_v45  ;;  %v246_v45 = vld [vmem:[%s3113_s1 + $0x730] sm:$0xff]  ;;  %v2081_v48 = vcombine.high %v114_v42, %v118_v43  ;;  %v2080_v56 = vcombine.low %v114_v42, %v118_v43 }
  0x93   :  { %1779 = vmatpush1.bf16.msra.mxu0 %v2016_v50  ;;  %v2209_v49 = vcombine.high %v242_v44, %v246_v45  ;;  %v106_v50 = vld [vmem:[%s3113_s1 + $0x2d0] sm:$0xff]  ;;  %v2208_v57 = vcombine.low %v242_v44, %v246_v45 }
  0x94   :  { %1780 = vmatprep.subr.bf16.mxu0 %v2009_v52  ;;  %v234_v52 = vld [vmem:[%s3113_s1 + $0x6d0] sm:$0xff] }
  0x95   :  { %1820 = vmatpush1.bf16.msra.mxu1 %v2144_v51  ;;  %v110_v51 = vld [vmem:[%s3113_s1 + $0x2f0] sm:$0xff] }
  0x96   :  { %1821 = vmatprep.subr.bf16.mxu1 %v2137_v55  ;;  %v238_v55 = vld [vmem:[%s3113_s1 + $0x6f0] sm:$0xff]  ;;  %v2073_v60 = vcombine.high %v106_v50, %v110_v51  ;;  %v2072_v2 = vcombine.low %v106_v50, %v110_v51 }
  0x97   :  { %1781 = vmatpush1.bf16.msra.mxu0 %v2008_v62  ;;  %v2201_v61 = vcombine.high %v234_v52, %v238_v55  ;;  %v98_v62 = vld [vmem:[%s3113_s1 + $0x290] sm:$0xff]  ;;  %v2200_v3 = vcombine.low %v234_v52, %v238_v55 }
  0x98   :  { %1782 = vmatprep.subr.bf16.mxu0 %v2001_v0  ;;  %v226_v0 = vld [vmem:[%s3113_s1 + $0x690] sm:$0xff] }
  0x99   :  { %1822 = vmatpush1.bf16.msra.mxu1 %v2136_v63  ;;  %v102_v63 = vld [vmem:[%s3113_s1 + $0x2b0] sm:$0xff] }
  0x9a   :  { %1823 = vmatprep.subr.bf16.mxu1 %v2129_v1  ;;  %v230_v1 = vld [vmem:[%s3113_s1 + $0x6b0] sm:$0xff]  ;;  %v2065_v4 = vcombine.high %v98_v62, %v102_v63  ;;  %v2064_v10 = vcombine.low %v98_v62, %v102_v63 }
  0x9b   :  { %1783 = vmatpush1.bf16.msra.mxu0 %v2000_v6  ;;  %v2193_v5 = vcombine.high %v226_v0, %v230_v1  ;;  %v90_v6 = vld [vmem:[%s3113_s1 + $0x250] sm:$0xff]  ;;  %v2192_v11 = vcombine.low %v226_v0, %v230_v1  ;;  %v35_v0 = vld [vmem:[%s3113_s1 + $0x98] sm:$0xff] }
  0x9c   :  { %1784 = vmatprep.subr.bf16.mxu0 %v1993_v8  ;;  %v218_v8 = vld [vmem:[%s3113_s1 + $0x650] sm:$0xff]  ;;  %v39_v1 = vld [vmem:[%s3113_s1 + $0xb8] sm:$0xff] }
  0x9d   :  { %1824 = vmatpush1.bf16.msra.mxu1 %v2128_v7  ;;  %v94_v7 = vld [vmem:[%s3113_s1 + $0x270] sm:$0xff] }
  0x9e   :  { %1825 = vmatprep.subr.bf16.mxu1 %v2121_v9  ;;  %v222_v9 = vld [vmem:[%s3113_s1 + $0x670] sm:$0xff]  ;;  %v2057_v12 = vcombine.high %v90_v6, %v94_v7  ;;  %v2056_v20 = vcombine.low %v90_v6, %v94_v7  ;;  %v2003_v6 = vcombine.high %v35_v0, %v39_v1 }
  0x9f   :  { %1785 = vmatpush1.bf16.msra.mxu0 %v1992_v14  ;;  %v2185_v13 = vcombine.high %v218_v8, %v222_v9  ;;  %v82_v14 = vld [vmem:[%s3113_s1 + $0x210] sm:$0xff]  ;;  %v2184_v21 = vcombine.low %v218_v8, %v222_v9  ;;  %v27_v8 = vld [vmem:[%s3113_s1 + $0x58] sm:$0xff] }
  0xa0   :  { %1786 = vmatprep.subr.bf16.mxu0 %v1985_v17  ;;  %v210_v17 = vld [vmem:[%s3113_s1 + $0x610] sm:$0xff]  ;;  %v31_v9 = vld [vmem:[%s3113_s1 + $0x78] sm:$0xff] }
  0xa1   :  { %1826 = vmatpush1.bf16.msra.mxu1 %v2120_v15  ;;  %v86_v15 = vld [vmem:[%s3113_s1 + $0x230] sm:$0xff] }
  0xa2   :  { %1827 = vmatprep.subr.bf16.mxu1 %v2113_v18  ;;  %v214_v18 = vld [vmem:[%s3113_s1 + $0x630] sm:$0xff]  ;;  %v2049_v22 = vcombine.high %v82_v14, %v86_v15  ;;  %v2048_v26 = vcombine.low %v82_v14, %v86_v15  ;;  %v1995_v14 = vcombine.high %v27_v8, %v31_v9 }
  0xa3   :  { %1787 = vmatpush1.bf16.msra.mxu0 %v1984_v23  ;;  %v2177_v53 = vcombine.high %v210_v17, %v214_v18  ;;  %v75_v23 = vld [vmem:[%s3113_s1 + $0x1d8] sm:$0xff]  ;;  %v2176_v27 = vcombine.low %v210_v17, %v214_v18 }
  0xa4   :  { %1788 = vmatprep.subr.bf16.mxu0 %v2105_v54  ;;  %v203_v54 = vld [vmem:[%s3113_s1 + $0x5d8] sm:$0xff] }
  0xa5   :  { %1828 = vmatpush1.bf16.msra.mxu1 %v2112_v24  ;;  %v79_v24 = vld [vmem:[%s3113_s1 + $0x1f8] sm:$0xff] }
  0xa6   :  { %1829 = vmatprep.subr.bf16.mxu1 %v2233_v25  ;;  %v207_v25 = vld [vmem:[%s3113_s1 + $0x5f8] sm:$0xff]  ;;  %v2043_v28 = vcombine.high %v75_v23, %v79_v24  ;;  %v2042_v34 = vcombine.low %v75_v23, %v79_v24 }
  0xa7   :  { %1789 = vmatpush2.bf16.msra.mxu0 %v2104_v30  ;;  %v2171_v29 = vcombine.high %v203_v54, %v207_v25  ;;  %v67_v30 = vld [vmem:[%s3113_s1 + $0x198] sm:$0xff]  ;;  %v2170_v35 = vcombine.low %v203_v54, %v207_v25 }
  0xa8   :  { %1790 = vmatprep.subr.bf16.mxu0 %v2097_v32  ;;  %v195_v32 = vld [vmem:[%s3113_s1 + $0x598] sm:$0xff] }
  0xa9   :  { %1830 = vmatpush2.bf16.msra.mxu1 %v2232_v31  ;;  %v71_v31 = vld [vmem:[%s3113_s1 + $0x1b8] sm:$0xff] }
  0xaa   :  { %1831 = vmatprep.subr.bf16.mxu1 %v2225_v33  ;;  %v199_v33 = vld [vmem:[%s3113_s1 + $0x5b8] sm:$0xff]  ;;  %v2035_v36 = vcombine.high %v67_v30, %v71_v31  ;;  %v2034_v42 = vcombine.low %v67_v30, %v71_v31 }
  0xab   :  { %1791 = vmatpush2.bf16.msra.mxu0 %v2096_v38  ;;  %v2163_v37 = vcombine.high %v195_v32, %v199_v33  ;;  %v59_v38 = vld [vmem:[%s3113_s1 + $0x158] sm:$0xff]  ;;  %v2162_v43 = vcombine.low %v195_v32, %v199_v33 }
  0xac   :  { %1792 = vmatprep.subr.bf16.mxu0 %v2089_v40  ;;  %v187_v40 = vld [vmem:[%s3113_s1 + $0x558] sm:$0xff] }
  0xad   :  { %1832 = vmatpush2.bf16.msra.mxu1 %v2224_v39  ;;  %v63_v39 = vld [vmem:[%s3113_s1 + $0x178] sm:$0xff] }
  0xae   :  { %1833 = vmatprep.subr.bf16.mxu1 %v2217_v41  ;;  %v191_v41 = vld [vmem:[%s3113_s1 + $0x578] sm:$0xff]  ;;  %v2027_v44 = vcombine.high %v59_v38, %v63_v39  ;;  %v2026_v50 = vcombine.low %v59_v38, %v63_v39 }
  0xaf   :  { %1793 = vmatpush2.bf16.msra.mxu0 %v2088_v46  ;;  %v2155_v45 = vcombine.high %v187_v40, %v191_v41  ;;  %v51_v46 = vld [vmem:[%s3113_s1 + $0x118] sm:$0xff]  ;;  %v2154_v51 = vcombine.low %v187_v40, %v191_v41 }
  0xb0   :  { %1794 = vmatprep.subr.bf16.mxu0 %v2081_v48  ;;  %v179_v48 = vld [vmem:[%s3113_s1 + $0x518] sm:$0xff] }
  0xb1   :  { %1834 = vmatpush2.bf16.msra.mxu1 %v2216_v47  ;;  %v55_v47 = vld [vmem:[%s3113_s1 + $0x138] sm:$0xff] }
  0xb2   :  { %1835 = vmatprep.subr.bf16.mxu1 %v2209_v49  ;;  %v183_v49 = vld [vmem:[%s3113_s1 + $0x538] sm:$0xff]  ;;  %v2019_v52 = vcombine.high %v51_v46, %v55_v47 }
  0xb3   :  { %1795 = vmatpush2.bf16.msra.mxu0 %v2080_v56  ;;  %v2147_v55 = vcombine.high %v179_v48, %v183_v49  ;;  %v47_v56 = vld [vmem:[%s3113_s1 + $0xf8] sm:$0xff] }
  0xb4   :  { %1796 = vmatprep.subr.bf16.mxu0 %v2073_v60  ;;  %v2018_v60 = vcombine.low %v51_v46, %v55_v47  ;;  %v19_v17 = vld [vmem:[%s3113_s1 + $0x18] sm:$0xff] }
  0xb5   :  { %1836 = vmatpush2.bf16.msra.mxu1 %v2208_v57  ;;  %v175_v57 = vld [vmem:[%s3113_s1 + $0x4f8] sm:$0xff] }
  0xb6   :  { %1837 = vmatprep.subr.bf16.mxu1 %v2201_v61  ;;  %v2146_v61 = vcombine.low %v179_v48, %v183_v49  ;;  %v23_v18 = vld [vmem:[%s3113_s1 + $0x38] sm:$0xff] }
  0xb7   :  { %1797 = vmatpush2.bf16.msra.mxu0 %v2072_v2  ;;  %v163_v2 = vld [vmem:[%s3113_s1 + $0x498] sm:$0xff]  ;;  %v1987_v23 = vcombine.high %v19_v17, %v23_v18 }
  0xb8   :  { %1798 = vmatprep.subr.bf16.mxu0 %v2065_v4  ;;  %v139_v54 = vld [vmem:[%s3113_s1 + $0x3d8] sm:$0xff] }
  0xb9   :  { %1838 = vmatpush2.bf16.msra.mxu1 %v2200_v3  ;;  %v167_v3 = vld [vmem:[%s3113_s1 + $0x4b8] sm:$0xff] }
  0xba   :  { %1839 = vmatprep.subr.bf16.mxu1 %v2193_v5  ;;  %v2131_v7 = vcombine.high %v163_v2, %v167_v3  ;;  %v143_v25 = vld [vmem:[%s3113_s1 + $0x3f8] sm:$0xff] }
  0xbb   :  { %1799 = vmatpush2.bf16.msra.mxu0 %v2064_v10  ;;  %v155_v10 = vld [vmem:[%s3113_s1 + $0x458] sm:$0xff]  ;;  %v2107_v30 = vcombine.high %v139_v54, %v143_v25 }
  0xbc   :  { %1800 = vmatprep.subr.bf16.mxu0 %v2057_v12  ;;  %v2002_v12 = vcombine.low %v35_v0, %v39_v1  ;;  %v131_v32 = vld [vmem:[%s3113_s1 + $0x398] sm:$0xff] }
  0xbd   :  { %1840 = vmatpush2.bf16.msra.mxu1 %v2192_v11  ;;  %v159_v11 = vld [vmem:[%s3113_s1 + $0x478] sm:$0xff] }
  0xbe   :  { %1841 = vmatprep.subr.bf16.mxu1 %v2185_v13  ;;  %v2130_v13 = vcombine.low %v163_v2, %v167_v3  ;;  %v2123_v15 = vcombine.high %v155_v10, %v159_v11  ;;  %v135_v33 = vld [vmem:[%s3113_s1 + $0x3b8] sm:$0xff] }
  0xbf   :  { %1801 = vmatpush2.bf16.msra.mxu0 %v2056_v20  ;;  %v147_v20 = vld [vmem:[%s3113_s1 + $0x418] sm:$0xff]  ;;  %v2099_v38 = vcombine.high %v131_v32, %v135_v33 }
  0xc0   :  { %1802 = vmatprep.subr.bf16.mxu0 %v2049_v22  ;;  %v1994_v22 = vcombine.low %v27_v8, %v31_v9  ;;  %v123_v40 = vld [vmem:[%s3113_s1 + $0x358] sm:$0xff] }
  0xc1   :  { %1842 = vmatpush2.bf16.msra.mxu1 %v2184_v21  ;;  %v151_v21 = vld [vmem:[%s3113_s1 + $0x438] sm:$0xff] }
  0xc2   :  { %1843 = vmatprep.subr.bf16.mxu1 %v2177_v53  ;;  %v2122_v53 = vcombine.low %v155_v10, %v159_v11  ;;  %v2115_v24 = vcombine.high %v147_v20, %v151_v21  ;;  %v127_v41 = vld [vmem:[%s3113_s1 + $0x378] sm:$0xff] }
  0xc3   :  { %1803 = vmatpush2.bf16.msra.mxu0 %v2048_v26  ;;  %v267_v26 = vld [vmem:[%s3113_s1 + $0x7d8] sm:$0xff]  ;;  %v2091_v46 = vcombine.high %v123_v40, %v127_v41 }
  0xc4   :  { %1854 = vmatprep.subr.bf16.mxu0 %v2043_v28  ;;  %v1986_v28 = vcombine.low %v19_v17, %v23_v18  ;;  %v115_v48 = vld [vmem:[%s3113_s1 + $0x318] sm:$0xff] }
  0xc5   :  { %1844 = vmatpush2.bf16.msra.mxu1 %v2176_v27  ;;  %v271_v27 = vld [vmem:[%s3113_s1 + $0x7f8] sm:$0xff] }
  0xc6   :  { %1895 = vmatprep.subr.bf16.mxu1 %v2171_v29  ;;  %1805 = vmatmul.mubr.bf16.vlgmr.msra.gmra.mxu0 %v2500_v16  ;;  %v2114_v29 = vcombine.low %v147_v20, %v151_v21  ;;  %v2235_v31 = vcombine.high %v267_v26, %v271_v27  ;;  %v119_v49 = vld [vmem:[%s3113_s1 + $0x338] sm:$0xff] }
  0xc7   :  { %1855 = vmatpush1.bf16.msra.mxu0 %v2042_v34  ;;  %1886 = vmatprep.mubr.bf16.mxu0 %v2370_v58  ;;  %v43_v58 = vld [vmem:[%s3113_s1 + $0xd8] sm:$0xff] }
  0xc8   :  { %1846 = vmatmul.mubr.bf16.vlgmr.msra.gmra.mxu1 %v2510_v19  ;;  %1856 = vmatprep.subr.bf16.mxu0 %v2035_v36  ;;  %v2011_v62 = vcombine.high %v43_v58, %v47_v56  ;;  %v2010_v4 = vcombine.low %v43_v58, %v47_v56  ;;  %v259_v34 = vld [vmem:[%s3113_s1 + $0x798] sm:$0xff]  ;;  %v2106_v36 = vcombine.low %v139_v54, %v143_v25 }
  0xc9   :  { %1896 = vmatpush1.bf16.msra.mxu1 %v2170_v35  ;;  %1927 = vmatprep.mubr.bf16.mxu1 %v2374_v59  ;;  %v171_v59 = vld [vmem:[%s3113_s1 + $0x4d8] sm:$0xff]  ;;  %v2083_v58 = vcombine.high %v115_v48, %v119_v49 }
  0xca   :  { %1897 = vmatprep.subr.bf16.mxu1 %v2163_v37  ;;  %v2139_v63 = vcombine.high %v171_v59, %v175_v57  ;;  %v2138_v5 = vcombine.low %v171_v59, %v175_v57  ;;  %v263_v35 = vld [vmem:[%s3113_s1 + $0x7b8] sm:$0xff]  ;;  %v2234_v37 = vcombine.low %v267_v26, %v271_v27 }
  0xcb   :  { %1857 = vmatpush1.bf16.msra.mxu0 %v2034_v42  ;;  %v2227_v39 = vcombine.high %v259_v34, %v263_v35  ;;  %v251_v42 = vld [vmem:[%s3113_s1 + $0x758] sm:$0xff] }
  0xcc   :  { %1858 = vmatprep.subr.bf16.mxu0 %v2027_v44  ;;  %v2098_v44 = vcombine.low %v131_v32, %v135_v33  ;;  %v107_v59 = vld [vmem:[%s3113_s1 + $0x2d8] sm:$0xff] }
  0xcd   :  { %1898 = vmatpush1.bf16.msra.mxu1 %v2162_v43  ;;  %v255_v43 = vld [vmem:[%s3113_s1 + $0x778] sm:$0xff] }
  0xce   :  { %1899 = vmatprep.subr.bf16.mxu1 %v2155_v45  ;;  %v2226_v45 = vcombine.low %v259_v34, %v263_v35  ;;  %v2219_v47 = vcombine.high %v251_v42, %v255_v43  ;;  %v111_v57 = vld [vmem:[%s3113_s1 + $0x2f8] sm:$0xff] }
  0xcf   :  { %1859 = vmatpush1.bf16.msra.mxu0 %v2026_v50  ;;  %v243_v50 = vld [vmem:[%s3113_s1 + $0x718] sm:$0xff]  ;;  %v2075_v0 = vcombine.high %v107_v59, %v111_v57 }
  0xd0   :  { %1860 = vmatprep.subr.bf16.mxu0 %v2019_v52  ;;  %v2090_v52 = vcombine.low %v123_v40, %v127_v41  ;;  %v99_v2 = vld [vmem:[%s3113_s1 + $0x298] sm:$0xff] }
  0xd1   :  { %1900 = vmatpush1.bf16.msra.mxu1 %v2154_v51  ;;  %v247_v51 = vld [vmem:[%s3113_s1 + $0x738] sm:$0xff] }
  0xd2   :  { %1901 = vmatprep.subr.bf16.mxu1 %v2147_v55  ;;  %v2218_v55 = vcombine.low %v251_v42, %v255_v43  ;;  %v2211_v56 = vcombine.high %v243_v50, %v247_v51  ;;  %v103_v3 = vld [vmem:[%s3113_s1 + $0x2b8] sm:$0xff] }
  0xd3   :  { %1861 = vmatpush1.bf16.msra.mxu0 %v2018_v60  ;;  %v235_v60 = vld [vmem:[%s3113_s1 + $0x6d8] sm:$0xff]  ;;  %v2067_v8 = vcombine.high %v99_v2, %v103_v3 }
  0xd4   :  { %1862 = vmatprep.subr.bf16.mxu0 %v2011_v62  ;;  %v2082_v62 = vcombine.low %v115_v48, %v119_v49  ;;  %v91_v10 = vld [vmem:[%s3113_s1 + $0x258] sm:$0xff] }
  0xd5   :  { %1902 = vmatpush1.bf16.msra.mxu1 %v2146_v61  ;;  %v239_v61 = vld [vmem:[%s3113_s1 + $0x6f8] sm:$0xff] }
  0xd6   :  { %1903 = vmatprep.subr.bf16.mxu1 %v2139_v63  ;;  %v2210_v63 = vcombine.low %v243_v50, %v247_v51  ;;  %v2203_v1 = vcombine.high %v235_v60, %v239_v61  ;;  %v95_v11 = vld [vmem:[%s3113_s1 + $0x278] sm:$0xff] }
  0xd7   :  { %1863 = vmatpush1.bf16.msra.mxu0 %v2010_v4  ;;  %v227_v4 = vld [vmem:[%s3113_s1 + $0x698] sm:$0xff]  ;;  %v2059_v18 = vcombine.high %v91_v10, %v95_v11 }
  0xd8   :  { %1864 = vmatprep.subr.bf16.mxu0 %v2003_v6  ;;  %v2074_v6 = vcombine.low %v107_v59, %v111_v57  ;;  %v83_v21 = vld [vmem:[%s3113_s1 + $0x218] sm:$0xff] }
  0xd9   :  { %1904 = vmatpush1.bf16.msra.mxu1 %v2138_v5  ;;  %v231_v5 = vld [vmem:[%s3113_s1 + $0x6b8] sm:$0xff] }
  0xda   :  { %1905 = vmatprep.subr.bf16.mxu1 %v2131_v7  ;;  %v2202_v7 = vcombine.low %v235_v60, %v239_v61  ;;  %v2195_v9 = vcombine.high %v227_v4, %v231_v5  ;;  %v2194_v17 = vcombine.low %v227_v4, %v231_v5 }
  0xdb   :  { %1865 = vmatpush1.bf16.msra.mxu0 %v2002_v12  ;;  %v219_v12 = vld [vmem:[%s3113_s1 + $0x658] sm:$0xff] }
  0xdc   :  { %1866 = vmatprep.subr.bf16.mxu0 %v1995_v14  ;;  %v2066_v14 = vcombine.low %v99_v2, %v103_v3 }
  0xdd   :  { %1906 = vmatpush1.bf16.msra.mxu1 %v2130_v13  ;;  %v223_v13 = vld [vmem:[%s3113_s1 + $0x678] sm:$0xff] }
  0xde   :  { %1907 = vmatprep.subr.bf16.mxu1 %v2123_v15  ;;  %v274_v15 = vlaneseq  ;;  %v2187_v20 = vcombine.high %v219_v12, %v223_v13  ;;  %v2186_v25 = vcombine.low %v219_v12, %v223_v13 }
  0xdf   :  { %1867 = vmatpush1.bf16.msra.mxu0 %v1994_v22  ;;  %v87_v22 = vld [vmem:[%s3113_s1 + $0x238] sm:$0xff] }
  0xe0   :  { %1868 = vmatprep.subr.bf16.mxu0 %v1987_v23  ;;  %v215_v23 = vld [vmem:[%s3113_s1 + $0x638] sm:$0xff]  ;;  %v3076_v54 = vshrl.u32 %v274_v15, 7  ;;  %v2051_v26 = vcombine.high %v83_v21, %v87_v22 }
  0xe1   :  { %1908 = vmatpush1.bf16.msra.mxu1 %v2122_v53  ;;  %v211_v53 = vld [vmem:[%s3113_s1 + $0x618] sm:$0xff] }
  0xe2   :  { %1909 = vmatprep.subr.bf16.mxu1 %v2115_v24  ;;  %v2058_v24 = vcombine.low %v91_v10, %v95_v11  ;;  %v2179_v27 = vcombine.high %v211_v53, %v215_v23  ;;  %v280_v32 = vsub.s32 1, %v3076_v54  ;;  %v288_v48 = vsub.s32 3, %v3076_v54 }
  0xe3   :  { %1869 = vmatpush1.bf16.msra.mxu0 %v1986_v28  ;;  %v2050_v28 = vcombine.low %v83_v21, %v87_v22  ;;  %v296_v2 = vsub.s32 5, %v3076_v54  ;;  %v304_v21 = vsub.s32 7, %v3076_v54 }
  0xe4   :  { %1870 = vmatprep.subr.bf16.mxu0 %v2107_v30  ;;  %v2178_v30 = vcombine.low %v211_v53, %v215_v23 }
  0xe5   :  { %1910 = vmatpush1.bf16.msra.mxu1 %v2114_v29  ;;  %v276_v29 = vsub.s32 0, %v3076_v54 }
  0xe6   :  { %1911 = vmatprep.subr.bf16.mxu1 %v2235_v31  ;;  %v3082_v31 = vld [vmem:[%s3115_s2] sm:$0xff] }
  0xe7   :  { %1871 = vmatpush2.bf16.msra.mxu0 %v2106_v36  ;;  %v277_v33 = vrot.slane %v3082_v31, %v276_v29  ;;  %v281_v34 = vrot.slane %v3082_v31, %v280_v32  ;;  %v289_v49 = vrot.slane %v3082_v31, %v288_v48  ;;  %v297_v4 = vrot.slane %v3082_v31, %v296_v2 }
  0xe8   :  { %1872 = vmatprep.subr.bf16.mxu0 %v2099_v38  ;;  %v305_v53 = vrot.slane %v3082_v31, %v304_v21 }
  0xe9   :  { %1912 = vmatpush2.bf16.msra.mxu1 %v2234_v37 }
  0xea   :  { %1913 = vmatprep.subr.bf16.mxu1 %v2227_v39 }
  0xeb   :  { %1873 = vmatpush2.bf16.msra.mxu0 %v2098_v44 }
  0xec   :  { %1874 = vmatprep.subr.bf16.mxu0 %v2091_v46 }
  0xed   :  { %1914 = vmatpush2.bf16.msra.mxu1 %v2226_v45 }
  0xee   :  { %1915 = vmatprep.subr.bf16.mxu1 %v2219_v47 }
  0xef   :  { %1875 = vmatpush2.bf16.msra.mxu0 %v2090_v52 }
  0xf0   :  { %1876 = vmatprep.subr.bf16.mxu0 %v2083_v58 }
  0xf1   :  { %1916 = vmatpush2.bf16.msra.mxu1 %v2218_v55 }
  0xf2   :  { %1917 = vmatprep.subr.bf16.mxu1 %v2211_v56 }
  0xf3   :  { %1877 = vmatpush2.bf16.msra.mxu0 %v2082_v62 }
  0xf4   :  { %1878 = vmatprep.subr.bf16.mxu0 %v2075_v0 }
  0xf5   :  { %1918 = vmatpush2.bf16.msra.mxu1 %v2210_v63 }
  0xf6   :  { %1919 = vmatprep.subr.bf16.mxu1 %v2203_v1  ;;  %v292_v1 = vsub.s32 4, %v3076_v54 }
  0xf7   :  { %1879 = vmatpush2.bf16.msra.mxu0 %v2074_v6 }
  0xf8   :  { %1880 = vmatprep.subr.bf16.mxu0 %v2067_v8  ;;  %v293_v3 = vrot.slane %v3082_v31, %v292_v1 }
  0xf9   :  { %1920 = vmatpush2.bf16.msra.mxu1 %v2202_v7 }
  0xfa   :  { %1921 = vmatprep.subr.bf16.mxu1 %v2195_v9 }
  0xfb   :  { %1881 = vmatpush2.bf16.msra.mxu0 %v2066_v14 }
  0xfc   :  { %1882 = vmatprep.subr.bf16.mxu0 %v2059_v18 }
  0xfd   :  { %1922 = vmatpush2.bf16.msra.mxu1 %v2194_v17 }
  0xfe   :  { %1923 = vmatprep.subr.bf16.mxu1 %v2187_v20  ;;  %v300_v20 = vsub.s32 6, %v3076_v54 }
  0xff   :  { %1883 = vmatpush2.bf16.msra.mxu0 %v2058_v24 }
 0x100   :  { %1884 = vmatprep.subr.bf16.mxu0 %v2051_v26  ;;  %v301_v22 = vrot.slane %v3082_v31, %v300_v20 }
 0x101   :  { %1924 = vmatpush2.bf16.msra.mxu1 %v2186_v25 }
 0x102   :  { %1925 = vmatprep.subr.bf16.mxu1 %v2179_v27 }
 0x103   :  { %1885 = vmatpush2.bf16.msra.mxu0 %v2050_v28 }
 0x105   :  { %1926 = vmatpush2.bf16.msra.mxu1 %v2178_v30 }
 0x106   :  { %v1642_v35 = vpop.f32.mrf.mxu0  ;;  %1887 = vmatmul.mubr.bf16.vlgmr.msra.gmra.mxu0 %v2500_v16  ;;  %v284_v16 = vsub.s32 2, %v3076_v54 }
 0x107   :  { %v1643_v36 = vadd.f32 %v1642_v35, %v277_v33 }
 0x108   :  { %v1683_v37 = vpop.f32.mrf.mxu1  ;;  %1928 = vmatmul.mubr.bf16.vlgmr.msra.gmra.mxu1 %v2510_v19  ;;  %v1644_v38 = vpop.f32.mrf.mxu0  ;;  %v285_v19 = vrot.slane %v3082_v31, %v284_v16 }
 0x109   :  { %v1684_v39 = vadd.f32 %v1683_v37, %v1643_v36  ;;  %v1645_v40 = vadd.f32 %v1644_v38, %v281_v34 }
 0x10a   :  { %v1685_v41 = vpop.f32.mrf.mxu1  ;;  %v1646_v42 = vpop.f32.mrf.mxu0 }
 0x10b   :  { %v1686_v43 = vadd.f32 %v1685_v41, %v1645_v40 }
 0x10c   :  { %v1687_v44 = vpop.f32.mrf.mxu1  ;;  %v1647_v45 = vpop.f32.mrf.mxu0 }
 0x10d   :  { %v2240_v46 = vpack.c.bf16 %v1686_v43, %v1684_v39 }
 0x10e   :  { %v1688_v47 = vpop.f32.mrf.mxu1 }
 0x10f   :  { %1968 = vst [vmem:[%s3116_s3] sm:$0xff] %v2240_v46 }
 0x146   :  { %v1724_v50 = vpop.f32.mrf.mxu0 }
 0x147   :  { %v1725_v51 = vadd.f32 %v1724_v50, %v285_v19 }
 0x148   :  { %v1765_v52 = vpop.f32.mrf.mxu1  ;;  %v1726_v55 = vpop.f32.mrf.mxu0 }
 0x149   :  { %v1766_v58 = vadd.f32 %v1765_v52, %v1725_v51  ;;  %v1727_v56 = vadd.f32 %v1726_v55, %v289_v49 }
 0x14a   :  { %v1767_v59 = vpop.f32.mrf.mxu1  ;;  %v1728_v57 = vpop.f32.mrf.mxu0 }
 0x14b   :  { %v1768_v60 = vadd.f32 %v1767_v59, %v1727_v56 }
 0x14c   :  { %v1769_v61 = vpop.f32.mrf.mxu1  ;;  %v1729_v62 = vpop.f32.mrf.mxu0 }
 0x14d   :  { %v2241_v63 = vpack.c.bf16 %v1768_v60, %v1766_v58 }
 0x14e   :  { %v1770_v0 = vpop.f32.mrf.mxu1 }
 0x14f   :  { %1969 = vst [vmem:[%s3116_s3 + $0x8] sm:$0xff] %v2241_v63 }
 0x186   :  { %v1806_v5 = vpop.f32.mrf.mxu0 }
 0x187   :  { %v1807_v6 = vadd.f32 %v1806_v5, %v293_v3 }
 0x188   :  { %v1847_v7 = vpop.f32.mrf.mxu1  ;;  %v1808_v8 = vpop.f32.mrf.mxu0 }
 0x189   :  { %v1848_v9 = vadd.f32 %v1847_v7, %v1807_v6  ;;  %v1809_v10 = vadd.f32 %v1808_v8, %v297_v4 }
 0x18a   :  { %v1849_v11 = vpop.f32.mrf.mxu1  ;;  %v1810_v12 = vpop.f32.mrf.mxu0 }
 0x18b   :  { %v1850_v13 = vadd.f32 %v1849_v11, %v1809_v10 }
 0x18c   :  { %v1851_v14 = vpop.f32.mrf.mxu1  ;;  %v1811_v15 = vpop.f32.mrf.mxu0 }
 0x18d   :  { %v2242_v17 = vpack.c.bf16 %v1850_v13, %v1848_v9 }
 0x18e   :  { %v1852_v18 = vpop.f32.mrf.mxu1 }
 0x18f   :  { %1970 = vst [vmem:[%s3116_s3 + $0x10] sm:$0xff] %v2242_v17 }
 0x1c6   :  { %v1888_v23 = vpop.f32.mrf.mxu0 }
 0x1c7   :  { %v1889_v24 = vadd.f32 %v1888_v23, %v301_v22 }
 0x1c8   :  { %v1929_v25 = vpop.f32.mrf.mxu1  ;;  %v1890_v26 = vpop.f32.mrf.mxu0 }
 0x1c9   :  { %v1891_v27 = vadd.f32 %v1890_v26, %v305_v53  ;;  %v1930_v30 = vadd.f32 %v1929_v25, %v1889_v24 }
 0x1ca   :  { %v1931_v28 = vpop.f32.mrf.mxu1  ;;  %v1892_v29 = vpop.f32.mrf.mxu0 }
 0x1cb   :  { %v1932_v32 = vadd.f32 %v1931_v28, %v1891_v27 }
 0x1cc   :  { %v1933_v33 = vpop.f32.mrf.mxu1  ;;  %v1893_v34 = vpop.f32.mrf.mxu0 }
 0x1cd   :  { %v2243_v35 = vpack.c.bf16 %v1932_v32, %v1930_v30 }
 0x1ce   :  { %v1934_v36 = vpop.f32.mrf.mxu1 }
 0x1cf   :  { %1971 = vst [vmem:[%s3116_s3 + $0x18] sm:$0xff] %v2243_v35 }

// kernel: backbone_forward.30
= control target key start
LH: loop header
LB: loop body
LE: loop exit
PB: predicated region body
PF: predicated region fallthrough
CT: control target
= control target key end

     0   :  { %s7266_s1 = inlined_call_operand.vmem [shape: bf16[2304,256], index: 1, kind: input, shape index: {}]   ;;  %s7267_s0 = inlined_call_operand.vmem [shape: bf16[8,2304], index: 0, kind: input, shape index: {}]   ;;  %s7268_s2 = inlined_call_operand.vmem [shape: f32[1,256], index: 2, kind: input, shape index: {}]   ;;  %s7269_s3 = inlined_call_operand.vmem [shape: bf16[256,1024], index: 3, kind: input, shape index: {}]   ;;  %s7270_s6 = inlined_call_operand.vmem [shape: bf16[1024,256], index: 6, kind: input, shape index: {}]   ;;  %s7271_s4 = inlined_call_operand.vmem [shape: f32[1,1024], index: 4, kind: input, shape index: {}]   ;;  %s7272_s5 = inlined_call_operand.vmem [shape: bf16[8,1024], index: 5, kind: input, shape index: {}]   ;;  %s7273_s8 = inlined_call_operand.vmem [shape: bf16[8,1024], index: 8, kind: output, shape index: {0}]   ;;  %s7274_s7 = inlined_call_operand.vmem [shape: f32[1,256], index: 7, kind: input, shape index: {}]   ;;  %s7275_s9 = inlined_call_operand.vmem [shape: bf16[8,256], index: 9, kind: output, shape index: {1}]  }
   0x1   :  { %v4789_v0 = vld [vmem:[%s7266_s1 + $0x74] ss:$8 sps:$4 sm:$0xff]   ;;  %v4791_v1 = vld [vmem:[%s7266_s1 + $0x70] ss:$8 sps:$4 sm:$0xff]   ;;  %v4795_v4 = vld [vmem:[%s7266_s1 + $0x64] ss:$8 sps:$4 sm:$0xff]  }
   0x2   :  { %1843 = vmatprep.subr.bf16.mxu0 %v4789_v0  ;;  %v4792_v2 = vld [vmem:[%s7266_s1 + $0x174] ss:$8 sps:$4 sm:$0xff]   ;;  %v4794_v3 = vld [vmem:[%s7266_s1 + $0x170] ss:$8 sps:$4 sm:$0xff]   ;;  %v4797_v5 = vld [vmem:[%s7266_s1 + $0x60] ss:$8 sps:$4 sm:$0xff]  }
   0x3   :  { %1844 = vmatpush1.bf16.msra.mxu0 %v4791_v1  ;;  %1884 = vmatprep.subr.bf16.mxu1 %v4792_v2  ;;  %v4798_v6 = vld [vmem:[%s7266_s1 + $0x164] ss:$8 sps:$4 sm:$0xff]   ;;  %v4800_v7 = vld [vmem:[%s7266_s1 + $0x160] ss:$8 sps:$4 sm:$0xff]   ;;  %v4801_v8 = vld [vmem:[%s7266_s1 + $0x54] ss:$8 sps:$4 sm:$0xff]  }
   0x4   :  { %1885 = vmatpush1.bf16.msra.mxu1 %v4794_v3  ;;  %1845 = vmatprep.subr.bf16.mxu0 %v4795_v4  ;;  %v4803_v9 = vld [vmem:[%s7266_s1 + $0x50] ss:$8 sps:$4 sm:$0xff]   ;;  %v4804_v10 = vld [vmem:[%s7266_s1 + $0x154] ss:$8 sps:$4 sm:$0xff]   ;;  %v4807_v11 = vld [vmem:[%s7266_s1 + $0x44] ss:$8 sps:$4 sm:$0xff]  }
   0x5   :  { %1886 = vmatprep.subr.bf16.mxu1 %v4798_v6  ;;  %v4806_v12 = vld [vmem:[%s7266_s1 + $0x150] ss:$8 sps:$4 sm:$0xff]   ;;  %v4810_v13 = vld [vmem:[%s7266_s1 + $0x144] ss:$8 sps:$4 sm:$0xff]   ;;  %v4809_v14 = vld [vmem:[%s7266_s1 + $0x40] ss:$8 sps:$4 sm:$0xff]  }
   0x6   :  { %v4813_v15 = vld [vmem:[%s7266_s1 + $0x34] ss:$8 sps:$4 sm:$0xff]   ;;  %v4812_v16 = vld [vmem:[%s7266_s1 + $0x140] ss:$8 sps:$4 sm:$0xff]   ;;  %v4815_v18 = vld [vmem:[%s7266_s1 + $0x30] ss:$8 sps:$4 sm:$0xff]  }
   0x7   :  { %1846 = vmatpush1.bf16.msra.mxu0 %v4797_v5  ;;  %v4816_v17 = vld [vmem:[%s7266_s1 + $0x134] ss:$8 sps:$4 sm:$0xff]   ;;  %v4819_v19 = vld [vmem:[%s7266_s1 + $0x24] ss:$8 sps:$4 sm:$0xff]   ;;  %v4818_v20 = vld [vmem:[%s7266_s1 + $0x130] ss:$8 sps:$4 sm:$0xff]  }
   0x8   :  { %1847 = vmatprep.subr.bf16.mxu0 %v4801_v8  ;;  %1887 = vmatpush1.bf16.msra.mxu1 %v4800_v7  ;;  %v4822_v21 = vld [vmem:[%s7266_s1 + $0x124] ss:$8 sps:$4 sm:$0xff]   ;;  %v4821_v22 = vld [vmem:[%s7266_s1 + $0x20] ss:$8 sps:$4 sm:$0xff]   ;;  %v4825_v23 = vld [vmem:[%s7266_s1 + $0x14] ss:$8 sps:$4 sm:$0xff]  }
   0x9   :  { %1888 = vmatprep.subr.bf16.mxu1 %v4804_v10  ;;  %v4824_v24 = vld [vmem:[%s7266_s1 + $0x120] ss:$8 sps:$4 sm:$0xff]   ;;  %v4828_v25 = vld [vmem:[%s7266_s1 + $0x114] ss:$8 sps:$4 sm:$0xff]   ;;  %v4827_v26 = vld [vmem:[%s7266_s1 + $0x10] ss:$8 sps:$4 sm:$0xff]  }
   0xa   :  { %v4831_v27 = vld [vmem:[%s7266_s1 + $0x4] ss:$8 sps:$4 sm:$0xff]   ;;  %v4830_v28 = vld [vmem:[%s7266_s1 + $0x110] ss:$8 sps:$4 sm:$0xff]   ;;  %v4833_v30 = vld [vmem:[%s7266_s1] ss:$8 sps:$4 sm:$0xff]  }
   0xb   :  { %1848 = vmatpush1.bf16.msra.mxu0 %v4803_v9  ;;  %v4834_v29 = vld [vmem:[%s7266_s1 + $0x104] ss:$8 sps:$4 sm:$0xff]   ;;  %v4837_v31 = vld [vmem:[%s7266_s1 + $0xf4] ss:$8 sps:$4 sm:$0xff]   ;;  %v4836_v32 = vld [vmem:[%s7266_s1 + $0x100] ss:$8 sps:$4 sm:$0xff]  }
   0xc   :  { %1849 = vmatprep.subr.bf16.mxu0 %v4807_v11  ;;  %1889 = vmatpush1.bf16.msra.mxu1 %v4806_v12  ;;  %v4840_v33 = vld [vmem:[%s7266_s1 + $0x1f4] ss:$8 sps:$4 sm:$0xff]   ;;  %v4839_v34 = vld [vmem:[%s7266_s1 + $0xf0] ss:$8 sps:$4 sm:$0xff]   ;;  %v4843_v35 = vld [vmem:[%s7266_s1 + $0xe4] ss:$8 sps:$4 sm:$0xff]  }
   0xd   :  { %1890 = vmatprep.subr.bf16.mxu1 %v4810_v13  ;;  %v4842_v36 = vld [vmem:[%s7266_s1 + $0x1f0] ss:$8 sps:$4 sm:$0xff]   ;;  %v4846_v37 = vld [vmem:[%s7266_s1 + $0x1e4] ss:$8 sps:$4 sm:$0xff]   ;;  %v4845_v38 = vld [vmem:[%s7266_s1 + $0xe0] ss:$8 sps:$4 sm:$0xff]  }
   0xe   :  { %v4849_v39 = vld [vmem:[%s7266_s1 + $0xd4] ss:$8 sps:$4 sm:$0xff]   ;;  %v4848_v40 = vld [vmem:[%s7266_s1 + $0x1e0] ss:$8 sps:$4 sm:$0xff]   ;;  %v4851_v42 = vld [vmem:[%s7266_s1 + $0xd0] ss:$8 sps:$4 sm:$0xff]  }
   0xf   :  { %1850 = vmatpush1.bf16.msra.mxu0 %v4809_v14  ;;  %v4852_v41 = vld [vmem:[%s7266_s1 + $0x1d4] ss:$8 sps:$4 sm:$0xff]   ;;  %v4855_v43 = vld [vmem:[%s7266_s1 + $0xc4] ss:$8 sps:$4 sm:$0xff]   ;;  %v4854_v44 = vld [vmem:[%s7266_s1 + $0x1d0] ss:$8 sps:$4 sm:$0xff]  }
  0x10   :  { %1851 = vmatprep.subr.bf16.mxu0 %v4813_v15  ;;  %1891 = vmatpush1.bf16.msra.mxu1 %v4812_v16  ;;  %v4858_v45 = vld [vmem:[%s7266_s1 + $0x1c4] ss:$8 sps:$4 sm:$0xff]   ;;  %v4857_v47 = vld [vmem:[%s7266_s1 + $0xc0] ss:$8 sps:$4 sm:$0xff]   ;;  %v4861_v49 = vld [vmem:[%s7266_s1 + $0xb4] ss:$8 sps:$4 sm:$0xff]  }
  0x11   :  { %1892 = vmatprep.subr.bf16.mxu1 %v4816_v17  ;;  %v31_v46 = vld [vmem:[%s7267_s0] sm:$0xff]  ;;  %v32_v50 = vld [vmem:[%s7267_s0 + $0x8] sm:$0xff]  ;;  %v4864_v53 = vld [vmem:[%s7266_s1 + $0x1b4] ss:$8 sps:$4 sm:$0xff]  }
  0x12   :  { %v4218_v48 = vcombine.high %v31_v46, %v31_v46  ;;  %v4860_v51 = vld [vmem:[%s7266_s1 + $0x1c0] ss:$8 sps:$4 sm:$0xff]   ;;  %v4220_v52 = vcombine.high %v32_v50, %v32_v50  ;;  %v4863_v54 = vld [vmem:[%s7266_s1 + $0xb0] ss:$8 sps:$4 sm:$0xff]   ;;  %v4867_v55 = vld [vmem:[%s7266_s1 + $0xa4] ss:$8 sps:$4 sm:$0xff]   ;;  %v4217_v5 = vcombine.low %v31_v46, %v31_v46  ;;  %v4219_v8 = vcombine.low %v32_v50, %v32_v50 }
  0x13   :  { %1852 = vmatpush1.bf16.msra.mxu0 %v4815_v18  ;;  %v4866_v56 = vld [vmem:[%s7266_s1 + $0x1b0] ss:$8 sps:$4 sm:$0xff]   ;;  %v4870_v57 = vld [vmem:[%s7266_s1 + $0x1a4] ss:$8 sps:$4 sm:$0xff]   ;;  %v4869_v58 = vld [vmem:[%s7266_s1 + $0xa0] ss:$8 sps:$4 sm:$0xff]  }
  0x14   :  { %1853 = vmatprep.subr.bf16.mxu0 %v4819_v19  ;;  %1893 = vmatpush1.bf16.msra.mxu1 %v4818_v20  ;;  %v4873_v59 = vld [vmem:[%s7266_s1 + $0x94] ss:$8 sps:$4 sm:$0xff]   ;;  %v4872_v60 = vld [vmem:[%s7266_s1 + $0x1a0] ss:$8 sps:$4 sm:$0xff]   ;;  %v4875_v62 = vld [vmem:[%s7266_s1 + $0x90] ss:$8 sps:$4 sm:$0xff]  }
  0x15   :  { %1894 = vmatprep.subr.bf16.mxu1 %v4822_v21  ;;  %1875 = vmatprep.mubr.bf16.mxu0 %v4218_v48  ;;  %v4876_v61 = vld [vmem:[%s7266_s1 + $0x194] ss:$8 sps:$4 sm:$0xff]   ;;  %v4879_v63 = vld [vmem:[%s7266_s1 + $0x84] ss:$8 sps:$4 sm:$0xff]   ;;  %v4878_v0 = vld [vmem:[%s7266_s1 + $0x190] ss:$8 sps:$4 sm:$0xff]  }
  0x16   :  { %1916 = vmatprep.mubr.bf16.mxu1 %v4220_v52  ;;  %v4882_v1 = vld [vmem:[%s7266_s1 + $0x184] ss:$8 sps:$4 sm:$0xff]   ;;  %v4881_v2 = vld [vmem:[%s7266_s1 + $0x80] ss:$8 sps:$4 sm:$0xff]   ;;  %v4889_v3 = vld [vmem:[%s7266_s1 + $0x274] ss:$8 sps:$4 sm:$0xff]  }
  0x17   :  { %1854 = vmatpush1.bf16.msra.mxu0 %v4821_v22  ;;  %v4886_v4 = vld [vmem:[%s7266_s1 + $0x180] ss:$8 sps:$4 sm:$0xff]   ;;  %v4894_v6 = vld [vmem:[%s7266_s1 + $0x374] ss:$8 sps:$4 sm:$0xff]   ;;  %v4887_v7 = vld [vmem:[%s7266_s1 + $0x270] ss:$8 sps:$4 sm:$0xff]  }
  0x18   :  { %1855 = vmatprep.subr.bf16.mxu0 %v4825_v23  ;;  %1895 = vmatpush1.bf16.msra.mxu1 %v4824_v24  ;;  %v4897_v9 = vld [vmem:[%s7266_s1 + $0x264] ss:$8 sps:$4 sm:$0xff]   ;;  %v4892_v10 = vld [vmem:[%s7266_s1 + $0x370] ss:$8 sps:$4 sm:$0xff]   ;;  %v4895_v12 = vld [vmem:[%s7266_s1 + $0x260] ss:$8 sps:$4 sm:$0xff]  }
  0x19   :  { %1896 = vmatprep.subr.bf16.mxu1 %v4828_v25  ;;  %v4900_v11 = vld [vmem:[%s7266_s1 + $0x364] ss:$8 sps:$4 sm:$0xff]   ;;  %v4903_v13 = vld [vmem:[%s7266_s1 + $0x254] ss:$8 sps:$4 sm:$0xff]   ;;  %v4898_v14 = vld [vmem:[%s7266_s1 + $0x360] ss:$8 sps:$4 sm:$0xff]  }
  0x1a   :  { %v4906_v15 = vld [vmem:[%s7266_s1 + $0x354] ss:$8 sps:$4 sm:$0xff]   ;;  %v4901_v16 = vld [vmem:[%s7266_s1 + $0x250] ss:$8 sps:$4 sm:$0xff]   ;;  %v4909_v17 = vld [vmem:[%s7266_s1 + $0x244] ss:$8 sps:$4 sm:$0xff]  }
  0x1b   :  { %1856 = vmatpush1.bf16.msra.mxu0 %v4827_v26  ;;  %v4904_v18 = vld [vmem:[%s7266_s1 + $0x350] ss:$8 sps:$4 sm:$0xff]   ;;  %v4912_v19 = vld [vmem:[%s7266_s1 + $0x344] ss:$8 sps:$4 sm:$0xff]   ;;  %v4907_v20 = vld [vmem:[%s7266_s1 + $0x240] ss:$8 sps:$4 sm:$0xff]  }
  0x1c   :  { %1857 = vmatprep.subr.bf16.mxu0 %v4831_v27  ;;  %1897 = vmatpush1.bf16.msra.mxu1 %v4830_v28  ;;  %v4915_v21 = vld [vmem:[%s7266_s1 + $0x234] ss:$8 sps:$4 sm:$0xff]   ;;  %v4910_v22 = vld [vmem:[%s7266_s1 + $0x340] ss:$8 sps:$4 sm:$0xff]   ;;  %v4913_v24 = vld [vmem:[%s7266_s1 + $0x230] ss:$8 sps:$4 sm:$0xff]  }
  0x1d   :  { %1898 = vmatprep.subr.bf16.mxu1 %v4834_v29  ;;  %v4918_v23 = vld [vmem:[%s7266_s1 + $0x334] ss:$8 sps:$4 sm:$0xff]   ;;  %v4921_v25 = vld [vmem:[%s7266_s1 + $0x224] ss:$8 sps:$4 sm:$0xff]   ;;  %v4916_v26 = vld [vmem:[%s7266_s1 + $0x330] ss:$8 sps:$4 sm:$0xff]  }
  0x1e   :  { %v4924_v27 = vld [vmem:[%s7266_s1 + $0x324] ss:$8 sps:$4 sm:$0xff]   ;;  %v4919_v28 = vld [vmem:[%s7266_s1 + $0x220] ss:$8 sps:$4 sm:$0xff]   ;;  %v4927_v29 = vld [vmem:[%s7266_s1 + $0x214] ss:$8 sps:$4 sm:$0xff]  }
  0x1f   :  { %1858 = vmatpush1.bf16.msra.mxu0 %v4833_v30  ;;  %v4922_v30 = vld [vmem:[%s7266_s1 + $0x320] ss:$8 sps:$4 sm:$0xff]   ;;  %v4940_v46 = vld [vmem:[%s7266_s1 + $0x3f0] ss:$8 sps:$4 sm:$0xff]  }
  0x20   :  { %1859 = vmatprep.subr.bf16.mxu0 %v4837_v31  ;;  %1899 = vmatpush1.bf16.msra.mxu1 %v4836_v32  ;;  %v4930_v31 = vld [vmem:[%s7266_s1 + $0x314] ss:$8 sps:$4 sm:$0xff]   ;;  %v4943_v48 = vld [vmem:[%s7266_s1 + $0x2e0] ss:$8 sps:$4 sm:$0xff]   ;;  %v4949_v52 = vld [vmem:[%s7266_s1 + $0x2d0] ss:$8 sps:$4 sm:$0xff]  }
  0x21   :  { %1900 = vmatprep.subr.bf16.mxu1 %v4840_v33  ;;  %v5760_v32 = vld [vmem:[%s7267_s0 + $0x10] sm:$0xff]  ;;  %v4946_v50 = vld [vmem:[%s7266_s1 + $0x3e0] ss:$8 sps:$4 sm:$0xff]  }
  0x22   :  { %v4925_v33 = vld [vmem:[%s7266_s1 + $0x210] ss:$8 sps:$4 sm:$0xff]  }
  0x23   :  { %1860 = vmatpush2.bf16.msra.mxu0 %v4839_v34  ;;  %v4222_v34 = vcombine.high %v5760_v32, %v5760_v32 }
  0x24   :  { %1861 = vmatprep.subr.bf16.mxu0 %v4843_v35  ;;  %1901 = vmatpush2.bf16.msra.mxu1 %v4842_v36  ;;  %v5770_v35 = vld [vmem:[%s7267_s0 + $0x18] sm:$0xff]  ;;  %v4933_v36 = vld [vmem:[%s7266_s1 + $0x204] ss:$8 sps:$4 sm:$0xff]  }
  0x25   :  { %1902 = vmatprep.subr.bf16.mxu1 %v4846_v37  ;;  %v4224_v37 = vcombine.high %v5770_v35, %v5770_v35 }
  0x27   :  { %1862 = vmatpush2.bf16.msra.mxu0 %v4845_v38  ;;  %v4928_v38 = vld [vmem:[%s7266_s1 + $0x310] ss:$8 sps:$4 sm:$0xff]  }
  0x28   :  { %1863 = vmatprep.subr.bf16.mxu0 %v4849_v39  ;;  %1903 = vmatpush2.bf16.msra.mxu1 %v4848_v40  ;;  %v4936_v39 = vld [vmem:[%s7266_s1 + $0x304] ss:$8 sps:$4 sm:$0xff]   ;;  %v4931_v40 = vld [vmem:[%s7266_s1 + $0x200] ss:$8 sps:$4 sm:$0xff]  }
  0x29   :  { %1904 = vmatprep.subr.bf16.mxu1 %v4852_v41  ;;  %v4939_v41 = vld [vmem:[%s7266_s1 + $0x2f4] ss:$8 sps:$4 sm:$0xff]  }
  0x2b   :  { %1864 = vmatpush2.bf16.msra.mxu0 %v4851_v42  ;;  %v4934_v42 = vld [vmem:[%s7266_s1 + $0x300] ss:$8 sps:$4 sm:$0xff]  }
  0x2c   :  { %1865 = vmatprep.subr.bf16.mxu0 %v4855_v43  ;;  %1905 = vmatpush2.bf16.msra.mxu1 %v4854_v44  ;;  %v4942_v43 = vld [vmem:[%s7266_s1 + $0x3f4] ss:$8 sps:$4 sm:$0xff]   ;;  %v4937_v44 = vld [vmem:[%s7266_s1 + $0x2f0] ss:$8 sps:$4 sm:$0xff]  }
  0x2d   :  { %1906 = vmatprep.subr.bf16.mxu1 %v4858_v45  ;;  %v4945_v45 = vld [vmem:[%s7266_s1 + $0x2e4] ss:$8 sps:$4 sm:$0xff]  }
  0x2f   :  { %1866 = vmatpush2.bf16.msra.mxu0 %v4857_v47  ;;  %v4948_v47 = vld [vmem:[%s7266_s1 + $0x3e4] ss:$8 sps:$4 sm:$0xff]  }
  0x30   :  { %1867 = vmatprep.subr.bf16.mxu0 %v4861_v49  ;;  %1907 = vmatpush2.bf16.msra.mxu1 %v4860_v51  ;;  %v4951_v49 = vld [vmem:[%s7266_s1 + $0x2d4] ss:$8 sps:$4 sm:$0xff]  }
  0x31   :  { %1908 = vmatprep.subr.bf16.mxu1 %v4864_v53  ;;  %v4954_v51 = vld [vmem:[%s7266_s1 + $0x3d4] ss:$8 sps:$4 sm:$0xff]   ;;  %v4957_v53 = vld [vmem:[%s7266_s1 + $0x2c4] ss:$8 sps:$4 sm:$0xff]  }
  0x33   :  { %1868 = vmatpush2.bf16.msra.mxu0 %v4863_v54  ;;  %v4952_v54 = vld [vmem:[%s7266_s1 + $0x3d0] ss:$8 sps:$4 sm:$0xff]  }
  0x34   :  { %1869 = vmatprep.subr.bf16.mxu0 %v4867_v55  ;;  %1909 = vmatpush2.bf16.msra.mxu1 %v4866_v56  ;;  %v4960_v55 = vld [vmem:[%s7266_s1 + $0x3c4] ss:$8 sps:$4 sm:$0xff]   ;;  %v4955_v56 = vld [vmem:[%s7266_s1 + $0x2c0] ss:$8 sps:$4 sm:$0xff]  }
  0x35   :  { %1910 = vmatprep.subr.bf16.mxu1 %v4870_v57  ;;  %v4963_v57 = vld [vmem:[%s7266_s1 + $0x2b4] ss:$8 sps:$4 sm:$0xff]  }
  0x37   :  { %1870 = vmatpush2.bf16.msra.mxu0 %v4869_v58  ;;  %v4958_v58 = vld [vmem:[%s7266_s1 + $0x3c0] ss:$8 sps:$4 sm:$0xff]  }
  0x38   :  { %1871 = vmatprep.subr.bf16.mxu0 %v4873_v59  ;;  %1911 = vmatpush2.bf16.msra.mxu1 %v4872_v60  ;;  %v4966_v59 = vld [vmem:[%s7266_s1 + $0x3b4] ss:$8 sps:$4 sm:$0xff]   ;;  %v4961_v60 = vld [vmem:[%s7266_s1 + $0x2b0] ss:$8 sps:$4 sm:$0xff]  }
  0x39   :  { %1912 = vmatprep.subr.bf16.mxu1 %v4876_v61  ;;  %v4969_v61 = vld [vmem:[%s7266_s1 + $0x2a4] ss:$8 sps:$4 sm:$0xff]  }
  0x3b   :  { %1872 = vmatpush2.bf16.msra.mxu0 %v4875_v62  ;;  %v4964_v62 = vld [vmem:[%s7266_s1 + $0x3b0] ss:$8 sps:$4 sm:$0xff]  }
  0x3c   :  { %1873 = vmatprep.subr.bf16.mxu0 %v4879_v63  ;;  %1913 = vmatpush2.bf16.msra.mxu1 %v4878_v0  ;;  %v4972_v63 = vld [vmem:[%s7266_s1 + $0x3a4] ss:$8 sps:$4 sm:$0xff]   ;;  %v4967_v0 = vld [vmem:[%s7266_s1 + $0x2a0] ss:$8 sps:$4 sm:$0xff]  }
  0x3d   :  { %1914 = vmatprep.subr.bf16.mxu1 %v4882_v1  ;;  %v4975_v1 = vld [vmem:[%s7266_s1 + $0x294] ss:$8 sps:$4 sm:$0xff]  }
  0x3f   :  { %1874 = vmatpush2.bf16.msra.mxu0 %v4881_v2  ;;  %v4970_v2 = vld [vmem:[%s7266_s1 + $0x3a0] ss:$8 sps:$4 sm:$0xff]  }
  0x40   :  { %1925 = vmatprep.subr.bf16.mxu0 %v4889_v3  ;;  %1915 = vmatpush2.bf16.msra.mxu1 %v4886_v4  ;;  %v4978_v3 = vld [vmem:[%s7266_s1 + $0x394] ss:$8 sps:$4 sm:$0xff]   ;;  %v4973_v4 = vld [vmem:[%s7266_s1 + $0x290] ss:$8 sps:$4 sm:$0xff]  }
  0x41   :  { %1966 = vmatprep.subr.bf16.mxu1 %v4894_v6  ;;  %v4976_v6 = vld [vmem:[%s7266_s1 + $0x390] ss:$8 sps:$4 sm:$0xff]  }
  0x42   :  { %1876 = vmatmul.mubr.bf16.vlgmr.msra.gmra.mxu0 %v4217_v5  ;;  %v4981_v5 = vld [vmem:[%s7266_s1 + $0x284] ss:$8 sps:$4 sm:$0xff]  }
  0x43   :  { %1926 = vmatpush1.bf16.msra.mxu0 %v4887_v7  ;;  %1917 = vmatmul.mubr.bf16.vlgmr.msra.gmra.mxu1 %v4219_v8  ;;  %v4984_v7 = vld [vmem:[%s7266_s1 + $0x384] ss:$8 sps:$4 sm:$0xff]   ;;  %v4979_v8 = vld [vmem:[%s7266_s1 + $0x280] ss:$8 sps:$4 sm:$0xff]  }
  0x44   :  { %1927 = vmatprep.subr.bf16.mxu0 %v4897_v9  ;;  %1967 = vmatpush1.bf16.msra.mxu1 %v4892_v10  ;;  %v4989_v9 = vld [vmem:[%s7266_s1 + $0x474] ss:$8 sps:$4 sm:$0xff]   ;;  %v4982_v10 = vld [vmem:[%s7266_s1 + $0x380] ss:$8 sps:$4 sm:$0xff]  }
  0x45   :  { %1968 = vmatprep.subr.bf16.mxu1 %v4900_v11  ;;  %1957 = vmatprep.mubr.bf16.mxu0 %v4222_v34  ;;  %v4221_v11 = vcombine.low %v5760_v32, %v5760_v32  ;;  %v5010_v32 = vld [vmem:[%s7266_s1 + $0x540] ss:$8 sps:$4 sm:$0xff]   ;;  %v5013_v34 = vld [vmem:[%s7266_s1 + $0x430] ss:$8 sps:$4 sm:$0xff]  }
  0x46   :  { %1998 = vmatprep.mubr.bf16.mxu1 %v4224_v37  ;;  %v5024_v37 = vld [vmem:[%s7266_s1 + $0x524] ss:$8 sps:$4 sm:$0xff]  }
  0x47   :  { %1928 = vmatpush1.bf16.msra.mxu0 %v4895_v12  ;;  %v4994_v12 = vld [vmem:[%s7266_s1 + $0x574] ss:$8 sps:$4 sm:$0xff]  }
  0x48   :  { %1929 = vmatprep.subr.bf16.mxu0 %v4903_v13  ;;  %1969 = vmatpush1.bf16.msra.mxu1 %v4898_v14  ;;  %v4987_v13 = vld [vmem:[%s7266_s1 + $0x470] ss:$8 sps:$4 sm:$0xff]   ;;  %v4223_v14 = vcombine.low %v5770_v35, %v5770_v35  ;;  %v5021_v35 = vld [vmem:[%s7266_s1 + $0x424] ss:$8 sps:$4 sm:$0xff]  }
  0x49   :  { %1970 = vmatprep.subr.bf16.mxu1 %v4906_v15  ;;  %v4997_v15 = vld [vmem:[%s7266_s1 + $0x464] ss:$8 sps:$4 sm:$0xff]  }
  0x4b   :  { %1930 = vmatpush1.bf16.msra.mxu0 %v4901_v16  ;;  %v4992_v16 = vld [vmem:[%s7266_s1 + $0x570] ss:$8 sps:$4 sm:$0xff]  }
  0x4c   :  { %1931 = vmatprep.subr.bf16.mxu0 %v4909_v17  ;;  %1971 = vmatpush1.bf16.msra.mxu1 %v4904_v18  ;;  %v5907_v17 = vld [vmem:[%s7267_s0 + $0x20] sm:$0xff] }
  0x4d   :  { %1972 = vmatprep.subr.bf16.mxu1 %v4912_v19  ;;  %v4995_v18 = vld [vmem:[%s7266_s1 + $0x460] ss:$8 sps:$4 sm:$0xff]   ;;  %v5000_v19 = vld [vmem:[%s7266_s1 + $0x564] ss:$8 sps:$4 sm:$0xff]  }
  0x4f   :  { %1932 = vmatpush1.bf16.msra.mxu0 %v4907_v20  ;;  %v4226_v20 = vcombine.high %v5907_v17, %v5907_v17 }
  0x50   :  { %1933 = vmatprep.subr.bf16.mxu0 %v4915_v21  ;;  %1973 = vmatpush1.bf16.msra.mxu1 %v4910_v22  ;;  %v5920_v21 = vld [vmem:[%s7267_s0 + $0x28] sm:$0xff]  ;;  %v5003_v22 = vld [vmem:[%s7266_s1 + $0x454] ss:$8 sps:$4 sm:$0xff]  }
  0x51   :  { %1974 = vmatprep.subr.bf16.mxu1 %v4918_v23  ;;  %v4228_v23 = vcombine.high %v5920_v21, %v5920_v21 }
  0x53   :  { %1934 = vmatpush1.bf16.msra.mxu0 %v4913_v24  ;;  %v4998_v24 = vld [vmem:[%s7266_s1 + $0x560] ss:$8 sps:$4 sm:$0xff]  }
  0x54   :  { %1935 = vmatprep.subr.bf16.mxu0 %v4921_v25  ;;  %1975 = vmatpush1.bf16.msra.mxu1 %v4916_v26  ;;  %v5006_v25 = vld [vmem:[%s7266_s1 + $0x554] ss:$8 sps:$4 sm:$0xff]   ;;  %v5001_v26 = vld [vmem:[%s7266_s1 + $0x450] ss:$8 sps:$4 sm:$0xff]  }
  0x55   :  { %1976 = vmatprep.subr.bf16.mxu1 %v4924_v27  ;;  %v5009_v27 = vld [vmem:[%s7266_s1 + $0x444] ss:$8 sps:$4 sm:$0xff]  }
  0x57   :  { %1936 = vmatpush1.bf16.msra.mxu0 %v4919_v28  ;;  %v5004_v28 = vld [vmem:[%s7266_s1 + $0x550] ss:$8 sps:$4 sm:$0xff]  }
  0x58   :  { %1937 = vmatprep.subr.bf16.mxu0 %v4927_v29  ;;  %1977 = vmatpush1.bf16.msra.mxu1 %v4922_v30  ;;  %v5012_v29 = vld [vmem:[%s7266_s1 + $0x544] ss:$8 sps:$4 sm:$0xff]   ;;  %v5007_v30 = vld [vmem:[%s7266_s1 + $0x440] ss:$8 sps:$4 sm:$0xff]  }
  0x59   :  { %1978 = vmatprep.subr.bf16.mxu1 %v4930_v31  ;;  %v5015_v31 = vld [vmem:[%s7266_s1 + $0x434] ss:$8 sps:$4 sm:$0xff]  }
  0x5b   :  { %1938 = vmatpush1.bf16.msra.mxu0 %v4925_v33  ;;  %v5018_v33 = vld [vmem:[%s7266_s1 + $0x534] ss:$8 sps:$4 sm:$0xff]  }
  0x5c   :  { %1939 = vmatprep.subr.bf16.mxu0 %v4933_v36  ;;  %1979 = vmatpush1.bf16.msra.mxu1 %v4928_v38  ;;  %v5016_v36 = vld [vmem:[%s7266_s1 + $0x530] ss:$8 sps:$4 sm:$0xff]   ;;  %v5019_v38 = vld [vmem:[%s7266_s1 + $0x420] ss:$8 sps:$4 sm:$0xff]  }
  0x5d   :  { %1980 = vmatprep.subr.bf16.mxu1 %v4936_v39  ;;  %v5027_v39 = vld [vmem:[%s7266_s1 + $0x414] ss:$8 sps:$4 sm:$0xff]  }
  0x5f   :  { %1940 = vmatpush1.bf16.msra.mxu0 %v4931_v40  ;;  %v5022_v40 = vld [vmem:[%s7266_s1 + $0x520] ss:$8 sps:$4 sm:$0xff]  }
  0x60   :  { %1941 = vmatprep.subr.bf16.mxu0 %v4939_v41  ;;  %1981 = vmatpush1.bf16.msra.mxu1 %v4934_v42  ;;  %v5030_v41 = vld [vmem:[%s7266_s1 + $0x514] ss:$8 sps:$4 sm:$0xff]   ;;  %v5025_v42 = vld [vmem:[%s7266_s1 + $0x410] ss:$8 sps:$4 sm:$0xff]  }
  0x61   :  { %1982 = vmatprep.subr.bf16.mxu1 %v4942_v43  ;;  %v5033_v43 = vld [vmem:[%s7266_s1 + $0x404] ss:$8 sps:$4 sm:$0xff]  }
  0x63   :  { %1942 = vmatpush2.bf16.msra.mxu0 %v4937_v44  ;;  %v5028_v44 = vld [vmem:[%s7266_s1 + $0x510] ss:$8 sps:$4 sm:$0xff]  }
  0x64   :  { %1943 = vmatprep.subr.bf16.mxu0 %v4945_v45  ;;  %1983 = vmatpush2.bf16.msra.mxu1 %v4940_v46  ;;  %v5036_v45 = vld [vmem:[%s7266_s1 + $0x504] ss:$8 sps:$4 sm:$0xff]   ;;  %v5031_v46 = vld [vmem:[%s7266_s1 + $0x400] ss:$8 sps:$4 sm:$0xff]  }
  0x65   :  { %1984 = vmatprep.subr.bf16.mxu1 %v4948_v47  ;;  %v5039_v47 = vld [vmem:[%s7266_s1 + $0x4f4] ss:$8 sps:$4 sm:$0xff]  }
  0x67   :  { %1944 = vmatpush2.bf16.msra.mxu0 %v4943_v48  ;;  %v5034_v48 = vld [vmem:[%s7266_s1 + $0x500] ss:$8 sps:$4 sm:$0xff]  }
  0x68   :  { %1945 = vmatprep.subr.bf16.mxu0 %v4951_v49  ;;  %1985 = vmatpush2.bf16.msra.mxu1 %v4946_v50  ;;  %v5042_v49 = vld [vmem:[%s7266_s1 + $0x5f4] ss:$8 sps:$4 sm:$0xff]   ;;  %v5037_v50 = vld [vmem:[%s7266_s1 + $0x4f0] ss:$8 sps:$4 sm:$0xff]  }
  0x69   :  { %1986 = vmatprep.subr.bf16.mxu1 %v4954_v51  ;;  %v5045_v51 = vld [vmem:[%s7266_s1 + $0x4e4] ss:$8 sps:$4 sm:$0xff]  }
  0x6b   :  { %1946 = vmatpush2.bf16.msra.mxu0 %v4949_v52  ;;  %v5040_v52 = vld [vmem:[%s7266_s1 + $0x5f0] ss:$8 sps:$4 sm:$0xff]  }
  0x6c   :  { %1947 = vmatprep.subr.bf16.mxu0 %v4957_v53  ;;  %1987 = vmatpush2.bf16.msra.mxu1 %v4952_v54  ;;  %v5048_v53 = vld [vmem:[%s7266_s1 + $0x5e4] ss:$8 sps:$4 sm:$0xff]   ;;  %v5043_v54 = vld [vmem:[%s7266_s1 + $0x4e0] ss:$8 sps:$4 sm:$0xff]  }
  0x6d   :  { %1988 = vmatprep.subr.bf16.mxu1 %v4960_v55  ;;  %v5051_v55 = vld [vmem:[%s7266_s1 + $0x4d4] ss:$8 sps:$4 sm:$0xff]  }
  0x6f   :  { %1948 = vmatpush2.bf16.msra.mxu0 %v4955_v56  ;;  %v5046_v56 = vld [vmem:[%s7266_s1 + $0x5e0] ss:$8 sps:$4 sm:$0xff]  }
  0x70   :  { %1949 = vmatprep.subr.bf16.mxu0 %v4963_v57  ;;  %1989 = vmatpush2.bf16.msra.mxu1 %v4958_v58  ;;  %v5054_v57 = vld [vmem:[%s7266_s1 + $0x5d4] ss:$8 sps:$4 sm:$0xff]   ;;  %v5049_v58 = vld [vmem:[%s7266_s1 + $0x4d0] ss:$8 sps:$4 sm:$0xff]  }
  0x71   :  { %1990 = vmatprep.subr.bf16.mxu1 %v4966_v59  ;;  %v5057_v59 = vld [vmem:[%s7266_s1 + $0x4c4] ss:$8 sps:$4 sm:$0xff]  }
  0x73   :  { %1950 = vmatpush2.bf16.msra.mxu0 %v4961_v60  ;;  %v5052_v60 = vld [vmem:[%s7266_s1 + $0x5d0] ss:$8 sps:$4 sm:$0xff]  }
  0x74   :  { %1951 = vmatprep.subr.bf16.mxu0 %v4969_v61  ;;  %1991 = vmatpush2.bf16.msra.mxu1 %v4964_v62  ;;  %v5060_v61 = vld [vmem:[%s7266_s1 + $0x5c4] ss:$8 sps:$4 sm:$0xff]   ;;  %v5055_v62 = vld [vmem:[%s7266_s1 + $0x4c0] ss:$8 sps:$4 sm:$0xff]  }
  0x75   :  { %1992 = vmatprep.subr.bf16.mxu1 %v4972_v63  ;;  %v5063_v63 = vld [vmem:[%s7266_s1 + $0x4b4] ss:$8 sps:$4 sm:$0xff]  }
  0x77   :  { %1952 = vmatpush2.bf16.msra.mxu0 %v4967_v0  ;;  %v5058_v0 = vld [vmem:[%s7266_s1 + $0x5c0] ss:$8 sps:$4 sm:$0xff]  }
  0x78   :  { %1953 = vmatprep.subr.bf16.mxu0 %v4975_v1  ;;  %1993 = vmatpush2.bf16.msra.mxu1 %v4970_v2  ;;  %v5066_v1 = vld [vmem:[%s7266_s1 + $0x5b4] ss:$8 sps:$4 sm:$0xff]   ;;  %v5061_v2 = vld [vmem:[%s7266_s1 + $0x4b0] ss:$8 sps:$4 sm:$0xff]  }
  0x79   :  { %1994 = vmatprep.subr.bf16.mxu1 %v4978_v3  ;;  %v5069_v3 = vld [vmem:[%s7266_s1 + $0x4a4] ss:$8 sps:$4 sm:$0xff]  }
  0x7b   :  { %1954 = vmatpush2.bf16.msra.mxu0 %v4973_v4  ;;  %v5064_v4 = vld [vmem:[%s7266_s1 + $0x5b0] ss:$8 sps:$4 sm:$0xff]  }
  0x7c   :  { %1955 = vmatprep.subr.bf16.mxu0 %v4981_v5  ;;  %1995 = vmatpush2.bf16.msra.mxu1 %v4976_v6  ;;  %v5072_v5 = vld [vmem:[%s7266_s1 + $0x5a4] ss:$8 sps:$4 sm:$0xff]   ;;  %v5067_v6 = vld [vmem:[%s7266_s1 + $0x4a0] ss:$8 sps:$4 sm:$0xff]  }
  0x7d   :  { %1996 = vmatprep.subr.bf16.mxu1 %v4984_v7  ;;  %v5075_v7 = vld [vmem:[%s7266_s1 + $0x494] ss:$8 sps:$4 sm:$0xff]  }
  0x7f   :  { %1956 = vmatpush2.bf16.msra.mxu0 %v4979_v8  ;;  %v5070_v8 = vld [vmem:[%s7266_s1 + $0x5a0] ss:$8 sps:$4 sm:$0xff]  }
  0x80   :  { %2007 = vmatprep.subr.bf16.mxu0 %v4989_v9  ;;  %1997 = vmatpush2.bf16.msra.mxu1 %v4982_v10  ;;  %v5078_v9 = vld [vmem:[%s7266_s1 + $0x594] ss:$8 sps:$4 sm:$0xff]   ;;  %v5073_v10 = vld [vmem:[%s7266_s1 + $0x490] ss:$8 sps:$4 sm:$0xff]  }
  0x81   :  { %2048 = vmatprep.subr.bf16.mxu1 %v4994_v12  ;;  %v5076_v12 = vld [vmem:[%s7266_s1 + $0x590] ss:$8 sps:$4 sm:$0xff]  }
  0x82   :  { %1958 = vmatmul.mubr.bf16.vlgmr.msra.gmra.mxu0 %v4221_v11  ;;  %v5081_v11 = vld [vmem:[%s7266_s1 + $0x484] ss:$8 sps:$4 sm:$0xff]  }
  0x83   :  { %2008 = vmatpush1.bf16.msra.mxu0 %v4987_v13  ;;  %1999 = vmatmul.mubr.bf16.vlgmr.msra.gmra.mxu1 %v4223_v14  ;;  %v5079_v13 = vld [vmem:[%s7266_s1 + $0x480] ss:$8 sps:$4 sm:$0xff]   ;;  %v5084_v14 = vld [vmem:[%s7266_s1 + $0x584] ss:$8 sps:$4 sm:$0xff]  }
  0x84   :  { %2009 = vmatprep.subr.bf16.mxu0 %v4997_v15  ;;  %2049 = vmatpush1.bf16.msra.mxu1 %v4992_v16  ;;  %v5089_v15 = vld [vmem:[%s7266_s1 + $0x674] ss:$8 sps:$4 sm:$0xff]  }
  0x85   :  { %2039 = vmatprep.mubr.bf16.mxu0 %v4226_v20  ;;  %2050 = vmatprep.subr.bf16.mxu1 %v5000_v19  ;;  %v6098_v16 = vld [vmem:[%s7267_s0 + $0x30] sm:$0xff]  ;;  %v4225_v19 = vcombine.low %v5907_v17, %v5907_v17  ;;  %v4227_v17 = vcombine.low %v5920_v21, %v5920_v21  ;;  %v5095_v21 = vld [vmem:[%s7266_s1 + $0x660] ss:$8 sps:$4 sm:$0xff]  }
  0x86   :  { %2080 = vmatprep.mubr.bf16.mxu1 %v4228_v23  ;;  %v5094_v20 = vld [vmem:[%s7266_s1 + $0x774] ss:$8 sps:$4 sm:$0xff]   ;;  %v5087_v23 = vld [vmem:[%s7266_s1 + $0x670] ss:$8 sps:$4 sm:$0xff]  }
  0x87   :  { %2010 = vmatpush1.bf16.msra.mxu0 %v4995_v18  ;;  %v5082_v18 = vld [vmem:[%s7266_s1 + $0x580] ss:$8 sps:$4 sm:$0xff]  }
  0x88   :  { %2011 = vmatprep.subr.bf16.mxu0 %v5003_v22  ;;  %2051 = vmatpush1.bf16.msra.mxu1 %v4998_v24  ;;  %v6111_v22 = vld [vmem:[%s7267_s0 + $0x38] sm:$0xff]  ;;  %v4230_v24 = vcombine.high %v6098_v16, %v6098_v16 }
  0x89   :  { %2052 = vmatprep.subr.bf16.mxu1 %v5006_v25  ;;  %v5097_v25 = vld [vmem:[%s7266_s1 + $0x664] ss:$8 sps:$4 sm:$0xff]  }
  0x8b   :  { %2012 = vmatpush1.bf16.msra.mxu0 %v5001_v26  ;;  %v5092_v26 = vld [vmem:[%s7266_s1 + $0x770] ss:$8 sps:$4 sm:$0xff]  }
  0x8c   :  { %2013 = vmatprep.subr.bf16.mxu0 %v5009_v27  ;;  %2053 = vmatpush1.bf16.msra.mxu1 %v5004_v28  ;;  %v4232_v27 = vcombine.high %v6111_v22, %v6111_v22  ;;  %v5100_v28 = vld [vmem:[%s7266_s1 + $0x764] ss:$8 sps:$4 sm:$0xff]  }
  0x8d   :  { %2054 = vmatprep.subr.bf16.mxu1 %v5012_v29  ;;  %v5103_v29 = vld [vmem:[%s7266_s1 + $0x654] ss:$8 sps:$4 sm:$0xff]  }
  0x8f   :  { %2014 = vmatpush1.bf16.msra.mxu0 %v5007_v30  ;;  %v5098_v30 = vld [vmem:[%s7266_s1 + $0x760] ss:$8 sps:$4 sm:$0xff]  }
  0x90   :  { %2015 = vmatprep.subr.bf16.mxu0 %v5015_v31  ;;  %2055 = vmatpush1.bf16.msra.mxu1 %v5010_v32  ;;  %v5106_v31 = vld [vmem:[%s7266_s1 + $0x754] ss:$8 sps:$4 sm:$0xff]   ;;  %v5101_v32 = vld [vmem:[%s7266_s1 + $0x650] ss:$8 sps:$4 sm:$0xff]  }
  0x91   :  { %2056 = vmatprep.subr.bf16.mxu1 %v5018_v33  ;;  %v5109_v33 = vld [vmem:[%s7266_s1 + $0x644] ss:$8 sps:$4 sm:$0xff]  }
  0x93   :  { %2016 = vmatpush1.bf16.msra.mxu0 %v5013_v34  ;;  %v5104_v34 = vld [vmem:[%s7266_s1 + $0x750] ss:$8 sps:$4 sm:$0xff]  }
  0x94   :  { %2017 = vmatprep.subr.bf16.mxu0 %v5021_v35  ;;  %2057 = vmatpush1.bf16.msra.mxu1 %v5016_v36  ;;  %v5112_v35 = vld [vmem:[%s7266_s1 + $0x744] ss:$8 sps:$4 sm:$0xff]   ;;  %v5107_v36 = vld [vmem:[%s7266_s1 + $0x640] ss:$8 sps:$4 sm:$0xff]  }
  0x95   :  { %2058 = vmatprep.subr.bf16.mxu1 %v5024_v37  ;;  %v5115_v37 = vld [vmem:[%s7266_s1 + $0x634] ss:$8 sps:$4 sm:$0xff]  }
  0x97   :  { %2018 = vmatpush1.bf16.msra.mxu0 %v5019_v38  ;;  %v5110_v38 = vld [vmem:[%s7266_s1 + $0x740] ss:$8 sps:$4 sm:$0xff]  }
  0x98   :  { %2019 = vmatprep.subr.bf16.mxu0 %v5027_v39  ;;  %2059 = vmatpush1.bf16.msra.mxu1 %v5022_v40  ;;  %v5118_v39 = vld [vmem:[%s7266_s1 + $0x734] ss:$8 sps:$4 sm:$0xff]   ;;  %v5113_v40 = vld [vmem:[%s7266_s1 + $0x630] ss:$8 sps:$4 sm:$0xff]  }
  0x99   :  { %2060 = vmatprep.subr.bf16.mxu1 %v5030_v41  ;;  %v5121_v41 = vld [vmem:[%s7266_s1 + $0x624] ss:$8 sps:$4 sm:$0xff]  }
  0x9b   :  { %2020 = vmatpush1.bf16.msra.mxu0 %v5025_v42  ;;  %v5116_v42 = vld [vmem:[%s7266_s1 + $0x730] ss:$8 sps:$4 sm:$0xff]  }
  0x9c   :  { %2021 = vmatprep.subr.bf16.mxu0 %v5033_v43  ;;  %2061 = vmatpush1.bf16.msra.mxu1 %v5028_v44  ;;  %v5124_v43 = vld [vmem:[%s7266_s1 + $0x724] ss:$8 sps:$4 sm:$0xff]   ;;  %v5119_v44 = vld [vmem:[%s7266_s1 + $0x620] ss:$8 sps:$4 sm:$0xff]  }
  0x9d   :  { %2062 = vmatprep.subr.bf16.mxu1 %v5036_v45  ;;  %v5127_v45 = vld [vmem:[%s7266_s1 + $0x614] ss:$8 sps:$4 sm:$0xff]  }
  0x9f   :  { %2022 = vmatpush1.bf16.msra.mxu0 %v5031_v46  ;;  %v5122_v46 = vld [vmem:[%s7266_s1 + $0x720] ss:$8 sps:$4 sm:$0xff]  }
  0xa0   :  { %2023 = vmatprep.subr.bf16.mxu0 %v5039_v47  ;;  %2063 = vmatpush1.bf16.msra.mxu1 %v5034_v48  ;;  %v5130_v47 = vld [vmem:[%s7266_s1 + $0x714] ss:$8 sps:$4 sm:$0xff]   ;;  %v5125_v48 = vld [vmem:[%s7266_s1 + $0x610] ss:$8 sps:$4 sm:$0xff]  }
  0xa1   :  { %2064 = vmatprep.subr.bf16.mxu1 %v5042_v49  ;;  %v5133_v49 = vld [vmem:[%s7266_s1 + $0x604] ss:$8 sps:$4 sm:$0xff]  }
  0xa3   :  { %2024 = vmatpush2.bf16.msra.mxu0 %v5037_v50  ;;  %v5128_v50 = vld [vmem:[%s7266_s1 + $0x710] ss:$8 sps:$4 sm:$0xff]  }
  0xa4   :  { %2025 = vmatprep.subr.bf16.mxu0 %v5045_v51  ;;  %2065 = vmatpush2.bf16.msra.mxu1 %v5040_v52  ;;  %v5136_v51 = vld [vmem:[%s7266_s1 + $0x704] ss:$8 sps:$4 sm:$0xff]   ;;  %v5131_v52 = vld [vmem:[%s7266_s1 + $0x600] ss:$8 sps:$4 sm:$0xff]  }
  0xa5   :  { %2066 = vmatprep.subr.bf16.mxu1 %v5048_v53  ;;  %v5139_v53 = vld [vmem:[%s7266_s1 + $0x6f4] ss:$8 sps:$4 sm:$0xff]  }
  0xa7   :  { %2026 = vmatpush2.bf16.msra.mxu0 %v5043_v54  ;;  %v5134_v54 = vld [vmem:[%s7266_s1 + $0x700] ss:$8 sps:$4 sm:$0xff]  }
  0xa8   :  { %2027 = vmatprep.subr.bf16.mxu0 %v5051_v55  ;;  %2067 = vmatpush2.bf16.msra.mxu1 %v5046_v56  ;;  %v5142_v55 = vld [vmem:[%s7266_s1 + $0x7f4] ss:$8 sps:$4 sm:$0xff]   ;;  %v5137_v56 = vld [vmem:[%s7266_s1 + $0x6f0] ss:$8 sps:$4 sm:$0xff]  }
  0xa9   :  { %2068 = vmatprep.subr.bf16.mxu1 %v5054_v57  ;;  %v5145_v57 = vld [vmem:[%s7266_s1 + $0x6e4] ss:$8 sps:$4 sm:$0xff]  }
  0xab   :  { %2028 = vmatpush2.bf16.msra.mxu0 %v5049_v58  ;;  %v5140_v58 = vld [vmem:[%s7266_s1 + $0x7f0] ss:$8 sps:$4 sm:$0xff]  }
  0xac   :  { %2029 = vmatprep.subr.bf16.mxu0 %v5057_v59  ;;  %2069 = vmatpush2.bf16.msra.mxu1 %v5052_v60  ;;  %v5148_v59 = vld [vmem:[%s7266_s1 + $0x7e4] ss:$8 sps:$4 sm:$0xff]   ;;  %v5143_v60 = vld [vmem:[%s7266_s1 + $0x6e0] ss:$8 sps:$4 sm:$0xff]  }
  0xad   :  { %2070 = vmatprep.subr.bf16.mxu1 %v5060_v61  ;;  %v5151_v61 = vld [vmem:[%s7266_s1 + $0x6d4] ss:$8 sps:$4 sm:$0xff]  }
  0xaf   :  { %2030 = vmatpush2.bf16.msra.mxu0 %v5055_v62  ;;  %v5146_v62 = vld [vmem:[%s7266_s1 + $0x7e0] ss:$8 sps:$4 sm:$0xff]  }
  0xb0   :  { %2031 = vmatprep.subr.bf16.mxu0 %v5063_v63  ;;  %2071 = vmatpush2.bf16.msra.mxu1 %v5058_v0  ;;  %v5154_v63 = vld [vmem:[%s7266_s1 + $0x7d4] ss:$8 sps:$4 sm:$0xff]   ;;  %v5149_v0 = vld [vmem:[%s7266_s1 + $0x6d0] ss:$8 sps:$4 sm:$0xff]  }
  0xb1   :  { %2072 = vmatprep.subr.bf16.mxu1 %v5066_v1  ;;  %v5157_v1 = vld [vmem:[%s7266_s1 + $0x6c4] ss:$8 sps:$4 sm:$0xff]  }
  0xb3   :  { %2032 = vmatpush2.bf16.msra.mxu0 %v5061_v2  ;;  %v5152_v2 = vld [vmem:[%s7266_s1 + $0x7d0] ss:$8 sps:$4 sm:$0xff]  }
  0xb4   :  { %2033 = vmatprep.subr.bf16.mxu0 %v5069_v3  ;;  %2073 = vmatpush2.bf16.msra.mxu1 %v5064_v4  ;;  %v5160_v3 = vld [vmem:[%s7266_s1 + $0x7c4] ss:$8 sps:$4 sm:$0xff]   ;;  %v5155_v4 = vld [vmem:[%s7266_s1 + $0x6c0] ss:$8 sps:$4 sm:$0xff]  }
  0xb5   :  { %2074 = vmatprep.subr.bf16.mxu1 %v5072_v5  ;;  %v5163_v5 = vld [vmem:[%s7266_s1 + $0x6b4] ss:$8 sps:$4 sm:$0xff]  }
  0xb7   :  { %2034 = vmatpush2.bf16.msra.mxu0 %v5067_v6  ;;  %v5158_v6 = vld [vmem:[%s7266_s1 + $0x7c0] ss:$8 sps:$4 sm:$0xff]  }
  0xb8   :  { %2035 = vmatprep.subr.bf16.mxu0 %v5075_v7  ;;  %2075 = vmatpush2.bf16.msra.mxu1 %v5070_v8  ;;  %v5166_v7 = vld [vmem:[%s7266_s1 + $0x7b4] ss:$8 sps:$4 sm:$0xff]   ;;  %v5161_v8 = vld [vmem:[%s7266_s1 + $0x6b0] ss:$8 sps:$4 sm:$0xff]  }
  0xb9   :  { %2076 = vmatprep.subr.bf16.mxu1 %v5078_v9  ;;  %v5169_v9 = vld [vmem:[%s7266_s1 + $0x6a4] ss:$8 sps:$4 sm:$0xff]  }
  0xbb   :  { %2036 = vmatpush2.bf16.msra.mxu0 %v5073_v10  ;;  %v5164_v10 = vld [vmem:[%s7266_s1 + $0x7b0] ss:$8 sps:$4 sm:$0xff]  }
  0xbc   :  { %2037 = vmatprep.subr.bf16.mxu0 %v5081_v11  ;;  %2077 = vmatpush2.bf16.msra.mxu1 %v5076_v12  ;;  %v5172_v11 = vld [vmem:[%s7266_s1 + $0x7a4] ss:$8 sps:$4 sm:$0xff]   ;;  %v5167_v12 = vld [vmem:[%s7266_s1 + $0x6a0] ss:$8 sps:$4 sm:$0xff]  }
  0xbd   :  { %2078 = vmatprep.subr.bf16.mxu1 %v5084_v14  ;;  %v5175_v14 = vld [vmem:[%s7266_s1 + $0x694] ss:$8 sps:$4 sm:$0xff]  }
  0xbf   :  { %2038 = vmatpush2.bf16.msra.mxu0 %v5079_v13  ;;  %v330_v13 = vlaneseq }
  0xc0   :  { %2089 = vmatprep.subr.bf16.mxu0 %v5089_v15  ;;  %2079 = vmatpush2.bf16.msra.mxu1 %v5082_v18  ;;  %v5170_v15 = vld [vmem:[%s7266_s1 + $0x7a0] ss:$8 sps:$4 sm:$0xff]   ;;  %v5178_v18 = vld [vmem:[%s7266_s1 + $0x794] ss:$8 sps:$4 sm:$0xff]  }
  0xc1   :  { %2130 = vmatprep.subr.bf16.mxu1 %v5094_v20  ;;  %v6290_v20 = vshrl.u32 %v330_v13, 7 }
  0xc2   :  { %2040 = vmatmul.mubr.bf16.vlgmr.msra.gmra.mxu0 %v4225_v19  ;;  %v5173_v19 = vld [vmem:[%s7266_s1 + $0x690] ss:$8 sps:$4 sm:$0xff]  }
  0xc3   :  { %2090 = vmatpush1.bf16.msra.mxu0 %v5087_v23  ;;  %2121 = vmatprep.mubr.bf16.mxu0 %v4230_v24  ;;  %v5181_v23 = vld [vmem:[%s7266_s1 + $0x684] ss:$8 sps:$4 sm:$0xff]   ;;  %v5176_v24 = vld [vmem:[%s7266_s1 + $0x790] ss:$8 sps:$4 sm:$0xff]  }
  0xc4   :  { %2081 = vmatmul.mubr.bf16.vlgmr.msra.gmra.mxu1 %v4227_v17  ;;  %2091 = vmatprep.subr.bf16.mxu0 %v5097_v25  ;;  %v5184_v17 = vld [vmem:[%s7266_s1 + $0x784] ss:$8 sps:$4 sm:$0xff]   ;;  %v5179_v25 = vld [vmem:[%s7266_s1 + $0x680] ss:$8 sps:$4 sm:$0xff]  }
  0xc5   :  { %2131 = vmatpush1.bf16.msra.mxu1 %v5092_v26  ;;  %2162 = vmatprep.mubr.bf16.mxu1 %v4232_v27  ;;  %v6305_v26 = vsub.s32 0, %v6290_v20  ;;  %v328_v27 = vld [vmem:[%s7268_s2] sm:$0x3] }
  0xc6   :  { %2132 = vmatprep.subr.bf16.mxu1 %v5100_v28  ;;  %v5189_v28 = vld [vmem:[%s7266_s1 + $0x874] ss:$8 sps:$4 sm:$0xff]  }
  0xc7   :  { %2092 = vmatpush1.bf16.msra.mxu0 %v5095_v21  ;;  %v6316_v21 = vld [vmem:[%s7267_s0 + $0x40] sm:$0xff] }
  0xc8   :  { %2093 = vmatprep.subr.bf16.mxu0 %v5103_v29  ;;  %v5182_v29 = vld [vmem:[%s7266_s1 + $0x780] ss:$8 sps:$4 sm:$0xff]   ;;  %v4233_v13 = vcombine.low %v6316_v21, %v6316_v21 }
  0xc9   :  { %2133 = vmatpush1.bf16.msra.mxu1 %v5098_v30  ;;  %v6322_v30 = vsub.s32 1, %v6290_v20 }
  0xca   :  { %2134 = vmatprep.subr.bf16.mxu1 %v5106_v31  ;;  %v4229_v31 = vcombine.low %v6098_v16, %v6098_v16 }
  0xcb   :  { %2094 = vmatpush1.bf16.msra.mxu0 %v5101_v32  ;;  %v333_v32 = vrot.slane %v328_v27, %v6305_v26  ;;  %v337_v16 = vrot.slane %v328_v27, %v6322_v30 }
  0xcc   :  { %2095 = vmatprep.subr.bf16.mxu0 %v5109_v33  ;;  %v5187_v33 = vld [vmem:[%s7266_s1 + $0x870] ss:$8 sps:$4 sm:$0xff]  }
  0xcd   :  { %2135 = vmatpush1.bf16.msra.mxu1 %v5104_v34  ;;  %v4234_v34 = vcombine.high %v6316_v21, %v6316_v21  ;;  %v2272_v21 = vld [vmem:[%s7269_s3 + $0x1c0] sm:$0xff] }
  0xce   :  { %2136 = vmatprep.subr.bf16.mxu1 %v5112_v35  ;;  %v4231_v35 = vcombine.low %v6111_v22, %v6111_v22  ;;  %v5197_v22 = vld [vmem:[%s7266_s1 + $0x854] ss:$8 sps:$4 sm:$0xff]  }
  0xcf   :  { %2096 = vmatpush1.bf16.msra.mxu0 %v5107_v36  ;;  %v5194_v36 = vld [vmem:[%s7266_s1 + $0x864] ss:$8 sps:$4 sm:$0xff]  }
  0xd0   :  { %2097 = vmatprep.subr.bf16.mxu0 %v5115_v37 }
  0xd1   :  { %2137 = vmatpush1.bf16.msra.mxu1 %v5110_v38 }
  0xd2   :  { %2138 = vmatprep.subr.bf16.mxu1 %v5118_v39  ;;  %v5192_v39 = vld [vmem:[%s7266_s1 + $0x860] ss:$8 sps:$4 sm:$0xff]  }
  0xd3   :  { %2098 = vmatpush1.bf16.msra.mxu0 %v5113_v40 }
  0xd4   :  { %2099 = vmatprep.subr.bf16.mxu0 %v5121_v41 }
  0xd5   :  { %2139 = vmatpush1.bf16.msra.mxu1 %v5116_v42 }
  0xd6   :  { %2140 = vmatprep.subr.bf16.mxu1 %v5124_v43 }
  0xd7   :  { %2100 = vmatpush1.bf16.msra.mxu0 %v5119_v44 }
  0xd8   :  { %2101 = vmatprep.subr.bf16.mxu0 %v5127_v45 }
  0xd9   :  { %2141 = vmatpush1.bf16.msra.mxu1 %v5122_v46 }
  0xda   :  { %2142 = vmatprep.subr.bf16.mxu1 %v5130_v47  ;;  %v5195_v47 = vld [vmem:[%s7266_s1 + $0x850] ss:$8 sps:$4 sm:$0xff]  }
  0xdb   :  { %2102 = vmatpush1.bf16.msra.mxu0 %v5125_v48 }
  0xdc   :  { %2103 = vmatprep.subr.bf16.mxu0 %v5133_v49  ;;  %v5200_v49 = vld [vmem:[%s7266_s1 + $0x844] ss:$8 sps:$4 sm:$0xff]  }
  0xdd   :  { %2143 = vmatpush1.bf16.msra.mxu1 %v5128_v50 }
  0xde   :  { %2144 = vmatprep.subr.bf16.mxu1 %v5136_v51 }
  0xdf   :  { %2104 = vmatpush1.bf16.msra.mxu0 %v5131_v52  ;;  %v5198_v52 = vld [vmem:[%s7266_s1 + $0x840] ss:$8 sps:$4 sm:$0xff]  }
  0xe0   :  { %2105 = vmatprep.subr.bf16.mxu0 %v5139_v53  ;;  %v5203_v53 = vld [vmem:[%s7266_s1 + $0x834] ss:$8 sps:$4 sm:$0xff]  }
  0xe1   :  { %2145 = vmatpush1.bf16.msra.mxu1 %v5134_v54  ;;  %v5201_v54 = vld [vmem:[%s7266_s1 + $0x830] ss:$8 sps:$4 sm:$0xff]  }
  0xe2   :  { %2146 = vmatprep.subr.bf16.mxu1 %v5142_v55  ;;  %v5206_v55 = vld [vmem:[%s7266_s1 + $0x824] ss:$8 sps:$4 sm:$0xff]  }
  0xe3   :  { %2106 = vmatpush2.bf16.msra.mxu0 %v5137_v56  ;;  %v5204_v56 = vld [vmem:[%s7266_s1 + $0x820] ss:$8 sps:$4 sm:$0xff]  }
  0xe4   :  { %2107 = vmatprep.subr.bf16.mxu0 %v5145_v57  ;;  %v5209_v57 = vld [vmem:[%s7266_s1 + $0x814] ss:$8 sps:$4 sm:$0xff]  }
  0xe5   :  { %2147 = vmatpush2.bf16.msra.mxu1 %v5140_v58  ;;  %v5207_v58 = vld [vmem:[%s7266_s1 + $0x810] ss:$8 sps:$4 sm:$0xff]  }
  0xe6   :  { %2148 = vmatprep.subr.bf16.mxu1 %v5148_v59  ;;  %v5212_v59 = vld [vmem:[%s7266_s1 + $0x804] ss:$8 sps:$4 sm:$0xff]  }
  0xe7   :  { %2108 = vmatpush2.bf16.msra.mxu0 %v5143_v60  ;;  %v5210_v60 = vld [vmem:[%s7266_s1 + $0x800] ss:$8 sps:$4 sm:$0xff]  }
  0xe8   :  { %2109 = vmatprep.subr.bf16.mxu0 %v5151_v61  ;;  %v5215_v61 = vld [vmem:[%s7266_s1 + $0x8f4] ss:$8 sps:$4 sm:$0xff]  }
  0xe9   :  { %2149 = vmatpush2.bf16.msra.mxu1 %v5146_v62  ;;  %v5213_v62 = vld [vmem:[%s7266_s1 + $0x8f0] ss:$8 sps:$4 sm:$0xff]  }
  0xea   :  { %2150 = vmatprep.subr.bf16.mxu1 %v5154_v63  ;;  %v5218_v63 = vld [vmem:[%s7266_s1 + $0x8e4] ss:$8 sps:$4 sm:$0xff]  }
  0xeb   :  { %2110 = vmatpush2.bf16.msra.mxu0 %v5149_v0  ;;  %v5216_v0 = vld [vmem:[%s7266_s1 + $0x8e0] ss:$8 sps:$4 sm:$0xff]  }
  0xec   :  { %2111 = vmatprep.subr.bf16.mxu0 %v5157_v1  ;;  %v5221_v1 = vld [vmem:[%s7266_s1 + $0x8d4] ss:$8 sps:$4 sm:$0xff]  }
  0xed   :  { %2151 = vmatpush2.bf16.msra.mxu1 %v5152_v2  ;;  %v5219_v2 = vld [vmem:[%s7266_s1 + $0x8d0] ss:$8 sps:$4 sm:$0xff]  }
  0xee   :  { %2152 = vmatprep.subr.bf16.mxu1 %v5160_v3  ;;  %v5224_v3 = vld [vmem:[%s7266_s1 + $0x8c4] ss:$8 sps:$4 sm:$0xff]  }
  0xef   :  { %2112 = vmatpush2.bf16.msra.mxu0 %v5155_v4  ;;  %v5222_v4 = vld [vmem:[%s7266_s1 + $0x8c0] ss:$8 sps:$4 sm:$0xff]  }
  0xf0   :  { %2113 = vmatprep.subr.bf16.mxu0 %v5163_v5  ;;  %v5227_v5 = vld [vmem:[%s7266_s1 + $0x8b4] ss:$8 sps:$4 sm:$0xff]  }
  0xf1   :  { %2153 = vmatpush2.bf16.msra.mxu1 %v5158_v6  ;;  %v5225_v6 = vld [vmem:[%s7266_s1 + $0x8b0] ss:$8 sps:$4 sm:$0xff]  }
  0xf2   :  { %2154 = vmatprep.subr.bf16.mxu1 %v5166_v7  ;;  %v5230_v7 = vld [vmem:[%s7266_s1 + $0x8a4] ss:$8 sps:$4 sm:$0xff]  }
  0xf3   :  { %2114 = vmatpush2.bf16.msra.mxu0 %v5161_v8  ;;  %v5228_v8 = vld [vmem:[%s7266_s1 + $0x8a0] ss:$8 sps:$4 sm:$0xff]  }
  0xf4   :  { %2115 = vmatprep.subr.bf16.mxu0 %v5169_v9  ;;  %v5233_v9 = vld [vmem:[%s7266_s1 + $0x894] ss:$8 sps:$4 sm:$0xff]  }
  0xf5   :  { %2155 = vmatpush2.bf16.msra.mxu1 %v5164_v10  ;;  %v5231_v10 = vld [vmem:[%s7266_s1 + $0x890] ss:$8 sps:$4 sm:$0xff]  }
  0xf6   :  { %2156 = vmatprep.subr.bf16.mxu1 %v5172_v11  ;;  %v5236_v11 = vld [vmem:[%s7266_s1 + $0x884] ss:$8 sps:$4 sm:$0xff]  }
  0xf7   :  { %2116 = vmatpush2.bf16.msra.mxu0 %v5167_v12  ;;  %v5234_v12 = vld [vmem:[%s7266_s1 + $0x880] ss:$8 sps:$4 sm:$0xff]  }
  0xf8   :  { %2117 = vmatprep.subr.bf16.mxu0 %v5175_v14 }
  0xf9   :  { %2157 = vmatpush2.bf16.msra.mxu1 %v5170_v15 }
  0xfa   :  { %2158 = vmatprep.subr.bf16.mxu1 %v5178_v18 }
  0xfb   :  { %2118 = vmatpush2.bf16.msra.mxu0 %v5173_v19 }
  0xfc   :  { %2119 = vmatprep.subr.bf16.mxu0 %v5181_v23 }
  0xfd   :  { %2159 = vmatpush2.bf16.msra.mxu1 %v5176_v24 }
  0xfe   :  { %2160 = vmatprep.subr.bf16.mxu1 %v5184_v17 }
  0xff   :  { %2120 = vmatpush2.bf16.msra.mxu0 %v5179_v25 }
 0x100   :  { %2171 = vmatprep.subr.bf16.mxu0 %v5189_v28 }
 0x101   :  { %2161 = vmatpush2.bf16.msra.mxu1 %v5182_v29 }
 0x102   :  { %v1877_v37 = vpop.f32.mrf.mxu0  ;;  %2122 = vmatmul.mubr.bf16.vlgmr.msra.gmra.mxu0 %v4229_v31  ;;  %v2276_v31 = vld [vmem:[%s7269_s3 + $0x1e0] sm:$0xff] }
 0x103   :  { %v1878_v38 = vadd.f32 %v1877_v37, %v333_v32  ;;  %2172 = vmatpush1.bf16.msra.mxu0 %v5187_v33  ;;  %2203 = vmatprep.mubr.bf16.mxu0 %v4234_v34  ;;  %v1918_v41 = vpop.f32.mrf.mxu1  ;;  %v2273_v32 = vld [vmem:[%s7269_s3 + $0x1c8] sm:$0xff]  ;;  %v4579_v33 = vcombine.low %v2272_v21, %v2276_v31  ;;  %v4580_v34 = vcombine.high %v2272_v21, %v2276_v31 }
 0x104   :  { %v1879_v40 = vpop.f32.mrf.mxu0  ;;  %2163 = vmatmul.mubr.bf16.vlgmr.msra.gmra.mxu1 %v4231_v35  ;;  %2173 = vmatprep.subr.bf16.mxu0 %v5194_v36  ;;  %v2277_v35 = vld [vmem:[%s7269_s3 + $0x1e8] sm:$0xff]  ;;  %v2264_v36 = vld [vmem:[%s7269_s3 + $0x180] sm:$0xff] }
 0x105   :  { %v1880_v42 = vadd.f32 %v1879_v40, %v337_v16  ;;  %v6344_v43 = vadd.f32 %v1918_v41, %v1878_v38  ;;  %v1920_v45 = vpop.f32.mrf.mxu1  ;;  %v2268_v16 = vld [vmem:[%s7269_s3 + $0x1a0] sm:$0xff]  ;;  %v4581_v38 = vcombine.low %v2273_v32, %v2277_v35  ;;  %v2265_v41 = vld [vmem:[%s7269_s3 + $0x188] sm:$0xff]  ;;  %3026 = vmatprep.subr.bf16.mxu1 %v4580_v34 }
 0x106   :  { %v1881_v44 = vpop.f32.mrf.mxu0  ;;  %v4572_v40 = vcombine.high %v2264_v36, %v2268_v16  ;;  %3027 = vmatpush1.bf16.msra.mxu1 %v4579_v33  ;;  %v2336_v34 = vld [vmem:[%s7269_s3 + $0x3c0] sm:$0xff] }
 0x107   :  { %v6346_v46 = vadd.f32 %v1920_v45, %v1880_v42  ;;  %2174 = vmatpush1.bf16.msra.mxu0 %v5192_v39  ;;  %v1922_v50 = vpop.f32.mrf.mxu1  ;;  %v4582_v39 = vcombine.high %v2273_v32, %v2277_v35  ;;  %v2256_v42 = vld [vmem:[%s7269_s3 + $0x140] sm:$0xff]  ;;  %v2257_v45 = vld [vmem:[%s7269_s3 + $0x148] sm:$0xff] }
 0x108   :  { %v1882_v48 = vpop.f32.mrf.mxu0  ;;  %2175 = vmatprep.subr.bf16.mxu0 %v5197_v22  ;;  %v2269_v22 = vld [vmem:[%s7269_s3 + $0x1a8] sm:$0xff]  ;;  %v2260_v44 = vld [vmem:[%s7269_s3 + $0x160] sm:$0xff]  ;;  %3028 = vmatprep.subr.bf16.mxu1 %v4572_v40 }
 0x109   :  { %v1923_v51 = vpop.f32.mrf.mxu1  ;;  %v4573_v48 = vcombine.low %v2265_v41, %v2269_v22  ;;  %v2340_v35 = vld [vmem:[%s7269_s3 + $0x3e0] sm:$0xff] }
 0x10a   :  { %v2248_v51 = vld [vmem:[%s7269_s3 + $0x100] sm:$0xff] }
 0x10b   :  { %2176 = vmatpush1.bf16.msra.mxu0 %v5195_v47  ;;  %v4571_v47 = vcombine.low %v2264_v36, %v2268_v16  ;;  %v2337_v36 = vld [vmem:[%s7269_s3 + $0x3c8] sm:$0xff] }
 0x10c   :  { %2177 = vmatprep.subr.bf16.mxu0 %v5200_v49  ;;  %v4564_v49 = vcombine.high %v2256_v42, %v2260_v44  ;;  %v2341_v16 = vld [vmem:[%s7269_s3 + $0x3e8] sm:$0xff] }
 0x10d   :  { %3029 = vmatpush1.bf16.msra.mxu1 %v4571_v47  ;;  %v4646_v40 = vcombine.high %v2337_v36, %v2341_v16 }
 0x10e   :  { %3030 = vmatprep.subr.bf16.mxu1 %v4564_v49  ;;  %v2324_v49 = vld [vmem:[%s7269_s3 + $0x360] sm:$0xff] }
 0x10f   :  { %2178 = vmatpush1.bf16.msra.mxu0 %v5198_v52  ;;  %v2252_v52 = vld [vmem:[%s7269_s3 + $0x120] sm:$0xff] }
 0x110   :  { %2179 = vmatprep.subr.bf16.mxu0 %v5203_v53  ;;  %v2249_v53 = vld [vmem:[%s7269_s3 + $0x108] sm:$0xff] }
 0x113   :  { %2180 = vmatpush1.bf16.msra.mxu0 %v5201_v54  ;;  %v2253_v54 = vld [vmem:[%s7269_s3 + $0x128] sm:$0xff] }
 0x114   :  { %2181 = vmatprep.subr.bf16.mxu0 %v5206_v55  ;;  %v4563_v55 = vcombine.low %v2256_v42, %v2260_v44  ;;  %v2329_v42 = vld [vmem:[%s7269_s3 + $0x388] sm:$0xff]  ;;  %v4643_v44 = vcombine.low %v2336_v34, %v2340_v35 }
 0x116   :  { %3031 = vmatpush1.bf16.msra.mxu1 %v4563_v55 }
 0x117   :  { %2182 = vmatpush1.bf16.msra.mxu0 %v5204_v56 }
 0x118   :  { %2183 = vmatprep.subr.bf16.mxu0 %v5209_v57  ;;  %v4556_v57 = vcombine.high %v2248_v51, %v2252_v52 }
 0x11a   :  { %3032 = vmatprep.subr.bf16.mxu1 %v4556_v57  ;;  %v2316_v57 = vld [vmem:[%s7269_s3 + $0x320] sm:$0xff] }
 0x11b   :  { %2184 = vmatpush1.bf16.msra.mxu0 %v5207_v58  ;;  %v4558_v58 = vcombine.high %v2249_v53, %v2253_v54 }
 0x11c   :  { %2185 = vmatprep.subr.bf16.mxu0 %v5212_v59  ;;  %v2240_v59 = vld [vmem:[%s7269_s3 + $0xc0] sm:$0xff] }
 0x11f   :  { %2186 = vmatpush1.bf16.msra.mxu0 %v5210_v60  ;;  %v2244_v60 = vld [vmem:[%s7269_s3 + $0xe0] sm:$0xff] }
 0x120   :  { %2187 = vmatprep.subr.bf16.mxu0 %v5215_v61  ;;  %v2241_v61 = vld [vmem:[%s7269_s3 + $0xc8] sm:$0xff] }
 0x123   :  { %2188 = vmatpush2.bf16.msra.mxu0 %v5213_v62  ;;  %v2245_v62 = vld [vmem:[%s7269_s3 + $0xe8] sm:$0xff] }
 0x124   :  { %2189 = vmatprep.subr.bf16.mxu0 %v5218_v63  ;;  %v4555_v63 = vcombine.low %v2248_v51, %v2252_v52  ;;  %v2325_v51 = vld [vmem:[%s7269_s3 + $0x368] sm:$0xff] }
 0x126   :  { %3033 = vmatpush1.bf16.msra.mxu1 %v4555_v63 }
 0x127   :  { %2190 = vmatpush2.bf16.msra.mxu0 %v5216_v0  ;;  %v4557_v0 = vcombine.low %v2249_v53, %v2253_v54 }
 0x128   :  { %2191 = vmatprep.subr.bf16.mxu0 %v5221_v1  ;;  %v4548_v1 = vcombine.high %v2240_v59, %v2244_v60 }
 0x12a   :  { %3034 = vmatprep.subr.bf16.mxu1 %v4548_v1  ;;  %v2308_v1 = vld [vmem:[%s7269_s3 + $0x2e0] sm:$0xff] }
 0x12b   :  { %2192 = vmatpush2.bf16.msra.mxu0 %v5219_v2  ;;  %v4550_v2 = vcombine.high %v2241_v61, %v2245_v62 }
 0x12c   :  { %2193 = vmatprep.subr.bf16.mxu0 %v5224_v3  ;;  %v2232_v3 = vld [vmem:[%s7269_s3 + $0x80] sm:$0xff] }
 0x12f   :  { %2194 = vmatpush2.bf16.msra.mxu0 %v5222_v4  ;;  %v2236_v4 = vld [vmem:[%s7269_s3 + $0xa0] sm:$0xff] }
 0x130   :  { %2195 = vmatprep.subr.bf16.mxu0 %v5227_v5  ;;  %v2233_v5 = vld [vmem:[%s7269_s3 + $0x88] sm:$0xff] }
 0x133   :  { %2196 = vmatpush2.bf16.msra.mxu0 %v5225_v6  ;;  %v2237_v6 = vld [vmem:[%s7269_s3 + $0xa8] sm:$0xff] }
 0x134   :  { %2197 = vmatprep.subr.bf16.mxu0 %v5230_v7  ;;  %v4547_v7 = vcombine.low %v2240_v59, %v2244_v60  ;;  %v2317_v59 = vld [vmem:[%s7269_s3 + $0x328] sm:$0xff] }
 0x136   :  { %3035 = vmatpush1.bf16.msra.mxu1 %v4547_v7 }
 0x137   :  { %2198 = vmatpush2.bf16.msra.mxu0 %v5228_v8  ;;  %v4549_v8 = vcombine.low %v2241_v61, %v2245_v62 }
 0x138   :  { %2199 = vmatprep.subr.bf16.mxu0 %v5233_v9  ;;  %v4540_v9 = vcombine.high %v2232_v3, %v2236_v4 }
 0x13a   :  { %3036 = vmatprep.subr.bf16.mxu1 %v4540_v9  ;;  %v2300_v9 = vld [vmem:[%s7269_s3 + $0x2a0] sm:$0xff] }
 0x13b   :  { %2200 = vmatpush2.bf16.msra.mxu0 %v5231_v10  ;;  %v4542_v10 = vcombine.high %v2233_v5, %v2237_v6 }
 0x13c   :  { %2201 = vmatprep.subr.bf16.mxu0 %v5236_v11  ;;  %v2224_v11 = vld [vmem:[%s7269_s3 + $0x40] sm:$0xff] }
 0x13f   :  { %2202 = vmatpush2.bf16.msra.mxu0 %v5234_v12  ;;  %v2228_v12 = vld [vmem:[%s7269_s3 + $0x60] sm:$0xff] }
 0x140   :  { %3067 = vmatprep.subr.bf16.mxu0 %v4582_v39  ;;  %v4531_v21 = vcombine.low %v2224_v11, %v2228_v12  ;;  %v4644_v39 = vcombine.high %v2336_v34, %v2340_v35 }
 0x142   :  { %v1959_v14 = vpop.f32.mrf.mxu0  ;;  %2204 = vmatmul.mubr.bf16.vlgmr.msra.gmra.mxu0 %v4233_v13  ;;  %v2225_v13 = vld [vmem:[%s7269_s3 + $0x48] sm:$0xff] }
 0x143   :  { %v1960_v15 = vadd.f32 %v1959_v14, %v6344_v43  ;;  %v2000_v19 = vpop.f32.mrf.mxu1  ;;  %v4574_v43 = vcombine.high %v2265_v41, %v2269_v22  ;;  %3068 = vmatpush1.bf16.msra.mxu0 %v4581_v38  ;;  %v2229_v14 = vld [vmem:[%s7269_s3 + $0x68] sm:$0xff]  ;;  %v2328_v41 = vld [vmem:[%s7269_s3 + $0x380] sm:$0xff] }
 0x144   :  { %v1961_v18 = vpop.f32.mrf.mxu0  ;;  %v4533_v31 = vcombine.low %v2225_v13, %v2229_v14  ;;  %v2332_v22 = vld [vmem:[%s7269_s3 + $0x3a0] sm:$0xff] }
 0x145   :  { %v1962_v23 = vadd.f32 %v1961_v18, %v6346_v46  ;;  %v6433_v24 = vadd.f32 %v2000_v19, %v1960_v15  ;;  %v2002_v25 = vpop.f32.mrf.mxu1  ;;  %v2261_v46 = vld [vmem:[%s7269_s3 + $0x168] sm:$0xff]  ;;  %3069 = vmatprep.subr.bf16.mxu0 %v4574_v43  ;;  %v4539_v15 = vcombine.low %v2232_v3, %v2236_v4  ;;  %v4541_v18 = vcombine.low %v2233_v5, %v2237_v6 }
 0x146   :  { %v1963_v17 = vpop.f32.mrf.mxu0  ;;  %v4566_v50 = vcombine.high %v2257_v45, %v2261_v46  ;;  %v4565_v56 = vcombine.low %v2257_v45, %v2261_v46  ;;  %v4532_v19 = vcombine.high %v2224_v11, %v2228_v12  ;;  %v2333_v43 = vld [vmem:[%s7269_s3 + $0x3a8] sm:$0xff]  ;;  %v4645_v45 = vcombine.low %v2337_v36, %v2341_v16  ;;  %v2280_v16 = vld [vmem:[%s7269_s3 + $0x200] sm:$0xff] }
 0x147   :  { %v6435_v27 = vadd.f32 %v2002_v25, %v1962_v23  ;;  %v2004_v29 = vpop.f32.mrf.mxu1  ;;  %3070 = vmatpush1.bf16.msra.mxu0 %v4573_v48  ;;  %v4534_v23 = vcombine.high %v2225_v13, %v2229_v14  ;;  %v2216_v17 = vld [vmem:[%s7269_s3] sm:$0xff]  ;;  %3037 = vmatpush1.bf16.msra.mxu1 %v4539_v15  ;;  %v4636_v46 = vcombine.high %v2328_v41, %v2332_v22  ;;  %v2309_v3 = vld [vmem:[%s7269_s3 + $0x2e8] sm:$0xff] }
 0x148   :  { %v1964_v28 = vpop.f32.mrf.mxu0  ;;  %3071 = vmatprep.subr.bf16.mxu0 %v4566_v50  ;;  %v2220_v25 = vld [vmem:[%s7269_s3 + $0x20] sm:$0xff]  ;;  %v2221_v29 = vld [vmem:[%s7269_s3 + $0x28] sm:$0xff]  ;;  %3038 = vmatprep.subr.bf16.mxu1 %v4532_v19  ;;  %v4638_v47 = vcombine.high %v2329_v42, %v2333_v43  ;;  %v4635_v52 = vcombine.low %v2328_v41, %v2332_v22  ;;  %v4637_v53 = vcombine.low %v2329_v42, %v2333_v43 }
 0x149   :  { %v2005_v37 = vpop.f32.mrf.mxu1  ;;  %v2217_v28 = vld [vmem:[%s7269_s3 + $0x8] sm:$0xff]  ;;  %v4524_v32 = vcombine.high %v2216_v17, %v2220_v25  ;;  %v2320_v48 = vld [vmem:[%s7269_s3 + $0x340] sm:$0xff] }
 0x14a   :  { %v4526_v33 = vcombine.high %v2217_v28, %v2221_v29  ;;  %v4523_v37 = vcombine.low %v2216_v17, %v2220_v25  ;;  %v4525_v38 = vcombine.low %v2217_v28, %v2221_v29  ;;  %v2321_v50 = vld [vmem:[%s7269_s3 + $0x348] sm:$0xff]  ;;  %v4628_v54 = vcombine.high %v2320_v48, %v2324_v49  ;;  %v2292_v17 = vld [vmem:[%s7269_s3 + $0x260] sm:$0xff] }
 0x14b   :  { %3072 = vmatpush1.bf16.msra.mxu0 %v4565_v56  ;;  %3039 = vmatpush1.bf16.msra.mxu1 %v4531_v21  ;;  %v4630_v55 = vcombine.high %v2321_v50, %v2325_v51  ;;  %v2312_v56 = vld [vmem:[%s7269_s3 + $0x300] sm:$0xff]  ;;  %v4627_v60 = vcombine.low %v2320_v48, %v2324_v49  ;;  %v4629_v61 = vcombine.low %v2321_v50, %v2325_v51  ;;  %v2301_v11 = vld [vmem:[%s7269_s3 + $0x2a8] sm:$0xff]  ;;  %v2278_v49 = vld [vmem:[%s7269_s3 + $0x1f0] sm:$0xff] }
 0x14c   :  { %3073 = vmatprep.subr.bf16.mxu0 %v4558_v58  ;;  %3040 = vmatprep.subr.bf16.mxu1 %v4524_v32  ;;  %v2313_v58 = vld [vmem:[%s7269_s3 + $0x308] sm:$0xff]  ;;  %v4620_v62 = vcombine.high %v2312_v56, %v2316_v57  ;;  %v4619_v4 = vcombine.low %v2312_v56, %v2316_v57  ;;  %v2275_v50 = vld [vmem:[%s7269_s3 + $0x1d8] sm:$0xff] }
 0x14d   :  { %v4622_v63 = vcombine.high %v2313_v58, %v2317_v59  ;;  %v4621_v5 = vcombine.low %v2313_v58, %v2317_v59  ;;  %v2289_v25 = vld [vmem:[%s7269_s3 + $0x248] sm:$0xff] }
 0x14e   :  { %v2293_v29 = vld [vmem:[%s7269_s3 + $0x268] sm:$0xff] }
 0x14f   :  { %3074 = vmatpush1.bf16.msra.mxu0 %v4557_v0  ;;  %3041 = vmatpush1.bf16.msra.mxu1 %v4523_v37  ;;  %v2304_v0 = vld [vmem:[%s7269_s3 + $0x2c0] sm:$0xff]  ;;  %v4597_v32 = vcombine.low %v2289_v25, %v2293_v29  ;;  %v2285_v41 = vld [vmem:[%s7269_s3 + $0x228] sm:$0xff] }
 0x150   :  { %3075 = vmatprep.subr.bf16.mxu0 %v4550_v2  ;;  %3042 = vmatprep.subr.bf16.mxu1 %v4644_v39  ;;  %v2305_v2 = vld [vmem:[%s7269_s3 + $0x2c8] sm:$0xff]  ;;  %v4612_v6 = vcombine.high %v2304_v0, %v2308_v1  ;;  %v4611_v12 = vcombine.low %v2304_v0, %v2308_v1  ;;  %v2284_v37 = vld [vmem:[%s7269_s3 + $0x220] sm:$0xff] }
 0x151   :  { %v4614_v7 = vcombine.high %v2305_v2, %v2309_v3  ;;  %v4613_v13 = vcombine.low %v2305_v2, %v2309_v3  ;;  %v4587_v43 = vcombine.low %v2280_v16, %v2284_v37 }
 0x153   :  { %3076 = vmatpush1.bf16.msra.mxu0 %v4549_v8  ;;  %3043 = vmatpush2.bf16.msra.mxu1 %v4643_v44  ;;  %v2296_v8 = vld [vmem:[%s7269_s3 + $0x280] sm:$0xff] }
 0x154   :  { %3077 = vmatprep.subr.bf16.mxu0 %v4542_v10  ;;  %3044 = vmatprep.subr.bf16.mxu1 %v4636_v46  ;;  %v2297_v10 = vld [vmem:[%s7269_s3 + $0x288] sm:$0xff]  ;;  %v4604_v14 = vcombine.high %v2296_v8, %v2300_v9 }
 0x155   :  { %v4606_v15 = vcombine.high %v2297_v10, %v2301_v11  ;;  %v4605_v19 = vcombine.low %v2297_v10, %v2301_v11  ;;  %v2266_v11 = vld [vmem:[%s7269_s3 + $0x190] sm:$0xff] }
 0x157   :  { %3078 = vmatpush1.bf16.msra.mxu0 %v4541_v18  ;;  %3045 = vmatpush2.bf16.msra.mxu1 %v4635_v52  ;;  %v4603_v18 = vcombine.low %v2296_v8, %v2300_v9  ;;  %v2279_v52 = vld [vmem:[%s7269_s3 + $0x1f8] sm:$0xff] }
 0x158   :  { %3079 = vmatprep.subr.bf16.mxu0 %v4534_v23  ;;  %3046 = vmatprep.subr.bf16.mxu1 %v4628_v54  ;;  %v2288_v23 = vld [vmem:[%s7269_s3 + $0x240] sm:$0xff]  ;;  %v4586_v56 = vcombine.high %v2275_v50, %v2279_v52 }
 0x159   :  { %v4596_v28 = vcombine.high %v2288_v23, %v2292_v17 }
 0x15b   :  { %3080 = vmatpush1.bf16.msra.mxu0 %v4533_v31  ;;  %3047 = vmatpush2.bf16.msra.mxu1 %v4627_v60  ;;  %v4595_v31 = vcombine.low %v2288_v23, %v2292_v17  ;;  %v2258_v17 = vld [vmem:[%s7269_s3 + $0x150] sm:$0xff] }
 0x15c   :  { %3081 = vmatprep.subr.bf16.mxu0 %v4526_v33  ;;  %3048 = vmatprep.subr.bf16.mxu1 %v4620_v62  ;;  %v4598_v33 = vcombine.high %v2289_v25, %v2293_v29  ;;  %v2262_v29 = vld [vmem:[%s7269_s3 + $0x170] sm:$0xff] }
 0x15f   :  { %3082 = vmatpush1.bf16.msra.mxu0 %v4525_v38  ;;  %3049 = vmatpush2.bf16.msra.mxu1 %v4619_v4  ;;  %v2281_v38 = vld [vmem:[%s7269_s3 + $0x208] sm:$0xff] }
 0x160   :  { %3083 = vmatprep.subr.bf16.mxu0 %v4646_v40  ;;  %3050 = vmatprep.subr.bf16.mxu1 %v4612_v6  ;;  %v4588_v40 = vcombine.high %v2280_v16, %v2284_v37  ;;  %v4589_v44 = vcombine.low %v2281_v38, %v2285_v41  ;;  %v2254_v16 = vld [vmem:[%s7269_s3 + $0x130] sm:$0xff]  ;;  %v2251_v37 = vld [vmem:[%s7269_s3 + $0x118] sm:$0xff] }
 0x163   :  { %3084 = vmatpush2.bf16.msra.mxu0 %v4645_v45  ;;  %3051 = vmatpush2.bf16.msra.mxu1 %v4611_v12  ;;  %v4590_v45 = vcombine.high %v2281_v38, %v2285_v41  ;;  %v2270_v12 = vld [vmem:[%s7269_s3 + $0x1b0] sm:$0xff]  ;;  %v2255_v38 = vld [vmem:[%s7269_s3 + $0x138] sm:$0xff] }
 0x164   :  { %3085 = vmatprep.subr.bf16.mxu0 %v4638_v47  ;;  %3052 = vmatprep.subr.bf16.mxu1 %v4604_v14  ;;  %v2271_v14 = vld [vmem:[%s7269_s3 + $0x1b8] sm:$0xff]  ;;  %v4576_v25 = vcombine.high %v2266_v11, %v2270_v12  ;;  %v4562_v41 = vcombine.high %v2251_v37, %v2255_v38 }
 0x167   :  { %3086 = vmatpush2.bf16.msra.mxu0 %v4637_v53  ;;  %3053 = vmatpush2.bf16.msra.mxu1 %v4603_v18 }
 0x168   :  { %3087 = vmatprep.subr.bf16.mxu0 %v4630_v55  ;;  %3054 = vmatprep.subr.bf16.mxu1 %v4596_v28  ;;  %v4585_v55 = vcombine.low %v2275_v50, %v2279_v52  ;;  %v2235_v50 = vld [vmem:[%s7269_s3 + $0x98] sm:$0xff] }
 0x16b   :  { %3088 = vmatpush2.bf16.msra.mxu0 %v4629_v61  ;;  %3055 = vmatpush2.bf16.msra.mxu1 %v4595_v31  ;;  %v2263_v31 = vld [vmem:[%s7269_s3 + $0x178] sm:$0xff] }
 0x16c   :  { %3089 = vmatprep.subr.bf16.mxu0 %v4622_v63  ;;  %3056 = vmatprep.subr.bf16.mxu1 %v4588_v40 }
 0x16f   :  { %3090 = vmatpush2.bf16.msra.mxu0 %v4621_v5  ;;  %3057 = vmatpush2.bf16.msra.mxu1 %v4587_v43  ;;  %v2243_v43 = vld [vmem:[%s7269_s3 + $0xd8] sm:$0xff] }
 0x170   :  { %3091 = vmatprep.subr.bf16.mxu0 %v4614_v7 }
 0x173   :  { %3092 = vmatpush2.bf16.msra.mxu0 %v4613_v13  ;;  %v2267_v13 = vld [vmem:[%s7269_s3 + $0x198] sm:$0xff] }
 0x174   :  { %3093 = vmatprep.subr.bf16.mxu0 %v4606_v15  ;;  %v4578_v28 = vcombine.high %v2267_v13, %v2271_v14 }
 0x177   :  { %3094 = vmatpush2.bf16.msra.mxu0 %v4605_v19 }
 0x178   :  { %3095 = vmatprep.subr.bf16.mxu0 %v4598_v33  ;;  %v4577_v33 = vcombine.low %v2267_v13, %v2271_v14 }
 0x17b   :  { %3096 = vmatpush2.bf16.msra.mxu0 %v4597_v32  ;;  %v4575_v32 = vcombine.low %v2266_v11, %v2270_v12  ;;  %v2343_v11 = vld [vmem:[%s7269_s3 + $0x3f8] sm:$0xff] }
 0x17c   :  { %3097 = vmatprep.subr.bf16.mxu0 %v4590_v45 }
 0x17f   :  { %3098 = vmatpush2.bf16.msra.mxu0 %v4589_v44  ;;  %v2247_v44 = vld [vmem:[%s7269_s3 + $0xf8] sm:$0xff] }
 0x180   :  { %3149 = vmatprep.subr.bf16.mxu0 %v4586_v56  ;;  %v2226_v56 = vld [vmem:[%s7269_s3 + $0x50] sm:$0xff] }
 0x182   :  { %v2041_v21 = vpop.f32.mrf.mxu0 }
 0x183   :  { %v2042_v34 = vadd.f32 %v2041_v21, %v6433_v24  ;;  %v2259_v21 = vld [vmem:[%s7269_s3 + $0x158] sm:$0xff] }
 0x184   :  { %v2043_v35 = vpop.f32.mrf.mxu0  ;;  %v2082_v36 = vpop.f32.mrf.mxu1 }
 0x185   :  { %v2044_v39 = vadd.f32 %v2043_v35, %v6435_v27  ;;  %v2083_v24 = vadd.f32 %v2082_v36, %v2042_v34  ;;  %v2274_v27 = vld [vmem:[%s7269_s3 + $0x1d0] sm:$0xff]  ;;  %v4568_v34 = vcombine.high %v2258_v17, %v2262_v29  ;;  %v4570_v35 = vcombine.high %v2259_v21, %v2263_v31 }
 0x186   :  { %v2045_v22 = vpop.f32.mrf.mxu0  ;;  %v2084_v42 = vpop.f32.mrf.mxu1  ;;  %v4584_v51 = vcombine.high %v2274_v27, %v2278_v49  ;;  %v4583_v54 = vcombine.low %v2274_v27, %v2278_v49  ;;  %v2250_v36 = vld [vmem:[%s7269_s3 + $0x110] sm:$0xff] }
 0x187   :  { %v2085_v46 = vadd.f32 %v2084_v42, %v2044_v39  ;;  %v4567_v39 = vcombine.low %v2258_v17, %v2262_v29  ;;  %v4560_v40 = vcombine.high %v2250_v36, %v2254_v16  ;;  %v2242_v22 = vld [vmem:[%s7269_s3 + $0xd0] sm:$0xff]  ;;  %v4559_v45 = vcombine.low %v2250_v36, %v2254_v16  ;;  %v2331_v17 = vld [vmem:[%s7269_s3 + $0x398] sm:$0xff] }
 0x188   :  { %v2046_v47 = vpop.f32.mrf.mxu0  ;;  %v2086_v48 = vpop.f32.mrf.mxu1  ;;  %3108 = vmatprep.subr.bf16.mxu1 %v4584_v51  ;;  %v2246_v42 = vld [vmem:[%s7269_s3 + $0xf0] sm:$0xff]  ;;  %v2239_v51 = vld [vmem:[%s7269_s3 + $0xb8] sm:$0xff] }
 0x189   :  { %v4552_v47 = vcombine.high %v2242_v22, %v2246_v42  ;;  %v4554_v48 = vcombine.high %v2243_v43, %v2247_v44  ;;  %v2234_v27 = vld [vmem:[%s7269_s3 + $0x90] sm:$0xff]  ;;  %v4551_v52 = vcombine.low %v2242_v22, %v2246_v42 }
 0x18a   :  { %v2087_v53 = vpop.f32.mrf.mxu1  ;;  %v2238_v49 = vld [vmem:[%s7269_s3 + $0xb0] sm:$0xff] }
 0x18b   :  { %v4553_v53 = vcombine.low %v2243_v43, %v2247_v44 }
 0x1c2   :  { %v2123_v57 = vpop.f32.mrf.mxu0 }
 0x1c3   :  { %v2124_v1 = vadd.f32 %v2123_v57, %v2083_v24  ;;  %v4569_v24 = vcombine.low %v2259_v21, %v2263_v31  ;;  %v2230_v57 = vld [vmem:[%s7269_s3 + $0x70] sm:$0xff] }
 0x1c4   :  { %v2125_v58 = vpop.f32.mrf.mxu0  ;;  %v2164_v59 = vpop.f32.mrf.mxu1 }
 0x1c5   :  { %v2126_v2 = vadd.f32 %v2125_v58, %v2085_v46  ;;  %v2165_v3 = vadd.f32 %v2164_v59, %v2124_v1  ;;  %v4561_v46 = vcombine.low %v2251_v37, %v2255_v38  ;;  %v2227_v58 = vld [vmem:[%s7269_s3 + $0x58] sm:$0xff]  ;;  %v2222_v1 = vld [vmem:[%s7269_s3 + $0x30] sm:$0xff] }
 0x1c6   :  { %v2127_v60 = vpop.f32.mrf.mxu0  ;;  %v2166_v61 = vpop.f32.mrf.mxu1  ;;  %v2231_v59 = vld [vmem:[%s7269_s3 + $0x78] sm:$0xff] }
 0x1c7   :  { %v2167_v5 = vadd.f32 %v2166_v61, %v2126_v2  ;;  %v4543_v60 = vcombine.low %v2234_v27, %v2238_v49  ;;  %v4545_v61 = vcombine.low %v2235_v50, %v2239_v51  ;;  %v2219_v2 = vld [vmem:[%s7269_s3 + $0x18] sm:$0xff] }
 0x1c8   :  { %v2128_v62 = vpop.f32.mrf.mxu0  ;;  %v2168_v63 = vpop.f32.mrf.mxu1 }
 0x1c9   :  { %v4536_v62 = vcombine.high %v2226_v56, %v2230_v57  ;;  %v4538_v63 = vcombine.high %v2227_v58, %v2231_v59 }
 0x1ca   :  { %v2169_v0 = vpop.f32.mrf.mxu1 }
 0x1cb   :  { %v2218_v0 = vld [vmem:[%s7269_s3 + $0x10] sm:$0xff] }
 0x1cc   :  { %v4527_v12 = vcombine.low %v2218_v0, %v2222_v1 }
 0x202   :  { %v2205_v4 = vpop.f32.mrf.mxu0 }
 0x203   :  { %v2206_v6 = vadd.f32 %v2205_v4, %v2165_v3  ;;  %v2223_v3 = vld [vmem:[%s7269_s3 + $0x38] sm:$0xff]  ;;  %v4535_v4 = vcombine.low %v2226_v56, %v2230_v57 }
 0x204   :  { %v2207_v7 = vpop.f32.mrf.mxu0  ;;  %v4529_v13 = vcombine.low %v2219_v2, %v2223_v3 }
 0x205   :  { %v2208_v8 = vadd.f32 %v2207_v7, %v2167_v5  ;;  %v2212_v9 = vmax.f32 %v2206_v6, 0.0  ;;  %v4537_v5 = vcombine.low %v2227_v58, %v2231_v59  ;;  %v4528_v6 = vcombine.high %v2218_v0, %v2222_v1 }
 0x206   :  { %v2209_v10 = vpop.f32.mrf.mxu0  ;;  %v4530_v7 = vcombine.high %v2219_v2, %v2223_v3 }
 0x207   :  { %v2213_v15 = vmax.f32 %v2208_v8, 0.0  ;;  %v6655_v23 = vpack.c.bf16 %v2212_v9, %v2212_v9  ;;  %v2338_v8 = vld [vmem:[%s7269_s3 + $0x3d0] sm:$0xff]  ;;  %v2339_v10 = vld [vmem:[%s7269_s3 + $0x3d8] sm:$0xff] }
 0x208   :  { %v2210_v18 = vpop.f32.mrf.mxu0  ;;  %v2342_v9 = vld [vmem:[%s7269_s3 + $0x3f0] sm:$0xff]  ;;  %v4649_v29 = vcombine.low %v2339_v10, %v2343_v11 }
 0x209   :  { %v2215_v19 = vpack.c.bf16 %v2213_v15, %v2213_v15  ;;  %v4648_v14 = vcombine.high %v2338_v8, %v2342_v9  ;;  %v4650_v15 = vcombine.high %v2339_v10, %v2343_v11  ;;  %v2330_v18 = vld [vmem:[%s7269_s3 + $0x390] sm:$0xff] }
 0x20b   :  { %3058 = vmatprep.mubr.bf16.mxu1 %v2215_v19  ;;  %3099 = vmatprep.mubr.bf16.mxu0 %v2215_v19 }
 0x20c   :  { %3059 = vmatmul.mubr.bf16.vlgmr.msra.gmra.mxu1 %v6655_v23  ;;  %3100 = vmatmul.mubr.bf16.vlgmr.msra.gmra.mxu0 %v6655_v23 }
 0x20d   :  { %3109 = vmatpush1.bf16.msra.mxu1 %v4583_v54  ;;  %3150 = vmatpush1.bf16.msra.mxu0 %v4585_v55  ;;  %v4544_v54 = vcombine.high %v2234_v27, %v2238_v49  ;;  %v4546_v55 = vcombine.high %v2235_v50, %v2239_v51 }
 0x20e   :  { %3140 = vmatprep.mubr.bf16.mxu1 %v2215_v19  ;;  %3181 = vmatprep.mubr.bf16.mxu0 %v2215_v19  ;;  %v2334_v19 = vld [vmem:[%s7269_s3 + $0x3b0] sm:$0xff] }
 0x20f   :  { %3110 = vmatprep.subr.bf16.mxu1 %v4576_v25  ;;  %3151 = vmatprep.subr.bf16.mxu0 %v4578_v28  ;;  %v2335_v25 = vld [vmem:[%s7269_s3 + $0x3b8] sm:$0xff]  ;;  %v4647_v28 = vcombine.low %v2338_v8, %v2342_v9  ;;  %v4640_v21 = vcombine.high %v2330_v18, %v2334_v19  ;;  %v4639_v36 = vcombine.low %v2330_v18, %v2334_v19 }
 0x210   :  { %v4642_v31 = vcombine.high %v2331_v17, %v2335_v25  ;;  %v4641_v16 = vcombine.low %v2331_v17, %v2335_v25  ;;  %v5239_v18 = vld [vmem:[%s7270_s6 + $0x70] ss:$8 sps:$4 sm:$0xff]   ;;  %v5247_v17 = vld [vmem:[%s7270_s6 + $0x64] ss:$8 sps:$4 sm:$0xff]  }
 0x211   :  { %3111 = vmatpush1.bf16.msra.mxu1 %v4575_v32  ;;  %3152 = vmatpush1.bf16.msra.mxu0 %v4577_v33  ;;  %v2322_v32 = vld [vmem:[%s7269_s3 + $0x350] sm:$0xff]  ;;  %v5250_v25 = vld [vmem:[%s7270_s6 + $0x164] ss:$8 sps:$4 sm:$0xff]  }
 0x212   :  { %3112 = vmatprep.subr.bf16.mxu1 %v4568_v34  ;;  %3153 = vmatprep.subr.bf16.mxu0 %v4570_v35  ;;  %v2326_v33 = vld [vmem:[%s7269_s3 + $0x370] sm:$0xff]  ;;  %v2323_v34 = vld [vmem:[%s7269_s3 + $0x358] sm:$0xff] }
 0x213   :  { %v2327_v35 = vld [vmem:[%s7269_s3 + $0x378] sm:$0xff]  ;;  %v4632_v37 = vcombine.high %v2322_v32, %v2326_v33  ;;  %v4631_v22 = vcombine.low %v2322_v32, %v2326_v33  ;;  %v5259_v33 = vld [vmem:[%s7270_s6 + $0x44] ss:$8 sps:$4 sm:$0xff]  }
 0x214   :  { %v4634_v38 = vcombine.high %v2323_v34, %v2327_v35  ;;  %v4633_v42 = vcombine.low %v2323_v34, %v2327_v35  ;;  %v5242_v19 = vld [vmem:[%s7270_s6 + $0x170] ss:$8 sps:$4 sm:$0xff]   ;;  %v5262_v34 = vld [vmem:[%s7270_s6 + $0x144] ss:$8 sps:$4 sm:$0xff]   ;;  %v5257_v35 = vld [vmem:[%s7270_s6 + $0x40] ss:$8 sps:$4 sm:$0xff]  }
 0x215   :  { %3113 = vmatpush1.bf16.msra.mxu1 %v4567_v39  ;;  %3154 = vmatpush1.bf16.msra.mxu0 %v4569_v24  ;;  %v2314_v39 = vld [vmem:[%s7269_s3 + $0x310] sm:$0xff] }
 0x216   :  { %3114 = vmatprep.subr.bf16.mxu1 %v4560_v40  ;;  %3155 = vmatprep.subr.bf16.mxu0 %v4562_v41  ;;  %v2318_v24 = vld [vmem:[%s7269_s3 + $0x330] sm:$0xff]  ;;  %v2315_v40 = vld [vmem:[%s7269_s3 + $0x318] sm:$0xff] }
 0x217   :  { %v2319_v41 = vld [vmem:[%s7269_s3 + $0x338] sm:$0xff]  ;;  %v4624_v43 = vcombine.high %v2314_v39, %v2318_v24  ;;  %v4623_v27 = vcombine.low %v2314_v39, %v2318_v24  ;;  %v5271_v24 = vld [vmem:[%s7270_s6 + $0x24] ss:$8 sps:$4 sm:$0xff]  }
 0x218   :  { %v4626_v44 = vcombine.high %v2315_v40, %v2319_v41  ;;  %v4625_v49 = vcombine.low %v2315_v40, %v2319_v41  ;;  %v5254_v32 = vld [vmem:[%s7270_s6 + $0x150] ss:$8 sps:$4 sm:$0xff]   ;;  %v5274_v40 = vld [vmem:[%s7270_s6 + $0x124] ss:$8 sps:$4 sm:$0xff]   ;;  %v5269_v41 = vld [vmem:[%s7270_s6 + $0x20] ss:$8 sps:$4 sm:$0xff]  }
 0x219   :  { %3115 = vmatpush1.bf16.msra.mxu1 %v4559_v45  ;;  %3156 = vmatpush1.bf16.msra.mxu0 %v4561_v46  ;;  %v2306_v45 = vld [vmem:[%s7269_s3 + $0x2d0] sm:$0xff] }
 0x21a   :  { %3116 = vmatprep.subr.bf16.mxu1 %v4552_v47  ;;  %3157 = vmatprep.subr.bf16.mxu0 %v4554_v48  ;;  %v2310_v46 = vld [vmem:[%s7269_s3 + $0x2f0] sm:$0xff]  ;;  %v2307_v47 = vld [vmem:[%s7269_s3 + $0x2d8] sm:$0xff] }
 0x21b   :  { %v2311_v48 = vld [vmem:[%s7269_s3 + $0x2f8] sm:$0xff]  ;;  %v4616_v50 = vcombine.high %v2306_v45, %v2310_v46  ;;  %v4615_v56 = vcombine.low %v2306_v45, %v2310_v46  ;;  %v5283_v46 = vld [vmem:[%s7270_s6 + $0x4] ss:$8 sps:$4 sm:$0xff]  }
 0x21c   :  { %v4618_v51 = vcombine.high %v2307_v47, %v2311_v48  ;;  %v4617_v57 = vcombine.low %v2307_v47, %v2311_v48  ;;  %v5266_v39 = vld [vmem:[%s7270_s6 + $0x130] ss:$8 sps:$4 sm:$0xff]   ;;  %v5286_v47 = vld [vmem:[%s7270_s6 + $0x104] ss:$8 sps:$4 sm:$0xff]   ;;  %v5281_v48 = vld [vmem:[%s7270_s6] ss:$8 sps:$4 sm:$0xff]  }
 0x21d   :  { %3117 = vmatpush1.bf16.msra.mxu1 %v4551_v52  ;;  %3158 = vmatpush1.bf16.msra.mxu0 %v4553_v53  ;;  %v2298_v52 = vld [vmem:[%s7269_s3 + $0x290] sm:$0xff] }
 0x21e   :  { %3118 = vmatprep.subr.bf16.mxu1 %v4544_v54  ;;  %3159 = vmatprep.subr.bf16.mxu0 %v4546_v55  ;;  %v2302_v53 = vld [vmem:[%s7269_s3 + $0x2b0] sm:$0xff]  ;;  %v2299_v54 = vld [vmem:[%s7269_s3 + $0x298] sm:$0xff] }
 0x21f   :  { %v2303_v55 = vld [vmem:[%s7269_s3 + $0x2b8] sm:$0xff]  ;;  %v4608_v58 = vcombine.high %v2298_v52, %v2302_v53  ;;  %v4607_v0 = vcombine.low %v2298_v52, %v2302_v53  ;;  %v5295_v53 = vld [vmem:[%s7270_s6 + $0xe4] ss:$8 sps:$4 sm:$0xff]  }
 0x220   :  { %v4610_v59 = vcombine.high %v2299_v54, %v2303_v55  ;;  %v4609_v1 = vcombine.low %v2299_v54, %v2303_v55  ;;  %v5278_v45 = vld [vmem:[%s7270_s6 + $0x110] ss:$8 sps:$4 sm:$0xff]   ;;  %v5298_v54 = vld [vmem:[%s7270_s6 + $0x1e4] ss:$8 sps:$4 sm:$0xff]   ;;  %v5293_v55 = vld [vmem:[%s7270_s6 + $0xe0] ss:$8 sps:$4 sm:$0xff]  }
 0x221   :  { %3119 = vmatpush1.bf16.msra.mxu1 %v4543_v60  ;;  %3160 = vmatpush1.bf16.msra.mxu0 %v4545_v61  ;;  %v2290_v60 = vld [vmem:[%s7269_s3 + $0x250] sm:$0xff] }
 0x222   :  { %3120 = vmatprep.subr.bf16.mxu1 %v4536_v62  ;;  %3161 = vmatprep.subr.bf16.mxu0 %v4538_v63  ;;  %v2294_v61 = vld [vmem:[%s7269_s3 + $0x270] sm:$0xff]  ;;  %v2291_v62 = vld [vmem:[%s7269_s3 + $0x258] sm:$0xff] }
 0x223   :  { %v2295_v63 = vld [vmem:[%s7269_s3 + $0x278] sm:$0xff]  ;;  %v4600_v2 = vcombine.high %v2290_v60, %v2294_v61  ;;  %v4599_v8 = vcombine.low %v2290_v60, %v2294_v61  ;;  %v5307_v61 = vld [vmem:[%s7270_s6 + $0xc4] ss:$8 sps:$4 sm:$0xff]  }
 0x224   :  { %v4602_v3 = vcombine.high %v2291_v62, %v2295_v63  ;;  %v4601_v9 = vcombine.low %v2291_v62, %v2295_v63  ;;  %v5290_v52 = vld [vmem:[%s7270_s6 + $0x1f0] ss:$8 sps:$4 sm:$0xff]   ;;  %v5310_v62 = vld [vmem:[%s7270_s6 + $0x1c4] ss:$8 sps:$4 sm:$0xff]   ;;  %v5305_v63 = vld [vmem:[%s7270_s6 + $0xc0] ss:$8 sps:$4 sm:$0xff]  }
 0x225   :  { %3121 = vmatpush1.bf16.msra.mxu1 %v4535_v4  ;;  %3162 = vmatpush1.bf16.msra.mxu0 %v4537_v5  ;;  %v2282_v4 = vld [vmem:[%s7269_s3 + $0x210] sm:$0xff] }
 0x226   :  { %3122 = vmatprep.subr.bf16.mxu1 %v4528_v6  ;;  %3163 = vmatprep.subr.bf16.mxu0 %v4530_v7  ;;  %v2286_v5 = vld [vmem:[%s7269_s3 + $0x230] sm:$0xff]  ;;  %v2283_v6 = vld [vmem:[%s7269_s3 + $0x218] sm:$0xff] }
 0x227   :  { %v2287_v7 = vld [vmem:[%s7269_s3 + $0x238] sm:$0xff]  ;;  %v4592_v10 = vcombine.high %v2282_v4, %v2286_v5 }
 0x228   :  { %v4594_v11 = vcombine.high %v2283_v6, %v2287_v7  ;;  %v5302_v60 = vld [vmem:[%s7270_s6 + $0x1d0] ss:$8 sps:$4 sm:$0xff]  }
 0x229   :  { %3123 = vmatpush1.bf16.msra.mxu1 %v4527_v12  ;;  %3164 = vmatpush1.bf16.msra.mxu0 %v4529_v13  ;;  %v4591_v12 = vcombine.low %v2282_v4, %v2286_v5  ;;  %v4593_v13 = vcombine.low %v2283_v6, %v2287_v7  ;;  %v5314_v4 = vld [vmem:[%s7270_s6 + $0x1b0] ss:$8 sps:$4 sm:$0xff]   ;;  %v5319_v5 = vld [vmem:[%s7270_s6 + $0xa4] ss:$8 sps:$4 sm:$0xff]   ;;  %v5317_v7 = vld [vmem:[%s7270_s6 + $0xa0] ss:$8 sps:$4 sm:$0xff]  }
 0x22a   :  { %3124 = vmatprep.subr.bf16.mxu1 %v4648_v14  ;;  %3165 = vmatprep.subr.bf16.mxu0 %v4650_v15  ;;  %v5241_v14 = vld [vmem:[%s7270_s6 + $0x74] ss:$8 sps:$4 sm:$0xff]   ;;  %v5322_v6 = vld [vmem:[%s7270_s6 + $0x1a4] ss:$8 sps:$4 sm:$0xff]  }
 0x22b   :  { %v5244_v15 = vld [vmem:[%s7270_s6 + $0x174] ss:$8 sps:$4 sm:$0xff]  }
 0x22d   :  { %3125 = vmatpush2.bf16.msra.mxu1 %v4647_v28  ;;  %3166 = vmatpush2.bf16.msra.mxu0 %v4649_v29  ;;  %v5245_v28 = vld [vmem:[%s7270_s6 + $0x60] ss:$8 sps:$4 sm:$0xff]  }
 0x22e   :  { %3126 = vmatprep.subr.bf16.mxu1 %v4640_v21  ;;  %3167 = vmatprep.subr.bf16.mxu0 %v4642_v31  ;;  %v5248_v29 = vld [vmem:[%s7270_s6 + $0x160] ss:$8 sps:$4 sm:$0xff]   ;;  %v5253_v21 = vld [vmem:[%s7270_s6 + $0x54] ss:$8 sps:$4 sm:$0xff]   ;;  %v5251_v31 = vld [vmem:[%s7270_s6 + $0x50] ss:$8 sps:$4 sm:$0xff]  }
 0x231   :  { %3127 = vmatpush2.bf16.msra.mxu1 %v4639_v36  ;;  %3168 = vmatpush2.bf16.msra.mxu0 %v4641_v16  ;;  %v5260_v36 = vld [vmem:[%s7270_s6 + $0x140] ss:$8 sps:$4 sm:$0xff]   ;;  %v5265_v16 = vld [vmem:[%s7270_s6 + $0x34] ss:$8 sps:$4 sm:$0xff]  }
 0x232   :  { %3128 = vmatprep.subr.bf16.mxu1 %v4632_v37  ;;  %3169 = vmatprep.subr.bf16.mxu0 %v4634_v38  ;;  %v5268_v37 = vld [vmem:[%s7270_s6 + $0x134] ss:$8 sps:$4 sm:$0xff]   ;;  %v5263_v38 = vld [vmem:[%s7270_s6 + $0x30] ss:$8 sps:$4 sm:$0xff]  }
 0x235   :  { %3129 = vmatpush2.bf16.msra.mxu1 %v4631_v22  ;;  %3170 = vmatpush2.bf16.msra.mxu0 %v4633_v42  ;;  %v5272_v22 = vld [vmem:[%s7270_s6 + $0x120] ss:$8 sps:$4 sm:$0xff]   ;;  %v5277_v42 = vld [vmem:[%s7270_s6 + $0x14] ss:$8 sps:$4 sm:$0xff]  }
 0x236   :  { %3130 = vmatprep.subr.bf16.mxu1 %v4624_v43  ;;  %3171 = vmatprep.subr.bf16.mxu0 %v4626_v44  ;;  %v5280_v43 = vld [vmem:[%s7270_s6 + $0x114] ss:$8 sps:$4 sm:$0xff]   ;;  %v5275_v44 = vld [vmem:[%s7270_s6 + $0x10] ss:$8 sps:$4 sm:$0xff]  }
 0x239   :  { %3131 = vmatpush2.bf16.msra.mxu1 %v4623_v27  ;;  %3172 = vmatpush2.bf16.msra.mxu0 %v4625_v49  ;;  %v5284_v27 = vld [vmem:[%s7270_s6 + $0x100] ss:$8 sps:$4 sm:$0xff]   ;;  %v5289_v49 = vld [vmem:[%s7270_s6 + $0xf4] ss:$8 sps:$4 sm:$0xff]  }
 0x23a   :  { %3132 = vmatprep.subr.bf16.mxu1 %v4616_v50  ;;  %3173 = vmatprep.subr.bf16.mxu0 %v4618_v51  ;;  %v5292_v50 = vld [vmem:[%s7270_s6 + $0x1f4] ss:$8 sps:$4 sm:$0xff]   ;;  %v5287_v51 = vld [vmem:[%s7270_s6 + $0xf0] ss:$8 sps:$4 sm:$0xff]  }
 0x23d   :  { %3133 = vmatpush2.bf16.msra.mxu1 %v4615_v56  ;;  %3174 = vmatpush2.bf16.msra.mxu0 %v4617_v57  ;;  %v5296_v56 = vld [vmem:[%s7270_s6 + $0x1e0] ss:$8 sps:$4 sm:$0xff]   ;;  %v5301_v57 = vld [vmem:[%s7270_s6 + $0xd4] ss:$8 sps:$4 sm:$0xff]  }
 0x23e   :  { %3134 = vmatprep.subr.bf16.mxu1 %v4608_v58  ;;  %3175 = vmatprep.subr.bf16.mxu0 %v4610_v59  ;;  %v5304_v58 = vld [vmem:[%s7270_s6 + $0x1d4] ss:$8 sps:$4 sm:$0xff]   ;;  %v5299_v59 = vld [vmem:[%s7270_s6 + $0xd0] ss:$8 sps:$4 sm:$0xff]  }
 0x241   :  { %3135 = vmatpush2.bf16.msra.mxu1 %v4607_v0  ;;  %3176 = vmatpush2.bf16.msra.mxu0 %v4609_v1  ;;  %v5308_v0 = vld [vmem:[%s7270_s6 + $0x1c0] ss:$8 sps:$4 sm:$0xff]   ;;  %v5313_v1 = vld [vmem:[%s7270_s6 + $0xb4] ss:$8 sps:$4 sm:$0xff]  }
 0x242   :  { %3136 = vmatprep.subr.bf16.mxu1 %v4600_v2  ;;  %3177 = vmatprep.subr.bf16.mxu0 %v4602_v3  ;;  %v5316_v2 = vld [vmem:[%s7270_s6 + $0x1b4] ss:$8 sps:$4 sm:$0xff]   ;;  %v5311_v3 = vld [vmem:[%s7270_s6 + $0xb0] ss:$8 sps:$4 sm:$0xff]  }
 0x245   :  { %3137 = vmatpush2.bf16.msra.mxu1 %v4599_v8  ;;  %3178 = vmatpush2.bf16.msra.mxu0 %v4601_v9  ;;  %v5320_v8 = vld [vmem:[%s7270_s6 + $0x1a0] ss:$8 sps:$4 sm:$0xff]   ;;  %v5325_v9 = vld [vmem:[%s7270_s6 + $0x94] ss:$8 sps:$4 sm:$0xff]  }
 0x246   :  { %3138 = vmatprep.subr.bf16.mxu1 %v4592_v10  ;;  %3179 = vmatprep.subr.bf16.mxu0 %v4594_v11  ;;  %v5328_v10 = vld [vmem:[%s7270_s6 + $0x194] ss:$8 sps:$4 sm:$0xff]   ;;  %v5323_v11 = vld [vmem:[%s7270_s6 + $0x90] ss:$8 sps:$4 sm:$0xff]  }
 0x249   :  { %3139 = vmatpush2.bf16.msra.mxu1 %v4591_v12  ;;  %3180 = vmatpush2.bf16.msra.mxu0 %v4593_v13  ;;  %v5326_v12 = vld [vmem:[%s7270_s6 + $0x190] ss:$8 sps:$4 sm:$0xff]   ;;  %v5331_v13 = vld [vmem:[%s7270_s6 + $0x84] ss:$8 sps:$4 sm:$0xff]  }
 0x24a   :  { %4034 = vmatprep.subr.bf16.mxu1 %v5241_v14  ;;  %4075 = vmatprep.subr.bf16.mxu0 %v5244_v15  ;;  %v5334_v14 = vld [vmem:[%s7270_s6 + $0x184] ss:$8 sps:$4 sm:$0xff]   ;;  %v5329_v15 = vld [vmem:[%s7270_s6 + $0x80] ss:$8 sps:$4 sm:$0xff]  }
 0x24c   :  { %3141 = vmatmul.mubr.bf16.vlgmr.msra.gmra.mxu1 %v6655_v23  ;;  %3182 = vmatmul.mubr.bf16.vlgmr.msra.gmra.mxu0 %v6655_v23  ;;  %v5256_v23 = vld [vmem:[%s7270_s6 + $0x154] ss:$8 sps:$4 sm:$0xff]  }
 0x24d   :  { %4035 = vmatpush1.bf16.msra.mxu1 %v5239_v18  ;;  %4076 = vmatpush1.bf16.msra.mxu0 %v5242_v19  ;;  %v5332_v18 = vld [vmem:[%s7270_s6 + $0x180] ss:$8 sps:$4 sm:$0xff]   ;;  %v5337_v19 = vld [vmem:[%s7270_s6 + $0x274] ss:$8 sps:$4 sm:$0xff]  }
 0x24e   :  { %4036 = vmatprep.subr.bf16.mxu1 %v5247_v17  ;;  %4077 = vmatprep.subr.bf16.mxu0 %v5250_v25  ;;  %v5340_v17 = vld [vmem:[%s7270_s6 + $0x374] ss:$8 sps:$4 sm:$0xff]   ;;  %v2356_v25 = vsub.s32 2, %v6290_v20 }
 0x251   :  { %4037 = vmatpush1.bf16.msra.mxu1 %v5245_v28  ;;  %4078 = vmatpush1.bf16.msra.mxu0 %v5248_v29  ;;  %v7031_v28 = vld [vmem:[%s7271_s4] sm:$0xff]  ;;  %v2360_v29 = vsub.s32 3, %v6290_v20 }
 0x252   :  { %4038 = vmatprep.subr.bf16.mxu1 %v5253_v21  ;;  %4079 = vmatprep.subr.bf16.mxu0 %v5256_v23  ;;  %v3190_v21 = vld [vmem:[%s7272_s5] sm:$0xff]  ;;  %v3191_v23 = vld [vmem:[%s7272_s5 + $0x8] sm:$0xff] }
 0x255   :  { %4039 = vmatpush1.bf16.msra.mxu1 %v5251_v31  ;;  %4080 = vmatpush1.bf16.msra.mxu0 %v5254_v32  ;;  %v2349_v31 = vrot.slane %v7031_v28, %v6305_v26  ;;  %v2357_v32 = vrot.slane %v7031_v28, %v2356_v25  ;;  %v5373_v25 = vld [vmem:[%s7270_s6 + $0x214] ss:$8 sps:$4 sm:$0xff]  }
 0x256   :  { %4040 = vmatprep.subr.bf16.mxu1 %v5259_v33  ;;  %4081 = vmatprep.subr.bf16.mxu0 %v5262_v34  ;;  %v3194_v33 = vunpack.c.l.bf16 %v3190_v21  ;;  %v3196_v34 = vunpack.c.l.bf16 %v3191_v23 }
 0x259   :  { %4041 = vmatpush1.bf16.msra.mxu1 %v5257_v35  ;;  %4082 = vmatpush1.bf16.msra.mxu0 %v5260_v36  ;;  %v2353_v35 = vrot.slane %v7031_v28, %v6322_v30  ;;  %v2361_v36 = vrot.slane %v7031_v28, %v2360_v29  ;;  %v5376_v29 = vld [vmem:[%s7270_s6 + $0x314] ss:$8 sps:$4 sm:$0xff]  }
 0x25a   :  { %4042 = vmatprep.subr.bf16.mxu1 %v5265_v16  ;;  %4083 = vmatprep.subr.bf16.mxu0 %v5268_v37 }
 0x25d   :  { %4043 = vmatpush1.bf16.msra.mxu1 %v5263_v38  ;;  %4084 = vmatpush1.bf16.msra.mxu0 %v5266_v39 }
 0x25e   :  { %4044 = vmatprep.subr.bf16.mxu1 %v5271_v24  ;;  %4085 = vmatprep.subr.bf16.mxu0 %v5274_v40  ;;  %v3195_v24 = vunpack.c.h.bf16 %v3190_v21  ;;  %v3197_v40 = vunpack.c.h.bf16 %v3191_v23  ;;  %v5371_v21 = vld [vmem:[%s7270_s6 + $0x210] ss:$8 sps:$4 sm:$0xff]  }
 0x25f   :  { %v5374_v23 = vld [vmem:[%s7270_s6 + $0x310] ss:$8 sps:$4 sm:$0xff]  }
 0x261   :  { %4045 = vmatpush1.bf16.msra.mxu1 %v5269_v41  ;;  %4086 = vmatpush1.bf16.msra.mxu0 %v5272_v22 }
 0x262   :  { %4046 = vmatprep.subr.bf16.mxu1 %v5277_v42  ;;  %4087 = vmatprep.subr.bf16.mxu0 %v5280_v43 }
 0x265   :  { %4047 = vmatpush1.bf16.msra.mxu1 %v5275_v44  ;;  %4088 = vmatpush1.bf16.msra.mxu0 %v5278_v45 }
 0x266   :  { %4048 = vmatprep.subr.bf16.mxu1 %v5283_v46  ;;  %4089 = vmatprep.subr.bf16.mxu0 %v5286_v47 }
 0x269   :  { %4049 = vmatpush1.bf16.msra.mxu1 %v5281_v48  ;;  %4090 = vmatpush1.bf16.msra.mxu0 %v5284_v27 }
 0x26a   :  { %4050 = vmatprep.subr.bf16.mxu1 %v5289_v49  ;;  %4091 = vmatprep.subr.bf16.mxu0 %v5292_v50 }
 0x26d   :  { %4051 = vmatpush2.bf16.msra.mxu1 %v5287_v51  ;;  %4092 = vmatpush2.bf16.msra.mxu0 %v5290_v52 }
 0x26e   :  { %4052 = vmatprep.subr.bf16.mxu1 %v5295_v53  ;;  %4093 = vmatprep.subr.bf16.mxu0 %v5298_v54 }
 0x271   :  { %4053 = vmatpush2.bf16.msra.mxu1 %v5293_v55  ;;  %4094 = vmatpush2.bf16.msra.mxu0 %v5296_v56 }
 0x272   :  { %4054 = vmatprep.subr.bf16.mxu1 %v5301_v57  ;;  %4095 = vmatprep.subr.bf16.mxu0 %v5304_v58 }
 0x275   :  { %4055 = vmatpush2.bf16.msra.mxu1 %v5299_v59  ;;  %4096 = vmatpush2.bf16.msra.mxu0 %v5302_v60  ;;  %v5335_v59 = vld [vmem:[%s7270_s6 + $0x270] ss:$8 sps:$4 sm:$0xff]  }
 0x276   :  { %4056 = vmatprep.subr.bf16.mxu1 %v5307_v61  ;;  %4097 = vmatprep.subr.bf16.mxu0 %v5310_v62  ;;  %v5338_v60 = vld [vmem:[%s7270_s6 + $0x370] ss:$8 sps:$4 sm:$0xff]  }
 0x279   :  { %4057 = vmatpush2.bf16.msra.mxu1 %v5305_v63  ;;  %4098 = vmatpush2.bf16.msra.mxu0 %v5308_v0  ;;  %v5343_v63 = vld [vmem:[%s7270_s6 + $0x264] ss:$8 sps:$4 sm:$0xff]  }
 0x27a   :  { %4058 = vmatprep.subr.bf16.mxu1 %v5313_v1  ;;  %4099 = vmatprep.subr.bf16.mxu0 %v5316_v2  ;;  %v5346_v0 = vld [vmem:[%s7270_s6 + $0x364] ss:$8 sps:$4 sm:$0xff]   ;;  %v5341_v1 = vld [vmem:[%s7270_s6 + $0x260] ss:$8 sps:$4 sm:$0xff]  }
 0x27b   :  { %v5344_v2 = vld [vmem:[%s7270_s6 + $0x360] ss:$8 sps:$4 sm:$0xff]  }
 0x27d   :  { %4059 = vmatpush2.bf16.msra.mxu1 %v5311_v3  ;;  %4100 = vmatpush2.bf16.msra.mxu0 %v5314_v4  ;;  %v5349_v3 = vld [vmem:[%s7270_s6 + $0x254] ss:$8 sps:$4 sm:$0xff]  }
 0x27e   :  { %4060 = vmatprep.subr.bf16.mxu1 %v5319_v5  ;;  %4101 = vmatprep.subr.bf16.mxu0 %v5322_v6  ;;  %v5352_v4 = vld [vmem:[%s7270_s6 + $0x354] ss:$8 sps:$4 sm:$0xff]   ;;  %v5347_v5 = vld [vmem:[%s7270_s6 + $0x250] ss:$8 sps:$4 sm:$0xff]  }
 0x27f   :  { %v5350_v6 = vld [vmem:[%s7270_s6 + $0x350] ss:$8 sps:$4 sm:$0xff]  }
 0x281   :  { %4061 = vmatpush2.bf16.msra.mxu1 %v5317_v7  ;;  %4102 = vmatpush2.bf16.msra.mxu0 %v5320_v8  ;;  %v5355_v7 = vld [vmem:[%s7270_s6 + $0x244] ss:$8 sps:$4 sm:$0xff]  }
 0x282   :  { %4062 = vmatprep.subr.bf16.mxu1 %v5325_v9  ;;  %4103 = vmatprep.subr.bf16.mxu0 %v5328_v10  ;;  %v5358_v8 = vld [vmem:[%s7270_s6 + $0x344] ss:$8 sps:$4 sm:$0xff]   ;;  %v5353_v9 = vld [vmem:[%s7270_s6 + $0x240] ss:$8 sps:$4 sm:$0xff]  }
 0x283   :  { %v5356_v10 = vld [vmem:[%s7270_s6 + $0x340] ss:$8 sps:$4 sm:$0xff]  }
 0x285   :  { %4063 = vmatpush2.bf16.msra.mxu1 %v5323_v11  ;;  %4104 = vmatpush2.bf16.msra.mxu0 %v5326_v12  ;;  %v5361_v11 = vld [vmem:[%s7270_s6 + $0x234] ss:$8 sps:$4 sm:$0xff]  }
 0x286   :  { %4064 = vmatprep.subr.bf16.mxu1 %v5331_v13  ;;  %4105 = vmatprep.subr.bf16.mxu0 %v5334_v14  ;;  %v5364_v12 = vld [vmem:[%s7270_s6 + $0x334] ss:$8 sps:$4 sm:$0xff]   ;;  %v5359_v13 = vld [vmem:[%s7270_s6 + $0x230] ss:$8 sps:$4 sm:$0xff]  }
 0x287   :  { %v5362_v14 = vld [vmem:[%s7270_s6 + $0x330] ss:$8 sps:$4 sm:$0xff]  }
 0x289   :  { %4065 = vmatpush2.bf16.msra.mxu1 %v5329_v15  ;;  %4106 = vmatpush2.bf16.msra.mxu0 %v5332_v18  ;;  %v5367_v15 = vld [vmem:[%s7270_s6 + $0x224] ss:$8 sps:$4 sm:$0xff]  }
 0x28a   :  { %4116 = vmatprep.subr.bf16.mxu1 %v5337_v19  ;;  %4157 = vmatprep.subr.bf16.mxu0 %v5340_v17  ;;  %v5370_v18 = vld [vmem:[%s7270_s6 + $0x324] ss:$8 sps:$4 sm:$0xff]   ;;  %v5365_v19 = vld [vmem:[%s7270_s6 + $0x220] ss:$8 sps:$4 sm:$0xff]  }
 0x28b   :  { %v5368_v17 = vld [vmem:[%s7270_s6 + $0x320] ss:$8 sps:$4 sm:$0xff]  }
 0x2cc   :  { %v3060_v16 = vpop.f32.mrf.mxu1  ;;  %v3101_v37 = vpop.f32.mrf.mxu0 }
 0x2cd   :  { %v3061_v38 = vadd.f32 %v3060_v16, %v2349_v31  ;;  %v3102_v39 = vadd.f32 %v3101_v37, %v2357_v32  ;;  %v5379_v31 = vld [vmem:[%s7270_s6 + $0x204] ss:$8 sps:$4 sm:$0xff]   ;;  %v5383_v16 = vld [vmem:[%s7270_s6 + $0x2f0] ss:$8 sps:$4 sm:$0xff]  }
 0x2ce   :  { %v3062_v41 = vpop.f32.mrf.mxu1  ;;  %v3103_v22 = vpop.f32.mrf.mxu0  ;;  %v5382_v32 = vld [vmem:[%s7270_s6 + $0x304] ss:$8 sps:$4 sm:$0xff]   ;;  %v5386_v37 = vld [vmem:[%s7270_s6 + $0x3f0] ss:$8 sps:$4 sm:$0xff]  }
 0x2cf   :  { %v3202_v42 = vadd.f32 %v3194_v33, %v3061_v38  ;;  %v3204_v43 = vadd.f32 %v3196_v34, %v3102_v39  ;;  %v3063_v44 = vadd.f32 %v3062_v41, %v2353_v35  ;;  %v3104_v45 = vadd.f32 %v3103_v22, %v2361_v36  ;;  %v5377_v33 = vld [vmem:[%s7270_s6 + $0x200] ss:$8 sps:$4 sm:$0xff]   ;;  %v5385_v35 = vld [vmem:[%s7270_s6 + $0x2f4] ss:$8 sps:$4 sm:$0xff]   ;;  %v5391_v38 = vld [vmem:[%s7270_s6 + $0x2e4] ss:$8 sps:$4 sm:$0xff]  }
 0x2d0   :  { %v3064_v46 = vpop.f32.mrf.mxu1  ;;  %v3105_v47 = vpop.f32.mrf.mxu0  ;;  %v5380_v34 = vld [vmem:[%s7270_s6 + $0x300] ss:$8 sps:$4 sm:$0xff]   ;;  %v5388_v36 = vld [vmem:[%s7270_s6 + $0x3f4] ss:$8 sps:$4 sm:$0xff]   ;;  %v5394_v39 = vld [vmem:[%s7270_s6 + $0x3e4] ss:$8 sps:$4 sm:$0xff]  }
 0x2d1   :  { %v3203_v48 = vadd.f32 %v3195_v24, %v3063_v44  ;;  %v3205_v27 = vadd.f32 %v3197_v40, %v3104_v45  ;;  %v3210_v49 = vmax.f32 %v3202_v42, 0.0  ;;  %v3212_v50 = vmax.f32 %v3204_v43, 0.0  ;;  %v5389_v24 = vld [vmem:[%s7270_s6 + $0x2e0] ss:$8 sps:$4 sm:$0xff]   ;;  %v5397_v41 = vld [vmem:[%s7270_s6 + $0x2d4] ss:$8 sps:$4 sm:$0xff]  }
 0x2d2   :  { %v3065_v51 = vpop.f32.mrf.mxu1  ;;  %v3106_v52 = vpop.f32.mrf.mxu0  ;;  %v5392_v40 = vld [vmem:[%s7270_s6 + $0x3e0] ss:$8 sps:$4 sm:$0xff]   ;;  %v5400_v22 = vld [vmem:[%s7270_s6 + $0x3d4] ss:$8 sps:$4 sm:$0xff]   ;;  %v5395_v42 = vld [vmem:[%s7270_s6 + $0x2d0] ss:$8 sps:$4 sm:$0xff]  }
 0x2d3   :  { %v3211_v53 = vmax.f32 %v3203_v48, 0.0  ;;  %v3213_v54 = vmax.f32 %v3205_v27, 0.0  ;;  %v3218_v61 = vpack.c.bf16 %v3210_v49, %v3210_v49  ;;  %v3220_v62 = vpack.c.bf16 %v3212_v50, %v3212_v50  ;;  %v5398_v43 = vld [vmem:[%s7270_s6 + $0x3d0] ss:$8 sps:$4 sm:$0xff]   ;;  %v5403_v44 = vld [vmem:[%s7270_s6 + $0x2c4] ss:$8 sps:$4 sm:$0xff]  }
 0x2d4   :  { %v5406_v45 = vld [vmem:[%s7270_s6 + $0x3c4] ss:$8 sps:$4 sm:$0xff]   ;;  %v5401_v46 = vld [vmem:[%s7270_s6 + $0x2c0] ss:$8 sps:$4 sm:$0xff]   ;;  %v5409_v48 = vld [vmem:[%s7270_s6 + $0x2b4] ss:$8 sps:$4 sm:$0xff]  }
 0x2d5   :  { %v4784_v55 = vpack.c.bf16 %v3211_v53, %v3210_v49  ;;  %v4785_v56 = vpack.c.bf16 %v3213_v54, %v3212_v50  ;;  %v3219_v57 = vpack.c.bf16 %v3211_v53, %v3211_v53  ;;  %v3221_v58 = vpack.c.bf16 %v3213_v54, %v3213_v54  ;;  %v5404_v47 = vld [vmem:[%s7270_s6 + $0x3c0] ss:$8 sps:$4 sm:$0xff]   ;;  %v5412_v27 = vld [vmem:[%s7270_s6 + $0x3b4] ss:$8 sps:$4 sm:$0xff]   ;;  %v5407_v49 = vld [vmem:[%s7270_s6 + $0x2b0] ss:$8 sps:$4 sm:$0xff]  }
 0x2d6   :  { %v5410_v50 = vld [vmem:[%s7270_s6 + $0x3b0] ss:$8 sps:$4 sm:$0xff]   ;;  %v2364_v51 = vsub.s32 4, %v6290_v20  ;;  %v2372_v52 = vsub.s32 6, %v6290_v20  ;;  %v5415_v53 = vld [vmem:[%s7270_s6 + $0x2a4] ss:$8 sps:$4 sm:$0xff]  }
 0x2d7   :  { %3250 = vst [vmem:[%s7273_s8] sm:$0xff] %v4784_v55  ;;  %3251 = vst [vmem:[%s7273_s8 + $0x8] sm:$0xff] %v4785_v56  ;;  %4066 = vmatprep.mubr.bf16.mxu1 %v3219_v57  ;;  %4107 = vmatprep.mubr.bf16.mxu0 %v3221_v58  ;;  %v5418_v54 = vld [vmem:[%s7270_s6 + $0x3a4] ss:$8 sps:$4 sm:$0xff]   ;;  %v2368_v55 = vsub.s32 5, %v6290_v20  ;;  %v2376_v56 = vsub.s32 7, %v6290_v20  ;;  %v3192_v57 = vld [vmem:[%s7272_s5 + $0x10] sm:$0xff] }
 0x2d8   :  { %4067 = vmatmul.mubr.bf16.vlgmr.msra.gmra.mxu1 %v3218_v61  ;;  %4108 = vmatmul.mubr.bf16.vlgmr.msra.gmra.mxu0 %v3220_v62  ;;  %v3193_v58 = vld [vmem:[%s7272_s5 + $0x18] sm:$0xff]  ;;  %v5413_v61 = vld [vmem:[%s7270_s6 + $0x2a0] ss:$8 sps:$4 sm:$0xff]  }
 0x2d9   :  { %4117 = vmatpush1.bf16.msra.mxu1 %v5335_v59  ;;  %4158 = vmatpush1.bf16.msra.mxu0 %v5338_v60  ;;  %v2365_v59 = vrot.slane %v7031_v28, %v2364_v51  ;;  %v2373_v60 = vrot.slane %v7031_v28, %v2372_v52  ;;  %v5416_v20 = vld [vmem:[%s7270_s6 + $0x3a0] ss:$8 sps:$4 sm:$0xff]   ;;  %v5421_v62 = vld [vmem:[%s7270_s6 + $0x294] ss:$8 sps:$4 sm:$0xff]  }
 0x2da   :  { %4118 = vmatprep.subr.bf16.mxu1 %v5343_v63  ;;  %4159 = vmatprep.subr.bf16.mxu0 %v5346_v0  ;;  %v5424_v63 = vld [vmem:[%s7270_s6 + $0x394] ss:$8 sps:$4 sm:$0xff]   ;;  %v3198_v0 = vunpack.c.l.bf16 %v3192_v57 }
 0x2dd   :  { %4119 = vmatpush1.bf16.msra.mxu1 %v5341_v1  ;;  %4160 = vmatpush1.bf16.msra.mxu0 %v5344_v2  ;;  %v3200_v1 = vunpack.c.l.bf16 %v3193_v58  ;;  %v2369_v2 = vrot.slane %v7031_v28, %v2368_v55 }
 0x2de   :  { %4120 = vmatprep.subr.bf16.mxu1 %v5349_v3  ;;  %4161 = vmatprep.subr.bf16.mxu0 %v5352_v4  ;;  %v2377_v3 = vrot.slane %v7031_v28, %v2376_v56  ;;  %v5427_v28 = vld [vmem:[%s7270_s6 + $0x284] ss:$8 sps:$4 sm:$0xff]  }
 0x2e1   :  { %4121 = vmatpush1.bf16.msra.mxu1 %v5347_v5  ;;  %4162 = vmatpush1.bf16.msra.mxu0 %v5350_v6 }
 0x2e2   :  { %4122 = vmatprep.subr.bf16.mxu1 %v5355_v7  ;;  %4163 = vmatprep.subr.bf16.mxu0 %v5358_v8  ;;  %v3199_v8 = vunpack.c.h.bf16 %v3192_v57 }
 0x2e5   :  { %4123 = vmatpush1.bf16.msra.mxu1 %v5353_v9  ;;  %4164 = vmatpush1.bf16.msra.mxu0 %v5356_v10  ;;  %v3201_v9 = vunpack.c.h.bf16 %v3193_v58  ;;  %v5419_v10 = vld [vmem:[%s7270_s6 + $0x290] ss:$8 sps:$4 sm:$0xff]  }
 0x2e6   :  { %4124 = vmatprep.subr.bf16.mxu1 %v5361_v11  ;;  %4165 = vmatprep.subr.bf16.mxu0 %v5364_v12  ;;  %v5422_v11 = vld [vmem:[%s7270_s6 + $0x390] ss:$8 sps:$4 sm:$0xff]  }
 0x2e9   :  { %4125 = vmatpush1.bf16.msra.mxu1 %v5359_v13  ;;  %4166 = vmatpush1.bf16.msra.mxu0 %v5362_v14  ;;  %v5430_v14 = vld [vmem:[%s7270_s6 + $0x384] ss:$8 sps:$4 sm:$0xff]  }
 0x2ea   :  { %4126 = vmatprep.subr.bf16.mxu1 %v5367_v15  ;;  %4167 = vmatprep.subr.bf16.mxu0 %v5370_v18 }
 0x2ed   :  { %4127 = vmatpush1.bf16.msra.mxu1 %v5365_v19  ;;  %4168 = vmatpush1.bf16.msra.mxu0 %v5368_v17 }
 0x2ee   :  { %4128 = vmatprep.subr.bf16.mxu1 %v5373_v25  ;;  %4169 = vmatprep.subr.bf16.mxu0 %v5376_v29 }
 0x2f1   :  { %4129 = vmatpush1.bf16.msra.mxu1 %v5371_v21  ;;  %4170 = vmatpush1.bf16.msra.mxu0 %v5374_v23 }
 0x2f2   :  { %4130 = vmatprep.subr.bf16.mxu1 %v5379_v31  ;;  %4171 = vmatprep.subr.bf16.mxu0 %v5382_v32  ;;  %v5425_v31 = vld [vmem:[%s7270_s6 + $0x280] ss:$8 sps:$4 sm:$0xff]  }
 0x2f3   :  { %v5428_v32 = vld [vmem:[%s7270_s6 + $0x380] ss:$8 sps:$4 sm:$0xff]  }
 0x2f5   :  { %4131 = vmatpush1.bf16.msra.mxu1 %v5377_v33  ;;  %4172 = vmatpush1.bf16.msra.mxu0 %v5380_v34 }
 0x2f6   :  { %4132 = vmatprep.subr.bf16.mxu1 %v5385_v35  ;;  %4173 = vmatprep.subr.bf16.mxu0 %v5388_v36 }
 0x2f9   :  { %4133 = vmatpush2.bf16.msra.mxu1 %v5383_v16  ;;  %4174 = vmatpush2.bf16.msra.mxu0 %v5386_v37 }
 0x2fa   :  { %4134 = vmatprep.subr.bf16.mxu1 %v5391_v38  ;;  %4175 = vmatprep.subr.bf16.mxu0 %v5394_v39 }
 0x2fd   :  { %4135 = vmatpush2.bf16.msra.mxu1 %v5389_v24  ;;  %4176 = vmatpush2.bf16.msra.mxu0 %v5392_v40 }
 0x2fe   :  { %4136 = vmatprep.subr.bf16.mxu1 %v5397_v41  ;;  %4177 = vmatprep.subr.bf16.mxu0 %v5400_v22 }
 0x301   :  { %4137 = vmatpush2.bf16.msra.mxu1 %v5395_v42  ;;  %4178 = vmatpush2.bf16.msra.mxu0 %v5398_v43 }
 0x302   :  { %4138 = vmatprep.subr.bf16.mxu1 %v5403_v44  ;;  %4179 = vmatprep.subr.bf16.mxu0 %v5406_v45 }
 0x305   :  { %4139 = vmatpush2.bf16.msra.mxu1 %v5401_v46  ;;  %4180 = vmatpush2.bf16.msra.mxu0 %v5404_v47 }
 0x306   :  { %4140 = vmatprep.subr.bf16.mxu1 %v5409_v48  ;;  %4181 = vmatprep.subr.bf16.mxu0 %v5412_v27 }
 0x309   :  { %4141 = vmatpush2.bf16.msra.mxu1 %v5407_v49  ;;  %4182 = vmatpush2.bf16.msra.mxu0 %v5410_v50  ;;  %v3382_v49 = vld [vmem:[%s7274_s7] sm:$0x3] }
 0x30a   :  { %4142 = vmatprep.subr.bf16.mxu1 %v5415_v53  ;;  %4183 = vmatprep.subr.bf16.mxu0 %v5418_v54  ;;  %v3387_v50 = vrot.slane %v3382_v49, %v6305_v26  ;;  %v3391_v51 = vrot.slane %v3382_v49, %v6322_v30 }
 0x30c   :  { %v3142_v4 = vpop.f32.mrf.mxu1  ;;  %v3183_v5 = vpop.f32.mrf.mxu0 }
 0x30d   :  { %v3143_v6 = vadd.f32 %v3142_v4, %v2365_v59  ;;  %v3184_v7 = vadd.f32 %v3183_v5, %v2373_v60  ;;  %4143 = vmatpush2.bf16.msra.mxu1 %v5413_v61  ;;  %4184 = vmatpush2.bf16.msra.mxu0 %v5416_v20 }
 0x30e   :  { %v3144_v12 = vpop.f32.mrf.mxu1  ;;  %v3185_v13 = vpop.f32.mrf.mxu0  ;;  %4144 = vmatprep.subr.bf16.mxu1 %v5421_v62  ;;  %4185 = vmatprep.subr.bf16.mxu0 %v5424_v63 }
 0x30f   :  { %v3206_v15 = vadd.f32 %v3198_v0, %v3143_v6  ;;  %v3208_v18 = vadd.f32 %v3200_v1, %v3184_v7  ;;  %v3145_v19 = vadd.f32 %v3144_v12, %v2369_v2  ;;  %v3186_v17 = vadd.f32 %v3185_v13, %v2377_v3 }
 0x310   :  { %v3146_v25 = vpop.f32.mrf.mxu1  ;;  %v3187_v29 = vpop.f32.mrf.mxu0 }
 0x311   :  { %v3207_v21 = vadd.f32 %v3199_v8, %v3145_v19  ;;  %v3209_v23 = vadd.f32 %v3201_v9, %v3186_v17  ;;  %4145 = vmatpush2.bf16.msra.mxu1 %v5419_v10  ;;  %4186 = vmatpush2.bf16.msra.mxu0 %v5422_v11  ;;  %v3214_v33 = vmax.f32 %v3206_v15, 0.0  ;;  %v3216_v36 = vmax.f32 %v3208_v18, 0.0 }
 0x312   :  { %v3147_v34 = vpop.f32.mrf.mxu1  ;;  %v3188_v35 = vpop.f32.mrf.mxu0  ;;  %4146 = vmatprep.subr.bf16.mxu1 %v5427_v28  ;;  %4187 = vmatprep.subr.bf16.mxu0 %v5430_v14 }
 0x313   :  { %v3215_v16 = vmax.f32 %v3207_v21, 0.0  ;;  %v3217_v37 = vmax.f32 %v3209_v23, 0.0  ;;  %v3222_v40 = vpack.c.bf16 %v3214_v33, %v3214_v33  ;;  %v3224_v22 = vpack.c.bf16 %v3216_v36, %v3216_v36 }
 0x315   :  { %v4786_v38 = vpack.c.bf16 %v3215_v16, %v3214_v33  ;;  %v4787_v39 = vpack.c.bf16 %v3217_v37, %v3216_v36  ;;  %4147 = vmatpush2.bf16.msra.mxu1 %v5425_v31  ;;  %4188 = vmatpush2.bf16.msra.mxu0 %v5428_v32  ;;  %v3223_v24 = vpack.c.bf16 %v3215_v16, %v3215_v16 }
 0x316   :  { %v3225_v41 = vpack.c.bf16 %v3217_v37, %v3217_v37 }
 0x317   :  { %3252 = vst [vmem:[%s7273_s8 + $0x10] sm:$0xff] %v4786_v38  ;;  %3253 = vst [vmem:[%s7273_s8 + $0x18] sm:$0xff] %v4787_v39  ;;  %4148 = vmatprep.mubr.bf16.mxu1 %v3223_v24 }
 0x318   :  { %4189 = vmatprep.mubr.bf16.mxu0 %v3225_v41  ;;  %4149 = vmatmul.mubr.bf16.vlgmr.msra.gmra.mxu1 %v3222_v40 }
 0x319   :  { %4190 = vmatmul.mubr.bf16.vlgmr.msra.gmra.mxu0 %v3224_v22 }
 0x398   :  { %v4068_v42 = vpop.f32.mrf.mxu1  ;;  %v4109_v43 = vpop.f32.mrf.mxu0 }
 0x399   :  { %v4069_v52 = vadd.f32 %v4068_v42, %v3387_v50 }
 0x39a   :  { %v4070_v44 = vpop.f32.mrf.mxu1  ;;  %v4111_v45 = vpop.f32.mrf.mxu0 }
 0x39b   :  { %v4071_v53 = vadd.f32 %v4070_v44, %v3391_v51  ;;  %v4110_v54 = vadd.f32 %v4109_v43, %v4069_v52 }
 0x39c   :  { %v4072_v46 = vpop.f32.mrf.mxu1  ;;  %v4113_v47 = vpop.f32.mrf.mxu0 }
 0x39d   :  { %v4112_v56 = vadd.f32 %v4111_v45, %v4071_v53 }
 0x39e   :  { %v4073_v48 = vpop.f32.mrf.mxu1  ;;  %v4114_v27 = vpop.f32.mrf.mxu0 }
 0x3d8   :  { %v4150_v55 = vpop.f32.mrf.mxu1 }
 0x3d9   :  { %v4151_v57 = vadd.f32 %v4150_v55, %v4110_v54  ;;  %v4191_v58 = vpop.f32.mrf.mxu0 }
 0x3da   :  { %v4152_v59 = vpop.f32.mrf.mxu1 }
 0x3db   :  { %v4192_v60 = vadd.f32 %v4191_v58, %v4151_v57  ;;  %v4153_v61 = vadd.f32 %v4152_v59, %v4112_v56  ;;  %v4193_v20 = vpop.f32.mrf.mxu0 }
 0x3dc   :  { %v4154_v62 = vpop.f32.mrf.mxu1 }
 0x3dd   :  { %v4194_v63 = vadd.f32 %v4193_v20, %v4153_v61  ;;  %v4195_v0 = vpop.f32.mrf.mxu0  ;;  %v4198_v2 = vmax.f32 %v4192_v60, 0.0 }
 0x3de   :  { %v4155_v1 = vpop.f32.mrf.mxu1 }
 0x3df   :  { %v4199_v3 = vmax.f32 %v4194_v63, 0.0  ;;  %v4196_v26 = vpop.f32.mrf.mxu0 }
 0x3e1   :  { %v4788_v4 = vpack.c.bf16 %v4199_v3, %v4198_v2 }
 0x3e3   :  { %4208 = vst [vmem:[%s7275_s9] sm:$0xff] %v4788_v4 }

// kernel: backbone_forward.35
= control target key start
LH: loop header
LB: loop body
LE: loop exit
PB: predicated region body
PF: predicated region fallthrough
CT: control target
= control target key end

     0   :  { %s5560_s1 = inlined_call_operand.vmem [shape: bf16[2304,256], index: 1, kind: input, shape index: {}]   ;;  %s5561_s0 = inlined_call_operand.vmem [shape: bf16[8,2304], index: 0, kind: input, shape index: {}]   ;;  %s5562_s2 = inlined_call_operand.vmem [shape: f32[1,256], index: 2, kind: input, shape index: {}]   ;;  %s5563_s3 = inlined_call_operand.vmem [shape: bf16[256,1024], index: 3, kind: input, shape index: {}]   ;;  %s5564_s4 = inlined_call_operand.vmem [shape: f32[1,1024], index: 4, kind: input, shape index: {}]   ;;  %s5565_s5 = inlined_call_operand.vmem [shape: bf16[8,1024], index: 5, kind: input, shape index: {}]   ;;  %s5566_s6 = inlined_call_operand.vmem [shape: bf16[8,1024], index: 6, kind: output, shape index: {}]  }
   0x1   :  { %v3692_v0 = vld [vmem:[%s5560_s1 + $0x74] ss:$8 sps:$4 sm:$0xff]   ;;  %v3694_v1 = vld [vmem:[%s5560_s1 + $0x70] ss:$8 sps:$4 sm:$0xff]   ;;  %v3698_v4 = vld [vmem:[%s5560_s1 + $0x64] ss:$8 sps:$4 sm:$0xff]  }
   0x2   :  { %1835 = vmatprep.subr.bf16.mxu0 %v3692_v0  ;;  %v3695_v2 = vld [vmem:[%s5560_s1 + $0x174] ss:$8 sps:$4 sm:$0xff]   ;;  %v3697_v3 = vld [vmem:[%s5560_s1 + $0x170] ss:$8 sps:$4 sm:$0xff]   ;;  %v3700_v5 = vld [vmem:[%s5560_s1 + $0x60] ss:$8 sps:$4 sm:$0xff]  }
   0x3   :  { %1836 = vmatpush1.bf16.msra.mxu0 %v3694_v1  ;;  %1876 = vmatprep.subr.bf16.mxu1 %v3695_v2  ;;  %v3701_v6 = vld [vmem:[%s5560_s1 + $0x164] ss:$8 sps:$4 sm:$0xff]   ;;  %v3703_v7 = vld [vmem:[%s5560_s1 + $0x160] ss:$8 sps:$4 sm:$0xff]   ;;  %v3704_v8 = vld [vmem:[%s5560_s1 + $0x54] ss:$8 sps:$4 sm:$0xff]  }
   0x4   :  { %1877 = vmatpush1.bf16.msra.mxu1 %v3697_v3  ;;  %1837 = vmatprep.subr.bf16.mxu0 %v3698_v4  ;;  %v3706_v9 = vld [vmem:[%s5560_s1 + $0x50] ss:$8 sps:$4 sm:$0xff]   ;;  %v3707_v10 = vld [vmem:[%s5560_s1 + $0x154] ss:$8 sps:$4 sm:$0xff]   ;;  %v3710_v11 = vld [vmem:[%s5560_s1 + $0x44] ss:$8 sps:$4 sm:$0xff]  }
   0x5   :  { %1878 = vmatprep.subr.bf16.mxu1 %v3701_v6  ;;  %v3709_v12 = vld [vmem:[%s5560_s1 + $0x150] ss:$8 sps:$4 sm:$0xff]   ;;  %v3713_v13 = vld [vmem:[%s5560_s1 + $0x144] ss:$8 sps:$4 sm:$0xff]   ;;  %v3712_v14 = vld [vmem:[%s5560_s1 + $0x40] ss:$8 sps:$4 sm:$0xff]  }
   0x6   :  { %v3716_v15 = vld [vmem:[%s5560_s1 + $0x34] ss:$8 sps:$4 sm:$0xff]   ;;  %v3715_v16 = vld [vmem:[%s5560_s1 + $0x140] ss:$8 sps:$4 sm:$0xff]   ;;  %v3718_v18 = vld [vmem:[%s5560_s1 + $0x30] ss:$8 sps:$4 sm:$0xff]  }
   0x7   :  { %1838 = vmatpush1.bf16.msra.mxu0 %v3700_v5  ;;  %v3719_v17 = vld [vmem:[%s5560_s1 + $0x134] ss:$8 sps:$4 sm:$0xff]   ;;  %v3722_v19 = vld [vmem:[%s5560_s1 + $0x24] ss:$8 sps:$4 sm:$0xff]   ;;  %v3721_v20 = vld [vmem:[%s5560_s1 + $0x130] ss:$8 sps:$4 sm:$0xff]  }
   0x8   :  { %1839 = vmatprep.subr.bf16.mxu0 %v3704_v8  ;;  %1879 = vmatpush1.bf16.msra.mxu1 %v3703_v7  ;;  %v3725_v21 = vld [vmem:[%s5560_s1 + $0x124] ss:$8 sps:$4 sm:$0xff]   ;;  %v3724_v22 = vld [vmem:[%s5560_s1 + $0x20] ss:$8 sps:$4 sm:$0xff]   ;;  %v3728_v23 = vld [vmem:[%s5560_s1 + $0x14] ss:$8 sps:$4 sm:$0xff]  }
   0x9   :  { %1880 = vmatprep.subr.bf16.mxu1 %v3707_v10  ;;  %v3727_v24 = vld [vmem:[%s5560_s1 + $0x120] ss:$8 sps:$4 sm:$0xff]   ;;  %v3731_v25 = vld [vmem:[%s5560_s1 + $0x114] ss:$8 sps:$4 sm:$0xff]   ;;  %v3730_v26 = vld [vmem:[%s5560_s1 + $0x10] ss:$8 sps:$4 sm:$0xff]  }
   0xa   :  { %v3734_v27 = vld [vmem:[%s5560_s1 + $0x4] ss:$8 sps:$4 sm:$0xff]   ;;  %v3733_v28 = vld [vmem:[%s5560_s1 + $0x110] ss:$8 sps:$4 sm:$0xff]   ;;  %v3736_v30 = vld [vmem:[%s5560_s1] ss:$8 sps:$4 sm:$0xff]  }
   0xb   :  { %1840 = vmatpush1.bf16.msra.mxu0 %v3706_v9  ;;  %v3737_v29 = vld [vmem:[%s5560_s1 + $0x104] ss:$8 sps:$4 sm:$0xff]   ;;  %v3740_v31 = vld [vmem:[%s5560_s1 + $0xf4] ss:$8 sps:$4 sm:$0xff]   ;;  %v3739_v32 = vld [vmem:[%s5560_s1 + $0x100] ss:$8 sps:$4 sm:$0xff]  }
   0xc   :  { %1841 = vmatprep.subr.bf16.mxu0 %v3710_v11  ;;  %1881 = vmatpush1.bf16.msra.mxu1 %v3709_v12  ;;  %v3743_v33 = vld [vmem:[%s5560_s1 + $0x1f4] ss:$8 sps:$4 sm:$0xff]   ;;  %v3742_v34 = vld [vmem:[%s5560_s1 + $0xf0] ss:$8 sps:$4 sm:$0xff]   ;;  %v3746_v35 = vld [vmem:[%s5560_s1 + $0xe4] ss:$8 sps:$4 sm:$0xff]  }
   0xd   :  { %1882 = vmatprep.subr.bf16.mxu1 %v3713_v13  ;;  %v3745_v36 = vld [vmem:[%s5560_s1 + $0x1f0] ss:$8 sps:$4 sm:$0xff]   ;;  %v3749_v37 = vld [vmem:[%s5560_s1 + $0x1e4] ss:$8 sps:$4 sm:$0xff]   ;;  %v3748_v38 = vld [vmem:[%s5560_s1 + $0xe0] ss:$8 sps:$4 sm:$0xff]  }
   0xe   :  { %v3752_v39 = vld [vmem:[%s5560_s1 + $0xd4] ss:$8 sps:$4 sm:$0xff]   ;;  %v3751_v40 = vld [vmem:[%s5560_s1 + $0x1e0] ss:$8 sps:$4 sm:$0xff]   ;;  %v3754_v42 = vld [vmem:[%s5560_s1 + $0xd0] ss:$8 sps:$4 sm:$0xff]  }
   0xf   :  { %1842 = vmatpush1.bf16.msra.mxu0 %v3712_v14  ;;  %v3755_v41 = vld [vmem:[%s5560_s1 + $0x1d4] ss:$8 sps:$4 sm:$0xff]   ;;  %v3758_v43 = vld [vmem:[%s5560_s1 + $0xc4] ss:$8 sps:$4 sm:$0xff]   ;;  %v3757_v44 = vld [vmem:[%s5560_s1 + $0x1d0] ss:$8 sps:$4 sm:$0xff]  }
  0x10   :  { %1843 = vmatprep.subr.bf16.mxu0 %v3716_v15  ;;  %1883 = vmatpush1.bf16.msra.mxu1 %v3715_v16  ;;  %v3761_v45 = vld [vmem:[%s5560_s1 + $0x1c4] ss:$8 sps:$4 sm:$0xff]   ;;  %v3760_v47 = vld [vmem:[%s5560_s1 + $0xc0] ss:$8 sps:$4 sm:$0xff]   ;;  %v3764_v49 = vld [vmem:[%s5560_s1 + $0xb4] ss:$8 sps:$4 sm:$0xff]  }
  0x11   :  { %1884 = vmatprep.subr.bf16.mxu1 %v3719_v17  ;;  %v23_v46 = vld [vmem:[%s5561_s0] sm:$0xff]  ;;  %v24_v50 = vld [vmem:[%s5561_s0 + $0x8] sm:$0xff]  ;;  %v3767_v53 = vld [vmem:[%s5560_s1 + $0x1b4] ss:$8 sps:$4 sm:$0xff]  }
  0x12   :  { %v3251_v48 = vcombine.high %v23_v46, %v23_v46  ;;  %v3763_v51 = vld [vmem:[%s5560_s1 + $0x1c0] ss:$8 sps:$4 sm:$0xff]   ;;  %v3253_v52 = vcombine.high %v24_v50, %v24_v50  ;;  %v3766_v54 = vld [vmem:[%s5560_s1 + $0xb0] ss:$8 sps:$4 sm:$0xff]   ;;  %v3770_v55 = vld [vmem:[%s5560_s1 + $0xa4] ss:$8 sps:$4 sm:$0xff]   ;;  %v3250_v5 = vcombine.low %v23_v46, %v23_v46  ;;  %v3252_v8 = vcombine.low %v24_v50, %v24_v50 }
  0x13   :  { %1844 = vmatpush1.bf16.msra.mxu0 %v3718_v18  ;;  %v3769_v56 = vld [vmem:[%s5560_s1 + $0x1b0] ss:$8 sps:$4 sm:$0xff]   ;;  %v3773_v57 = vld [vmem:[%s5560_s1 + $0x1a4] ss:$8 sps:$4 sm:$0xff]   ;;  %v3772_v58 = vld [vmem:[%s5560_s1 + $0xa0] ss:$8 sps:$4 sm:$0xff]  }
  0x14   :  { %1845 = vmatprep.subr.bf16.mxu0 %v3722_v19  ;;  %1885 = vmatpush1.bf16.msra.mxu1 %v3721_v20  ;;  %v3776_v59 = vld [vmem:[%s5560_s1 + $0x94] ss:$8 sps:$4 sm:$0xff]   ;;  %v3775_v60 = vld [vmem:[%s5560_s1 + $0x1a0] ss:$8 sps:$4 sm:$0xff]   ;;  %v3778_v62 = vld [vmem:[%s5560_s1 + $0x90] ss:$8 sps:$4 sm:$0xff]  }
  0x15   :  { %1886 = vmatprep.subr.bf16.mxu1 %v3725_v21  ;;  %1867 = vmatprep.mubr.bf16.mxu0 %v3251_v48  ;;  %v3779_v61 = vld [vmem:[%s5560_s1 + $0x194] ss:$8 sps:$4 sm:$0xff]   ;;  %v3782_v63 = vld [vmem:[%s5560_s1 + $0x84] ss:$8 sps:$4 sm:$0xff]   ;;  %v3781_v0 = vld [vmem:[%s5560_s1 + $0x190] ss:$8 sps:$4 sm:$0xff]  }
  0x16   :  { %1908 = vmatprep.mubr.bf16.mxu1 %v3253_v52  ;;  %v3785_v1 = vld [vmem:[%s5560_s1 + $0x184] ss:$8 sps:$4 sm:$0xff]   ;;  %v3784_v2 = vld [vmem:[%s5560_s1 + $0x80] ss:$8 sps:$4 sm:$0xff]   ;;  %v3792_v3 = vld [vmem:[%s5560_s1 + $0x274] ss:$8 sps:$4 sm:$0xff]  }
  0x17   :  { %1846 = vmatpush1.bf16.msra.mxu0 %v3724_v22  ;;  %v3789_v4 = vld [vmem:[%s5560_s1 + $0x180] ss:$8 sps:$4 sm:$0xff]   ;;  %v3797_v6 = vld [vmem:[%s5560_s1 + $0x374] ss:$8 sps:$4 sm:$0xff]   ;;  %v3790_v7 = vld [vmem:[%s5560_s1 + $0x270] ss:$8 sps:$4 sm:$0xff]  }
  0x18   :  { %1847 = vmatprep.subr.bf16.mxu0 %v3728_v23  ;;  %1887 = vmatpush1.bf16.msra.mxu1 %v3727_v24  ;;  %v3800_v9 = vld [vmem:[%s5560_s1 + $0x264] ss:$8 sps:$4 sm:$0xff]   ;;  %v3795_v10 = vld [vmem:[%s5560_s1 + $0x370] ss:$8 sps:$4 sm:$0xff]   ;;  %v3798_v12 = vld [vmem:[%s5560_s1 + $0x260] ss:$8 sps:$4 sm:$0xff]  }
  0x19   :  { %1888 = vmatprep.subr.bf16.mxu1 %v3731_v25  ;;  %v3803_v11 = vld [vmem:[%s5560_s1 + $0x364] ss:$8 sps:$4 sm:$0xff]   ;;  %v3806_v13 = vld [vmem:[%s5560_s1 + $0x254] ss:$8 sps:$4 sm:$0xff]   ;;  %v3801_v14 = vld [vmem:[%s5560_s1 + $0x360] ss:$8 sps:$4 sm:$0xff]  }
  0x1a   :  { %v3809_v15 = vld [vmem:[%s5560_s1 + $0x354] ss:$8 sps:$4 sm:$0xff]   ;;  %v3804_v16 = vld [vmem:[%s5560_s1 + $0x250] ss:$8 sps:$4 sm:$0xff]   ;;  %v3812_v17 = vld [vmem:[%s5560_s1 + $0x244] ss:$8 sps:$4 sm:$0xff]  }
  0x1b   :  { %1848 = vmatpush1.bf16.msra.mxu0 %v3730_v26  ;;  %v3807_v18 = vld [vmem:[%s5560_s1 + $0x350] ss:$8 sps:$4 sm:$0xff]   ;;  %v3815_v19 = vld [vmem:[%s5560_s1 + $0x344] ss:$8 sps:$4 sm:$0xff]   ;;  %v3810_v20 = vld [vmem:[%s5560_s1 + $0x240] ss:$8 sps:$4 sm:$0xff]  }
  0x1c   :  { %1849 = vmatprep.subr.bf16.mxu0 %v3734_v27  ;;  %1889 = vmatpush1.bf16.msra.mxu1 %v3733_v28  ;;  %v3818_v21 = vld [vmem:[%s5560_s1 + $0x234] ss:$8 sps:$4 sm:$0xff]   ;;  %v3813_v22 = vld [vmem:[%s5560_s1 + $0x340] ss:$8 sps:$4 sm:$0xff]   ;;  %v3816_v24 = vld [vmem:[%s5560_s1 + $0x230] ss:$8 sps:$4 sm:$0xff]  }
  0x1d   :  { %1890 = vmatprep.subr.bf16.mxu1 %v3737_v29  ;;  %v3821_v23 = vld [vmem:[%s5560_s1 + $0x334] ss:$8 sps:$4 sm:$0xff]   ;;  %v3824_v25 = vld [vmem:[%s5560_s1 + $0x224] ss:$8 sps:$4 sm:$0xff]   ;;  %v3819_v26 = vld [vmem:[%s5560_s1 + $0x330] ss:$8 sps:$4 sm:$0xff]  }
  0x1e   :  { %v3827_v27 = vld [vmem:[%s5560_s1 + $0x324] ss:$8 sps:$4 sm:$0xff]   ;;  %v3822_v28 = vld [vmem:[%s5560_s1 + $0x220] ss:$8 sps:$4 sm:$0xff]   ;;  %v3830_v29 = vld [vmem:[%s5560_s1 + $0x214] ss:$8 sps:$4 sm:$0xff]  }
  0x1f   :  { %1850 = vmatpush1.bf16.msra.mxu0 %v3736_v30  ;;  %v3825_v30 = vld [vmem:[%s5560_s1 + $0x320] ss:$8 sps:$4 sm:$0xff]   ;;  %v3843_v46 = vld [vmem:[%s5560_s1 + $0x3f0] ss:$8 sps:$4 sm:$0xff]  }
  0x20   :  { %1851 = vmatprep.subr.bf16.mxu0 %v3740_v31  ;;  %1891 = vmatpush1.bf16.msra.mxu1 %v3739_v32  ;;  %v3833_v31 = vld [vmem:[%s5560_s1 + $0x314] ss:$8 sps:$4 sm:$0xff]   ;;  %v3846_v48 = vld [vmem:[%s5560_s1 + $0x2e0] ss:$8 sps:$4 sm:$0xff]   ;;  %v3852_v52 = vld [vmem:[%s5560_s1 + $0x2d0] ss:$8 sps:$4 sm:$0xff]  }
  0x21   :  { %1892 = vmatprep.subr.bf16.mxu1 %v3743_v33  ;;  %v4456_v32 = vld [vmem:[%s5561_s0 + $0x10] sm:$0xff]  ;;  %v3849_v50 = vld [vmem:[%s5560_s1 + $0x3e0] ss:$8 sps:$4 sm:$0xff]  }
  0x22   :  { %v3828_v33 = vld [vmem:[%s5560_s1 + $0x210] ss:$8 sps:$4 sm:$0xff]  }
  0x23   :  { %1852 = vmatpush2.bf16.msra.mxu0 %v3742_v34  ;;  %v3255_v34 = vcombine.high %v4456_v32, %v4456_v32 }
  0x24   :  { %1853 = vmatprep.subr.bf16.mxu0 %v3746_v35  ;;  %1893 = vmatpush2.bf16.msra.mxu1 %v3745_v36  ;;  %v4466_v35 = vld [vmem:[%s5561_s0 + $0x18] sm:$0xff]  ;;  %v3836_v36 = vld [vmem:[%s5560_s1 + $0x204] ss:$8 sps:$4 sm:$0xff]  }
  0x25   :  { %1894 = vmatprep.subr.bf16.mxu1 %v3749_v37  ;;  %v3257_v37 = vcombine.high %v4466_v35, %v4466_v35 }
  0x27   :  { %1854 = vmatpush2.bf16.msra.mxu0 %v3748_v38  ;;  %v3831_v38 = vld [vmem:[%s5560_s1 + $0x310] ss:$8 sps:$4 sm:$0xff]  }
  0x28   :  { %1855 = vmatprep.subr.bf16.mxu0 %v3752_v39  ;;  %1895 = vmatpush2.bf16.msra.mxu1 %v3751_v40  ;;  %v3839_v39 = vld [vmem:[%s5560_s1 + $0x304] ss:$8 sps:$4 sm:$0xff]   ;;  %v3834_v40 = vld [vmem:[%s5560_s1 + $0x200] ss:$8 sps:$4 sm:$0xff]  }
  0x29   :  { %1896 = vmatprep.subr.bf16.mxu1 %v3755_v41  ;;  %v3842_v41 = vld [vmem:[%s5560_s1 + $0x2f4] ss:$8 sps:$4 sm:$0xff]  }
  0x2b   :  { %1856 = vmatpush2.bf16.msra.mxu0 %v3754_v42  ;;  %v3837_v42 = vld [vmem:[%s5560_s1 + $0x300] ss:$8 sps:$4 sm:$0xff]  }
  0x2c   :  { %1857 = vmatprep.subr.bf16.mxu0 %v3758_v43  ;;  %1897 = vmatpush2.bf16.msra.mxu1 %v3757_v44  ;;  %v3845_v43 = vld [vmem:[%s5560_s1 + $0x3f4] ss:$8 sps:$4 sm:$0xff]   ;;  %v3840_v44 = vld [vmem:[%s5560_s1 + $0x2f0] ss:$8 sps:$4 sm:$0xff]  }
  0x2d   :  { %1898 = vmatprep.subr.bf16.mxu1 %v3761_v45  ;;  %v3848_v45 = vld [vmem:[%s5560_s1 + $0x2e4] ss:$8 sps:$4 sm:$0xff]  }
  0x2f   :  { %1858 = vmatpush2.bf16.msra.mxu0 %v3760_v47  ;;  %v3851_v47 = vld [vmem:[%s5560_s1 + $0x3e4] ss:$8 sps:$4 sm:$0xff]  }
  0x30   :  { %1859 = vmatprep.subr.bf16.mxu0 %v3764_v49  ;;  %1899 = vmatpush2.bf16.msra.mxu1 %v3763_v51  ;;  %v3854_v49 = vld [vmem:[%s5560_s1 + $0x2d4] ss:$8 sps:$4 sm:$0xff]  }
  0x31   :  { %1900 = vmatprep.subr.bf16.mxu1 %v3767_v53  ;;  %v3857_v51 = vld [vmem:[%s5560_s1 + $0x3d4] ss:$8 sps:$4 sm:$0xff]   ;;  %v3860_v53 = vld [vmem:[%s5560_s1 + $0x2c4] ss:$8 sps:$4 sm:$0xff]  }
  0x33   :  { %1860 = vmatpush2.bf16.msra.mxu0 %v3766_v54  ;;  %v3855_v54 = vld [vmem:[%s5560_s1 + $0x3d0] ss:$8 sps:$4 sm:$0xff]  }
  0x34   :  { %1861 = vmatprep.subr.bf16.mxu0 %v3770_v55  ;;  %1901 = vmatpush2.bf16.msra.mxu1 %v3769_v56  ;;  %v3863_v55 = vld [vmem:[%s5560_s1 + $0x3c4] ss:$8 sps:$4 sm:$0xff]   ;;  %v3858_v56 = vld [vmem:[%s5560_s1 + $0x2c0] ss:$8 sps:$4 sm:$0xff]  }
  0x35   :  { %1902 = vmatprep.subr.bf16.mxu1 %v3773_v57  ;;  %v3866_v57 = vld [vmem:[%s5560_s1 + $0x2b4] ss:$8 sps:$4 sm:$0xff]  }
  0x37   :  { %1862 = vmatpush2.bf16.msra.mxu0 %v3772_v58  ;;  %v3861_v58 = vld [vmem:[%s5560_s1 + $0x3c0] ss:$8 sps:$4 sm:$0xff]  }
  0x38   :  { %1863 = vmatprep.subr.bf16.mxu0 %v3776_v59  ;;  %1903 = vmatpush2.bf16.msra.mxu1 %v3775_v60  ;;  %v3869_v59 = vld [vmem:[%s5560_s1 + $0x3b4] ss:$8 sps:$4 sm:$0xff]   ;;  %v3864_v60 = vld [vmem:[%s5560_s1 + $0x2b0] ss:$8 sps:$4 sm:$0xff]  }
  0x39   :  { %1904 = vmatprep.subr.bf16.mxu1 %v3779_v61  ;;  %v3872_v61 = vld [vmem:[%s5560_s1 + $0x2a4] ss:$8 sps:$4 sm:$0xff]  }
  0x3b   :  { %1864 = vmatpush2.bf16.msra.mxu0 %v3778_v62  ;;  %v3867_v62 = vld [vmem:[%s5560_s1 + $0x3b0] ss:$8 sps:$4 sm:$0xff]  }
  0x3c   :  { %1865 = vmatprep.subr.bf16.mxu0 %v3782_v63  ;;  %1905 = vmatpush2.bf16.msra.mxu1 %v3781_v0  ;;  %v3875_v63 = vld [vmem:[%s5560_s1 + $0x3a4] ss:$8 sps:$4 sm:$0xff]   ;;  %v3870_v0 = vld [vmem:[%s5560_s1 + $0x2a0] ss:$8 sps:$4 sm:$0xff]  }
  0x3d   :  { %1906 = vmatprep.subr.bf16.mxu1 %v3785_v1  ;;  %v3878_v1 = vld [vmem:[%s5560_s1 + $0x294] ss:$8 sps:$4 sm:$0xff]  }
  0x3f   :  { %1866 = vmatpush2.bf16.msra.mxu0 %v3784_v2  ;;  %v3873_v2 = vld [vmem:[%s5560_s1 + $0x3a0] ss:$8 sps:$4 sm:$0xff]  }
  0x40   :  { %1917 = vmatprep.subr.bf16.mxu0 %v3792_v3  ;;  %1907 = vmatpush2.bf16.msra.mxu1 %v3789_v4  ;;  %v3881_v3 = vld [vmem:[%s5560_s1 + $0x394] ss:$8 sps:$4 sm:$0xff]   ;;  %v3876_v4 = vld [vmem:[%s5560_s1 + $0x290] ss:$8 sps:$4 sm:$0xff]  }
  0x41   :  { %1958 = vmatprep.subr.bf16.mxu1 %v3797_v6  ;;  %v3879_v6 = vld [vmem:[%s5560_s1 + $0x390] ss:$8 sps:$4 sm:$0xff]  }
  0x42   :  { %1868 = vmatmul.mubr.bf16.vlgmr.msra.gmra.mxu0 %v3250_v5  ;;  %v3884_v5 = vld [vmem:[%s5560_s1 + $0x284] ss:$8 sps:$4 sm:$0xff]  }
  0x43   :  { %1918 = vmatpush1.bf16.msra.mxu0 %v3790_v7  ;;  %1909 = vmatmul.mubr.bf16.vlgmr.msra.gmra.mxu1 %v3252_v8  ;;  %v3887_v7 = vld [vmem:[%s5560_s1 + $0x384] ss:$8 sps:$4 sm:$0xff]   ;;  %v3882_v8 = vld [vmem:[%s5560_s1 + $0x280] ss:$8 sps:$4 sm:$0xff]  }
  0x44   :  { %1919 = vmatprep.subr.bf16.mxu0 %v3800_v9  ;;  %1959 = vmatpush1.bf16.msra.mxu1 %v3795_v10  ;;  %v3892_v9 = vld [vmem:[%s5560_s1 + $0x474] ss:$8 sps:$4 sm:$0xff]   ;;  %v3885_v10 = vld [vmem:[%s5560_s1 + $0x380] ss:$8 sps:$4 sm:$0xff]  }
  0x45   :  { %1960 = vmatprep.subr.bf16.mxu1 %v3803_v11  ;;  %1949 = vmatprep.mubr.bf16.mxu0 %v3255_v34  ;;  %v3254_v11 = vcombine.low %v4456_v32, %v4456_v32  ;;  %v3913_v32 = vld [vmem:[%s5560_s1 + $0x540] ss:$8 sps:$4 sm:$0xff]   ;;  %v3916_v34 = vld [vmem:[%s5560_s1 + $0x430] ss:$8 sps:$4 sm:$0xff]  }
  0x46   :  { %1990 = vmatprep.mubr.bf16.mxu1 %v3257_v37  ;;  %v3927_v37 = vld [vmem:[%s5560_s1 + $0x524] ss:$8 sps:$4 sm:$0xff]  }
  0x47   :  { %1920 = vmatpush1.bf16.msra.mxu0 %v3798_v12  ;;  %v3897_v12 = vld [vmem:[%s5560_s1 + $0x574] ss:$8 sps:$4 sm:$0xff]  }
  0x48   :  { %1921 = vmatprep.subr.bf16.mxu0 %v3806_v13  ;;  %1961 = vmatpush1.bf16.msra.mxu1 %v3801_v14  ;;  %v3890_v13 = vld [vmem:[%s5560_s1 + $0x470] ss:$8 sps:$4 sm:$0xff]   ;;  %v3256_v14 = vcombine.low %v4466_v35, %v4466_v35  ;;  %v3924_v35 = vld [vmem:[%s5560_s1 + $0x424] ss:$8 sps:$4 sm:$0xff]  }
  0x49   :  { %1962 = vmatprep.subr.bf16.mxu1 %v3809_v15  ;;  %v3900_v15 = vld [vmem:[%s5560_s1 + $0x464] ss:$8 sps:$4 sm:$0xff]  }
  0x4b   :  { %1922 = vmatpush1.bf16.msra.mxu0 %v3804_v16  ;;  %v3895_v16 = vld [vmem:[%s5560_s1 + $0x570] ss:$8 sps:$4 sm:$0xff]  }
  0x4c   :  { %1923 = vmatprep.subr.bf16.mxu0 %v3812_v17  ;;  %1963 = vmatpush1.bf16.msra.mxu1 %v3807_v18  ;;  %v4603_v17 = vld [vmem:[%s5561_s0 + $0x20] sm:$0xff] }
  0x4d   :  { %1964 = vmatprep.subr.bf16.mxu1 %v3815_v19  ;;  %v3898_v18 = vld [vmem:[%s5560_s1 + $0x460] ss:$8 sps:$4 sm:$0xff]   ;;  %v3903_v19 = vld [vmem:[%s5560_s1 + $0x564] ss:$8 sps:$4 sm:$0xff]  }
  0x4f   :  { %1924 = vmatpush1.bf16.msra.mxu0 %v3810_v20  ;;  %v3259_v20 = vcombine.high %v4603_v17, %v4603_v17 }
  0x50   :  { %1925 = vmatprep.subr.bf16.mxu0 %v3818_v21  ;;  %1965 = vmatpush1.bf16.msra.mxu1 %v3813_v22  ;;  %v4616_v21 = vld [vmem:[%s5561_s0 + $0x28] sm:$0xff]  ;;  %v3906_v22 = vld [vmem:[%s5560_s1 + $0x454] ss:$8 sps:$4 sm:$0xff]  }
  0x51   :  { %1966 = vmatprep.subr.bf16.mxu1 %v3821_v23  ;;  %v3261_v23 = vcombine.high %v4616_v21, %v4616_v21 }
  0x53   :  { %1926 = vmatpush1.bf16.msra.mxu0 %v3816_v24  ;;  %v3901_v24 = vld [vmem:[%s5560_s1 + $0x560] ss:$8 sps:$4 sm:$0xff]  }
  0x54   :  { %1927 = vmatprep.subr.bf16.mxu0 %v3824_v25  ;;  %1967 = vmatpush1.bf16.msra.mxu1 %v3819_v26  ;;  %v3909_v25 = vld [vmem:[%s5560_s1 + $0x554] ss:$8 sps:$4 sm:$0xff]   ;;  %v3904_v26 = vld [vmem:[%s5560_s1 + $0x450] ss:$8 sps:$4 sm:$0xff]  }
  0x55   :  { %1968 = vmatprep.subr.bf16.mxu1 %v3827_v27  ;;  %v3912_v27 = vld [vmem:[%s5560_s1 + $0x444] ss:$8 sps:$4 sm:$0xff]  }
  0x57   :  { %1928 = vmatpush1.bf16.msra.mxu0 %v3822_v28  ;;  %v3907_v28 = vld [vmem:[%s5560_s1 + $0x550] ss:$8 sps:$4 sm:$0xff]  }
  0x58   :  { %1929 = vmatprep.subr.bf16.mxu0 %v3830_v29  ;;  %1969 = vmatpush1.bf16.msra.mxu1 %v3825_v30  ;;  %v3915_v29 = vld [vmem:[%s5560_s1 + $0x544] ss:$8 sps:$4 sm:$0xff]   ;;  %v3910_v30 = vld [vmem:[%s5560_s1 + $0x440] ss:$8 sps:$4 sm:$0xff]  }
  0x59   :  { %1970 = vmatprep.subr.bf16.mxu1 %v3833_v31  ;;  %v3918_v31 = vld [vmem:[%s5560_s1 + $0x434] ss:$8 sps:$4 sm:$0xff]  }
  0x5b   :  { %1930 = vmatpush1.bf16.msra.mxu0 %v3828_v33  ;;  %v3921_v33 = vld [vmem:[%s5560_s1 + $0x534] ss:$8 sps:$4 sm:$0xff]  }
  0x5c   :  { %1931 = vmatprep.subr.bf16.mxu0 %v3836_v36  ;;  %1971 = vmatpush1.bf16.msra.mxu1 %v3831_v38  ;;  %v3919_v36 = vld [vmem:[%s5560_s1 + $0x530] ss:$8 sps:$4 sm:$0xff]   ;;  %v3922_v38 = vld [vmem:[%s5560_s1 + $0x420] ss:$8 sps:$4 sm:$0xff]  }
  0x5d   :  { %1972 = vmatprep.subr.bf16.mxu1 %v3839_v39  ;;  %v3930_v39 = vld [vmem:[%s5560_s1 + $0x414] ss:$8 sps:$4 sm:$0xff]  }
  0x5f   :  { %1932 = vmatpush1.bf16.msra.mxu0 %v3834_v40  ;;  %v3925_v40 = vld [vmem:[%s5560_s1 + $0x520] ss:$8 sps:$4 sm:$0xff]  }
  0x60   :  { %1933 = vmatprep.subr.bf16.mxu0 %v3842_v41  ;;  %1973 = vmatpush1.bf16.msra.mxu1 %v3837_v42  ;;  %v3933_v41 = vld [vmem:[%s5560_s1 + $0x514] ss:$8 sps:$4 sm:$0xff]   ;;  %v3928_v42 = vld [vmem:[%s5560_s1 + $0x410] ss:$8 sps:$4 sm:$0xff]  }
  0x61   :  { %1974 = vmatprep.subr.bf16.mxu1 %v3845_v43  ;;  %v3936_v43 = vld [vmem:[%s5560_s1 + $0x404] ss:$8 sps:$4 sm:$0xff]  }
  0x63   :  { %1934 = vmatpush2.bf16.msra.mxu0 %v3840_v44  ;;  %v3931_v44 = vld [vmem:[%s5560_s1 + $0x510] ss:$8 sps:$4 sm:$0xff]  }
  0x64   :  { %1935 = vmatprep.subr.bf16.mxu0 %v3848_v45  ;;  %1975 = vmatpush2.bf16.msra.mxu1 %v3843_v46  ;;  %v3939_v45 = vld [vmem:[%s5560_s1 + $0x504] ss:$8 sps:$4 sm:$0xff]   ;;  %v3934_v46 = vld [vmem:[%s5560_s1 + $0x400] ss:$8 sps:$4 sm:$0xff]  }
  0x65   :  { %1976 = vmatprep.subr.bf16.mxu1 %v3851_v47  ;;  %v3942_v47 = vld [vmem:[%s5560_s1 + $0x4f4] ss:$8 sps:$4 sm:$0xff]  }
  0x67   :  { %1936 = vmatpush2.bf16.msra.mxu0 %v3846_v48  ;;  %v3937_v48 = vld [vmem:[%s5560_s1 + $0x500] ss:$8 sps:$4 sm:$0xff]  }
  0x68   :  { %1937 = vmatprep.subr.bf16.mxu0 %v3854_v49  ;;  %1977 = vmatpush2.bf16.msra.mxu1 %v3849_v50  ;;  %v3945_v49 = vld [vmem:[%s5560_s1 + $0x5f4] ss:$8 sps:$4 sm:$0xff]   ;;  %v3940_v50 = vld [vmem:[%s5560_s1 + $0x4f0] ss:$8 sps:$4 sm:$0xff]  }
  0x69   :  { %1978 = vmatprep.subr.bf16.mxu1 %v3857_v51  ;;  %v3948_v51 = vld [vmem:[%s5560_s1 + $0x4e4] ss:$8 sps:$4 sm:$0xff]  }
  0x6b   :  { %1938 = vmatpush2.bf16.msra.mxu0 %v3852_v52  ;;  %v3943_v52 = vld [vmem:[%s5560_s1 + $0x5f0] ss:$8 sps:$4 sm:$0xff]  }
  0x6c   :  { %1939 = vmatprep.subr.bf16.mxu0 %v3860_v53  ;;  %1979 = vmatpush2.bf16.msra.mxu1 %v3855_v54  ;;  %v3951_v53 = vld [vmem:[%s5560_s1 + $0x5e4] ss:$8 sps:$4 sm:$0xff]   ;;  %v3946_v54 = vld [vmem:[%s5560_s1 + $0x4e0] ss:$8 sps:$4 sm:$0xff]  }
  0x6d   :  { %1980 = vmatprep.subr.bf16.mxu1 %v3863_v55  ;;  %v3954_v55 = vld [vmem:[%s5560_s1 + $0x4d4] ss:$8 sps:$4 sm:$0xff]  }
  0x6f   :  { %1940 = vmatpush2.bf16.msra.mxu0 %v3858_v56  ;;  %v3949_v56 = vld [vmem:[%s5560_s1 + $0x5e0] ss:$8 sps:$4 sm:$0xff]  }
  0x70   :  { %1941 = vmatprep.subr.bf16.mxu0 %v3866_v57  ;;  %1981 = vmatpush2.bf16.msra.mxu1 %v3861_v58  ;;  %v3957_v57 = vld [vmem:[%s5560_s1 + $0x5d4] ss:$8 sps:$4 sm:$0xff]   ;;  %v3952_v58 = vld [vmem:[%s5560_s1 + $0x4d0] ss:$8 sps:$4 sm:$0xff]  }
  0x71   :  { %1982 = vmatprep.subr.bf16.mxu1 %v3869_v59  ;;  %v3960_v59 = vld [vmem:[%s5560_s1 + $0x4c4] ss:$8 sps:$4 sm:$0xff]  }
  0x73   :  { %1942 = vmatpush2.bf16.msra.mxu0 %v3864_v60  ;;  %v3955_v60 = vld [vmem:[%s5560_s1 + $0x5d0] ss:$8 sps:$4 sm:$0xff]  }
  0x74   :  { %1943 = vmatprep.subr.bf16.mxu0 %v3872_v61  ;;  %1983 = vmatpush2.bf16.msra.mxu1 %v3867_v62  ;;  %v3963_v61 = vld [vmem:[%s5560_s1 + $0x5c4] ss:$8 sps:$4 sm:$0xff]   ;;  %v3958_v62 = vld [vmem:[%s5560_s1 + $0x4c0] ss:$8 sps:$4 sm:$0xff]  }
  0x75   :  { %1984 = vmatprep.subr.bf16.mxu1 %v3875_v63  ;;  %v3966_v63 = vld [vmem:[%s5560_s1 + $0x4b4] ss:$8 sps:$4 sm:$0xff]  }
  0x77   :  { %1944 = vmatpush2.bf16.msra.mxu0 %v3870_v0  ;;  %v3961_v0 = vld [vmem:[%s5560_s1 + $0x5c0] ss:$8 sps:$4 sm:$0xff]  }
  0x78   :  { %1945 = vmatprep.subr.bf16.mxu0 %v3878_v1  ;;  %1985 = vmatpush2.bf16.msra.mxu1 %v3873_v2  ;;  %v3969_v1 = vld [vmem:[%s5560_s1 + $0x5b4] ss:$8 sps:$4 sm:$0xff]   ;;  %v3964_v2 = vld [vmem:[%s5560_s1 + $0x4b0] ss:$8 sps:$4 sm:$0xff]  }
  0x79   :  { %1986 = vmatprep.subr.bf16.mxu1 %v3881_v3  ;;  %v3972_v3 = vld [vmem:[%s5560_s1 + $0x4a4] ss:$8 sps:$4 sm:$0xff]  }
  0x7b   :  { %1946 = vmatpush2.bf16.msra.mxu0 %v3876_v4  ;;  %v3967_v4 = vld [vmem:[%s5560_s1 + $0x5b0] ss:$8 sps:$4 sm:$0xff]  }
  0x7c   :  { %1947 = vmatprep.subr.bf16.mxu0 %v3884_v5  ;;  %1987 = vmatpush2.bf16.msra.mxu1 %v3879_v6  ;;  %v3975_v5 = vld [vmem:[%s5560_s1 + $0x5a4] ss:$8 sps:$4 sm:$0xff]   ;;  %v3970_v6 = vld [vmem:[%s5560_s1 + $0x4a0] ss:$8 sps:$4 sm:$0xff]  }
  0x7d   :  { %1988 = vmatprep.subr.bf16.mxu1 %v3887_v7  ;;  %v3978_v7 = vld [vmem:[%s5560_s1 + $0x494] ss:$8 sps:$4 sm:$0xff]  }
  0x7f   :  { %1948 = vmatpush2.bf16.msra.mxu0 %v3882_v8  ;;  %v3973_v8 = vld [vmem:[%s5560_s1 + $0x5a0] ss:$8 sps:$4 sm:$0xff]  }
  0x80   :  { %1999 = vmatprep.subr.bf16.mxu0 %v3892_v9  ;;  %1989 = vmatpush2.bf16.msra.mxu1 %v3885_v10  ;;  %v3981_v9 = vld [vmem:[%s5560_s1 + $0x594] ss:$8 sps:$4 sm:$0xff]   ;;  %v3976_v10 = vld [vmem:[%s5560_s1 + $0x490] ss:$8 sps:$4 sm:$0xff]  }
  0x81   :  { %2040 = vmatprep.subr.bf16.mxu1 %v3897_v12  ;;  %v3979_v12 = vld [vmem:[%s5560_s1 + $0x590] ss:$8 sps:$4 sm:$0xff]  }
  0x82   :  { %1950 = vmatmul.mubr.bf16.vlgmr.msra.gmra.mxu0 %v3254_v11  ;;  %v3984_v11 = vld [vmem:[%s5560_s1 + $0x484] ss:$8 sps:$4 sm:$0xff]  }
  0x83   :  { %2000 = vmatpush1.bf16.msra.mxu0 %v3890_v13  ;;  %1991 = vmatmul.mubr.bf16.vlgmr.msra.gmra.mxu1 %v3256_v14  ;;  %v3982_v13 = vld [vmem:[%s5560_s1 + $0x480] ss:$8 sps:$4 sm:$0xff]   ;;  %v3987_v14 = vld [vmem:[%s5560_s1 + $0x584] ss:$8 sps:$4 sm:$0xff]  }
  0x84   :  { %2001 = vmatprep.subr.bf16.mxu0 %v3900_v15  ;;  %2041 = vmatpush1.bf16.msra.mxu1 %v3895_v16  ;;  %v3992_v15 = vld [vmem:[%s5560_s1 + $0x674] ss:$8 sps:$4 sm:$0xff]  }
  0x85   :  { %2031 = vmatprep.mubr.bf16.mxu0 %v3259_v20  ;;  %2042 = vmatprep.subr.bf16.mxu1 %v3903_v19  ;;  %v4794_v16 = vld [vmem:[%s5561_s0 + $0x30] sm:$0xff]  ;;  %v3258_v19 = vcombine.low %v4603_v17, %v4603_v17  ;;  %v3260_v17 = vcombine.low %v4616_v21, %v4616_v21  ;;  %v3998_v21 = vld [vmem:[%s5560_s1 + $0x660] ss:$8 sps:$4 sm:$0xff]  }
  0x86   :  { %2072 = vmatprep.mubr.bf16.mxu1 %v3261_v23  ;;  %v3997_v20 = vld [vmem:[%s5560_s1 + $0x774] ss:$8 sps:$4 sm:$0xff]   ;;  %v3990_v23 = vld [vmem:[%s5560_s1 + $0x670] ss:$8 sps:$4 sm:$0xff]  }
  0x87   :  { %2002 = vmatpush1.bf16.msra.mxu0 %v3898_v18  ;;  %v3985_v18 = vld [vmem:[%s5560_s1 + $0x580] ss:$8 sps:$4 sm:$0xff]  }
  0x88   :  { %2003 = vmatprep.subr.bf16.mxu0 %v3906_v22  ;;  %2043 = vmatpush1.bf16.msra.mxu1 %v3901_v24  ;;  %v4807_v22 = vld [vmem:[%s5561_s0 + $0x38] sm:$0xff]  ;;  %v3263_v24 = vcombine.high %v4794_v16, %v4794_v16 }
  0x89   :  { %2044 = vmatprep.subr.bf16.mxu1 %v3909_v25  ;;  %v4000_v25 = vld [vmem:[%s5560_s1 + $0x664] ss:$8 sps:$4 sm:$0xff]  }
  0x8b   :  { %2004 = vmatpush1.bf16.msra.mxu0 %v3904_v26  ;;  %v3995_v26 = vld [vmem:[%s5560_s1 + $0x770] ss:$8 sps:$4 sm:$0xff]  }
  0x8c   :  { %2005 = vmatprep.subr.bf16.mxu0 %v3912_v27  ;;  %2045 = vmatpush1.bf16.msra.mxu1 %v3907_v28  ;;  %v3265_v27 = vcombine.high %v4807_v22, %v4807_v22  ;;  %v4003_v28 = vld [vmem:[%s5560_s1 + $0x764] ss:$8 sps:$4 sm:$0xff]  }
  0x8d   :  { %2046 = vmatprep.subr.bf16.mxu1 %v3915_v29  ;;  %v4006_v29 = vld [vmem:[%s5560_s1 + $0x654] ss:$8 sps:$4 sm:$0xff]  }
  0x8f   :  { %2006 = vmatpush1.bf16.msra.mxu0 %v3910_v30  ;;  %v4001_v30 = vld [vmem:[%s5560_s1 + $0x760] ss:$8 sps:$4 sm:$0xff]  }
  0x90   :  { %2007 = vmatprep.subr.bf16.mxu0 %v3918_v31  ;;  %2047 = vmatpush1.bf16.msra.mxu1 %v3913_v32  ;;  %v4009_v31 = vld [vmem:[%s5560_s1 + $0x754] ss:$8 sps:$4 sm:$0xff]   ;;  %v4004_v32 = vld [vmem:[%s5560_s1 + $0x650] ss:$8 sps:$4 sm:$0xff]  }
  0x91   :  { %2048 = vmatprep.subr.bf16.mxu1 %v3921_v33  ;;  %v4012_v33 = vld [vmem:[%s5560_s1 + $0x644] ss:$8 sps:$4 sm:$0xff]  }
  0x93   :  { %2008 = vmatpush1.bf16.msra.mxu0 %v3916_v34  ;;  %v4007_v34 = vld [vmem:[%s5560_s1 + $0x750] ss:$8 sps:$4 sm:$0xff]  }
  0x94   :  { %2009 = vmatprep.subr.bf16.mxu0 %v3924_v35  ;;  %2049 = vmatpush1.bf16.msra.mxu1 %v3919_v36  ;;  %v4015_v35 = vld [vmem:[%s5560_s1 + $0x744] ss:$8 sps:$4 sm:$0xff]   ;;  %v4010_v36 = vld [vmem:[%s5560_s1 + $0x640] ss:$8 sps:$4 sm:$0xff]  }
  0x95   :  { %2050 = vmatprep.subr.bf16.mxu1 %v3927_v37  ;;  %v4018_v37 = vld [vmem:[%s5560_s1 + $0x634] ss:$8 sps:$4 sm:$0xff]  }
  0x97   :  { %2010 = vmatpush1.bf16.msra.mxu0 %v3922_v38  ;;  %v4013_v38 = vld [vmem:[%s5560_s1 + $0x740] ss:$8 sps:$4 sm:$0xff]  }
  0x98   :  { %2011 = vmatprep.subr.bf16.mxu0 %v3930_v39  ;;  %2051 = vmatpush1.bf16.msra.mxu1 %v3925_v40  ;;  %v4021_v39 = vld [vmem:[%s5560_s1 + $0x734] ss:$8 sps:$4 sm:$0xff]   ;;  %v4016_v40 = vld [vmem:[%s5560_s1 + $0x630] ss:$8 sps:$4 sm:$0xff]  }
  0x99   :  { %2052 = vmatprep.subr.bf16.mxu1 %v3933_v41  ;;  %v4024_v41 = vld [vmem:[%s5560_s1 + $0x624] ss:$8 sps:$4 sm:$0xff]  }
  0x9b   :  { %2012 = vmatpush1.bf16.msra.mxu0 %v3928_v42  ;;  %v4019_v42 = vld [vmem:[%s5560_s1 + $0x730] ss:$8 sps:$4 sm:$0xff]  }
  0x9c   :  { %2013 = vmatprep.subr.bf16.mxu0 %v3936_v43  ;;  %2053 = vmatpush1.bf16.msra.mxu1 %v3931_v44  ;;  %v4027_v43 = vld [vmem:[%s5560_s1 + $0x724] ss:$8 sps:$4 sm:$0xff]   ;;  %v4022_v44 = vld [vmem:[%s5560_s1 + $0x620] ss:$8 sps:$4 sm:$0xff]  }
  0x9d   :  { %2054 = vmatprep.subr.bf16.mxu1 %v3939_v45  ;;  %v4030_v45 = vld [vmem:[%s5560_s1 + $0x614] ss:$8 sps:$4 sm:$0xff]  }
  0x9f   :  { %2014 = vmatpush1.bf16.msra.mxu0 %v3934_v46  ;;  %v4025_v46 = vld [vmem:[%s5560_s1 + $0x720] ss:$8 sps:$4 sm:$0xff]  }
  0xa0   :  { %2015 = vmatprep.subr.bf16.mxu0 %v3942_v47  ;;  %2055 = vmatpush1.bf16.msra.mxu1 %v3937_v48  ;;  %v4033_v47 = vld [vmem:[%s5560_s1 + $0x714] ss:$8 sps:$4 sm:$0xff]   ;;  %v4028_v48 = vld [vmem:[%s5560_s1 + $0x610] ss:$8 sps:$4 sm:$0xff]  }
  0xa1   :  { %2056 = vmatprep.subr.bf16.mxu1 %v3945_v49  ;;  %v4036_v49 = vld [vmem:[%s5560_s1 + $0x604] ss:$8 sps:$4 sm:$0xff]  }
  0xa3   :  { %2016 = vmatpush2.bf16.msra.mxu0 %v3940_v50  ;;  %v4031_v50 = vld [vmem:[%s5560_s1 + $0x710] ss:$8 sps:$4 sm:$0xff]  }
  0xa4   :  { %2017 = vmatprep.subr.bf16.mxu0 %v3948_v51  ;;  %2057 = vmatpush2.bf16.msra.mxu1 %v3943_v52  ;;  %v4039_v51 = vld [vmem:[%s5560_s1 + $0x704] ss:$8 sps:$4 sm:$0xff]   ;;  %v4034_v52 = vld [vmem:[%s5560_s1 + $0x600] ss:$8 sps:$4 sm:$0xff]  }
  0xa5   :  { %2058 = vmatprep.subr.bf16.mxu1 %v3951_v53  ;;  %v4042_v53 = vld [vmem:[%s5560_s1 + $0x6f4] ss:$8 sps:$4 sm:$0xff]  }
  0xa7   :  { %2018 = vmatpush2.bf16.msra.mxu0 %v3946_v54  ;;  %v4037_v54 = vld [vmem:[%s5560_s1 + $0x700] ss:$8 sps:$4 sm:$0xff]  }
  0xa8   :  { %2019 = vmatprep.subr.bf16.mxu0 %v3954_v55  ;;  %2059 = vmatpush2.bf16.msra.mxu1 %v3949_v56  ;;  %v4045_v55 = vld [vmem:[%s5560_s1 + $0x7f4] ss:$8 sps:$4 sm:$0xff]   ;;  %v4040_v56 = vld [vmem:[%s5560_s1 + $0x6f0] ss:$8 sps:$4 sm:$0xff]  }
  0xa9   :  { %2060 = vmatprep.subr.bf16.mxu1 %v3957_v57  ;;  %v4048_v57 = vld [vmem:[%s5560_s1 + $0x6e4] ss:$8 sps:$4 sm:$0xff]  }
  0xab   :  { %2020 = vmatpush2.bf16.msra.mxu0 %v3952_v58  ;;  %v4043_v58 = vld [vmem:[%s5560_s1 + $0x7f0] ss:$8 sps:$4 sm:$0xff]  }
  0xac   :  { %2021 = vmatprep.subr.bf16.mxu0 %v3960_v59  ;;  %2061 = vmatpush2.bf16.msra.mxu1 %v3955_v60  ;;  %v4051_v59 = vld [vmem:[%s5560_s1 + $0x7e4] ss:$8 sps:$4 sm:$0xff]   ;;  %v4046_v60 = vld [vmem:[%s5560_s1 + $0x6e0] ss:$8 sps:$4 sm:$0xff]  }
  0xad   :  { %2062 = vmatprep.subr.bf16.mxu1 %v3963_v61  ;;  %v4054_v61 = vld [vmem:[%s5560_s1 + $0x6d4] ss:$8 sps:$4 sm:$0xff]  }
  0xaf   :  { %2022 = vmatpush2.bf16.msra.mxu0 %v3958_v62  ;;  %v4049_v62 = vld [vmem:[%s5560_s1 + $0x7e0] ss:$8 sps:$4 sm:$0xff]  }
  0xb0   :  { %2023 = vmatprep.subr.bf16.mxu0 %v3966_v63  ;;  %2063 = vmatpush2.bf16.msra.mxu1 %v3961_v0  ;;  %v4057_v63 = vld [vmem:[%s5560_s1 + $0x7d4] ss:$8 sps:$4 sm:$0xff]   ;;  %v4052_v0 = vld [vmem:[%s5560_s1 + $0x6d0] ss:$8 sps:$4 sm:$0xff]  }
  0xb1   :  { %2064 = vmatprep.subr.bf16.mxu1 %v3969_v1  ;;  %v4060_v1 = vld [vmem:[%s5560_s1 + $0x6c4] ss:$8 sps:$4 sm:$0xff]  }
  0xb3   :  { %2024 = vmatpush2.bf16.msra.mxu0 %v3964_v2  ;;  %v4055_v2 = vld [vmem:[%s5560_s1 + $0x7d0] ss:$8 sps:$4 sm:$0xff]  }
  0xb4   :  { %2025 = vmatprep.subr.bf16.mxu0 %v3972_v3  ;;  %2065 = vmatpush2.bf16.msra.mxu1 %v3967_v4  ;;  %v4063_v3 = vld [vmem:[%s5560_s1 + $0x7c4] ss:$8 sps:$4 sm:$0xff]   ;;  %v4058_v4 = vld [vmem:[%s5560_s1 + $0x6c0] ss:$8 sps:$4 sm:$0xff]  }
  0xb5   :  { %2066 = vmatprep.subr.bf16.mxu1 %v3975_v5  ;;  %v4066_v5 = vld [vmem:[%s5560_s1 + $0x6b4] ss:$8 sps:$4 sm:$0xff]  }
  0xb7   :  { %2026 = vmatpush2.bf16.msra.mxu0 %v3970_v6  ;;  %v4061_v6 = vld [vmem:[%s5560_s1 + $0x7c0] ss:$8 sps:$4 sm:$0xff]  }
  0xb8   :  { %2027 = vmatprep.subr.bf16.mxu0 %v3978_v7  ;;  %2067 = vmatpush2.bf16.msra.mxu1 %v3973_v8  ;;  %v4069_v7 = vld [vmem:[%s5560_s1 + $0x7b4] ss:$8 sps:$4 sm:$0xff]   ;;  %v4064_v8 = vld [vmem:[%s5560_s1 + $0x6b0] ss:$8 sps:$4 sm:$0xff]  }
  0xb9   :  { %2068 = vmatprep.subr.bf16.mxu1 %v3981_v9  ;;  %v4072_v9 = vld [vmem:[%s5560_s1 + $0x6a4] ss:$8 sps:$4 sm:$0xff]  }
  0xbb   :  { %2028 = vmatpush2.bf16.msra.mxu0 %v3976_v10  ;;  %v4067_v10 = vld [vmem:[%s5560_s1 + $0x7b0] ss:$8 sps:$4 sm:$0xff]  }
  0xbc   :  { %2029 = vmatprep.subr.bf16.mxu0 %v3984_v11  ;;  %2069 = vmatpush2.bf16.msra.mxu1 %v3979_v12  ;;  %v4075_v11 = vld [vmem:[%s5560_s1 + $0x7a4] ss:$8 sps:$4 sm:$0xff]   ;;  %v4070_v12 = vld [vmem:[%s5560_s1 + $0x6a0] ss:$8 sps:$4 sm:$0xff]  }
  0xbd   :  { %2070 = vmatprep.subr.bf16.mxu1 %v3987_v14  ;;  %v4078_v14 = vld [vmem:[%s5560_s1 + $0x694] ss:$8 sps:$4 sm:$0xff]  }
  0xbf   :  { %2030 = vmatpush2.bf16.msra.mxu0 %v3982_v13  ;;  %v322_v13 = vlaneseq }
  0xc0   :  { %2081 = vmatprep.subr.bf16.mxu0 %v3992_v15  ;;  %2071 = vmatpush2.bf16.msra.mxu1 %v3985_v18  ;;  %v4073_v15 = vld [vmem:[%s5560_s1 + $0x7a0] ss:$8 sps:$4 sm:$0xff]   ;;  %v4081_v18 = vld [vmem:[%s5560_s1 + $0x794] ss:$8 sps:$4 sm:$0xff]  }
  0xc1   :  { %2122 = vmatprep.subr.bf16.mxu1 %v3997_v20  ;;  %v4986_v20 = vshrl.u32 %v322_v13, 7 }
  0xc2   :  { %2032 = vmatmul.mubr.bf16.vlgmr.msra.gmra.mxu0 %v3258_v19  ;;  %v4076_v19 = vld [vmem:[%s5560_s1 + $0x690] ss:$8 sps:$4 sm:$0xff]  }
  0xc3   :  { %2082 = vmatpush1.bf16.msra.mxu0 %v3990_v23  ;;  %2113 = vmatprep.mubr.bf16.mxu0 %v3263_v24  ;;  %v4084_v23 = vld [vmem:[%s5560_s1 + $0x684] ss:$8 sps:$4 sm:$0xff]   ;;  %v4079_v24 = vld [vmem:[%s5560_s1 + $0x790] ss:$8 sps:$4 sm:$0xff]  }
  0xc4   :  { %2073 = vmatmul.mubr.bf16.vlgmr.msra.gmra.mxu1 %v3260_v17  ;;  %2083 = vmatprep.subr.bf16.mxu0 %v4000_v25  ;;  %v4087_v17 = vld [vmem:[%s5560_s1 + $0x784] ss:$8 sps:$4 sm:$0xff]   ;;  %v4082_v25 = vld [vmem:[%s5560_s1 + $0x680] ss:$8 sps:$4 sm:$0xff]  }
  0xc5   :  { %2123 = vmatpush1.bf16.msra.mxu1 %v3995_v26  ;;  %2154 = vmatprep.mubr.bf16.mxu1 %v3265_v27  ;;  %v324_v26 = vsub.s32 0, %v4986_v20  ;;  %v320_v27 = vld [vmem:[%s5562_s2] sm:$0x3] }
  0xc6   :  { %2124 = vmatprep.subr.bf16.mxu1 %v4003_v28  ;;  %v4092_v28 = vld [vmem:[%s5560_s1 + $0x874] ss:$8 sps:$4 sm:$0xff]  }
  0xc7   :  { %2084 = vmatpush1.bf16.msra.mxu0 %v3998_v21  ;;  %v5010_v21 = vld [vmem:[%s5561_s0 + $0x40] sm:$0xff] }
  0xc8   :  { %2085 = vmatprep.subr.bf16.mxu0 %v4006_v29  ;;  %v4085_v29 = vld [vmem:[%s5560_s1 + $0x780] ss:$8 sps:$4 sm:$0xff]   ;;  %v3266_v13 = vcombine.low %v5010_v21, %v5010_v21 }
  0xc9   :  { %2125 = vmatpush1.bf16.msra.mxu1 %v4001_v30  ;;  %v328_v30 = vsub.s32 1, %v4986_v20 }
  0xca   :  { %2126 = vmatprep.subr.bf16.mxu1 %v4009_v31  ;;  %v3262_v31 = vcombine.low %v4794_v16, %v4794_v16 }
  0xcb   :  { %2086 = vmatpush1.bf16.msra.mxu0 %v4004_v32  ;;  %v325_v32 = vrot.slane %v320_v27, %v324_v26  ;;  %v329_v16 = vrot.slane %v320_v27, %v328_v30 }
  0xcc   :  { %2087 = vmatprep.subr.bf16.mxu0 %v4012_v33  ;;  %v4090_v33 = vld [vmem:[%s5560_s1 + $0x870] ss:$8 sps:$4 sm:$0xff]  }
  0xcd   :  { %2127 = vmatpush1.bf16.msra.mxu1 %v4007_v34  ;;  %v3267_v34 = vcombine.high %v5010_v21, %v5010_v21  ;;  %v2264_v21 = vld [vmem:[%s5563_s3 + $0x1c0] sm:$0xff] }
  0xce   :  { %2128 = vmatprep.subr.bf16.mxu1 %v4015_v35  ;;  %v3264_v35 = vcombine.low %v4807_v22, %v4807_v22  ;;  %v4100_v22 = vld [vmem:[%s5560_s1 + $0x854] ss:$8 sps:$4 sm:$0xff]  }
  0xcf   :  { %2088 = vmatpush1.bf16.msra.mxu0 %v4010_v36  ;;  %v4097_v36 = vld [vmem:[%s5560_s1 + $0x864] ss:$8 sps:$4 sm:$0xff]  }
  0xd0   :  { %2089 = vmatprep.subr.bf16.mxu0 %v4018_v37 }
  0xd1   :  { %2129 = vmatpush1.bf16.msra.mxu1 %v4013_v38 }
  0xd2   :  { %2130 = vmatprep.subr.bf16.mxu1 %v4021_v39  ;;  %v4095_v39 = vld [vmem:[%s5560_s1 + $0x860] ss:$8 sps:$4 sm:$0xff]  }
  0xd3   :  { %2090 = vmatpush1.bf16.msra.mxu0 %v4016_v40 }
  0xd4   :  { %2091 = vmatprep.subr.bf16.mxu0 %v4024_v41 }
  0xd5   :  { %2131 = vmatpush1.bf16.msra.mxu1 %v4019_v42 }
  0xd6   :  { %2132 = vmatprep.subr.bf16.mxu1 %v4027_v43 }
  0xd7   :  { %2092 = vmatpush1.bf16.msra.mxu0 %v4022_v44 }
  0xd8   :  { %2093 = vmatprep.subr.bf16.mxu0 %v4030_v45 }
  0xd9   :  { %2133 = vmatpush1.bf16.msra.mxu1 %v4025_v46 }
  0xda   :  { %2134 = vmatprep.subr.bf16.mxu1 %v4033_v47  ;;  %v4098_v47 = vld [vmem:[%s5560_s1 + $0x850] ss:$8 sps:$4 sm:$0xff]  }
  0xdb   :  { %2094 = vmatpush1.bf16.msra.mxu0 %v4028_v48 }
  0xdc   :  { %2095 = vmatprep.subr.bf16.mxu0 %v4036_v49  ;;  %v4103_v49 = vld [vmem:[%s5560_s1 + $0x844] ss:$8 sps:$4 sm:$0xff]  }
  0xdd   :  { %2135 = vmatpush1.bf16.msra.mxu1 %v4031_v50 }
  0xde   :  { %2136 = vmatprep.subr.bf16.mxu1 %v4039_v51 }
  0xdf   :  { %2096 = vmatpush1.bf16.msra.mxu0 %v4034_v52  ;;  %v4101_v52 = vld [vmem:[%s5560_s1 + $0x840] ss:$8 sps:$4 sm:$0xff]  }
  0xe0   :  { %2097 = vmatprep.subr.bf16.mxu0 %v4042_v53  ;;  %v4106_v53 = vld [vmem:[%s5560_s1 + $0x834] ss:$8 sps:$4 sm:$0xff]  }
  0xe1   :  { %2137 = vmatpush1.bf16.msra.mxu1 %v4037_v54  ;;  %v4104_v54 = vld [vmem:[%s5560_s1 + $0x830] ss:$8 sps:$4 sm:$0xff]  }
  0xe2   :  { %2138 = vmatprep.subr.bf16.mxu1 %v4045_v55  ;;  %v4109_v55 = vld [vmem:[%s5560_s1 + $0x824] ss:$8 sps:$4 sm:$0xff]  }
  0xe3   :  { %2098 = vmatpush2.bf16.msra.mxu0 %v4040_v56  ;;  %v4107_v56 = vld [vmem:[%s5560_s1 + $0x820] ss:$8 sps:$4 sm:$0xff]  }
  0xe4   :  { %2099 = vmatprep.subr.bf16.mxu0 %v4048_v57  ;;  %v4112_v57 = vld [vmem:[%s5560_s1 + $0x814] ss:$8 sps:$4 sm:$0xff]  }
  0xe5   :  { %2139 = vmatpush2.bf16.msra.mxu1 %v4043_v58  ;;  %v4110_v58 = vld [vmem:[%s5560_s1 + $0x810] ss:$8 sps:$4 sm:$0xff]  }
  0xe6   :  { %2140 = vmatprep.subr.bf16.mxu1 %v4051_v59  ;;  %v4115_v59 = vld [vmem:[%s5560_s1 + $0x804] ss:$8 sps:$4 sm:$0xff]  }
  0xe7   :  { %2100 = vmatpush2.bf16.msra.mxu0 %v4046_v60  ;;  %v4113_v60 = vld [vmem:[%s5560_s1 + $0x800] ss:$8 sps:$4 sm:$0xff]  }
  0xe8   :  { %2101 = vmatprep.subr.bf16.mxu0 %v4054_v61  ;;  %v4118_v61 = vld [vmem:[%s5560_s1 + $0x8f4] ss:$8 sps:$4 sm:$0xff]  }
  0xe9   :  { %2141 = vmatpush2.bf16.msra.mxu1 %v4049_v62  ;;  %v4116_v62 = vld [vmem:[%s5560_s1 + $0x8f0] ss:$8 sps:$4 sm:$0xff]  }
  0xea   :  { %2142 = vmatprep.subr.bf16.mxu1 %v4057_v63  ;;  %v4121_v63 = vld [vmem:[%s5560_s1 + $0x8e4] ss:$8 sps:$4 sm:$0xff]  }
  0xeb   :  { %2102 = vmatpush2.bf16.msra.mxu0 %v4052_v0  ;;  %v4119_v0 = vld [vmem:[%s5560_s1 + $0x8e0] ss:$8 sps:$4 sm:$0xff]  }
  0xec   :  { %2103 = vmatprep.subr.bf16.mxu0 %v4060_v1  ;;  %v4124_v1 = vld [vmem:[%s5560_s1 + $0x8d4] ss:$8 sps:$4 sm:$0xff]  }
  0xed   :  { %2143 = vmatpush2.bf16.msra.mxu1 %v4055_v2  ;;  %v4122_v2 = vld [vmem:[%s5560_s1 + $0x8d0] ss:$8 sps:$4 sm:$0xff]  }
  0xee   :  { %2144 = vmatprep.subr.bf16.mxu1 %v4063_v3  ;;  %v4127_v3 = vld [vmem:[%s5560_s1 + $0x8c4] ss:$8 sps:$4 sm:$0xff]  }
  0xef   :  { %2104 = vmatpush2.bf16.msra.mxu0 %v4058_v4  ;;  %v4125_v4 = vld [vmem:[%s5560_s1 + $0x8c0] ss:$8 sps:$4 sm:$0xff]  }
  0xf0   :  { %2105 = vmatprep.subr.bf16.mxu0 %v4066_v5  ;;  %v4130_v5 = vld [vmem:[%s5560_s1 + $0x8b4] ss:$8 sps:$4 sm:$0xff]  }
  0xf1   :  { %2145 = vmatpush2.bf16.msra.mxu1 %v4061_v6  ;;  %v4128_v6 = vld [vmem:[%s5560_s1 + $0x8b0] ss:$8 sps:$4 sm:$0xff]  }
  0xf2   :  { %2146 = vmatprep.subr.bf16.mxu1 %v4069_v7  ;;  %v4133_v7 = vld [vmem:[%s5560_s1 + $0x8a4] ss:$8 sps:$4 sm:$0xff]  }
  0xf3   :  { %2106 = vmatpush2.bf16.msra.mxu0 %v4064_v8  ;;  %v4131_v8 = vld [vmem:[%s5560_s1 + $0x8a0] ss:$8 sps:$4 sm:$0xff]  }
  0xf4   :  { %2107 = vmatprep.subr.bf16.mxu0 %v4072_v9  ;;  %v4136_v9 = vld [vmem:[%s5560_s1 + $0x894] ss:$8 sps:$4 sm:$0xff]  }
  0xf5   :  { %2147 = vmatpush2.bf16.msra.mxu1 %v4067_v10  ;;  %v4134_v10 = vld [vmem:[%s5560_s1 + $0x890] ss:$8 sps:$4 sm:$0xff]  }
  0xf6   :  { %2148 = vmatprep.subr.bf16.mxu1 %v4075_v11  ;;  %v4139_v11 = vld [vmem:[%s5560_s1 + $0x884] ss:$8 sps:$4 sm:$0xff]  }
  0xf7   :  { %2108 = vmatpush2.bf16.msra.mxu0 %v4070_v12  ;;  %v4137_v12 = vld [vmem:[%s5560_s1 + $0x880] ss:$8 sps:$4 sm:$0xff]  }
  0xf8   :  { %2109 = vmatprep.subr.bf16.mxu0 %v4078_v14 }
  0xf9   :  { %2149 = vmatpush2.bf16.msra.mxu1 %v4073_v15 }
  0xfa   :  { %2150 = vmatprep.subr.bf16.mxu1 %v4081_v18 }
  0xfb   :  { %2110 = vmatpush2.bf16.msra.mxu0 %v4076_v19 }
  0xfc   :  { %2111 = vmatprep.subr.bf16.mxu0 %v4084_v23 }
  0xfd   :  { %2151 = vmatpush2.bf16.msra.mxu1 %v4079_v24 }
  0xfe   :  { %2152 = vmatprep.subr.bf16.mxu1 %v4087_v17 }
  0xff   :  { %2112 = vmatpush2.bf16.msra.mxu0 %v4082_v25 }
 0x100   :  { %2163 = vmatprep.subr.bf16.mxu0 %v4092_v28 }
 0x101   :  { %2153 = vmatpush2.bf16.msra.mxu1 %v4085_v29 }
 0x102   :  { %v1869_v37 = vpop.f32.mrf.mxu0  ;;  %2114 = vmatmul.mubr.bf16.vlgmr.msra.gmra.mxu0 %v3262_v31  ;;  %v2268_v31 = vld [vmem:[%s5563_s3 + $0x1e0] sm:$0xff] }
 0x103   :  { %v1870_v38 = vadd.f32 %v1869_v37, %v325_v32  ;;  %2164 = vmatpush1.bf16.msra.mxu0 %v4090_v33  ;;  %2195 = vmatprep.mubr.bf16.mxu0 %v3267_v34  ;;  %v1910_v41 = vpop.f32.mrf.mxu1  ;;  %v2265_v32 = vld [vmem:[%s5563_s3 + $0x1c8] sm:$0xff]  ;;  %v3612_v33 = vcombine.low %v2264_v21, %v2268_v31  ;;  %v3613_v34 = vcombine.high %v2264_v21, %v2268_v31 }
 0x104   :  { %v1871_v40 = vpop.f32.mrf.mxu0  ;;  %2155 = vmatmul.mubr.bf16.vlgmr.msra.gmra.mxu1 %v3264_v35  ;;  %2165 = vmatprep.subr.bf16.mxu0 %v4097_v36  ;;  %v2269_v35 = vld [vmem:[%s5563_s3 + $0x1e8] sm:$0xff]  ;;  %v2256_v36 = vld [vmem:[%s5563_s3 + $0x180] sm:$0xff] }
 0x105   :  { %v1872_v42 = vadd.f32 %v1871_v40, %v329_v16  ;;  %v5038_v43 = vadd.f32 %v1910_v41, %v1870_v38  ;;  %v1912_v45 = vpop.f32.mrf.mxu1  ;;  %v2260_v16 = vld [vmem:[%s5563_s3 + $0x1a0] sm:$0xff]  ;;  %v3614_v38 = vcombine.low %v2265_v32, %v2269_v35  ;;  %v2257_v41 = vld [vmem:[%s5563_s3 + $0x188] sm:$0xff]  ;;  %3018 = vmatprep.subr.bf16.mxu1 %v3613_v34 }
 0x106   :  { %v1873_v44 = vpop.f32.mrf.mxu0  ;;  %v3605_v40 = vcombine.high %v2256_v36, %v2260_v16  ;;  %3019 = vmatpush1.bf16.msra.mxu1 %v3612_v33  ;;  %v2328_v34 = vld [vmem:[%s5563_s3 + $0x3c0] sm:$0xff] }
 0x107   :  { %v5040_v46 = vadd.f32 %v1912_v45, %v1872_v42  ;;  %2166 = vmatpush1.bf16.msra.mxu0 %v4095_v39  ;;  %v1914_v50 = vpop.f32.mrf.mxu1  ;;  %v3615_v39 = vcombine.high %v2265_v32, %v2269_v35  ;;  %v2248_v42 = vld [vmem:[%s5563_s3 + $0x140] sm:$0xff]  ;;  %v2249_v45 = vld [vmem:[%s5563_s3 + $0x148] sm:$0xff] }
 0x108   :  { %v1874_v48 = vpop.f32.mrf.mxu0  ;;  %2167 = vmatprep.subr.bf16.mxu0 %v4100_v22  ;;  %v2261_v22 = vld [vmem:[%s5563_s3 + $0x1a8] sm:$0xff]  ;;  %v2252_v44 = vld [vmem:[%s5563_s3 + $0x160] sm:$0xff]  ;;  %3020 = vmatprep.subr.bf16.mxu1 %v3605_v40 }
 0x109   :  { %v1915_v51 = vpop.f32.mrf.mxu1  ;;  %v3606_v48 = vcombine.low %v2257_v41, %v2261_v22  ;;  %v2332_v35 = vld [vmem:[%s5563_s3 + $0x3e0] sm:$0xff] }
 0x10a   :  { %v2240_v51 = vld [vmem:[%s5563_s3 + $0x100] sm:$0xff] }
 0x10b   :  { %2168 = vmatpush1.bf16.msra.mxu0 %v4098_v47  ;;  %v3604_v47 = vcombine.low %v2256_v36, %v2260_v16  ;;  %v2329_v36 = vld [vmem:[%s5563_s3 + $0x3c8] sm:$0xff] }
 0x10c   :  { %2169 = vmatprep.subr.bf16.mxu0 %v4103_v49  ;;  %v3597_v49 = vcombine.high %v2248_v42, %v2252_v44  ;;  %v2333_v16 = vld [vmem:[%s5563_s3 + $0x3e8] sm:$0xff] }
 0x10d   :  { %3021 = vmatpush1.bf16.msra.mxu1 %v3604_v47  ;;  %v3679_v40 = vcombine.high %v2329_v36, %v2333_v16 }
 0x10e   :  { %3022 = vmatprep.subr.bf16.mxu1 %v3597_v49  ;;  %v2316_v49 = vld [vmem:[%s5563_s3 + $0x360] sm:$0xff] }
 0x10f   :  { %2170 = vmatpush1.bf16.msra.mxu0 %v4101_v52  ;;  %v2244_v52 = vld [vmem:[%s5563_s3 + $0x120] sm:$0xff] }
 0x110   :  { %2171 = vmatprep.subr.bf16.mxu0 %v4106_v53  ;;  %v2241_v53 = vld [vmem:[%s5563_s3 + $0x108] sm:$0xff] }
 0x113   :  { %2172 = vmatpush1.bf16.msra.mxu0 %v4104_v54  ;;  %v2245_v54 = vld [vmem:[%s5563_s3 + $0x128] sm:$0xff] }
 0x114   :  { %2173 = vmatprep.subr.bf16.mxu0 %v4109_v55  ;;  %v3596_v55 = vcombine.low %v2248_v42, %v2252_v44  ;;  %v2321_v42 = vld [vmem:[%s5563_s3 + $0x388] sm:$0xff]  ;;  %v3676_v44 = vcombine.low %v2328_v34, %v2332_v35 }
 0x116   :  { %3023 = vmatpush1.bf16.msra.mxu1 %v3596_v55 }
 0x117   :  { %2174 = vmatpush1.bf16.msra.mxu0 %v4107_v56 }
 0x118   :  { %2175 = vmatprep.subr.bf16.mxu0 %v4112_v57  ;;  %v3589_v57 = vcombine.high %v2240_v51, %v2244_v52 }
 0x11a   :  { %3024 = vmatprep.subr.bf16.mxu1 %v3589_v57  ;;  %v2308_v57 = vld [vmem:[%s5563_s3 + $0x320] sm:$0xff] }
 0x11b   :  { %2176 = vmatpush1.bf16.msra.mxu0 %v4110_v58  ;;  %v3591_v58 = vcombine.high %v2241_v53, %v2245_v54 }
 0x11c   :  { %2177 = vmatprep.subr.bf16.mxu0 %v4115_v59  ;;  %v2232_v59 = vld [vmem:[%s5563_s3 + $0xc0] sm:$0xff] }
 0x11f   :  { %2178 = vmatpush1.bf16.msra.mxu0 %v4113_v60  ;;  %v2236_v60 = vld [vmem:[%s5563_s3 + $0xe0] sm:$0xff] }
 0x120   :  { %2179 = vmatprep.subr.bf16.mxu0 %v4118_v61  ;;  %v2233_v61 = vld [vmem:[%s5563_s3 + $0xc8] sm:$0xff] }
 0x123   :  { %2180 = vmatpush2.bf16.msra.mxu0 %v4116_v62  ;;  %v2237_v62 = vld [vmem:[%s5563_s3 + $0xe8] sm:$0xff] }
 0x124   :  { %2181 = vmatprep.subr.bf16.mxu0 %v4121_v63  ;;  %v3588_v63 = vcombine.low %v2240_v51, %v2244_v52  ;;  %v2317_v51 = vld [vmem:[%s5563_s3 + $0x368] sm:$0xff] }
 0x126   :  { %3025 = vmatpush1.bf16.msra.mxu1 %v3588_v63 }
 0x127   :  { %2182 = vmatpush2.bf16.msra.mxu0 %v4119_v0  ;;  %v3590_v0 = vcombine.low %v2241_v53, %v2245_v54 }
 0x128   :  { %2183 = vmatprep.subr.bf16.mxu0 %v4124_v1  ;;  %v3581_v1 = vcombine.high %v2232_v59, %v2236_v60 }
 0x12a   :  { %3026 = vmatprep.subr.bf16.mxu1 %v3581_v1  ;;  %v2300_v1 = vld [vmem:[%s5563_s3 + $0x2e0] sm:$0xff] }
 0x12b   :  { %2184 = vmatpush2.bf16.msra.mxu0 %v4122_v2  ;;  %v3583_v2 = vcombine.high %v2233_v61, %v2237_v62 }
 0x12c   :  { %2185 = vmatprep.subr.bf16.mxu0 %v4127_v3  ;;  %v2224_v3 = vld [vmem:[%s5563_s3 + $0x80] sm:$0xff] }
 0x12f   :  { %2186 = vmatpush2.bf16.msra.mxu0 %v4125_v4  ;;  %v2228_v4 = vld [vmem:[%s5563_s3 + $0xa0] sm:$0xff] }
 0x130   :  { %2187 = vmatprep.subr.bf16.mxu0 %v4130_v5  ;;  %v2225_v5 = vld [vmem:[%s5563_s3 + $0x88] sm:$0xff] }
 0x133   :  { %2188 = vmatpush2.bf16.msra.mxu0 %v4128_v6  ;;  %v2229_v6 = vld [vmem:[%s5563_s3 + $0xa8] sm:$0xff] }
 0x134   :  { %2189 = vmatprep.subr.bf16.mxu0 %v4133_v7  ;;  %v3580_v7 = vcombine.low %v2232_v59, %v2236_v60  ;;  %v2309_v59 = vld [vmem:[%s5563_s3 + $0x328] sm:$0xff] }
 0x136   :  { %3027 = vmatpush1.bf16.msra.mxu1 %v3580_v7 }
 0x137   :  { %2190 = vmatpush2.bf16.msra.mxu0 %v4131_v8  ;;  %v3582_v8 = vcombine.low %v2233_v61, %v2237_v62 }
 0x138   :  { %2191 = vmatprep.subr.bf16.mxu0 %v4136_v9  ;;  %v3573_v9 = vcombine.high %v2224_v3, %v2228_v4 }
 0x13a   :  { %3028 = vmatprep.subr.bf16.mxu1 %v3573_v9  ;;  %v2292_v9 = vld [vmem:[%s5563_s3 + $0x2a0] sm:$0xff] }
 0x13b   :  { %2192 = vmatpush2.bf16.msra.mxu0 %v4134_v10  ;;  %v3575_v10 = vcombine.high %v2225_v5, %v2229_v6 }
 0x13c   :  { %2193 = vmatprep.subr.bf16.mxu0 %v4139_v11  ;;  %v2216_v11 = vld [vmem:[%s5563_s3 + $0x40] sm:$0xff] }
 0x13f   :  { %2194 = vmatpush2.bf16.msra.mxu0 %v4137_v12  ;;  %v2220_v12 = vld [vmem:[%s5563_s3 + $0x60] sm:$0xff] }
 0x140   :  { %3059 = vmatprep.subr.bf16.mxu0 %v3615_v39  ;;  %v3564_v21 = vcombine.low %v2216_v11, %v2220_v12  ;;  %v3677_v39 = vcombine.high %v2328_v34, %v2332_v35 }
 0x142   :  { %v1951_v14 = vpop.f32.mrf.mxu0  ;;  %2196 = vmatmul.mubr.bf16.vlgmr.msra.gmra.mxu0 %v3266_v13  ;;  %v2217_v13 = vld [vmem:[%s5563_s3 + $0x48] sm:$0xff] }
 0x143   :  { %v1952_v15 = vadd.f32 %v1951_v14, %v5038_v43  ;;  %v1992_v19 = vpop.f32.mrf.mxu1  ;;  %v3607_v43 = vcombine.high %v2257_v41, %v2261_v22  ;;  %3060 = vmatpush1.bf16.msra.mxu0 %v3614_v38  ;;  %v2221_v14 = vld [vmem:[%s5563_s3 + $0x68] sm:$0xff]  ;;  %v2320_v41 = vld [vmem:[%s5563_s3 + $0x380] sm:$0xff] }
 0x144   :  { %v1953_v18 = vpop.f32.mrf.mxu0  ;;  %v3566_v31 = vcombine.low %v2217_v13, %v2221_v14  ;;  %v2324_v22 = vld [vmem:[%s5563_s3 + $0x3a0] sm:$0xff] }
 0x145   :  { %v1954_v23 = vadd.f32 %v1953_v18, %v5040_v46  ;;  %v5127_v24 = vadd.f32 %v1992_v19, %v1952_v15  ;;  %v1994_v25 = vpop.f32.mrf.mxu1  ;;  %v2253_v46 = vld [vmem:[%s5563_s3 + $0x168] sm:$0xff]  ;;  %3061 = vmatprep.subr.bf16.mxu0 %v3607_v43  ;;  %v3572_v15 = vcombine.low %v2224_v3, %v2228_v4  ;;  %v3574_v18 = vcombine.low %v2225_v5, %v2229_v6 }
 0x146   :  { %v1955_v17 = vpop.f32.mrf.mxu0  ;;  %v3599_v50 = vcombine.high %v2249_v45, %v2253_v46  ;;  %v3598_v56 = vcombine.low %v2249_v45, %v2253_v46  ;;  %v3565_v19 = vcombine.high %v2216_v11, %v2220_v12  ;;  %v2325_v43 = vld [vmem:[%s5563_s3 + $0x3a8] sm:$0xff]  ;;  %v3678_v45 = vcombine.low %v2329_v36, %v2333_v16  ;;  %v2272_v16 = vld [vmem:[%s5563_s3 + $0x200] sm:$0xff] }
 0x147   :  { %v5129_v27 = vadd.f32 %v1994_v25, %v1954_v23  ;;  %v1996_v29 = vpop.f32.mrf.mxu1  ;;  %3062 = vmatpush1.bf16.msra.mxu0 %v3606_v48  ;;  %v3567_v23 = vcombine.high %v2217_v13, %v2221_v14  ;;  %v2208_v17 = vld [vmem:[%s5563_s3] sm:$0xff]  ;;  %3029 = vmatpush1.bf16.msra.mxu1 %v3572_v15  ;;  %v3669_v46 = vcombine.high %v2320_v41, %v2324_v22  ;;  %v2301_v3 = vld [vmem:[%s5563_s3 + $0x2e8] sm:$0xff] }
 0x148   :  { %v1956_v28 = vpop.f32.mrf.mxu0  ;;  %3063 = vmatprep.subr.bf16.mxu0 %v3599_v50  ;;  %v2212_v25 = vld [vmem:[%s5563_s3 + $0x20] sm:$0xff]  ;;  %v2213_v29 = vld [vmem:[%s5563_s3 + $0x28] sm:$0xff]  ;;  %3030 = vmatprep.subr.bf16.mxu1 %v3565_v19  ;;  %v3671_v47 = vcombine.high %v2321_v42, %v2325_v43  ;;  %v3668_v52 = vcombine.low %v2320_v41, %v2324_v22  ;;  %v3670_v53 = vcombine.low %v2321_v42, %v2325_v43 }
 0x149   :  { %v1997_v37 = vpop.f32.mrf.mxu1  ;;  %v2209_v28 = vld [vmem:[%s5563_s3 + $0x8] sm:$0xff]  ;;  %v3557_v32 = vcombine.high %v2208_v17, %v2212_v25  ;;  %v2312_v48 = vld [vmem:[%s5563_s3 + $0x340] sm:$0xff] }
 0x14a   :  { %v3559_v33 = vcombine.high %v2209_v28, %v2213_v29  ;;  %v3556_v37 = vcombine.low %v2208_v17, %v2212_v25  ;;  %v3558_v38 = vcombine.low %v2209_v28, %v2213_v29  ;;  %v2313_v50 = vld [vmem:[%s5563_s3 + $0x348] sm:$0xff]  ;;  %v3661_v54 = vcombine.high %v2312_v48, %v2316_v49  ;;  %v2284_v17 = vld [vmem:[%s5563_s3 + $0x260] sm:$0xff] }
 0x14b   :  { %3064 = vmatpush1.bf16.msra.mxu0 %v3598_v56  ;;  %3031 = vmatpush1.bf16.msra.mxu1 %v3564_v21  ;;  %v3663_v55 = vcombine.high %v2313_v50, %v2317_v51  ;;  %v2304_v56 = vld [vmem:[%s5563_s3 + $0x300] sm:$0xff]  ;;  %v3660_v60 = vcombine.low %v2312_v48, %v2316_v49  ;;  %v3662_v61 = vcombine.low %v2313_v50, %v2317_v51  ;;  %v2293_v11 = vld [vmem:[%s5563_s3 + $0x2a8] sm:$0xff]  ;;  %v2270_v49 = vld [vmem:[%s5563_s3 + $0x1f0] sm:$0xff] }
 0x14c   :  { %3065 = vmatprep.subr.bf16.mxu0 %v3591_v58  ;;  %3032 = vmatprep.subr.bf16.mxu1 %v3557_v32  ;;  %v2305_v58 = vld [vmem:[%s5563_s3 + $0x308] sm:$0xff]  ;;  %v3653_v62 = vcombine.high %v2304_v56, %v2308_v57  ;;  %v3652_v4 = vcombine.low %v2304_v56, %v2308_v57  ;;  %v2267_v50 = vld [vmem:[%s5563_s3 + $0x1d8] sm:$0xff] }
 0x14d   :  { %v3655_v63 = vcombine.high %v2305_v58, %v2309_v59  ;;  %v3654_v5 = vcombine.low %v2305_v58, %v2309_v59  ;;  %v2281_v25 = vld [vmem:[%s5563_s3 + $0x248] sm:$0xff] }
 0x14e   :  { %v2285_v29 = vld [vmem:[%s5563_s3 + $0x268] sm:$0xff] }
 0x14f   :  { %3066 = vmatpush1.bf16.msra.mxu0 %v3590_v0  ;;  %3033 = vmatpush1.bf16.msra.mxu1 %v3556_v37  ;;  %v2296_v0 = vld [vmem:[%s5563_s3 + $0x2c0] sm:$0xff]  ;;  %v3630_v32 = vcombine.low %v2281_v25, %v2285_v29  ;;  %v2277_v41 = vld [vmem:[%s5563_s3 + $0x228] sm:$0xff] }
 0x150   :  { %3067 = vmatprep.subr.bf16.mxu0 %v3583_v2  ;;  %3034 = vmatprep.subr.bf16.mxu1 %v3677_v39  ;;  %v2297_v2 = vld [vmem:[%s5563_s3 + $0x2c8] sm:$0xff]  ;;  %v3645_v6 = vcombine.high %v2296_v0, %v2300_v1  ;;  %v3644_v12 = vcombine.low %v2296_v0, %v2300_v1  ;;  %v2276_v37 = vld [vmem:[%s5563_s3 + $0x220] sm:$0xff] }
 0x151   :  { %v3647_v7 = vcombine.high %v2297_v2, %v2301_v3  ;;  %v3646_v13 = vcombine.low %v2297_v2, %v2301_v3  ;;  %v3620_v43 = vcombine.low %v2272_v16, %v2276_v37 }
 0x153   :  { %3068 = vmatpush1.bf16.msra.mxu0 %v3582_v8  ;;  %3035 = vmatpush2.bf16.msra.mxu1 %v3676_v44  ;;  %v2288_v8 = vld [vmem:[%s5563_s3 + $0x280] sm:$0xff] }
 0x154   :  { %3069 = vmatprep.subr.bf16.mxu0 %v3575_v10  ;;  %3036 = vmatprep.subr.bf16.mxu1 %v3669_v46  ;;  %v2289_v10 = vld [vmem:[%s5563_s3 + $0x288] sm:$0xff]  ;;  %v3637_v14 = vcombine.high %v2288_v8, %v2292_v9 }
 0x155   :  { %v3639_v15 = vcombine.high %v2289_v10, %v2293_v11  ;;  %v3638_v19 = vcombine.low %v2289_v10, %v2293_v11 }
 0x157   :  { %3070 = vmatpush1.bf16.msra.mxu0 %v3574_v18  ;;  %3037 = vmatpush2.bf16.msra.mxu1 %v3668_v52  ;;  %v3636_v18 = vcombine.low %v2288_v8, %v2292_v9  ;;  %v2271_v52 = vld [vmem:[%s5563_s3 + $0x1f8] sm:$0xff] }
 0x158   :  { %3071 = vmatprep.subr.bf16.mxu0 %v3567_v23  ;;  %3038 = vmatprep.subr.bf16.mxu1 %v3661_v54  ;;  %v2280_v23 = vld [vmem:[%s5563_s3 + $0x240] sm:$0xff]  ;;  %v3619_v56 = vcombine.high %v2267_v50, %v2271_v52 }
 0x159   :  { %v3629_v28 = vcombine.high %v2280_v23, %v2284_v17 }
 0x15b   :  { %3072 = vmatpush1.bf16.msra.mxu0 %v3566_v31  ;;  %3039 = vmatpush2.bf16.msra.mxu1 %v3660_v60  ;;  %v3628_v31 = vcombine.low %v2280_v23, %v2284_v17  ;;  %v2250_v17 = vld [vmem:[%s5563_s3 + $0x150] sm:$0xff] }
 0x15c   :  { %3073 = vmatprep.subr.bf16.mxu0 %v3559_v33  ;;  %3040 = vmatprep.subr.bf16.mxu1 %v3653_v62  ;;  %v3631_v33 = vcombine.high %v2281_v25, %v2285_v29  ;;  %v2254_v29 = vld [vmem:[%s5563_s3 + $0x170] sm:$0xff] }
 0x15f   :  { %3074 = vmatpush1.bf16.msra.mxu0 %v3558_v38  ;;  %3041 = vmatpush2.bf16.msra.mxu1 %v3652_v4  ;;  %v2273_v38 = vld [vmem:[%s5563_s3 + $0x208] sm:$0xff] }
 0x160   :  { %3075 = vmatprep.subr.bf16.mxu0 %v3679_v40  ;;  %3042 = vmatprep.subr.bf16.mxu1 %v3645_v6  ;;  %v3621_v40 = vcombine.high %v2272_v16, %v2276_v37  ;;  %v3622_v44 = vcombine.low %v2273_v38, %v2277_v41  ;;  %v2246_v16 = vld [vmem:[%s5563_s3 + $0x130] sm:$0xff]  ;;  %v2243_v37 = vld [vmem:[%s5563_s3 + $0x118] sm:$0xff] }
 0x163   :  { %3076 = vmatpush2.bf16.msra.mxu0 %v3678_v45  ;;  %3043 = vmatpush2.bf16.msra.mxu1 %v3644_v12  ;;  %v3623_v45 = vcombine.high %v2273_v38, %v2277_v41  ;;  %v2258_v12 = vld [vmem:[%s5563_s3 + $0x190] sm:$0xff]  ;;  %v2247_v38 = vld [vmem:[%s5563_s3 + $0x138] sm:$0xff] }
 0x164   :  { %3077 = vmatprep.subr.bf16.mxu0 %v3671_v47  ;;  %3044 = vmatprep.subr.bf16.mxu1 %v3637_v14  ;;  %v2262_v14 = vld [vmem:[%s5563_s3 + $0x1b0] sm:$0xff]  ;;  %v3595_v41 = vcombine.high %v2243_v37, %v2247_v38 }
 0x165   :  { %v3609_v25 = vcombine.high %v2258_v12, %v2262_v14 }
 0x167   :  { %3078 = vmatpush2.bf16.msra.mxu0 %v3670_v53  ;;  %3045 = vmatpush2.bf16.msra.mxu1 %v3636_v18  ;;  %v2263_v18 = vld [vmem:[%s5563_s3 + $0x1b8] sm:$0xff] }
 0x168   :  { %3079 = vmatprep.subr.bf16.mxu0 %v3663_v55  ;;  %3046 = vmatprep.subr.bf16.mxu1 %v3629_v28  ;;  %v3618_v55 = vcombine.low %v2267_v50, %v2271_v52  ;;  %v2227_v50 = vld [vmem:[%s5563_s3 + $0x98] sm:$0xff] }
 0x16b   :  { %3080 = vmatpush2.bf16.msra.mxu0 %v3662_v61  ;;  %3047 = vmatpush2.bf16.msra.mxu1 %v3628_v31  ;;  %v2255_v31 = vld [vmem:[%s5563_s3 + $0x178] sm:$0xff] }
 0x16c   :  { %3081 = vmatprep.subr.bf16.mxu0 %v3655_v63  ;;  %3048 = vmatprep.subr.bf16.mxu1 %v3621_v40 }
 0x16f   :  { %3082 = vmatpush2.bf16.msra.mxu0 %v3654_v5  ;;  %3049 = vmatpush2.bf16.msra.mxu1 %v3620_v43  ;;  %v2235_v43 = vld [vmem:[%s5563_s3 + $0xd8] sm:$0xff] }
 0x170   :  { %3083 = vmatprep.subr.bf16.mxu0 %v3647_v7 }
 0x173   :  { %3084 = vmatpush2.bf16.msra.mxu0 %v3646_v13 }
 0x174   :  { %3085 = vmatprep.subr.bf16.mxu0 %v3639_v15  ;;  %v2259_v15 = vld [vmem:[%s5563_s3 + $0x198] sm:$0xff] }
 0x175   :  { %v3611_v28 = vcombine.high %v2259_v15, %v2263_v18 }
 0x177   :  { %3086 = vmatpush2.bf16.msra.mxu0 %v3638_v19 }
 0x178   :  { %3087 = vmatprep.subr.bf16.mxu0 %v3631_v33  ;;  %v3610_v33 = vcombine.low %v2259_v15, %v2263_v18  ;;  %v2322_v18 = vld [vmem:[%s5563_s3 + $0x390] sm:$0xff] }
 0x17b   :  { %3088 = vmatpush2.bf16.msra.mxu0 %v3630_v32  ;;  %v3608_v32 = vcombine.low %v2258_v12, %v2262_v14 }
 0x17c   :  { %3089 = vmatprep.subr.bf16.mxu0 %v3623_v45 }
 0x17f   :  { %3090 = vmatpush2.bf16.msra.mxu0 %v3622_v44  ;;  %v2239_v44 = vld [vmem:[%s5563_s3 + $0xf8] sm:$0xff] }
 0x180   :  { %3141 = vmatprep.subr.bf16.mxu0 %v3619_v56  ;;  %v2218_v56 = vld [vmem:[%s5563_s3 + $0x50] sm:$0xff] }
 0x182   :  { %v2033_v21 = vpop.f32.mrf.mxu0 }
 0x183   :  { %v2034_v34 = vadd.f32 %v2033_v21, %v5127_v24  ;;  %v2251_v21 = vld [vmem:[%s5563_s3 + $0x158] sm:$0xff] }
 0x184   :  { %v2035_v35 = vpop.f32.mrf.mxu0  ;;  %v2074_v36 = vpop.f32.mrf.mxu1 }
 0x185   :  { %v2036_v39 = vadd.f32 %v2035_v35, %v5129_v27  ;;  %v2075_v24 = vadd.f32 %v2074_v36, %v2034_v34  ;;  %v2266_v27 = vld [vmem:[%s5563_s3 + $0x1d0] sm:$0xff]  ;;  %v3601_v34 = vcombine.high %v2250_v17, %v2254_v29  ;;  %v3603_v35 = vcombine.high %v2251_v21, %v2255_v31 }
 0x186   :  { %v2037_v22 = vpop.f32.mrf.mxu0  ;;  %v2076_v42 = vpop.f32.mrf.mxu1  ;;  %v3617_v51 = vcombine.high %v2266_v27, %v2270_v49  ;;  %v3616_v54 = vcombine.low %v2266_v27, %v2270_v49  ;;  %v2242_v36 = vld [vmem:[%s5563_s3 + $0x110] sm:$0xff] }
 0x187   :  { %v2077_v46 = vadd.f32 %v2076_v42, %v2036_v39  ;;  %v3600_v39 = vcombine.low %v2250_v17, %v2254_v29  ;;  %v3593_v40 = vcombine.high %v2242_v36, %v2246_v16  ;;  %v2234_v22 = vld [vmem:[%s5563_s3 + $0xd0] sm:$0xff]  ;;  %v3592_v45 = vcombine.low %v2242_v36, %v2246_v16  ;;  %v2323_v17 = vld [vmem:[%s5563_s3 + $0x398] sm:$0xff] }
 0x188   :  { %v2038_v47 = vpop.f32.mrf.mxu0  ;;  %v2078_v48 = vpop.f32.mrf.mxu1  ;;  %3100 = vmatprep.subr.bf16.mxu1 %v3617_v51  ;;  %v2238_v42 = vld [vmem:[%s5563_s3 + $0xf0] sm:$0xff]  ;;  %v2231_v51 = vld [vmem:[%s5563_s3 + $0xb8] sm:$0xff] }
 0x189   :  { %v3585_v47 = vcombine.high %v2234_v22, %v2238_v42  ;;  %v3587_v48 = vcombine.high %v2235_v43, %v2239_v44  ;;  %v2226_v27 = vld [vmem:[%s5563_s3 + $0x90] sm:$0xff]  ;;  %v3584_v52 = vcombine.low %v2234_v22, %v2238_v42 }
 0x18a   :  { %v2079_v53 = vpop.f32.mrf.mxu1  ;;  %v2230_v49 = vld [vmem:[%s5563_s3 + $0xb0] sm:$0xff] }
 0x18b   :  { %v3586_v53 = vcombine.low %v2235_v43, %v2239_v44 }
 0x1c2   :  { %v2115_v57 = vpop.f32.mrf.mxu0 }
 0x1c3   :  { %v2116_v1 = vadd.f32 %v2115_v57, %v2075_v24  ;;  %v3602_v24 = vcombine.low %v2251_v21, %v2255_v31  ;;  %v2222_v57 = vld [vmem:[%s5563_s3 + $0x70] sm:$0xff] }
 0x1c4   :  { %v2117_v58 = vpop.f32.mrf.mxu0  ;;  %v2156_v59 = vpop.f32.mrf.mxu1 }
 0x1c5   :  { %v2118_v2 = vadd.f32 %v2117_v58, %v2077_v46  ;;  %v2157_v3 = vadd.f32 %v2156_v59, %v2116_v1  ;;  %v3594_v46 = vcombine.low %v2243_v37, %v2247_v38  ;;  %v2219_v58 = vld [vmem:[%s5563_s3 + $0x58] sm:$0xff]  ;;  %v2214_v1 = vld [vmem:[%s5563_s3 + $0x30] sm:$0xff] }
 0x1c6   :  { %v2119_v60 = vpop.f32.mrf.mxu0  ;;  %v2158_v61 = vpop.f32.mrf.mxu1  ;;  %v2223_v59 = vld [vmem:[%s5563_s3 + $0x78] sm:$0xff] }
 0x1c7   :  { %v2159_v5 = vadd.f32 %v2158_v61, %v2118_v2  ;;  %v3576_v60 = vcombine.low %v2226_v27, %v2230_v49  ;;  %v3578_v61 = vcombine.low %v2227_v50, %v2231_v51  ;;  %v2211_v2 = vld [vmem:[%s5563_s3 + $0x18] sm:$0xff] }
 0x1c8   :  { %v2120_v62 = vpop.f32.mrf.mxu0  ;;  %v2160_v63 = vpop.f32.mrf.mxu1 }
 0x1c9   :  { %v3569_v62 = vcombine.high %v2218_v56, %v2222_v57  ;;  %v3571_v63 = vcombine.high %v2219_v58, %v2223_v59 }
 0x1ca   :  { %v2161_v0 = vpop.f32.mrf.mxu1 }
 0x1cb   :  { %v2210_v0 = vld [vmem:[%s5563_s3 + $0x10] sm:$0xff] }
 0x1cc   :  { %v3560_v12 = vcombine.low %v2210_v0, %v2214_v1 }
 0x202   :  { %v2197_v4 = vpop.f32.mrf.mxu0 }
 0x203   :  { %v2198_v6 = vadd.f32 %v2197_v4, %v2157_v3  ;;  %v2215_v3 = vld [vmem:[%s5563_s3 + $0x38] sm:$0xff]  ;;  %v3568_v4 = vcombine.low %v2218_v56, %v2222_v57 }
 0x204   :  { %v2199_v7 = vpop.f32.mrf.mxu0 }
 0x205   :  { %v2200_v8 = vadd.f32 %v2199_v7, %v2159_v5  ;;  %v2204_v9 = vmax.f32 %v2198_v6, 0.0  ;;  %v3570_v5 = vcombine.low %v2219_v58, %v2223_v59  ;;  %v3561_v6 = vcombine.high %v2210_v0, %v2214_v1 }
 0x206   :  { %v2201_v10 = vpop.f32.mrf.mxu0  ;;  %v3563_v7 = vcombine.high %v2211_v2, %v2215_v3 }
 0x207   :  { %v2205_v11 = vmax.f32 %v2200_v8, 0.0  ;;  %v5349_v23 = vpack.c.bf16 %v2204_v9, %v2204_v9  ;;  %v2330_v8 = vld [vmem:[%s5563_s3 + $0x3d0] sm:$0xff]  ;;  %v2331_v10 = vld [vmem:[%s5563_s3 + $0x3d8] sm:$0xff] }
 0x208   :  { %v2202_v13 = vpop.f32.mrf.mxu0  ;;  %v2334_v9 = vld [vmem:[%s5563_s3 + $0x3f0] sm:$0xff] }
 0x209   :  { %v2207_v19 = vpack.c.bf16 %v2205_v11, %v2205_v11  ;;  %v2335_v11 = vld [vmem:[%s5563_s3 + $0x3f8] sm:$0xff]  ;;  %v3562_v13 = vcombine.low %v2211_v2, %v2215_v3  ;;  %v3681_v14 = vcombine.high %v2330_v8, %v2334_v9 }
 0x20a   :  { %v3683_v15 = vcombine.high %v2331_v10, %v2335_v11  ;;  %v3682_v29 = vcombine.low %v2331_v10, %v2335_v11 }
 0x20b   :  { %3050 = vmatprep.mubr.bf16.mxu1 %v2207_v19  ;;  %3091 = vmatprep.mubr.bf16.mxu0 %v2207_v19 }
 0x20c   :  { %3051 = vmatmul.mubr.bf16.vlgmr.msra.gmra.mxu1 %v5349_v23  ;;  %3092 = vmatmul.mubr.bf16.vlgmr.msra.gmra.mxu0 %v5349_v23 }
 0x20d   :  { %3101 = vmatpush1.bf16.msra.mxu1 %v3616_v54  ;;  %3142 = vmatpush1.bf16.msra.mxu0 %v3618_v55  ;;  %v3577_v54 = vcombine.high %v2226_v27, %v2230_v49  ;;  %v3579_v55 = vcombine.high %v2227_v50, %v2231_v51 }
 0x20e   :  { %3132 = vmatprep.mubr.bf16.mxu1 %v2207_v19  ;;  %3173 = vmatprep.mubr.bf16.mxu0 %v2207_v19  ;;  %v2326_v19 = vld [vmem:[%s5563_s3 + $0x3b0] sm:$0xff] }
 0x20f   :  { %3102 = vmatprep.subr.bf16.mxu1 %v3609_v25  ;;  %3143 = vmatprep.subr.bf16.mxu0 %v3611_v28  ;;  %v2327_v25 = vld [vmem:[%s5563_s3 + $0x3b8] sm:$0xff]  ;;  %v3680_v28 = vcombine.low %v2330_v8, %v2334_v9  ;;  %v3673_v21 = vcombine.high %v2322_v18, %v2326_v19  ;;  %v3672_v36 = vcombine.low %v2322_v18, %v2326_v19  ;;  %v2352_v18 = vsub.s32 3, %v4986_v20  ;;  %v3182_v19 = vld [vmem:[%s5565_s5] sm:$0xff] }
 0x210   :  { %v3675_v31 = vcombine.high %v2323_v17, %v2327_v25  ;;  %v3674_v16 = vcombine.low %v2323_v17, %v2327_v25  ;;  %v3183_v17 = vld [vmem:[%s5565_s5 + $0x8] sm:$0xff] }
 0x211   :  { %3103 = vmatpush1.bf16.msra.mxu1 %v3608_v32  ;;  %3144 = vmatpush1.bf16.msra.mxu0 %v3610_v33  ;;  %v2314_v32 = vld [vmem:[%s5563_s3 + $0x350] sm:$0xff] }
 0x212   :  { %3104 = vmatprep.subr.bf16.mxu1 %v3601_v34  ;;  %3145 = vmatprep.subr.bf16.mxu0 %v3603_v35  ;;  %v2318_v33 = vld [vmem:[%s5563_s3 + $0x370] sm:$0xff]  ;;  %v2315_v34 = vld [vmem:[%s5563_s3 + $0x358] sm:$0xff] }
 0x213   :  { %v2319_v35 = vld [vmem:[%s5563_s3 + $0x378] sm:$0xff]  ;;  %v3665_v37 = vcombine.high %v2314_v32, %v2318_v33  ;;  %v3664_v22 = vcombine.low %v2314_v32, %v2318_v33 }
 0x214   :  { %v3667_v38 = vcombine.high %v2315_v34, %v2319_v35  ;;  %v3666_v42 = vcombine.low %v2315_v34, %v2319_v35 }
 0x215   :  { %3105 = vmatpush1.bf16.msra.mxu1 %v3600_v39  ;;  %3146 = vmatpush1.bf16.msra.mxu0 %v3602_v24  ;;  %v2306_v39 = vld [vmem:[%s5563_s3 + $0x310] sm:$0xff] }
 0x216   :  { %3106 = vmatprep.subr.bf16.mxu1 %v3593_v40  ;;  %3147 = vmatprep.subr.bf16.mxu0 %v3595_v41  ;;  %v2310_v24 = vld [vmem:[%s5563_s3 + $0x330] sm:$0xff]  ;;  %v2307_v40 = vld [vmem:[%s5563_s3 + $0x318] sm:$0xff] }
 0x217   :  { %v2311_v41 = vld [vmem:[%s5563_s3 + $0x338] sm:$0xff]  ;;  %v3657_v43 = vcombine.high %v2306_v39, %v2310_v24  ;;  %v3656_v27 = vcombine.low %v2306_v39, %v2310_v24 }
 0x218   :  { %v3659_v44 = vcombine.high %v2307_v40, %v2311_v41  ;;  %v3658_v49 = vcombine.low %v2307_v40, %v2311_v41 }
 0x219   :  { %3107 = vmatpush1.bf16.msra.mxu1 %v3592_v45  ;;  %3148 = vmatpush1.bf16.msra.mxu0 %v3594_v46  ;;  %v2298_v45 = vld [vmem:[%s5563_s3 + $0x2d0] sm:$0xff] }
 0x21a   :  { %3108 = vmatprep.subr.bf16.mxu1 %v3585_v47  ;;  %3149 = vmatprep.subr.bf16.mxu0 %v3587_v48  ;;  %v2302_v46 = vld [vmem:[%s5563_s3 + $0x2f0] sm:$0xff]  ;;  %v2299_v47 = vld [vmem:[%s5563_s3 + $0x2d8] sm:$0xff] }
 0x21b   :  { %v2303_v48 = vld [vmem:[%s5563_s3 + $0x2f8] sm:$0xff]  ;;  %v3649_v50 = vcombine.high %v2298_v45, %v2302_v46  ;;  %v3648_v56 = vcombine.low %v2298_v45, %v2302_v46 }
 0x21c   :  { %v3651_v51 = vcombine.high %v2299_v47, %v2303_v48  ;;  %v3650_v57 = vcombine.low %v2299_v47, %v2303_v48 }
 0x21d   :  { %3109 = vmatpush1.bf16.msra.mxu1 %v3584_v52  ;;  %3150 = vmatpush1.bf16.msra.mxu0 %v3586_v53  ;;  %v2290_v52 = vld [vmem:[%s5563_s3 + $0x290] sm:$0xff] }
 0x21e   :  { %3110 = vmatprep.subr.bf16.mxu1 %v3577_v54  ;;  %3151 = vmatprep.subr.bf16.mxu0 %v3579_v55  ;;  %v2294_v53 = vld [vmem:[%s5563_s3 + $0x2b0] sm:$0xff]  ;;  %v2291_v54 = vld [vmem:[%s5563_s3 + $0x298] sm:$0xff] }
 0x21f   :  { %v2295_v55 = vld [vmem:[%s5563_s3 + $0x2b8] sm:$0xff]  ;;  %v3641_v58 = vcombine.high %v2290_v52, %v2294_v53  ;;  %v3640_v0 = vcombine.low %v2290_v52, %v2294_v53  ;;  %v2360_v52 = vsub.s32 5, %v4986_v20  ;;  %v2368_v53 = vsub.s32 7, %v4986_v20 }
 0x220   :  { %v3643_v59 = vcombine.high %v2291_v54, %v2295_v55  ;;  %v3642_v1 = vcombine.low %v2291_v54, %v2295_v55  ;;  %v3184_v54 = vld [vmem:[%s5565_s5 + $0x10] sm:$0xff]  ;;  %v3185_v55 = vld [vmem:[%s5565_s5 + $0x18] sm:$0xff] }
 0x221   :  { %3111 = vmatpush1.bf16.msra.mxu1 %v3576_v60  ;;  %3152 = vmatpush1.bf16.msra.mxu0 %v3578_v61  ;;  %v2282_v60 = vld [vmem:[%s5563_s3 + $0x250] sm:$0xff] }
 0x222   :  { %3112 = vmatprep.subr.bf16.mxu1 %v3569_v62  ;;  %3153 = vmatprep.subr.bf16.mxu0 %v3571_v63  ;;  %v2286_v61 = vld [vmem:[%s5563_s3 + $0x270] sm:$0xff]  ;;  %v2283_v62 = vld [vmem:[%s5563_s3 + $0x258] sm:$0xff] }
 0x223   :  { %v2287_v63 = vld [vmem:[%s5563_s3 + $0x278] sm:$0xff]  ;;  %v3633_v2 = vcombine.high %v2282_v60, %v2286_v61  ;;  %v3632_v8 = vcombine.low %v2282_v60, %v2286_v61 }
 0x224   :  { %v3635_v3 = vcombine.high %v2283_v62, %v2287_v63  ;;  %v3634_v9 = vcombine.low %v2283_v62, %v2287_v63 }
 0x225   :  { %3113 = vmatpush1.bf16.msra.mxu1 %v3568_v4  ;;  %3154 = vmatpush1.bf16.msra.mxu0 %v3570_v5  ;;  %v2274_v4 = vld [vmem:[%s5563_s3 + $0x210] sm:$0xff] }
 0x226   :  { %3114 = vmatprep.subr.bf16.mxu1 %v3561_v6  ;;  %3155 = vmatprep.subr.bf16.mxu0 %v3563_v7  ;;  %v2278_v5 = vld [vmem:[%s5563_s3 + $0x230] sm:$0xff]  ;;  %v2275_v6 = vld [vmem:[%s5563_s3 + $0x218] sm:$0xff] }
 0x227   :  { %v2279_v7 = vld [vmem:[%s5563_s3 + $0x238] sm:$0xff]  ;;  %v3625_v10 = vcombine.high %v2274_v4, %v2278_v5 }
 0x228   :  { %v3627_v11 = vcombine.high %v2275_v6, %v2279_v7 }
 0x229   :  { %3115 = vmatpush1.bf16.msra.mxu1 %v3560_v12  ;;  %3156 = vmatpush1.bf16.msra.mxu0 %v3562_v13  ;;  %v3624_v12 = vcombine.low %v2274_v4, %v2278_v5  ;;  %v3626_v13 = vcombine.low %v2275_v6, %v2279_v7 }
 0x22a   :  { %3116 = vmatprep.subr.bf16.mxu1 %v3681_v14  ;;  %3157 = vmatprep.subr.bf16.mxu0 %v3683_v15  ;;  %v2348_v14 = vsub.s32 2, %v4986_v20  ;;  %v2336_v15 = vld [vmem:[%s5564_s4] sm:$0xff] }
 0x22b   :  { %v2341_v25 = vrot.slane %v2336_v15, %v324_v26  ;;  %v2361_v60 = vrot.slane %v2336_v15, %v2360_v52  ;;  %v2369_v61 = vrot.slane %v2336_v15, %v2368_v53 }
 0x22d   :  { %3117 = vmatpush2.bf16.msra.mxu1 %v3680_v28  ;;  %3158 = vmatpush2.bf16.msra.mxu0 %v3682_v29  ;;  %v3186_v28 = vunpack.c.l.bf16 %v3182_v19  ;;  %v3188_v29 = vunpack.c.l.bf16 %v3183_v17 }
 0x22e   :  { %3118 = vmatprep.subr.bf16.mxu1 %v3673_v21  ;;  %3159 = vmatprep.subr.bf16.mxu0 %v3675_v31  ;;  %v2345_v21 = vrot.slane %v2336_v15, %v328_v30  ;;  %v2353_v31 = vrot.slane %v2336_v15, %v2352_v18 }
 0x231   :  { %3119 = vmatpush2.bf16.msra.mxu1 %v3672_v36  ;;  %3160 = vmatpush2.bf16.msra.mxu0 %v3674_v16  ;;  %v3187_v36 = vunpack.c.h.bf16 %v3182_v19  ;;  %v3189_v16 = vunpack.c.h.bf16 %v3183_v17 }
 0x232   :  { %3120 = vmatprep.subr.bf16.mxu1 %v3665_v37  ;;  %3161 = vmatprep.subr.bf16.mxu0 %v3667_v38 }
 0x235   :  { %3121 = vmatpush2.bf16.msra.mxu1 %v3664_v22  ;;  %3162 = vmatpush2.bf16.msra.mxu0 %v3666_v42 }
 0x236   :  { %3122 = vmatprep.subr.bf16.mxu1 %v3657_v43  ;;  %3163 = vmatprep.subr.bf16.mxu0 %v3659_v44 }
 0x239   :  { %3123 = vmatpush2.bf16.msra.mxu1 %v3656_v27  ;;  %3164 = vmatpush2.bf16.msra.mxu0 %v3658_v49 }
 0x23a   :  { %3124 = vmatprep.subr.bf16.mxu1 %v3649_v50  ;;  %3165 = vmatprep.subr.bf16.mxu0 %v3651_v51  ;;  %v2356_v50 = vsub.s32 4, %v4986_v20  ;;  %v2364_v51 = vsub.s32 6, %v4986_v20  ;;  %v3193_v20 = vunpack.c.h.bf16 %v3185_v55 }
 0x23d   :  { %3125 = vmatpush2.bf16.msra.mxu1 %v3648_v56  ;;  %3166 = vmatpush2.bf16.msra.mxu0 %v3650_v57  ;;  %v2357_v56 = vrot.slane %v2336_v15, %v2356_v50  ;;  %v2365_v57 = vrot.slane %v2336_v15, %v2364_v51 }
 0x23e   :  { %3126 = vmatprep.subr.bf16.mxu1 %v3641_v58  ;;  %3167 = vmatprep.subr.bf16.mxu0 %v3643_v59  ;;  %v3190_v58 = vunpack.c.l.bf16 %v3184_v54  ;;  %v3192_v59 = vunpack.c.l.bf16 %v3185_v55 }
 0x241   :  { %3127 = vmatpush2.bf16.msra.mxu1 %v3640_v0  ;;  %3168 = vmatpush2.bf16.msra.mxu0 %v3642_v1 }
 0x242   :  { %3128 = vmatprep.subr.bf16.mxu1 %v3633_v2  ;;  %3169 = vmatprep.subr.bf16.mxu0 %v3635_v3  ;;  %v3191_v2 = vunpack.c.h.bf16 %v3184_v54 }
 0x245   :  { %3129 = vmatpush2.bf16.msra.mxu1 %v3632_v8  ;;  %3170 = vmatpush2.bf16.msra.mxu0 %v3634_v9 }
 0x246   :  { %3130 = vmatprep.subr.bf16.mxu1 %v3625_v10  ;;  %3171 = vmatprep.subr.bf16.mxu0 %v3627_v11 }
 0x249   :  { %3131 = vmatpush2.bf16.msra.mxu1 %v3624_v12  ;;  %3172 = vmatpush2.bf16.msra.mxu0 %v3626_v13 }
 0x24c   :  { %3133 = vmatmul.mubr.bf16.vlgmr.msra.gmra.mxu1 %v5349_v23  ;;  %3174 = vmatmul.mubr.bf16.vlgmr.msra.gmra.mxu0 %v5349_v23  ;;  %v2349_v23 = vrot.slane %v2336_v15, %v2348_v14 }
 0x2cc   :  { %v3052_v32 = vpop.f32.mrf.mxu1  ;;  %v3093_v33 = vpop.f32.mrf.mxu0 }
 0x2cd   :  { %v3053_v34 = vadd.f32 %v3052_v32, %v2341_v25  ;;  %v3094_v35 = vadd.f32 %v3093_v33, %v2349_v23 }
 0x2ce   :  { %v3054_v37 = vpop.f32.mrf.mxu1  ;;  %v3095_v38 = vpop.f32.mrf.mxu0 }
 0x2cf   :  { %v3194_v39 = vadd.f32 %v3186_v28, %v3053_v34  ;;  %v3196_v24 = vadd.f32 %v3188_v29, %v3094_v35  ;;  %v3055_v40 = vadd.f32 %v3054_v37, %v2345_v21  ;;  %v3096_v41 = vadd.f32 %v3095_v38, %v2353_v31 }
 0x2d0   :  { %v3056_v26 = vpop.f32.mrf.mxu1  ;;  %v3097_v22 = vpop.f32.mrf.mxu0 }
 0x2d1   :  { %v3195_v42 = vadd.f32 %v3187_v36, %v3055_v40  ;;  %v3197_v43 = vadd.f32 %v3189_v16, %v3096_v41  ;;  %v3202_v30 = vmax.f32 %v3194_v39, 0.0  ;;  %v3204_v46 = vmax.f32 %v3196_v24, 0.0 }
 0x2d2   :  { %v3057_v44 = vpop.f32.mrf.mxu1  ;;  %v3098_v45 = vpop.f32.mrf.mxu0 }
 0x2d3   :  { %v3203_v47 = vmax.f32 %v3195_v42, 0.0  ;;  %v3205_v48 = vmax.f32 %v3197_v43, 0.0 }
 0x2d5   :  { %v3688_v27 = vpack.c.bf16 %v3203_v47, %v3202_v30  ;;  %v3689_v49 = vpack.c.bf16 %v3205_v48, %v3204_v46 }
 0x2d7   :  { %3242 = vst [vmem:[%s5566_s6] sm:$0xff] %v3688_v27  ;;  %3243 = vst [vmem:[%s5566_s6 + $0x8] sm:$0xff] %v3689_v49 }
 0x30c   :  { %v3134_v62 = vpop.f32.mrf.mxu1  ;;  %v3175_v63 = vpop.f32.mrf.mxu0 }
 0x30d   :  { %v3135_v0 = vadd.f32 %v3134_v62, %v2357_v56  ;;  %v3176_v1 = vadd.f32 %v3175_v63, %v2365_v57 }
 0x30e   :  { %v3136_v3 = vpop.f32.mrf.mxu1  ;;  %v3177_v4 = vpop.f32.mrf.mxu0 }
 0x30f   :  { %v3198_v5 = vadd.f32 %v3190_v58, %v3135_v0  ;;  %v3200_v6 = vadd.f32 %v3192_v59, %v3176_v1  ;;  %v3137_v7 = vadd.f32 %v3136_v3, %v2361_v60  ;;  %v3178_v8 = vadd.f32 %v3177_v4, %v2369_v61 }
 0x310   :  { %v3138_v9 = vpop.f32.mrf.mxu1  ;;  %v3179_v10 = vpop.f32.mrf.mxu0 }
 0x311   :  { %v3199_v11 = vadd.f32 %v3191_v2, %v3137_v7  ;;  %v3201_v12 = vadd.f32 %v3193_v20, %v3178_v8  ;;  %v3206_v18 = vmax.f32 %v3198_v5, 0.0  ;;  %v3208_v15 = vmax.f32 %v3200_v6, 0.0 }
 0x312   :  { %v3139_v13 = vpop.f32.mrf.mxu1  ;;  %v3180_v14 = vpop.f32.mrf.mxu0 }
 0x313   :  { %v3207_v19 = vmax.f32 %v3199_v11, 0.0  ;;  %v3209_v17 = vmax.f32 %v3201_v12, 0.0 }
 0x315   :  { %v3690_v25 = vpack.c.bf16 %v3207_v19, %v3206_v18  ;;  %v3691_v23 = vpack.c.bf16 %v3209_v17, %v3208_v15 }
 0x317   :  { %3244 = vst [vmem:[%s5566_s6 + $0x10] sm:$0xff] %v3690_v25  ;;  %3245 = vst [vmem:[%s5566_s6 + $0x18] sm:$0xff] %v3691_v23 }

</bundles_post_ra>
